<compile_context>
chip_gen: v7x
topology: tpu7x:2x2x1
jax: 0.10.0
libtpu: 0.0.40
codegen_flags: <defaults>
</compile_context>

<pallas_src>
import functools

import jax
import jax.numpy as jnp
from jax import lax
from jax.experimental import pallas as pl
from jax.experimental.pallas import tpu as pltpu


_VMEM_LIMIT = 32 * 1024 * 1024  # > v5e 16MiB scoped default, safe on v7x (64MiB phys)


# ----------------------------- tiling helper ---------------------------------


def _pick_tile(dim: int, pref: int, align: int) -> int:
    """Largest tile t <= pref with dim % t == 0 and t % align == 0.
    Falls back to the full dim (full-dim blocks are always legal)."""
    if dim <= pref:
        return dim
    t = (pref // align) * align
    while t >= align:
        if dim % t == 0:
            return t
        t -= align
    return dim


# --------------------------- conv-as-GEMM kernels ------------------------------


def _gemm_bias_act_kernel(x_ref, w_ref, b_ref, o_ref, acc_ref, *, act, alpha):
    """patches @ W + bias with fused activation (non-BatchNorm layers)."""
    k = pl.program_id(1)

    @pl.when(k == 0)
    def _init():
        acc_ref[...] = jnp.zeros_like(acc_ref)

    acc_ref[...] += jnp.dot(
        x_ref[...], w_ref[...], preferred_element_type=jnp.float32
    )

    @pl.when(k == pl.num_programs(1) - 1)
    def _epilogue():
        z = acc_ref[...] + b_ref[...]
        if act == "leaky_relu":
            z = jnp.where(z >= 0.0, z, alpha * z)
        elif act == "sigmoid":
            z = pl.reciprocal(1.0 + jnp.exp(-z), approx=True)
        o_ref[...] = z.astype(o_ref.dtype)


def _gemm_bn_stats_kernel(x_ref, w_ref, o_ref, stats_ref, acc_ref):
    """patches @ W (no bias: it cancels under BN) + fused per-tile BN partial
    statistics (row 0 = sum, row 1 = sum of squares) in the epilogue."""
    k = pl.program_id(1)

    @pl.when(k == 0)
    def _init():
        acc_ref[...] = jnp.zeros_like(acc_ref)

    acc_ref[...] += jnp.dot(
        x_ref[...], w_ref[...], preferred_element_type=jnp.float32
    )

    @pl.when(k == pl.num_programs(1) - 1)
    def _epilogue():
        z = acc_ref[...]
        o_ref[...] = z.astype(o_ref.dtype)
        n = z.shape[1]
        s = jnp.sum(z, axis=0, keepdims=True)            # (1, N)
        q = jnp.sum(z * z, axis=0, keepdims=True)        # (1, N)
        rid = lax.broadcasted_iota(jnp.int32, (8, n), 0)
        tile = jnp.where(rid == 0, jnp.broadcast_to(s, (8, n)),
                         jnp.where(rid == 1, jnp.broadcast_to(q, (8, n)), 0.0))
        stats_ref[...] = tile.reshape(1, 8, n)


def _conv_gemm_act(patches, w2, bias, *, act, alpha=0.2, out_dtype):
    """(M,K) bf16 @ (K,N) bf16 + bias, fused activation. tn = N (full panel)."""
    M, K = patches.shape
    _, N = w2.shape
    tm = _pick_tile(M, 512, 16)     # bf16 packs 2 rows/sublane -> align 16
    tk = _pick_tile(K, 1024, 128)
    grid = (M // tm, K // tk)
    return pl.pallas_call(
        functools.partial(_gemm_bias_act_kernel, act=act, alpha=alpha),
        out_shape=jax.ShapeDtypeStruct((M, N), out_dtype),
        grid=grid,
        in_specs=[
            pl.BlockSpec((tm, tk), lambda i, k: (i, k)),
            pl.BlockSpec((tk, N), lambda i, k: (k, 0)),
            pl.BlockSpec((1, N), lambda i, k: (0, 0)),
        ],
        out_specs=pl.BlockSpec((tm, N), lambda i, k: (i, 0)),
        scratch_shapes=[pltpu.VMEM((tm, N), jnp.float32)],
        compiler_params=pltpu.CompilerParams(
            dimension_semantics=("parallel", "arbitrary"),
            vmem_limit_bytes=_VMEM_LIMIT,
        ),
    )(patches, w2, bias)


def _conv_gemm_bn(patches, w2, *, out_dtype):
    """GEMM for normalize=True layers: returns (y, per-tile BN partial stats)."""
    M, K = patches.shape
    _, N = w2.shape
    tm = _pick_tile(M, 512, 16)
    tk = _pick_tile(K, 1024, 128)
    grid = (M // tm, K // tk)
    return pl.pallas_call(
        _gemm_bn_stats_kernel,
        out_shape=(
            jax.ShapeDtypeStruct((M, N), out_dtype),
            jax.ShapeDtypeStruct((grid[0], 8, N), jnp.float32),
        ),
        grid=grid,
        in_specs=[
            pl.BlockSpec((tm, tk), lambda i, k: (i, k)),
            pl.BlockSpec((tk, N), lambda i, k: (k, 0)),
        ],
        out_specs=(
            pl.BlockSpec((tm, N), lambda i, k: (i, 0)),
            pl.BlockSpec((1, 8, N), lambda i, k: (i, 0, 0)),
        ),
        scratch_shapes=[pltpu.VMEM((tm, N), jnp.float32)],
        compiler_params=pltpu.CompilerParams(
            dimension_semantics=("parallel", "arbitrary"),
            vmem_limit_bytes=_VMEM_LIMIT,
        ),
    )(patches, w2)


# ---------------------- per-channel affine + activation -----------------------


def _affine_act_kernel(y_ref, scale_ref, shift_ref, o_ref, *, act, alpha):
    z = y_ref[...].astype(jnp.float32) * scale_ref[...] + shift_ref[...]
    if act == "leaky_relu":
        z = jnp.where(z >= 0.0, z, alpha * z)
    elif act == "sigmoid":
        z = pl.reciprocal(1.0 + jnp.exp(-z), approx=True)
    o_ref[...] = z.astype(o_ref.dtype)


def _affine_act(y, scale, shift, *, act, alpha=0.2):
    M, C = y.shape
    tm = _pick_tile(M, 1024, 16)
    return pl.pallas_call(
        functools.partial(_affine_act_kernel, act=act, alpha=alpha),
        out_shape=jax.ShapeDtypeStruct((M, C), y.dtype),
        grid=(M // tm,),
        in_specs=[
            pl.BlockSpec((tm, C), lambda i: (i, 0)),
            pl.BlockSpec((1, C), lambda i: (0, 0)),
            pl.BlockSpec((1, C), lambda i: (0, 0)),
        ],
        out_specs=pl.BlockSpec((tm, C), lambda i: (i, 0)),
        compiler_params=pltpu.CompilerParams(
            dimension_semantics=("parallel",),
            vmem_limit_bytes=_VMEM_LIMIT,
        ),
    )(y, scale, shift)


def _bn_scale_shift_from_stats(stats, n_rows, eps=1e-5):
    """Finish the (tiny) BN reduction from fused per-tile partial stats."""
    sums = jnp.sum(stats[:, 0, :], axis=0)
    ssq = jnp.sum(stats[:, 1, :], axis=0)
    mean = sums / n_rows
    var = jnp.maximum(ssq / n_rows - mean * mean, 0.0)   # clamp: f32 cancellation
    scale = lax.rsqrt(var + eps)
    shift = -mean * scale
    return scale.reshape(1, -1), shift.reshape(1, -1)


# --------------------------------- dropout ------------------------------------


def _dropout_kernel(seed_ref, x_ref, o_ref, *, p):
    pltpu.prng_seed(seed_ref[0] + pl.program_id(0))
    bits = pltpu.bitcast(pltpu.prng_random_bits(x_ref.shape), jnp.uint32)
    threshold = jnp.uint32(min(int(p * (1 << 32)), (1 << 32) - 1))
    keep = bits >= threshold                      # P(keep) = 1 - p
    scale = jnp.float32(1.0 / (1.0 - p))
    o_ref[...] = jnp.where(
        keep, x_ref[...].astype(jnp.float32) * scale, 0.0
    ).astype(o_ref.dtype)


class Dropout:
    """droprate == 0 -> nn.Identity (pass-through, no kernel / HBM traffic).
    droprate > 0 -> inverted dropout; never exercised by this Discriminator."""

    def __init__(self, droprate: float = 0.0) -> None:
        self.droprate = float(droprate)

    def __call__(self, x, seed: int = 0):
        if self.droprate <= 0.0:
            return x
        lanes = 1024
        total = x.size
        pad = (-total) % lanes
        flat = x.reshape(-1)
        if pad:
            flat = jnp.pad(flat, (0, pad))
        x2 = flat.reshape(-1, lanes)
        M = x2.shape[0]
        tm = _pick_tile(M, 1024, 8)
        seed_arr = jnp.asarray([seed], dtype=jnp.int32)
        out = pl.pallas_call(
            functools.partial(_dropout_kernel, p=self.droprate),
            out_shape=jax.ShapeDtypeStruct(x2.shape, x2.dtype),
            grid=(M // tm,),
            in_specs=[
                pl.BlockSpec(memory_space=pltpu.MemorySpace.SMEM),
                pl.BlockSpec((tm, lanes), lambda i: (i, 0)),
            ],
            out_specs=pl.BlockSpec((tm, lanes), lambda i: (i, 0)),
            compiler_params=pltpu.CompilerParams(
                dimension_semantics=("arbitrary",)
            ),
        )(seed_arr, x2)
        out = out.reshape(-1)
        if pad:
            out = out[:total]
        return out.reshape(x.shape)


# ------------------------------ conv block ------------------------------------


def _im2col_nhwc(x, stride):
    """x: (B,H,W,C), 4x4 window, pad=1 -> (B*Ho*Wo, C*16); K index = c*16+kh*4+kw."""
    B, H, W, C = x.shape
    Ho = (H + 2 - 4) // stride + 1
    Wo = (W + 2 - 4) // stride + 1
    xp = jnp.pad(x, ((0, 0), (1, 1), (1, 1), (0, 0)))
    cols = []
    for kh in range(4):
        for kw in range(4):
            sl = lax.slice(
                xp,
                (0, kh, kw, 0),
                (B, kh + stride * (Ho - 1) + 1, kw + stride * (Wo - 1) + 1, C),
                (1, stride, stride, 1),
            )                                       # (B, Ho, Wo, C)
            cols.append(sl)
    patches = jnp.stack(cols, axis=-1)              # (B, Ho, Wo, C, 16)
    return patches.reshape(B * Ho * Wo, C * 16), (B, Ho, Wo)


def _down_conv4x4(x, w2, bias, cout, n_pad, *, stride, normalize, act,
                  out_dtype, alpha=0.2):
    """Conv2d(4,stride,pad=1) -> [BatchNorm] -> Dropout(0)==Identity -> act."""
    patches, (B, Ho, Wo) = _im2col_nhwc(x, stride)
    if normalize:
        # Bias cancels under batch-stat BN -> skipped; stats fused into GEMM.
        y, stats = _conv_gemm_bn(patches, w2, out_dtype=jnp.bfloat16)
        scale, shift = _bn_scale_shift_from_stats(stats, patches.shape[0])
        y = _affine_act(y, scale, shift, act=act, alpha=alpha)
    else:
        y = _conv_gemm_act(patches, w2, bias, act=act, alpha=alpha,
                           out_dtype=out_dtype)
        if n_pad:
            y = y[:, :cout]                         # only the tiny 1-ch head
    return y.reshape(B, Ho, Wo, cout)


# ------------------------------ Discriminator ---------------------------------

_LAYERS = (
    # (cout, stride, normalize, activation)
    (64, 2, False, "leaky_relu"),
    (128, 2, True, "leaky_relu"),
    (256, 2, True, "leaky_relu"),
    (512, 1, True, "leaky_relu"),
    (1, 1, False, "sigmoid"),
)


class Discriminator:
    """Pallas-TPU forward of the 70x70 PatchGAN discriminator."""

    def __init__(self, cin, key=None, dtype=jnp.float32):
        if key is None:
            key = jax.random.PRNGKey(0)
        self.params = []          # original-layout f32 params (for reference)
        self.packed = []          # GEMM-ready bf16 weights, prepared once
        ci = cin
        keys = jax.random.split(key, len(_LAYERS))
        for (cout, _, _, _), k in zip(_LAYERS, keys):
            kw, kb = jax.random.split(k)
            w = (0.05 * jax.random.normal(kw, (cout, ci, 4, 4))).astype(dtype)
            b = (0.05 * jax.random.normal(kb, (cout,))).astype(dtype)
            self.params.append((w, b))
            w2 = jnp.transpose(w.reshape(cout, -1)).astype(jnp.bfloat16)  # (K, cout)
            bias = b.astype(jnp.float32).reshape(1, cout)
            n_pad = (128 - cout) if cout < 64 else 0     # pad only the 1-ch head
            if n_pad:
                w2 = jnp.pad(w2, ((0, 0), (0, n_pad)))
                bias = jnp.pad(bias, ((0, 0), (0, n_pad)))
            self.packed.append((w2, bias, cout, n_pad))
            ci = cout

    def __call__(self, x):
        # NCHW -> NHWC (channels on lanes); bf16 activations between layers.
        y = jnp.transpose(x, (0, 2, 3, 1)).astype(jnp.bfloat16)
        n_layers = len(_LAYERS)
        for li, ((cout, stride, normalize, act), (w2, bias, _, n_pad)) in enumerate(
                zip(_LAYERS, self.packed)):
            is_last = li == n_layers - 1
            out_dtype = x.dtype if is_last else jnp.bfloat16
            y = _down_conv4x4(y, w2, bias, cout, n_pad, stride=stride,
                              normalize=normalize, act=act, out_dtype=out_dtype)
        return jnp.transpose(y, (0, 3, 1, 2))       # back to NCHW


# --------------------------- pure-JAX reference --------------------------------


def _ref_discriminator(x, params):
    y = x
    for (cout, stride, normalize, act), (w, b) in zip(_LAYERS, params):
        y = lax.conv_general_dilated(
            y, w, window_strides=(stride, stride), padding=((1, 1), (1, 1)),
            dimension_numbers=("NCHW", "OIHW", "NCHW"),
        )
        y = y + b.reshape(1, -1, 1, 1)
        if normalize:
            mean = jnp.mean(y, axis=(0, 2, 3), keepdims=True)
            var = jnp.var(y, axis=(0, 2, 3), keepdims=True)   # biased, like PyTorch
            y = (y - mean) * lax.rsqrt(var + 1e-5)
        if act == "leaky_relu":
            y = jnp.where(y >= 0.0, y, 0.2 * y)
        else:
            y = 1.0 / (1.0 + jnp.exp(-y))
    return y


# ---------------------------------- demo ---------------------------------------

if __name__ == "__main__":
    root = jax.random.PRNGKey(0)
    k_x, k_p = jax.random.split(root)

    B, CIN, H, W = 2, 3, 32, 32
    x = jax.random.normal(k_x, (B, CIN, H, W), dtype=jnp.float32)

    disc = Discriminator(CIN, key=k_p)
    fwd = jax.jit(disc.__call__)
    y = jax.block_until_ready(fwd(x))

    # Spatial path: 32 -> 16 -> 8 -> 4 -> 3 -> 2; one patch-logit channel.
    assert y.shape == (B, 1, 2, 2), y.shape
    assert y.dtype == x.dtype
    assert bool(jnp.all(jnp.isfinite(y)))
    assert bool(jnp.all((y >= 0.0) & (y <= 1.0)))    # sigmoid output range

    # Independent pure-JAX f32 reference (XLA conv + batch-stat BN + LeakyReLU).
    y_ref = _ref_discriminator(x, disc.params)
    max_diff = float(jnp.max(jnp.abs(y - y_ref)))
    assert bool(jnp.allclose(y, y_ref, rtol=5e-2, atol=5e-2)), max_diff

    print("KERNEL_OK")
</pallas_src>

<mosaic_0001>
module attributes {stable_mosaic.version = 11 : i64} {
  func.func @_gemm_bias_act_kernel(%arg0: i32, %arg1: i32, %arg2: memref<512x48xbf16, #tpu.memory_space<vmem>>, %arg3: memref<48x64xbf16, #tpu.memory_space<vmem>>, %arg4: memref<1x64xf32, #tpu.memory_space<vmem>>, %arg5: memref<512x64xbf16, #tpu.memory_space<vmem>>, %arg6: memref<512x64xf32, #tpu.memory_space<vmem>>) attributes {dimension_semantics = [#tpu.dimension_semantics<parallel>, #tpu.dimension_semantics<arbitrary>], iteration_bounds = array<i64: 1, 1>, scalar_prefetch = 0 : i64, scratch_operands = 1 : i64, tpu.core_type = #tpu.core_type<tc>, window_params = [{transform_indices = @transform_0, window_bounds = array<i64: 512, 48>}, {transform_indices = @transform_1, window_bounds = array<i64: 48, 64>}, {pipeline_mode = #tpu.pipeline_mode<synchronous>, transform_indices = @transform_2, window_bounds = array<i64: 1, 64>}, {transform_indices = @transform_3, window_bounds = array<i64: 512, 64>}]} {
    %c0_i32 = arith.constant 0 : i32
    %0 = arith.cmpi eq, %arg1, %c0_i32 : i32
    %1 = arith.extui %0 : i1 to i32
    %c0_i32_0 = arith.constant 0 : i32
    %2 = arith.cmpi ne, %1, %c0_i32_0 : i32
    scf.if %2 {
      %cst_10 = arith.constant 0.000000e+00 : f32
      %12 = vector.broadcast %cst_10 : f32 to vector<512x64xf32>
      %c0_11 = arith.constant 0 : index
      %c0_12 = arith.constant 0 : index
      %13 = vector.load %arg6[%c0_11, %c0_12] : memref<512x64xf32, #tpu.memory_space<vmem>>, vector<512x64xf32>
      tpu.vector_store %arg6[%c0_11, %c0_12], %12 {strides = array<i32>} : memref<512x64xf32, #tpu.memory_space<vmem>>, vector<512x64xf32>,
    } else {
    }
    %c0 = arith.constant 0 : index
    %c0_1 = arith.constant 0 : index
    %3 = vector.load %arg6[%c0, %c0_1] : memref<512x64xf32, #tpu.memory_space<vmem>>, vector<512x64xf32>
    %c0_2 = arith.constant 0 : index
    %c0_3 = arith.constant 0 : index
    %4 = vector.load %arg2[%c0_2, %c0_3] : memref<512x48xbf16, #tpu.memory_space<vmem>>, vector<512x48xbf16>
    %c0_4 = arith.constant 0 : index
    %c0_5 = arith.constant 0 : index
    %5 = vector.load %arg3[%c0_4, %c0_5] : memref<48x64xbf16, #tpu.memory_space<vmem>>, vector<48x64xbf16>
    %cst = arith.constant dense<0.000000e+00> : vector<512x64xf32>
    %6 = tpu.matmul %4, %5, %cst {dimension_numbers = #tpu.dot_dimension_numbers<[1], [0], [0], [1], [0, 0, 1, 1], [], []>} : vector<512x48xbf16>, vector<48x64xbf16>, vector<512x64xf32> -> vector<512x64xf32>
    %7 = arith.addf %3, %6 : vector<512x64xf32>
    %c0_6 = arith.constant 0 : index
    %c0_7 = arith.constant 0 : index
    %8 = vector.load %arg6[%c0_6, %c0_7] : memref<512x64xf32, #tpu.memory_space<vmem>>, vector<512x64xf32>
    tpu.vector_store %arg6[%c0_6, %c0_7], %7 {strides = array<i32>} : memref<512x64xf32, #tpu.memory_space<vmem>>, vector<512x64xf32>,
    %c0_i32_8 = arith.constant 0 : i32
    %9 = arith.cmpi eq, %arg1, %c0_i32_8 : i32
    %10 = arith.extui %9 : i1 to i32
    %c0_i32_9 = arith.constant 0 : i32
    %11 = arith.cmpi ne, %10, %c0_i32_9 : i32
    scf.if %11 {
      %c0_10 = arith.constant 0 : index
      %c0_11 = arith.constant 0 : index
      %12 = vector.load %arg6[%c0_10, %c0_11] : memref<512x64xf32, #tpu.memory_space<vmem>>, vector<512x64xf32>
      %c0_12 = arith.constant 0 : index
      %c0_13 = arith.constant 0 : index
      %13 = vector.load %arg4[%c0_12, %c0_13] : memref<1x64xf32, #tpu.memory_space<vmem>>, vector<1x64xf32>
      %14 = vector.broadcast %13 : vector<1x64xf32> to vector<512x64xf32>
      %15 = arith.addf %12, %14 : vector<512x64xf32>
      %cst_14 = arith.constant 0.000000e+00 : f32
      %16 = vector.broadcast %cst_14 : f32 to vector<512x64xf32>
      %17 = arith.cmpf oge, %15, %16 : vector<512x64xf32>
      %cst_15 = arith.constant 2.000000e-01 : f32
      %18 = vector.broadcast %cst_15 : f32 to vector<512x64xf32>
      %19 = arith.mulf %18, %15 : vector<512x64xf32>
      %20 = arith.select %17, %15, %19 : vector<512x64xi1>, vector<512x64xf32>
      %21 = arith.truncf %20 : vector<512x64xf32> to vector<512x64xbf16>
      %c0_16 = arith.constant 0 : index
      %c0_17 = arith.constant 0 : index
      %22 = vector.load %arg5[%c0_16, %c0_17] : memref<512x64xbf16, #tpu.memory_space<vmem>>, vector<512x64xbf16>
      tpu.vector_store %arg5[%c0_16, %c0_17], %21 {strides = array<i32>} : memref<512x64xbf16, #tpu.memory_space<vmem>>, vector<512x64xbf16>,
    } else {
    }
    return
  }
  func.func @transform_0(%arg0: i32, %arg1: i32) -> (i32, i32) {
    %c0_i32 = arith.constant 0 : i32
    return %arg0, %arg1 : i32, i32
  }
  func.func @transform_1(%arg0: i32, %arg1: i32) -> (i32, i32) {
    %c0_i32 = arith.constant 0 : i32
    %c0_i32_0 = arith.constant 0 : i32
    return %arg1, %c0_i32 : i32, i32
  }
  func.func @transform_2(%arg0: i32, %arg1: i32) -> (i32, i32) {
    %c0_i32 = arith.constant 0 : i32
    %c0_i32_0 = arith.constant 0 : i32
    %c0_i32_1 = arith.constant 0 : i32
    return %c0_i32, %c0_i32_0 : i32, i32
  }
  func.func @transform_3(%arg0: i32, %arg1: i32) -> (i32, i32) {
    %c0_i32 = arith.constant 0 : i32
    %c0_i32_0 = arith.constant 0 : i32
    return %arg0, %c0_i32 : i32, i32
  }
}

module attributes {stable_mosaic.version = 11 : i64} {
  func.func @_gemm_bn_stats_kernel(%arg0: i32, %arg1: i32, %arg2: memref<128x1024xbf16, #tpu.memory_space<vmem>>, %arg3: memref<1024x128xbf16, #tpu.memory_space<vmem>>, %arg4: memref<128x128xbf16, #tpu.memory_space<vmem>>, %arg5: memref<1x8x128xf32, #tpu.memory_space<vmem>>, %arg6: memref<128x128xf32, #tpu.memory_space<vmem>>) attributes {dimension_semantics = [#tpu.dimension_semantics<parallel>, #tpu.dimension_semantics<arbitrary>], iteration_bounds = array<i64: 1, 1>, scalar_prefetch = 0 : i64, scratch_operands = 1 : i64, tpu.core_type = #tpu.core_type<tc>, window_params = [{transform_indices = @transform_0, window_bounds = array<i64: 128, 1024>}, {transform_indices = @transform_1, window_bounds = array<i64: 1024, 128>}, {transform_indices = @transform_2, window_bounds = array<i64: 128, 128>}, {transform_indices = @transform_3, window_bounds = array<i64: 1, 8, 128>}]} {
    %c0_i32 = arith.constant 0 : i32
    %0 = arith.cmpi eq, %arg1, %c0_i32 : i32
    %1 = arith.extui %0 : i1 to i32
    %c0_i32_0 = arith.constant 0 : i32
    %2 = arith.cmpi ne, %1, %c0_i32_0 : i32
    scf.if %2 {
      %cst_10 = arith.constant 0.000000e+00 : f32
      %12 = vector.broadcast %cst_10 : f32 to vector<128x128xf32>
      %c0_11 = arith.constant 0 : index
      %c0_12 = arith.constant 0 : index
      %13 = vector.load %arg6[%c0_11, %c0_12] : memref<128x128xf32, #tpu.memory_space<vmem>>, vector<128x128xf32>
      tpu.vector_store %arg6[%c0_11, %c0_12], %12 {strides = array<i32>} : memref<128x128xf32, #tpu.memory_space<vmem>>, vector<128x128xf32>,
    } else {
    }
    %c0 = arith.constant 0 : index
    %c0_1 = arith.constant 0 : index
    %3 = vector.load %arg6[%c0, %c0_1] : memref<128x128xf32, #tpu.memory_space<vmem>>, vector<128x128xf32>
    %c0_2 = arith.constant 0 : index
    %c0_3 = arith.constant 0 : index
    %4 = vector.load %arg2[%c0_2, %c0_3] : memref<128x1024xbf16, #tpu.memory_space<vmem>>, vector<128x1024xbf16>
    %c0_4 = arith.constant 0 : index
    %c0_5 = arith.constant 0 : index
    %5 = vector.load %arg3[%c0_4, %c0_5] : memref<1024x128xbf16, #tpu.memory_space<vmem>>, vector<1024x128xbf16>
    %cst = arith.constant dense<0.000000e+00> : vector<128x128xf32>
    %6 = tpu.matmul %4, %5, %cst {dimension_numbers = #tpu.dot_dimension_numbers<[1], [0], [0], [1], [0, 0, 1, 1], [], []>} : vector<128x1024xbf16>, vector<1024x128xbf16>, vector<128x128xf32> -> vector<128x128xf32>
    %7 = arith.addf %3, %6 : vector<128x128xf32>
    %c0_6 = arith.constant 0 : index
    %c0_7 = arith.constant 0 : index
    %8 = vector.load %arg6[%c0_6, %c0_7] : memref<128x128xf32, #tpu.memory_space<vmem>>, vector<128x128xf32>
    tpu.vector_store %arg6[%c0_6, %c0_7], %7 {strides = array<i32>} : memref<128x128xf32, #tpu.memory_space<vmem>>, vector<128x128xf32>,
    %c0_i32_8 = arith.constant 0 : i32
    %9 = arith.cmpi eq, %arg1, %c0_i32_8 : i32
    %10 = arith.extui %9 : i1 to i32
    %c0_i32_9 = arith.constant 0 : i32
    %11 = arith.cmpi ne, %10, %c0_i32_9 : i32
    scf.if %11 {
      %c0_10 = arith.constant 0 : index
      %c0_11 = arith.constant 0 : index
      %12 = vector.load %arg6[%c0_10, %c0_11] : memref<128x128xf32, #tpu.memory_space<vmem>>, vector<128x128xf32>
      %13 = arith.truncf %12 : vector<128x128xf32> to vector<128x128xbf16>
      %c0_12 = arith.constant 0 : index
      %c0_13 = arith.constant 0 : index
      %14 = vector.load %arg4[%c0_12, %c0_13] : memref<128x128xbf16, #tpu.memory_space<vmem>>, vector<128x128xbf16>
      tpu.vector_store %arg4[%c0_12, %c0_13], %13 {strides = array<i32>} : memref<128x128xbf16, #tpu.memory_space<vmem>>, vector<128x128xbf16>,
      %cst_14 = arith.constant dense<0.000000e+00> : vector<128xf32>
      %15 = vector.multi_reduction <add>, %12, %cst_14 [0] : vector<128x128xf32> to vector<128xf32>
      %16 = vector.shape_cast %15 : vector<128xf32> to vector<1x128xf32>
      %17 = arith.mulf %12, %12 : vector<128x128xf32>
      %cst_15 = arith.constant dense<0.000000e+00> : vector<128xf32>
      %18 = vector.multi_reduction <add>, %17, %cst_15 [0] : vector<128x128xf32> to vector<128xf32>
      %19 = vector.shape_cast %18 : vector<128xf32> to vector<1x128xf32>
      %20 = tpu.iota {dimensions = array<i32: 0>} : vector<8x128xi32>
      %c0_i32_16 = arith.constant 0 : i32
      %21 = vector.broadcast %c0_i32_16 : i32 to vector<8x128xi32>
      %22 = arith.cmpi eq, %20, %21 : vector<8x128xi32>
      %23 = vector.shape_cast %16 : vector<1x128xf32> to vector<1x128xf32>
      %24 = vector.broadcast %23 : vector<1x128xf32> to vector<8x128xf32>
      %c1_i32 = arith.constant 1 : i32
      %25 = vector.broadcast %c1_i32 : i32 to vector<8x128xi32>
      %26 = arith.cmpi eq, %20, %25 : vector<8x128xi32>
      %27 = vector.shape_cast %19 : vector<1x128xf32> to vector<1x128xf32>
      %28 = vector.broadcast %27 : vector<1x128xf32> to vector<8x128xf32>
      %cst_17 = arith.constant 0.000000e+00 : f32
      %29 = vector.broadcast %cst_17 : f32 to vector<8x128xf32>
      %30 = arith.select %26, %28, %29 : vector<8x128xi1>, vector<8x128xf32>
      %31 = arith.select %22, %24, %30 : vector<8x128xi1>, vector<8x128xf32>
      %32 = vector.shape_cast %31 : vector<8x128xf32> to vector<1x8x128xf32>
      %c0_18 = arith.constant 0 : index
      %c0_19 = arith.constant 0 : index
      %c0_20 = arith.constant 0 : index
      %33 = vector.load %arg5[%c0_18, %c0_19, %c0_20] : memref<1x8x128xf32, #tpu.memory_space<vmem>>, vector<1x8x128xf32>
      tpu.vector_store %arg5[%c0_18, %c0_19, %c0_20], %32 {strides = array<i32>} : memref<1x8x128xf32, #tpu.memory_space<vmem>>, vector<1x8x128xf32>,
    } else {
    }
    return
  }
  func.func @transform_0(%arg0: i32, %arg1: i32) -> (i32, i32) {
    %c0_i32 = arith.constant 0 : i32
    return %arg0, %arg1 : i32, i32
  }
  func.func @transform_1(%arg0: i32, %arg1: i32) -> (i32, i32) {
    %c0_i32 = arith.constant 0 : i32
    %c0_i32_0 = arith.constant 0 : i32
    return %arg1, %c0_i32 : i32, i32
  }
  func.func @transform_2(%arg0: i32, %arg1: i32) -> (i32, i32) {
    %c0_i32 = arith.constant 0 : i32
    %c0_i32_0 = arith.constant 0 : i32
    return %arg0, %c0_i32 : i32, i32
  }
  func.func @transform_3(%arg0: i32, %arg1: i32) -> (i32, i32, i32) {
    %c0_i32 = arith.constant 0 : i32
    %c0_i32_0 = arith.constant 0 : i32
    %c0_i32_1 = arith.constant 0 : i32
    return %arg0, %c0_i32, %c0_i32_0 : i32, i32, i32
  }
}

module attributes {stable_mosaic.version = 11 : i64} {
  func.func @_affine_act_kernel(%arg0: i32, %arg1: memref<128x128xbf16, #tpu.memory_space<vmem>>, %arg2: memref<1x128xf32, #tpu.memory_space<vmem>>, %arg3: memref<1x128xf32, #tpu.memory_space<vmem>>, %arg4: memref<128x128xbf16, #tpu.memory_space<vmem>>) attributes {dimension_semantics = [#tpu.dimension_semantics<parallel>], iteration_bounds = array<i64: 1>, scalar_prefetch = 0 : i64, scratch_operands = 0 : i64, tpu.core_type = #tpu.core_type<tc>, window_params = [{transform_indices = @transform_0, window_bounds = array<i64: 128, 128>}, {pipeline_mode = #tpu.pipeline_mode<synchronous>, transform_indices = @transform_1, window_bounds = array<i64: 1, 128>}, {pipeline_mode = #tpu.pipeline_mode<synchronous>, transform_indices = @transform_2, window_bounds = array<i64: 1, 128>}, {transform_indices = @transform_3, window_bounds = array<i64: 128, 128>}]} {
    %c0 = arith.constant 0 : index
    %c0_0 = arith.constant 0 : index
    %0 = vector.load %arg1[%c0, %c0_0] : memref<128x128xbf16, #tpu.memory_space<vmem>>, vector<128x128xbf16>
    %1 = arith.extf %0 : vector<128x128xbf16> to vector<128x128xf32>
    %c0_1 = arith.constant 0 : index
    %c0_2 = arith.constant 0 : index
    %2 = vector.load %arg2[%c0_1, %c0_2] : memref<1x128xf32, #tpu.memory_space<vmem>>, vector<1x128xf32>
    %3 = vector.broadcast %2 : vector<1x128xf32> to vector<128x128xf32>
    %4 = arith.mulf %1, %3 : vector<128x128xf32>
    %c0_3 = arith.constant 0 : index
    %c0_4 = arith.constant 0 : index
    %5 = vector.load %arg3[%c0_3, %c0_4] : memref<1x128xf32, #tpu.memory_space<vmem>>, vector<1x128xf32>
    %6 = vector.broadcast %5 : vector<1x128xf32> to vector<128x128xf32>
    %7 = arith.addf %4, %6 : vector<128x128xf32>
    %cst = arith.constant 0.000000e+00 : f32
    %8 = vector.broadcast %cst : f32 to vector<128x128xf32>
    %9 = arith.cmpf oge, %7, %8 : vector<128x128xf32>
    %cst_5 = arith.constant 2.000000e-01 : f32
    %10 = vector.broadcast %cst_5 : f32 to vector<128x128xf32>
    %11 = arith.mulf %10, %7 : vector<128x128xf32>
    %12 = arith.select %9, %7, %11 : vector<128x128xi1>, vector<128x128xf32>
    %13 = arith.truncf %12 : vector<128x128xf32> to vector<128x128xbf16>
    %c0_6 = arith.constant 0 : index
    %c0_7 = arith.constant 0 : index
    %14 = vector.load %arg4[%c0_6, %c0_7] : memref<128x128xbf16, #tpu.memory_space<vmem>>, vector<128x128xbf16>
    tpu.vector_store %arg4[%c0_6, %c0_7], %13 {strides = array<i32>} : memref<128x128xbf16, #tpu.memory_space<vmem>>, vector<128x128xbf16>,
    return
  }
  func.func @transform_0(%arg0: i32) -> (i32, i32) {
    %c0_i32 = arith.constant 0 : i32
    %c0_i32_0 = arith.constant 0 : i32
    return %arg0, %c0_i32 : i32, i32
  }
  func.func @transform_1(%arg0: i32) -> (i32, i32) {
    %c0_i32 = arith.constant 0 : i32
    %c0_i32_0 = arith.constant 0 : i32
    %c0_i32_1 = arith.constant 0 : i32
    return %c0_i32, %c0_i32_0 : i32, i32
  }
  func.func @transform_2(%arg0: i32) -> (i32, i32) {
    %c0_i32 = arith.constant 0 : i32
    %c0_i32_0 = arith.constant 0 : i32
    %c0_i32_1 = arith.constant 0 : i32
    return %c0_i32, %c0_i32_0 : i32, i32
  }
  func.func @transform_3(%arg0: i32) -> (i32, i32) {
    %c0_i32 = arith.constant 0 : i32
    %c0_i32_0 = arith.constant 0 : i32
    return %arg0, %c0_i32 : i32, i32
  }
}

module attributes {stable_mosaic.version = 11 : i64} {
  func.func @_gemm_bn_stats_kernel(%arg0: i32, %arg1: i32, %arg2: memref<32x1024xbf16, #tpu.memory_space<vmem>>, %arg3: memref<1024x256xbf16, #tpu.memory_space<vmem>>, %arg4: memref<32x256xbf16, #tpu.memory_space<vmem>>, %arg5: memref<1x8x256xf32, #tpu.memory_space<vmem>>, %arg6: memref<32x256xf32, #tpu.memory_space<vmem>>) attributes {dimension_semantics = [#tpu.dimension_semantics<parallel>, #tpu.dimension_semantics<arbitrary>], iteration_bounds = array<i64: 1, 2>, scalar_prefetch = 0 : i64, scratch_operands = 1 : i64, tpu.core_type = #tpu.core_type<tc>, window_params = [{transform_indices = @transform_0, window_bounds = array<i64: 32, 1024>}, {transform_indices = @transform_1, window_bounds = array<i64: 1024, 256>}, {transform_indices = @transform_2, window_bounds = array<i64: 32, 256>}, {transform_indices = @transform_3, window_bounds = array<i64: 1, 8, 256>}]} {
    %c0_i32 = arith.constant 0 : i32
    %0 = arith.cmpi eq, %arg1, %c0_i32 : i32
    %1 = arith.extui %0 : i1 to i32
    %c0_i32_0 = arith.constant 0 : i32
    %2 = arith.cmpi ne, %1, %c0_i32_0 : i32
    scf.if %2 {
      %cst_9 = arith.constant 0.000000e+00 : f32
      %12 = vector.broadcast %cst_9 : f32 to vector<32x256xf32>
      %c0_10 = arith.constant 0 : index
      %c0_11 = arith.constant 0 : index
      %13 = vector.load %arg6[%c0_10, %c0_11] : memref<32x256xf32, #tpu.memory_space<vmem>>, vector<32x256xf32>
      tpu.vector_store %arg6[%c0_10, %c0_11], %12 {strides = array<i32>} : memref<32x256xf32, #tpu.memory_space<vmem>>, vector<32x256xf32>,
    } else {
    }
    %c0 = arith.constant 0 : index
    %c0_1 = arith.constant 0 : index
    %3 = vector.load %arg6[%c0, %c0_1] : memref<32x256xf32, #tpu.memory_space<vmem>>, vector<32x256xf32>
    %c0_2 = arith.constant 0 : index
    %c0_3 = arith.constant 0 : index
    %4 = vector.load %arg2[%c0_2, %c0_3] : memref<32x1024xbf16, #tpu.memory_space<vmem>>, vector<32x1024xbf16>
    %c0_4 = arith.constant 0 : index
    %c0_5 = arith.constant 0 : index
    %5 = vector.load %arg3[%c0_4, %c0_5] : memref<1024x256xbf16, #tpu.memory_space<vmem>>, vector<1024x256xbf16>
    %cst = arith.constant dense<0.000000e+00> : vector<32x256xf32>
    %6 = tpu.matmul %4, %5, %cst {dimension_numbers = #tpu.dot_dimension_numbers<[1], [0], [0], [1], [0, 0, 1, 1], [], []>} : vector<32x1024xbf16>, vector<1024x256xbf16>, vector<32x256xf32> -> vector<32x256xf32>
    %7 = arith.addf %3, %6 : vector<32x256xf32>
    %c0_6 = arith.constant 0 : index
    %c0_7 = arith.constant 0 : index
    %8 = vector.load %arg6[%c0_6, %c0_7] : memref<32x256xf32, #tpu.memory_space<vmem>>, vector<32x256xf32>
    tpu.vector_store %arg6[%c0_6, %c0_7], %7 {strides = array<i32>} : memref<32x256xf32, #tpu.memory_space<vmem>>, vector<32x256xf32>,
    %c1_i32 = arith.constant 1 : i32
    %9 = arith.cmpi eq, %arg1, %c1_i32 : i32
    %10 = arith.extui %9 : i1 to i32
    %c0_i32_8 = arith.constant 0 : i32
    %11 = arith.cmpi ne, %10, %c0_i32_8 : i32
    scf.if %11 {
      %c0_9 = arith.constant 0 : index
      %c0_10 = arith.constant 0 : index
      %12 = vector.load %arg6[%c0_9, %c0_10] : memref<32x256xf32, #tpu.memory_space<vmem>>, vector<32x256xf32>
      %13 = arith.truncf %12 : vector<32x256xf32> to vector<32x256xbf16>
      %c0_11 = arith.constant 0 : index
      %c0_12 = arith.constant 0 : index
      %14 = vector.load %arg4[%c0_11, %c0_12] : memref<32x256xbf16, #tpu.memory_space<vmem>>, vector<32x256xbf16>
      tpu.vector_store %arg4[%c0_11, %c0_12], %13 {strides = array<i32>} : memref<32x256xbf16, #tpu.memory_space<vmem>>, vector<32x256xbf16>,
      %cst_13 = arith.constant dense<0.000000e+00> : vector<256xf32>
      %15 = vector.multi_reduction <add>, %12, %cst_13 [0] : vector<32x256xf32> to vector<256xf32>
      %16 = vector.shape_cast %15 : vector<256xf32> to vector<1x256xf32>
      %17 = arith.mulf %12, %12 : vector<32x256xf32>
      %cst_14 = arith.constant dense<0.000000e+00> : vector<256xf32>
      %18 = vector.multi_reduction <add>, %17, %cst_14 [0] : vector<32x256xf32> to vector<256xf32>
      %19 = vector.shape_cast %18 : vector<256xf32> to vector<1x256xf32>
      %20 = tpu.iota {dimensions = array<i32: 0>} : vector<8x256xi32>
      %c0_i32_15 = arith.constant 0 : i32
      %21 = vector.broadcast %c0_i32_15 : i32 to vector<8x256xi32>
      %22 = arith.cmpi eq, %20, %21 : vector<8x256xi32>
      %23 = vector.shape_cast %16 : vector<1x256xf32> to vector<1x256xf32>
      %24 = vector.broadcast %23 : vector<1x256xf32> to vector<8x256xf32>
      %c1_i32_16 = arith.constant 1 : i32
      %25 = vector.broadcast %c1_i32_16 : i32 to vector<8x256xi32>
      %26 = arith.cmpi eq, %20, %25 : vector<8x256xi32>
      %27 = vector.shape_cast %19 : vector<1x256xf32> to vector<1x256xf32>
      %28 = vector.broadcast %27 : vector<1x256xf32> to vector<8x256xf32>
      %cst_17 = arith.constant 0.000000e+00 : f32
      %29 = vector.broadcast %cst_17 : f32 to vector<8x256xf32>
      %30 = arith.select %26, %28, %29 : vector<8x256xi1>, vector<8x256xf32>
      %31 = arith.select %22, %24, %30 : vector<8x256xi1>, vector<8x256xf32>
      %32 = vector.shape_cast %31 : vector<8x256xf32> to vector<1x8x256xf32>
      %c0_18 = arith.constant 0 : index
      %c0_19 = arith.constant 0 : index
      %c0_20 = arith.constant 0 : index
      %33 = vector.load %arg5[%c0_18, %c0_19, %c0_20] : memref<1x8x256xf32, #tpu.memory_space<vmem>>, vector<1x8x256xf32>
      tpu.vector_store %arg5[%c0_18, %c0_19, %c0_20], %32 {strides = array<i32>} : memref<1x8x256xf32, #tpu.memory_space<vmem>>, vector<1x8x256xf32>,
    } else {
    }
    return
  }
  func.func @transform_0(%arg0: i32, %arg1: i32) -> (i32, i32) {
    %c0_i32 = arith.constant 0 : i32
    return %arg0, %arg1 : i32, i32
  }
  func.func @transform_1(%arg0: i32, %arg1: i32) -> (i32, i32) {
    %c0_i32 = arith.constant 0 : i32
    %c0_i32_0 = arith.constant 0 : i32
    return %arg1, %c0_i32 : i32, i32
  }
  func.func @transform_2(%arg0: i32, %arg1: i32) -> (i32, i32) {
    %c0_i32 = arith.constant 0 : i32
    %c0_i32_0 = arith.constant 0 : i32
    return %arg0, %c0_i32 : i32, i32
  }
  func.func @transform_3(%arg0: i32, %arg1: i32) -> (i32, i32, i32) {
    %c0_i32 = arith.constant 0 : i32
    %c0_i32_0 = arith.constant 0 : i32
    %c0_i32_1 = arith.constant 0 : i32
    return %arg0, %c0_i32, %c0_i32_0 : i32, i32, i32
  }
}

module attributes {stable_mosaic.version = 11 : i64} {
  func.func @_affine_act_kernel(%arg0: i32, %arg1: memref<32x256xbf16, #tpu.memory_space<vmem>>, %arg2: memref<1x256xf32, #tpu.memory_space<vmem>>, %arg3: memref<1x256xf32, #tpu.memory_space<vmem>>, %arg4: memref<32x256xbf16, #tpu.memory_space<vmem>>) attributes {dimension_semantics = [#tpu.dimension_semantics<parallel>], iteration_bounds = array<i64: 1>, scalar_prefetch = 0 : i64, scratch_operands = 0 : i64, tpu.core_type = #tpu.core_type<tc>, window_params = [{transform_indices = @transform_0, window_bounds = array<i64: 32, 256>}, {pipeline_mode = #tpu.pipeline_mode<synchronous>, transform_indices = @transform_1, window_bounds = array<i64: 1, 256>}, {pipeline_mode = #tpu.pipeline_mode<synchronous>, transform_indices = @transform_2, window_bounds = array<i64: 1, 256>}, {transform_indices = @transform_3, window_bounds = array<i64: 32, 256>}]} {
    %c0 = arith.constant 0 : index
    %c0_0 = arith.constant 0 : index
    %0 = vector.load %arg1[%c0, %c0_0] : memref<32x256xbf16, #tpu.memory_space<vmem>>, vector<32x256xbf16>
    %1 = arith.extf %0 : vector<32x256xbf16> to vector<32x256xf32>
    %c0_1 = arith.constant 0 : index
    %c0_2 = arith.constant 0 : index
    %2 = vector.load %arg2[%c0_1, %c0_2] : memref<1x256xf32, #tpu.memory_space<vmem>>, vector<1x256xf32>
    %3 = vector.broadcast %2 : vector<1x256xf32> to vector<32x256xf32>
    %4 = arith.mulf %1, %3 : vector<32x256xf32>
    %c0_3 = arith.constant 0 : index
    %c0_4 = arith.constant 0 : index
    %5 = vector.load %arg3[%c0_3, %c0_4] : memref<1x256xf32, #tpu.memory_space<vmem>>, vector<1x256xf32>
    %6 = vector.broadcast %5 : vector<1x256xf32> to vector<32x256xf32>
    %7 = arith.addf %4, %6 : vector<32x256xf32>
    %cst = arith.constant 0.000000e+00 : f32
    %8 = vector.broadcast %cst : f32 to vector<32x256xf32>
    %9 = arith.cmpf oge, %7, %8 : vector<32x256xf32>
    %cst_5 = arith.constant 2.000000e-01 : f32
    %10 = vector.broadcast %cst_5 : f32 to vector<32x256xf32>
    %11 = arith.mulf %10, %7 : vector<32x256xf32>
    %12 = arith.select %9, %7, %11 : vector<32x256xi1>, vector<32x256xf32>
    %13 = arith.truncf %12 : vector<32x256xf32> to vector<32x256xbf16>
    %c0_6 = arith.constant 0 : index
    %c0_7 = arith.constant 0 : index
    %14 = vector.load %arg4[%c0_6, %c0_7] : memref<32x256xbf16, #tpu.memory_space<vmem>>, vector<32x256xbf16>
    tpu.vector_store %arg4[%c0_6, %c0_7], %13 {strides = array<i32>} : memref<32x256xbf16, #tpu.memory_space<vmem>>, vector<32x256xbf16>,
    return
  }
  func.func @transform_0(%arg0: i32) -> (i32, i32) {
    %c0_i32 = arith.constant 0 : i32
    %c0_i32_0 = arith.constant 0 : i32
    return %arg0, %c0_i32 : i32, i32
  }
  func.func @transform_1(%arg0: i32) -> (i32, i32) {
    %c0_i32 = arith.constant 0 : i32
    %c0_i32_0 = arith.constant 0 : i32
    %c0_i32_1 = arith.constant 0 : i32
    return %c0_i32, %c0_i32_0 : i32, i32
  }
  func.func @transform_2(%arg0: i32) -> (i32, i32) {
    %c0_i32 = arith.constant 0 : i32
    %c0_i32_0 = arith.constant 0 : i32
    %c0_i32_1 = arith.constant 0 : i32
    return %c0_i32, %c0_i32_0 : i32, i32
  }
  func.func @transform_3(%arg0: i32) -> (i32, i32) {
    %c0_i32 = arith.constant 0 : i32
    %c0_i32_0 = arith.constant 0 : i32
    return %arg0, %c0_i32 : i32, i32
  }
}

module attributes {stable_mosaic.version = 11 : i64} {
  func.func @_gemm_bn_stats_kernel(%arg0: i32, %arg1: i32, %arg2: memref<18x1024xbf16, #tpu.memory_space<vmem>>, %arg3: memref<1024x512xbf16, #tpu.memory_space<vmem>>, %arg4: memref<18x512xbf16, #tpu.memory_space<vmem>>, %arg5: memref<1x8x512xf32, #tpu.memory_space<vmem>>, %arg6: memref<18x512xf32, #tpu.memory_space<vmem>>) attributes {dimension_semantics = [#tpu.dimension_semantics<parallel>, #tpu.dimension_semantics<arbitrary>], iteration_bounds = array<i64: 1, 4>, scalar_prefetch = 0 : i64, scratch_operands = 1 : i64, tpu.core_type = #tpu.core_type<tc>, window_params = [{transform_indices = @transform_0, window_bounds = array<i64: 18, 1024>}, {transform_indices = @transform_1, window_bounds = array<i64: 1024, 512>}, {transform_indices = @transform_2, window_bounds = array<i64: 18, 512>}, {transform_indices = @transform_3, window_bounds = array<i64: 1, 8, 512>}]} {
    %c0_i32 = arith.constant 0 : i32
    %0 = arith.cmpi eq, %arg1, %c0_i32 : i32
    %1 = arith.extui %0 : i1 to i32
    %c0_i32_0 = arith.constant 0 : i32
    %2 = arith.cmpi ne, %1, %c0_i32_0 : i32
    scf.if %2 {
      %cst_9 = arith.constant 0.000000e+00 : f32
      %12 = vector.broadcast %cst_9 : f32 to vector<18x512xf32>
      %c0_10 = arith.constant 0 : index
      %c0_11 = arith.constant 0 : index
      %13 = vector.load %arg6[%c0_10, %c0_11] : memref<18x512xf32, #tpu.memory_space<vmem>>, vector<18x512xf32>
      tpu.vector_store %arg6[%c0_10, %c0_11], %12 {strides = array<i32>} : memref<18x512xf32, #tpu.memory_space<vmem>>, vector<18x512xf32>,
    } else {
    }
    %c0 = arith.constant 0 : index
    %c0_1 = arith.constant 0 : index
    %3 = vector.load %arg6[%c0, %c0_1] : memref<18x512xf32, #tpu.memory_space<vmem>>, vector<18x512xf32>
    %c0_2 = arith.constant 0 : index
    %c0_3 = arith.constant 0 : index
    %4 = vector.load %arg2[%c0_2, %c0_3] : memref<18x1024xbf16, #tpu.memory_space<vmem>>, vector<18x1024xbf16>
    %c0_4 = arith.constant 0 : index
    %c0_5 = arith.constant 0 : index
    %5 = vector.load %arg3[%c0_4, %c0_5] : memref<1024x512xbf16, #tpu.memory_space<vmem>>, vector<1024x512xbf16>
    %cst = arith.constant dense<0.000000e+00> : vector<18x512xf32>
    %6 = tpu.matmul %4, %5, %cst {dimension_numbers = #tpu.dot_dimension_numbers<[1], [0], [0], [1], [0, 0, 1, 1], [], []>} : vector<18x1024xbf16>, vector<1024x512xbf16>, vector<18x512xf32> -> vector<18x512xf32>
    %7 = arith.addf %3, %6 : vector<18x512xf32>
    %c0_6 = arith.constant 0 : index
    %c0_7 = arith.constant 0 : index
    %8 = vector.load %arg6[%c0_6, %c0_7] : memref<18x512xf32, #tpu.memory_space<vmem>>, vector<18x512xf32>
    tpu.vector_store %arg6[%c0_6, %c0_7], %7 {strides = array<i32>} : memref<18x512xf32, #tpu.memory_space<vmem>>, vector<18x512xf32>,
    %c3_i32 = arith.constant 3 : i32
    %9 = arith.cmpi eq, %arg1, %c3_i32 : i32
    %10 = arith.extui %9 : i1 to i32
    %c0_i32_8 = arith.constant 0 : i32
    %11 = arith.cmpi ne, %10, %c0_i32_8 : i32
    scf.if %11 {
      %c0_9 = arith.constant 0 : index
      %c0_10 = arith.constant 0 : index
      %12 = vector.load %arg6[%c0_9, %c0_10] : memref<18x512xf32, #tpu.memory_space<vmem>>, vector<18x512xf32>
      %13 = arith.truncf %12 : vector<18x512xf32> to vector<18x512xbf16>
      %c0_11 = arith.constant 0 : index
      %c0_12 = arith.constant 0 : index
      %14 = vector.load %arg4[%c0_11, %c0_12] : memref<18x512xbf16, #tpu.memory_space<vmem>>, vector<18x512xbf16>
      tpu.vector_store %arg4[%c0_11, %c0_12], %13 {strides = array<i32>} : memref<18x512xbf16, #tpu.memory_space<vmem>>, vector<18x512xbf16>,
      %cst_13 = arith.constant dense<0.000000e+00> : vector<512xf32>
      %15 = vector.multi_reduction <add>, %12, %cst_13 [0] : vector<18x512xf32> to vector<512xf32>
      %16 = vector.shape_cast %15 : vector<512xf32> to vector<1x512xf32>
      %17 = arith.mulf %12, %12 : vector<18x512xf32>
      %cst_14 = arith.constant dense<0.000000e+00> : vector<512xf32>
      %18 = vector.multi_reduction <add>, %17, %cst_14 [0] : vector<18x512xf32> to vector<512xf32>
      %19 = vector.shape_cast %18 : vector<512xf32> to vector<1x512xf32>
      %20 = tpu.iota {dimensions = array<i32: 0>} : vector<8x512xi32>
      %c0_i32_15 = arith.constant 0 : i32
      %21 = vector.broadcast %c0_i32_15 : i32 to vector<8x512xi32>
      %22 = arith.cmpi eq, %20, %21 : vector<8x512xi32>
      %23 = vector.shape_cast %16 : vector<1x512xf32> to vector<1x512xf32>
      %24 = vector.broadcast %23 : vector<1x512xf32> to vector<8x512xf32>
      %c1_i32 = arith.constant 1 : i32
      %25 = vector.broadcast %c1_i32 : i32 to vector<8x512xi32>
      %26 = arith.cmpi eq, %20, %25 : vector<8x512xi32>
      %27 = vector.shape_cast %19 : vector<1x512xf32> to vector<1x512xf32>
      %28 = vector.broadcast %27 : vector<1x512xf32> to vector<8x512xf32>
      %cst_16 = arith.constant 0.000000e+00 : f32
      %29 = vector.broadcast %cst_16 : f32 to vector<8x512xf32>
      %30 = arith.select %26, %28, %29 : vector<8x512xi1>, vector<8x512xf32>
      %31 = arith.select %22, %24, %30 : vector<8x512xi1>, vector<8x512xf32>
      %32 = vector.shape_cast %31 : vector<8x512xf32> to vector<1x8x512xf32>
      %c0_17 = arith.constant 0 : index
      %c0_18 = arith.constant 0 : index
      %c0_19 = arith.constant 0 : index
      %33 = vector.load %arg5[%c0_17, %c0_18, %c0_19] : memref<1x8x512xf32, #tpu.memory_space<vmem>>, vector<1x8x512xf32>
      tpu.vector_store %arg5[%c0_17, %c0_18, %c0_19], %32 {strides = array<i32>} : memref<1x8x512xf32, #tpu.memory_space<vmem>>, vector<1x8x512xf32>,
    } else {
    }
    return
  }
  func.func @transform_0(%arg0: i32, %arg1: i32) -> (i32, i32) {
    %c0_i32 = arith.constant 0 : i32
    return %arg0, %arg1 : i32, i32
  }
  func.func @transform_1(%arg0: i32, %arg1: i32) -> (i32, i32) {
    %c0_i32 = arith.constant 0 : i32
    %c0_i32_0 = arith.constant 0 : i32
    return %arg1, %c0_i32 : i32, i32
  }
  func.func @transform_2(%arg0: i32, %arg1: i32) -> (i32, i32) {
    %c0_i32 = arith.constant 0 : i32
    %c0_i32_0 = arith.constant 0 : i32
    return %arg0, %c0_i32 : i32, i32
  }
  func.func @transform_3(%arg0: i32, %arg1: i32) -> (i32, i32, i32) {
    %c0_i32 = arith.constant 0 : i32
    %c0_i32_0 = arith.constant 0 : i32
    %c0_i32_1 = arith.constant 0 : i32
    return %arg0, %c0_i32, %c0_i32_0 : i32, i32, i32
  }
}

module attributes {stable_mosaic.version = 11 : i64} {
  func.func @_affine_act_kernel(%arg0: i32, %arg1: memref<18x512xbf16, #tpu.memory_space<vmem>>, %arg2: memref<1x512xf32, #tpu.memory_space<vmem>>, %arg3: memref<1x512xf32, #tpu.memory_space<vmem>>, %arg4: memref<18x512xbf16, #tpu.memory_space<vmem>>) attributes {dimension_semantics = [#tpu.dimension_semantics<parallel>], iteration_bounds = array<i64: 1>, scalar_prefetch = 0 : i64, scratch_operands = 0 : i64, tpu.core_type = #tpu.core_type<tc>, window_params = [{transform_indices = @transform_0, window_bounds = array<i64: 18, 512>}, {pipeline_mode = #tpu.pipeline_mode<synchronous>, transform_indices = @transform_1, window_bounds = array<i64: 1, 512>}, {pipeline_mode = #tpu.pipeline_mode<synchronous>, transform_indices = @transform_2, window_bounds = array<i64: 1, 512>}, {transform_indices = @transform_3, window_bounds = array<i64: 18, 512>}]} {
    %c0 = arith.constant 0 : index
    %c0_0 = arith.constant 0 : index
    %0 = vector.load %arg1[%c0, %c0_0] : memref<18x512xbf16, #tpu.memory_space<vmem>>, vector<18x512xbf16>
    %1 = arith.extf %0 : vector<18x512xbf16> to vector<18x512xf32>
    %c0_1 = arith.constant 0 : index
    %c0_2 = arith.constant 0 : index
    %2 = vector.load %arg2[%c0_1, %c0_2] : memref<1x512xf32, #tpu.memory_space<vmem>>, vector<1x512xf32>
    %3 = vector.broadcast %2 : vector<1x512xf32> to vector<18x512xf32>
    %4 = arith.mulf %1, %3 : vector<18x512xf32>
    %c0_3 = arith.constant 0 : index
    %c0_4 = arith.constant 0 : index
    %5 = vector.load %arg3[%c0_3, %c0_4] : memref<1x512xf32, #tpu.memory_space<vmem>>, vector<1x512xf32>
    %6 = vector.broadcast %5 : vector<1x512xf32> to vector<18x512xf32>
    %7 = arith.addf %4, %6 : vector<18x512xf32>
    %cst = arith.constant 0.000000e+00 : f32
    %8 = vector.broadcast %cst : f32 to vector<18x512xf32>
    %9 = arith.cmpf oge, %7, %8 : vector<18x512xf32>
    %cst_5 = arith.constant 2.000000e-01 : f32
    %10 = vector.broadcast %cst_5 : f32 to vector<18x512xf32>
    %11 = arith.mulf %10, %7 : vector<18x512xf32>
    %12 = arith.select %9, %7, %11 : vector<18x512xi1>, vector<18x512xf32>
    %13 = arith.truncf %12 : vector<18x512xf32> to vector<18x512xbf16>
    %c0_6 = arith.constant 0 : index
    %c0_7 = arith.constant 0 : index
    %14 = vector.load %arg4[%c0_6, %c0_7] : memref<18x512xbf16, #tpu.memory_space<vmem>>, vector<18x512xbf16>
    tpu.vector_store %arg4[%c0_6, %c0_7], %13 {strides = array<i32>} : memref<18x512xbf16, #tpu.memory_space<vmem>>, vector<18x512xbf16>,
    return
  }
  func.func @transform_0(%arg0: i32) -> (i32, i32) {
    %c0_i32 = arith.constant 0 : i32
    %c0_i32_0 = arith.constant 0 : i32
    return %arg0, %c0_i32 : i32, i32
  }
  func.func @transform_1(%arg0: i32) -> (i32, i32) {
    %c0_i32 = arith.constant 0 : i32
    %c0_i32_0 = arith.constant 0 : i32
    %c0_i32_1 = arith.constant 0 : i32
    return %c0_i32, %c0_i32_0 : i32, i32
  }
  func.func @transform_2(%arg0: i32) -> (i32, i32) {
    %c0_i32 = arith.constant 0 : i32
    %c0_i32_0 = arith.constant 0 : i32
    %c0_i32_1 = arith.constant 0 : i32
    return %c0_i32, %c0_i32_0 : i32, i32
  }
  func.func @transform_3(%arg0: i32) -> (i32, i32) {
    %c0_i32 = arith.constant 0 : i32
    %c0_i32_0 = arith.constant 0 : i32
    return %arg0, %c0_i32 : i32, i32
  }
}

module attributes {stable_mosaic.version = 11 : i64} {
  func.func @_gemm_bias_act_kernel(%arg0: i32, %arg1: i32, %arg2: memref<8x1024xbf16, #tpu.memory_space<vmem>>, %arg3: memref<1024x128xbf16, #tpu.memory_space<vmem>>, %arg4: memref<1x128xf32, #tpu.memory_space<vmem>>, %arg5: memref<8x128xf32, #tpu.memory_space<vmem>>, %arg6: memref<8x128xf32, #tpu.memory_space<vmem>>) attributes {dimension_semantics = [#tpu.dimension_semantics<parallel>, #tpu.dimension_semantics<arbitrary>], iteration_bounds = array<i64: 1, 8>, scalar_prefetch = 0 : i64, scratch_operands = 1 : i64, tpu.core_type = #tpu.core_type<tc>, window_params = [{transform_indices = @transform_0, window_bounds = array<i64: 8, 1024>}, {transform_indices = @transform_1, window_bounds = array<i64: 1024, 128>}, {pipeline_mode = #tpu.pipeline_mode<synchronous>, transform_indices = @transform_2, window_bounds = array<i64: 1, 128>}, {transform_indices = @transform_3, window_bounds = array<i64: 8, 128>}]} {
    %c0_i32 = arith.constant 0 : i32
    %0 = arith.cmpi eq, %arg1, %c0_i32 : i32
    %1 = arith.extui %0 : i1 to i32
    %c0_i32_0 = arith.constant 0 : i32
    %2 = arith.cmpi ne, %1, %c0_i32_0 : i32
    scf.if %2 {
      %cst_9 = arith.constant 0.000000e+00 : f32
      %12 = vector.broadcast %cst_9 : f32 to vector<8x128xf32>
      %c0_10 = arith.constant 0 : index
      %c0_11 = arith.constant 0 : index
      %13 = vector.load %arg6[%c0_10, %c0_11] : memref<8x128xf32, #tpu.memory_space<vmem>>, vector<8x128xf32>
      tpu.vector_store %arg6[%c0_10, %c0_11], %12 {strides = array<i32>} : memref<8x128xf32, #tpu.memory_space<vmem>>, vector<8x128xf32>,
    } else {
    }
    %c0 = arith.constant 0 : index
    %c0_1 = arith.constant 0 : index
    %3 = vector.load %arg6[%c0, %c0_1] : memref<8x128xf32, #tpu.memory_space<vmem>>, vector<8x128xf32>
    %c0_2 = arith.constant 0 : index
    %c0_3 = arith.constant 0 : index
    %4 = vector.load %arg2[%c0_2, %c0_3] : memref<8x1024xbf16, #tpu.memory_space<vmem>>, vector<8x1024xbf16>
    %c0_4 = arith.constant 0 : index
    %c0_5 = arith.constant 0 : index
    %5 = vector.load %arg3[%c0_4, %c0_5] : memref<1024x128xbf16, #tpu.memory_space<vmem>>, vector<1024x128xbf16>
    %cst = arith.constant dense<0.000000e+00> : vector<8x128xf32>
    %6 = tpu.matmul %4, %5, %cst {dimension_numbers = #tpu.dot_dimension_numbers<[1], [0], [0], [1], [0, 0, 1, 1], [], []>} : vector<8x1024xbf16>, vector<1024x128xbf16>, vector<8x128xf32> -> vector<8x128xf32>
    %7 = arith.addf %3, %6 : vector<8x128xf32>
    %c0_6 = arith.constant 0 : index
    %c0_7 = arith.constant 0 : index
    %8 = vector.load %arg6[%c0_6, %c0_7] : memref<8x128xf32, #tpu.memory_space<vmem>>, vector<8x128xf32>
    tpu.vector_store %arg6[%c0_6, %c0_7], %7 {strides = array<i32>} : memref<8x128xf32, #tpu.memory_space<vmem>>, vector<8x128xf32>,
    %c7_i32 = arith.constant 7 : i32
    %9 = arith.cmpi eq, %arg1, %c7_i32 : i32
    %10 = arith.extui %9 : i1 to i32
    %c0_i32_8 = arith.constant 0 : i32
    %11 = arith.cmpi ne, %10, %c0_i32_8 : i32
    scf.if %11 {
      %c0_9 = arith.constant 0 : index
      %c0_10 = arith.constant 0 : index
      %12 = vector.load %arg6[%c0_9, %c0_10] : memref<8x128xf32, #tpu.memory_space<vmem>>, vector<8x128xf32>
      %c0_11 = arith.constant 0 : index
      %c0_12 = arith.constant 0 : index
      %13 = vector.load %arg4[%c0_11, %c0_12] : memref<1x128xf32, #tpu.memory_space<vmem>>, vector<1x128xf32>
      %14 = vector.broadcast %13 : vector<1x128xf32> to vector<8x128xf32>
      %15 = arith.addf %12, %14 : vector<8x128xf32>
      %cst_13 = arith.constant 0.000000e+00 : f32
      %16 = vector.broadcast %cst_13 : f32 to vector<8x128xf32>
      %17 = arith.subf %16, %15 : vector<8x128xf32>
      %18 = math.exp %17 : vector<8x128xf32>
      %cst_14 = arith.constant 1.000000e+00 : f32
      %19 = vector.broadcast %cst_14 : f32 to vector<8x128xf32>
      %20 = arith.addf %19, %18 : vector<8x128xf32>
      %21 = tpu.reciprocal %20 {approx = true} : vector<8x128xf32> -> vector<8x128xf32>
      %c0_15 = arith.constant 0 : index
      %c0_16 = arith.constant 0 : index
      %22 = vector.load %arg5[%c0_15, %c0_16] : memref<8x128xf32, #tpu.memory_space<vmem>>, vector<8x128xf32>
      tpu.vector_store %arg5[%c0_15, %c0_16], %21 {strides = array<i32>} : memref<8x128xf32, #tpu.memory_space<vmem>>, vector<8x128xf32>,
    } else {
    }
    return
  }
  func.func @transform_0(%arg0: i32, %arg1: i32) -> (i32, i32) {
    %c0_i32 = arith.constant 0 : i32
    return %arg0, %arg1 : i32, i32
  }
  func.func @transform_1(%arg0: i32, %arg1: i32) -> (i32, i32) {
    %c0_i32 = arith.constant 0 : i32
    %c0_i32_0 = arith.constant 0 : i32
    return %arg1, %c0_i32 : i32, i32
  }
  func.func @transform_2(%arg0: i32, %arg1: i32) -> (i32, i32) {
    %c0_i32 = arith.constant 0 : i32
    %c0_i32_0 = arith.constant 0 : i32
    %c0_i32_1 = arith.constant 0 : i32
    return %c0_i32, %c0_i32_0 : i32, i32
  }
  func.func @transform_3(%arg0: i32, %arg1: i32) -> (i32, i32) {
    %c0_i32 = arith.constant 0 : i32
    %c0_i32_0 = arith.constant 0 : i32
    return %arg0, %c0_i32 : i32, i32
  }
}

</mosaic_0001>

<bundles_post_ra>
// kernel: a_call__.8
= control target key start
LH: loop header
LB: loop body
LE: loop exit
PB: predicated region body
PF: predicated region fallthrough
CT: control target
= control target key end

     0   :  { %vm19_vm0 = vcmask 523264   ;;  %v1910_v1 = vmov 0.0   ;;  %vm396_vm1 = vcmask 392192   ;;  %vm1497_vm2 = vcmask 519168   ;;  %s2715_s1 = inlined_call_operand.vmem [shape: bf16[48,64], index: 1, kind: input, shape index: {}]   ;;  %s2716_s0 = inlined_call_operand.vmem [shape: bf16[512,48], index: 0, kind: input, shape index: {}]   ;;  %s2717_s2 = inlined_call_operand.vmem [shape: f32[1,64], index: 2, kind: input, shape index: {}]   ;;  %s2718_s3 = inlined_call_operand.vmem [shape: bf16[512,64], index: 3, kind: output, shape index: {}]  }
   0x1   :  { %v1934_v0 = vld [vmem:[%s2715_s1] sm:$0xff]   ;;  %22 = vst.msk [vmem:[#allocation2 + $0x10] sm:$0xff] %vm19_vm0, %v1910_v1  ;;  %20 = vst.msk [vmem:[#allocation2] sm:$0xff] %vm19_vm0, %v1910_v1  ;;  %v1875_v2 = vld [vmem:[%s2715_s1 + $0x8] sm:$0xff]  }
   0x2   :  { %21 = vst.msk [vmem:[#allocation2 + $0x8] sm:$0xff] %vm19_vm0, %v1910_v1  ;;  %23 = vst.msk [vmem:[#allocation2 + $0x18] sm:$0xff] %vm19_vm0, %v1910_v1  ;;  %1797 = vmatprep.subr.bf16.mxu0 %v1934_v0  ;;  %1867 = vmatprep.subr.bf16.mxu1 %v1934_v0  ;;  %v1876_v3 = vld [vmem:[%s2715_s1 + $0x10] sm:$0xff]   ;;  %v1877_v4 = vld [vmem:[%s2716_s0] sm:$0xff]  }
   0x3   :  { %24 = vst.msk [vmem:[#allocation2 + $0x20] sm:$0xff] %vm19_vm0, %v1910_v1  ;;  %25 = vst.msk [vmem:[#allocation2 + $0x28] sm:$0xff] %vm19_vm0, %v1910_v1  ;;  %1798 = vmatpush3.bf16.msra.mxu0 %v1934_v0  ;;  %1870 = vmatpush3.bf16.msra.mxu1 %v1934_v0  ;;  %v1878_v5 = vld [vmem:[%s2716_s0 + $0x80] sm:$0xff]   ;;  %v1879_v6 = vld [vmem:[%s2716_s0 + $0x8] sm:$0xff]  }
   0x4   :  { %26 = vst.msk [vmem:[#allocation2 + $0x30] sm:$0xff] %vm19_vm0, %v1910_v1  ;;  %27 = vst.msk [vmem:[#allocation2 + $0x38] sm:$0xff] %vm19_vm0, %v1910_v1  ;;  %1799 = vmatprep.subr.bf16.mxu0 %v1875_v2  ;;  %1868 = vmatprep.subr.bf16.mxu1 %v1875_v2  ;;  %v1880_v7 = vld [vmem:[%s2716_s0 + $0x88] sm:$0xff]   ;;  %v1881_v8 = vld [vmem:[%s2716_s0 + $0x10] sm:$0xff]  }
   0x5   :  { %28 = vst.msk [vmem:[#allocation2 + $0x40] sm:$0xff] %vm19_vm0, %v1910_v1  ;;  %29 = vst.msk [vmem:[#allocation2 + $0x48] sm:$0xff] %vm19_vm0, %v1910_v1  ;;  %1803 = vmatprep.mubr.msk.bf16.mxu0 %vm396_vm1, %v1877_v4  ;;  %1835 = vmatprep.mubr.msk.bf16.mxu1 %vm396_vm1, %v1878_v5  ;;  %v1882_v9 = vld [vmem:[%s2716_s0 + $0x90] sm:$0xff]   ;;  %v1883_v10 = vld [vmem:[%s2716_s0 + $0x18] sm:$0xff]  }
   0x6   :  { %30 = vst.msk [vmem:[#allocation2 + $0x50] sm:$0xff] %vm19_vm0, %v1910_v1  ;;  %31 = vst.msk [vmem:[#allocation2 + $0x58] sm:$0xff] %vm19_vm0, %v1910_v1  ;;  %v1884_v11 = vld [vmem:[%s2716_s0 + $0x98] sm:$0xff]   ;;  %v1885_v12 = vld [vmem:[%s2716_s0 + $0x20] sm:$0xff]  }
   0x7   :  { %32 = vst.msk [vmem:[#allocation2 + $0x60] sm:$0xff] %vm19_vm0, %v1910_v1  ;;  %33 = vst.msk [vmem:[#allocation2 + $0x68] sm:$0xff] %vm19_vm0, %v1910_v1  ;;  %1800 = vmatpush3.bf16.msra.mxu0 %v1875_v2  ;;  %1871 = vmatpush3.bf16.msra.mxu1 %v1875_v2  ;;  %v1886_v13 = vld [vmem:[%s2716_s0 + $0xa0] sm:$0xff]   ;;  %v1887_v14 = vld [vmem:[%s2716_s0 + $0x28] sm:$0xff]  }
   0x8   :  { %34 = vst.msk [vmem:[#allocation2 + $0x70] sm:$0xff] %vm19_vm0, %v1910_v1  ;;  %35 = vst.msk [vmem:[#allocation2 + $0x78] sm:$0xff] %vm19_vm0, %v1910_v1  ;;  %1801 = vmatprep.subr.bf16.mxu0 %v1876_v3  ;;  %1869 = vmatprep.subr.bf16.mxu1 %v1876_v3  ;;  %v1888_v15 = vld [vmem:[%s2716_s0 + $0xa8] sm:$0xff]   ;;  %v1889_v16 = vld [vmem:[%s2716_s0 + $0x30] sm:$0xff]  }
   0x9   :  { %36 = vst.msk [vmem:[#allocation2 + $0x80] sm:$0xff] %vm19_vm0, %v1910_v1  ;;  %37 = vst.msk [vmem:[#allocation2 + $0x88] sm:$0xff] %vm19_vm0, %v1910_v1  ;;  %v1890_v17 = vld [vmem:[%s2716_s0 + $0xb0] sm:$0xff]   ;;  %v1891_v18 = vld [vmem:[%s2716_s0 + $0x38] sm:$0xff]  }
   0xa   :  { %38 = vst.msk [vmem:[#allocation2 + $0x90] sm:$0xff] %vm19_vm0, %v1910_v1  ;;  %39 = vst.msk [vmem:[#allocation2 + $0x98] sm:$0xff] %vm19_vm0, %v1910_v1  ;;  %v1892_v19 = vld [vmem:[%s2716_s0 + $0xb8] sm:$0xff]   ;;  %v1893_v20 = vld [vmem:[%s2716_s0 + $0x40] sm:$0xff]  }
   0xb   :  { %40 = vst.msk [vmem:[#allocation2 + $0xa0] sm:$0xff] %vm19_vm0, %v1910_v1  ;;  %41 = vst.msk [vmem:[#allocation2 + $0xa8] sm:$0xff] %vm19_vm0, %v1910_v1  ;;  %1802 = vmatpush3.bf16.msra.mxu0 %v1876_v3  ;;  %1872 = vmatpush3.bf16.msra.mxu1 %v1876_v3  ;;  %v1894_v21 = vld [vmem:[%s2716_s0 + $0xc0] sm:$0xff]   ;;  %v1895_v22 = vld [vmem:[%s2716_s0 + $0x48] sm:$0xff]  }
   0xc   :  { %42 = vst.msk [vmem:[#allocation2 + $0xb0] sm:$0xff] %vm19_vm0, %v1910_v1  ;;  %43 = vst.msk [vmem:[#allocation2 + $0xb8] sm:$0xff] %vm19_vm0, %v1910_v1  ;;  %v1896_v23 = vld [vmem:[%s2716_s0 + $0xc8] sm:$0xff]   ;;  %v1897_v24 = vld [vmem:[%s2716_s0 + $0x50] sm:$0xff]  }
   0xd   :  { %44 = vst.msk [vmem:[#allocation2 + $0xc0] sm:$0xff] %vm19_vm0, %v1910_v1  ;;  %45 = vst.msk [vmem:[#allocation2 + $0xc8] sm:$0xff] %vm19_vm0, %v1910_v1  ;;  %v1898_v25 = vld [vmem:[%s2716_s0 + $0xd0] sm:$0xff]   ;;  %v1899_v26 = vld [vmem:[%s2716_s0 + $0x58] sm:$0xff]  }
   0xe   :  { %46 = vst.msk [vmem:[#allocation2 + $0xd0] sm:$0xff] %vm19_vm0, %v1910_v1  ;;  %47 = vst.msk [vmem:[#allocation2 + $0xd8] sm:$0xff] %vm19_vm0, %v1910_v1  ;;  %1804 = vmatmul.mubr.msk.bf16.vlgmr.msra.gmra.mrb[0].mxu0 %vm396_vm1, %v1879_v6  ;;  %1836 = vmatmul.mubr.msk.bf16.vlgmr.msra.gmra.mrb[0].mxu1 %vm396_vm1, %v1880_v7  ;;  %v1900_v27 = vld [vmem:[%s2716_s0 + $0xd8] sm:$0xff]   ;;  %v1901_v28 = vld [vmem:[%s2716_s0 + $0x60] sm:$0xff]  }
   0xf   :  { %48 = vst.msk [vmem:[#allocation2 + $0xe0] sm:$0xff] %vm19_vm0, %v1910_v1  ;;  %49 = vst.msk [vmem:[#allocation2 + $0xe8] sm:$0xff] %vm19_vm0, %v1910_v1  ;;  %1807 = vmatprep.mubr.msk.bf16.mxu0 %vm396_vm1, %v1881_v8  ;;  %1839 = vmatprep.mubr.msk.bf16.mxu1 %vm396_vm1, %v1882_v9  ;;  %v1902_v29 = vld [vmem:[%s2716_s0 + $0xe0] sm:$0xff]   ;;  %v1903_v30 = vld [vmem:[%s2716_s0 + $0x68] sm:$0xff]  }
  0x10   :  { %50 = vst.msk [vmem:[#allocation2 + $0xf0] sm:$0xff] %vm19_vm0, %v1910_v1  ;;  %51 = vst.msk [vmem:[#allocation2 + $0xf8] sm:$0xff] %vm19_vm0, %v1910_v1  ;;  %v1904_v31 = vld [vmem:[%s2716_s0 + $0xe8] sm:$0xff]   ;;  %v1905_v32 = vld [vmem:[%s2716_s0 + $0x70] sm:$0xff]  }
  0x11   :  { %52 = vst.msk [vmem:[#allocation2 + $0x100] sm:$0xff] %vm19_vm0, %v1910_v1  ;;  %53 = vst.msk [vmem:[#allocation2 + $0x108] sm:$0xff] %vm19_vm0, %v1910_v1  ;;  %v1906_v33 = vld [vmem:[%s2716_s0 + $0xf0] sm:$0xff]   ;;  %v1907_v34 = vld [vmem:[%s2716_s0 + $0x78] sm:$0xff]  }
  0x12   :  { %54 = vst.msk [vmem:[#allocation2 + $0x110] sm:$0xff] %vm19_vm0, %v1910_v1  ;;  %55 = vst.msk [vmem:[#allocation2 + $0x118] sm:$0xff] %vm19_vm0, %v1910_v1  ;;  %v1908_v35 = vld [vmem:[%s2716_s0 + $0xf8] sm:$0xff]   ;;  %v86_v36 = vld [vmem:[#allocation2 + $0x10] sm:$0xff] }
  0x13   :  { %56 = vst.msk [vmem:[#allocation2 + $0x120] sm:$0xff] %vm19_vm0, %v1910_v1  ;;  %57 = vst.msk [vmem:[#allocation2 + $0x128] sm:$0xff] %vm19_vm0, %v1910_v1  ;;  %v84_v38 = vld [vmem:[#allocation2] sm:$0xff]  ;;  %v87_v42 = vld [vmem:[#allocation2 + $0x18] sm:$0xff] }
  0x14   :  { %58 = vst.msk [vmem:[#allocation2 + $0x130] sm:$0xff] %vm19_vm0, %v1910_v1  ;;  %59 = vst.msk [vmem:[#allocation2 + $0x138] sm:$0xff] %vm19_vm0, %v1910_v1  ;;  %v85_v48 = vld [vmem:[#allocation2 + $0x8] sm:$0xff]  ;;  %v90_v60 = vld [vmem:[#allocation2 + $0x30] sm:$0xff] }
  0x15   :  { %60 = vst.msk [vmem:[#allocation2 + $0x140] sm:$0xff] %vm19_vm0, %v1910_v1  ;;  %61 = vst.msk [vmem:[#allocation2 + $0x148] sm:$0xff] %vm19_vm0, %v1910_v1  ;;  %v88_v62 = vld [vmem:[#allocation2 + $0x20] sm:$0xff]  ;;  %v91_v3 = vld [vmem:[#allocation2 + $0x38] sm:$0xff] }
  0x16   :  { %62 = vst.msk [vmem:[#allocation2 + $0x150] sm:$0xff] %vm19_vm0, %v1910_v1  ;;  %63 = vst.msk [vmem:[#allocation2 + $0x158] sm:$0xff] %vm19_vm0, %v1910_v1  ;;  %1808 = vmatmul.mubr.msk.bf16.gmra.mrb[4].mxu0 %vm396_vm1, %v1883_v10  ;;  %1840 = vmatmul.mubr.msk.bf16.gmra.mrb[4].mxu1 %vm396_vm1, %v1884_v11  ;;  %v2213_v0 = vld [vmem:[%s2717_s2] ss:$0 sm:$0xff]  ;;  %v89_v9 = vld [vmem:[#allocation2 + $0x28] sm:$0xff] }
  0x17   :  { %64 = vst.msk [vmem:[#allocation2 + $0x160] sm:$0xff] %vm19_vm0, %v1910_v1  ;;  %65 = vst.msk [vmem:[#allocation2 + $0x168] sm:$0xff] %vm19_vm0, %v1910_v1  ;;  %1811 = vmatprep.mubr.msk.bf16.mxu0 %vm396_vm1, %v1885_v12  ;;  %1843 = vmatprep.mubr.msk.bf16.mxu1 %vm396_vm1, %v1886_v13 }
  0x18   :  { %66 = vst.msk [vmem:[#allocation2 + $0x170] sm:$0xff] %vm19_vm0, %v1910_v1  ;;  %67 = vst.msk [vmem:[#allocation2 + $0x178] sm:$0xff] %vm19_vm0, %v1910_v1  ;;  %v116_v39 = vld [vmem:[#allocation2 + $0x100] sm:$0xff]  ;;  %v117_v49 = vld [vmem:[#allocation2 + $0x108] sm:$0xff] }
  0x19   :  { %68 = vst.msk [vmem:[#allocation2 + $0x180] sm:$0xff] %vm19_vm0, %v1910_v1  ;;  %69 = vst.msk [vmem:[#allocation2 + $0x188] sm:$0xff] %vm19_vm0, %v1910_v1  ;;  %v118_v37 = vld [vmem:[#allocation2 + $0x110] sm:$0xff]  ;;  %v119_v43 = vld [vmem:[#allocation2 + $0x118] sm:$0xff] }
  0x1a   :  { %70 = vst.msk [vmem:[#allocation2 + $0x190] sm:$0xff] %vm19_vm0, %v1910_v1  ;;  %71 = vst.msk [vmem:[#allocation2 + $0x198] sm:$0xff] %vm19_vm0, %v1910_v1  ;;  %v120_v63 = vld [vmem:[#allocation2 + $0x120] sm:$0xff]  ;;  %v121_v10 = vld [vmem:[#allocation2 + $0x128] sm:$0xff] }
  0x1b   :  { %72 = vst.msk [vmem:[#allocation2 + $0x1a0] sm:$0xff] %vm19_vm0, %v1910_v1  ;;  %73 = vst.msk [vmem:[#allocation2 + $0x1a8] sm:$0xff] %vm19_vm0, %v1910_v1  ;;  %v122_v61 = vld [vmem:[#allocation2 + $0x130] sm:$0xff]  ;;  %v123_v4 = vld [vmem:[#allocation2 + $0x138] sm:$0xff] }
  0x1c   :  { %74 = vst.msk [vmem:[#allocation2 + $0x1b0] sm:$0xff] %vm19_vm0, %v1910_v1  ;;  %75 = vst.msk [vmem:[#allocation2 + $0x1b8] sm:$0xff] %vm19_vm0, %v1910_v1 }
  0x1d   :  { %76 = vst.msk [vmem:[#allocation2 + $0x1c0] sm:$0xff] %vm19_vm0, %v1910_v1  ;;  %77 = vst.msk [vmem:[#allocation2 + $0x1c8] sm:$0xff] %vm19_vm0, %v1910_v1 }
  0x1e   :  { %78 = vst.msk [vmem:[#allocation2 + $0x1d0] sm:$0xff] %vm19_vm0, %v1910_v1  ;;  %79 = vst.msk [vmem:[#allocation2 + $0x1d8] sm:$0xff] %vm19_vm0, %v1910_v1  ;;  %1812 = vmatmul.mubr.msk.bf16.gmra.mrb[8].mxu0 %vm396_vm1, %v1887_v14  ;;  %1844 = vmatmul.mubr.msk.bf16.gmra.mrb[8].mxu1 %vm396_vm1, %v1888_v15 }
  0x1f   :  { %80 = vst.msk [vmem:[#allocation2 + $0x1e0] sm:$0xff] %vm19_vm0, %v1910_v1  ;;  %81 = vst.msk [vmem:[#allocation2 + $0x1e8] sm:$0xff] %vm19_vm0, %v1910_v1  ;;  %1815 = vmatprep.mubr.msk.bf16.mxu0 %vm396_vm1, %v1889_v16  ;;  %1847 = vmatprep.mubr.msk.bf16.mxu1 %vm396_vm1, %v1890_v17 }
  0x20   :  { %82 = vst.msk [vmem:[#allocation2 + $0x1f0] sm:$0xff] %vm19_vm0, %v1910_v1  ;;  %83 = vst.msk [vmem:[#allocation2 + $0x1f8] sm:$0xff] %vm19_vm0, %v1910_v1 }
  0x26   :  { %1816 = vmatmul.mubr.msk.bf16.gmra.mrb[12].mxu0 %vm396_vm1, %v1891_v18  ;;  %1848 = vmatmul.mubr.msk.bf16.gmra.mrb[12].mxu1 %vm396_vm1, %v1892_v19 }
  0x27   :  { %1819 = vmatprep.mubr.msk.bf16.mxu0 %vm396_vm1, %v1893_v20  ;;  %1851 = vmatprep.mubr.msk.bf16.mxu1 %vm396_vm1, %v1894_v21 }
  0x2e   :  { %1820 = vmatmul.mubr.msk.bf16.gmra.mrb[16].mxu0 %vm396_vm1, %v1895_v22  ;;  %1852 = vmatmul.mubr.msk.bf16.gmra.mrb[16].mxu1 %vm396_vm1, %v1896_v23 }
  0x2f   :  { %1823 = vmatprep.mubr.msk.bf16.mxu0 %vm396_vm1, %v1897_v24  ;;  %1855 = vmatprep.mubr.msk.bf16.mxu1 %vm396_vm1, %v1898_v25 }
  0x36   :  { %1824 = vmatmul.mubr.msk.bf16.gmra.mrb[20].mxu0 %vm396_vm1, %v1899_v26  ;;  %1856 = vmatmul.mubr.msk.bf16.gmra.mrb[20].mxu1 %vm396_vm1, %v1900_v27 }
  0x37   :  { %1827 = vmatprep.mubr.msk.bf16.mxu0 %vm396_vm1, %v1901_v28  ;;  %1859 = vmatprep.mubr.msk.bf16.mxu1 %vm396_vm1, %v1902_v29 }
  0x3e   :  { %1828 = vmatmul.mubr.msk.bf16.gmra.mrb[24].mxu0 %vm396_vm1, %v1903_v30  ;;  %1860 = vmatmul.mubr.msk.bf16.gmra.mrb[24].mxu1 %vm396_vm1, %v1904_v31 }
  0x3f   :  { %1831 = vmatprep.mubr.msk.bf16.mxu0 %vm396_vm1, %v1905_v32  ;;  %1863 = vmatprep.mubr.msk.bf16.mxu1 %vm396_vm1, %v1906_v33 }
  0x46   :  { %1832 = vmatmul.mubr.msk.bf16.gmra.mrb[28].mxu0 %vm396_vm1, %v1907_v34  ;;  %1864 = vmatmul.mubr.msk.bf16.gmra.mrb[28].mxu1 %vm396_vm1, %v1908_v35 }
  0xe1   :  { %v1805_v40 = vpop.f32.mrb[0].mxu0  ;;  %v1837_v41 = vpop.f32.mrb[0].mxu1 }
  0xe2   :  { %v784_v44 = vadd.f32 %v1805_v40, %v86_v36  ;;  %v816_v45 = vadd.f32 %v1837_v41, %v118_v37  ;;  %v527_v46 = vpop.f32.mrb[1].mxu0  ;;  %v655_v47 = vpop.f32.mrb[1].mxu1 }
  0xe3   :  { %v782_v50 = vadd.f32 %v527_v46, %v84_v38  ;;  %v814_v51 = vadd.f32 %v655_v47, %v116_v39  ;;  %v1806_v52 = vpop.f32.mrb[2].mxu0  ;;  %v1838_v53 = vpop.f32.mrb[2].mxu1 }
  0xe4   :  { %849 = vst.msk [vmem:[#allocation2 + $0x10] sm:$0xff] %vm19_vm0, %v784_v44  ;;  %881 = vst.msk [vmem:[#allocation2 + $0x110] sm:$0xff] %vm19_vm0, %v816_v45  ;;  %v785_v54 = vadd.f32 %v1806_v52, %v87_v42  ;;  %v817_v55 = vadd.f32 %v1838_v53, %v119_v43  ;;  %v530_v56 = vpop.f32.mrb[3].mxu0  ;;  %v658_v57 = vpop.f32.mrb[3].mxu1  ;;  %v94_v45 = vld [vmem:[#allocation2 + $0x50] sm:$0xff] }
  0xe5   :  { %847 = vst.msk [vmem:[#allocation2] sm:$0xff] %vm19_vm0, %v782_v50  ;;  %879 = vst.msk [vmem:[#allocation2 + $0x100] sm:$0xff] %vm19_vm0, %v814_v51  ;;  %v783_v58 = vadd.f32 %v530_v56, %v85_v48  ;;  %v815_v59 = vadd.f32 %v658_v57, %v117_v49 }
  0xe6   :  { %850 = vst.msk [vmem:[#allocation2 + $0x18] sm:$0xff] %vm19_vm0, %v785_v54  ;;  %882 = vst.msk [vmem:[#allocation2 + $0x118] sm:$0xff] %vm19_vm0, %v817_v55 }
  0xe7   :  { %848 = vst.msk [vmem:[#allocation2 + $0x8] sm:$0xff] %vm19_vm0, %v783_v58  ;;  %880 = vst.msk [vmem:[#allocation2 + $0x108] sm:$0xff] %vm19_vm0, %v815_v59 }
  0xe9   :  { %v1809_v1 = vpop.f32.mrb[4].mxu0  ;;  %v1841_v2 = vpop.f32.mrb[4].mxu1 }
  0xea   :  { %v788_v5 = vadd.f32 %v1809_v1, %v90_v60  ;;  %v820_v6 = vadd.f32 %v1841_v2, %v122_v61  ;;  %v543_v7 = vpop.f32.mrb[5].mxu0  ;;  %v671_v8 = vpop.f32.mrb[5].mxu1 }
  0xeb   :  { %v916_v11 = vld [vmem:[#allocation2 + $0x10] sm:$0xff]  ;;  %v786_v13 = vadd.f32 %v543_v7, %v88_v62  ;;  %v818_v14 = vadd.f32 %v671_v8, %v120_v63  ;;  %v1810_v15 = vpop.f32.mrb[6].mxu0  ;;  %v1842_v16 = vpop.f32.mrb[6].mxu1 }
  0xec   :  { %v948_v12 = vld [vmem:[#allocation2 + $0x110] sm:$0xff]  ;;  %v987_v17 = vadd.f32 %v2213_v0, %v916_v11  ;;  %v914_v19 = vld [vmem:[#allocation2] sm:$0xff]  ;;  %853 = vst.msk [vmem:[#allocation2 + $0x30] sm:$0xff] %vm19_vm0, %v788_v5  ;;  %885 = vst.msk [vmem:[#allocation2 + $0x130] sm:$0xff] %vm19_vm0, %v820_v6  ;;  %v789_v21 = vadd.f32 %v1810_v15, %v91_v3  ;;  %v821_v22 = vadd.f32 %v1842_v16, %v123_v4  ;;  %v546_v23 = vpop.f32.mrb[7].mxu0  ;;  %v674_v24 = vpop.f32.mrb[7].mxu1 }
  0xed   :  { %v1019_v18 = vadd.f32 %v2213_v0, %v948_v12  ;;  %v946_v20 = vld [vmem:[#allocation2 + $0x100] sm:$0xff]  ;;  %v985_v25 = vadd.f32 %v2213_v0, %v914_v19  ;;  %v917_v27 = vld [vmem:[#allocation2 + $0x18] sm:$0xff]  ;;  %851 = vst.msk [vmem:[#allocation2 + $0x20] sm:$0xff] %vm19_vm0, %v786_v13  ;;  %883 = vst.msk [vmem:[#allocation2 + $0x120] sm:$0xff] %vm19_vm0, %v818_v14  ;;  %v787_v29 = vadd.f32 %v546_v23, %v89_v9 }
  0xee   :  { %v1017_v26 = vadd.f32 %v2213_v0, %v946_v20  ;;  %v949_v28 = vld [vmem:[#allocation2 + $0x118] sm:$0xff]  ;;  %v819_v30 = vadd.f32 %v674_v24, %v121_v10  ;;  %vm1051_vm3 = vcmp.ge.f32.partialorder %v987_v17, 0.0  ;;  %v1115_v31 = vmul.f32 0.2, %v987_v17  ;;  %854 = vst.msk [vmem:[#allocation2 + $0x38] sm:$0xff] %vm19_vm0, %v789_v21  ;;  %886 = vst.msk [vmem:[#allocation2 + $0x138] sm:$0xff] %vm19_vm0, %v821_v22 }
  0xef   :  { %vm1083_vm4 = vcmp.ge.f32.partialorder %v1019_v18, 0.0  ;;  %v1147_v32 = vmul.f32 0.2, %v1019_v18  ;;  %vm1049_vm5 = vcmp.ge.f32.partialorder %v985_v25, 0.0  ;;  %v1113_v33 = vmul.f32 0.2, %v985_v25 }
  0xf0   :  { %vm1081_vm6 = vcmp.ge.f32.partialorder %v1017_v26, 0.0  ;;  %v1145_v34 = vmul.f32 0.2, %v1017_v26  ;;  %852 = vst.msk [vmem:[#allocation2 + $0x28] sm:$0xff] %vm19_vm0, %v787_v29  ;;  %884 = vst.msk [vmem:[#allocation2 + $0x128] sm:$0xff] %vm19_vm0, %v819_v30  ;;  %v1179_v35 = vsel %vm1051_vm3, %v987_v17, %v1115_v31  ;;  %v988_v37 = vadd.f32 %v2213_v0, %v917_v27  ;;  %v915_v39 = vld [vmem:[#allocation2 + $0x8] sm:$0xff] }
  0xf1   :  { %v1211_v36 = vsel %vm1083_vm4, %v1019_v18, %v1147_v32  ;;  %v1020_v38 = vadd.f32 %v2213_v0, %v949_v28  ;;  %v947_v40 = vld [vmem:[#allocation2 + $0x108] sm:$0xff]  ;;  %v1700_v41 = vpack.c.bf16 %v1179_v35, %v1179_v35  ;;  %v1177_v43 = vsel %vm1049_vm5, %v985_v25, %v1113_v33  ;;  %v1813_v46 = vpop.f32.mrb[8].mxu0  ;;  %v2229_v47 = vpop.f32.mrb[8].mxu1  ;;  %v126_v30 = vld [vmem:[#allocation2 + $0x150] sm:$0xff] }
  0xf2   :  { %v1732_v42 = vpack.c.bf16 %v1211_v36, %v1211_v36  ;;  %v1209_v44 = vsel %vm1081_vm6, %v1017_v26, %v1145_v34  ;;  %v1698_v48 = vpack.c.bf16 %v1177_v43, %v1177_v43  ;;  %vm1052_vm7 = vcmp.ge.f32.partialorder %v988_v37, 0.0  ;;  %v2231_v51 = vpop.f32.mrb[9].mxu0  ;;  %v2233_v52 = vpop.f32.mrb[9].mxu1 }
  0xf3   :  { %v1730_v49 = vpack.c.bf16 %v1209_v44, %v1209_v44  ;;  %v1116_v50 = vmul.f32 0.2, %v988_v37  ;;  %1500 = vst.msk [vmem:[%s2718_s3 + $0x8] sm:$0xf] %vm1497_vm2, %v1700_v41  ;;  %vm1084_vm8 = vcmp.ge.f32.partialorder %v1020_v38, 0.0  ;;  %v986_v54 = vadd.f32 %v2213_v0, %v915_v39  ;;  %v920_v56 = vld [vmem:[#allocation2 + $0x30] sm:$0xff] }
  0xf4   :  { %1532 = vst.msk [vmem:[%s2718_s3 + $0x88] sm:$0xf] %vm1497_vm2, %v1732_v42  ;;  %v1148_v53 = vmul.f32 0.2, %v1020_v38  ;;  %v1018_v55 = vadd.f32 %v2213_v0, %v947_v40  ;;  %v952_v57 = vld [vmem:[#allocation2 + $0x130] sm:$0xff]  ;;  %v2245_v58 = vpop.f32.mrb[10].mxu0  ;;  %v991_v60 = vadd.f32 %v2213_v0, %v920_v56  ;;  %v792_v62 = vadd.f32 %v1813_v46, %v94_v45 }
  0xf5   :  { %1498 = vst.msk [vmem:[%s2718_s3] sm:$0xf] %vm1497_vm2, %v1698_v48  ;;  %1530 = vst.msk [vmem:[%s2718_s3 + $0x80] sm:$0xf] %vm1497_vm2, %v1730_v49  ;;  %v1180_v59 = vsel %vm1052_vm7, %v988_v37, %v1116_v50  ;;  %v1023_v61 = vadd.f32 %v2213_v0, %v952_v57  ;;  %v2257_v63 = vpop.f32.mrb[10].mxu1  ;;  %v2259_v1 = vpop.f32.mrb[11].mxu0  ;;  %v824_v46 = vadd.f32 %v2229_v47, %v126_v30 }
  0xf6   :  { %v1701_v2 = vpack.c.bf16 %v1180_v59, %v1180_v59  ;;  %v1212_v3 = vsel %vm1084_vm8, %v1020_v38, %v1148_v53  ;;  %vm1050_vm9 = vcmp.ge.f32.partialorder %v986_v54, 0.0  ;;  %v1114_v4 = vmul.f32 0.2, %v986_v54  ;;  %v918_v5 = vld [vmem:[#allocation2 + $0x20] sm:$0xff]  ;;  %v2262_v7 = vpop.f32.mrb[11].mxu1  ;;  %v921_v10 = vld [vmem:[#allocation2 + $0x38] sm:$0xff] }
  0xf7   :  { %v950_v6 = vld [vmem:[#allocation2 + $0x120] sm:$0xff]  ;;  %v1733_v8 = vpack.c.bf16 %v1212_v3, %v1212_v3  ;;  %vm1082_vm10 = vcmp.ge.f32.partialorder %v1018_v55, 0.0  ;;  %v1146_v9 = vmul.f32 0.2, %v1018_v55  ;;  %vm1055_vm11 = vcmp.ge.f32.partialorder %v991_v60, 0.0  ;;  %857 = vst.msk [vmem:[#allocation2 + $0x50] sm:$0xff] %vm19_vm0, %v792_v62 }
  0xf8   :  { %1501 = vst.msk [vmem:[%s2718_s3 + $0xc] sm:$0xf] %vm1497_vm2, %v1701_v2  ;;  %v1178_v11 = vsel %vm1050_vm9, %v986_v54, %v1114_v4  ;;  %v1119_v12 = vmul.f32 0.2, %v991_v60  ;;  %vm1087_vm12 = vcmp.ge.f32.partialorder %v1023_v61, 0.0  ;;  %v989_v16 = vadd.f32 %v2213_v0, %v918_v5  ;;  %v953_v22 = vld [vmem:[#allocation2 + $0x138] sm:$0xff] }
  0xf9   :  { %v1151_v13 = vmul.f32 0.2, %v1023_v61  ;;  %1533 = vst.msk [vmem:[%s2718_s3 + $0x8c] sm:$0xf] %vm1497_vm2, %v1733_v8  ;;  %v1699_v14 = vpack.c.bf16 %v1178_v11, %v1178_v11  ;;  %v1210_v15 = vsel %vm1082_vm10, %v1018_v55, %v1146_v9  ;;  %v1021_v17 = vadd.f32 %v2213_v0, %v950_v6  ;;  %v919_v23 = vld [vmem:[#allocation2 + $0x28] sm:$0xff]  ;;  %v2276_v25 = vpop.f32.mrb[12].mxu0 }
  0xfa   :  { %v1731_v18 = vpack.c.bf16 %v1210_v15, %v1210_v15  ;;  %v1183_v19 = vsel %vm1055_vm11, %v991_v60, %v1119_v12  ;;  %v992_v21 = vadd.f32 %v2213_v0, %v921_v10  ;;  %v951_v24 = vld [vmem:[#allocation2 + $0x128] sm:$0xff]  ;;  %v2278_v26 = vpop.f32.mrb[12].mxu1  ;;  %vm1053_vm13 = vcmp.ge.f32.partialorder %v989_v16, 0.0  ;;  %v2284_v31 = vpop.f32.mrb[13].mxu0  ;;  %v92_v39 = vld [vmem:[#allocation2 + $0x40] sm:$0xff]  ;;  %v95_v49 = vld [vmem:[#allocation2 + $0x58] sm:$0xff] }
  0xfb   :  { %v1215_v20 = vsel %vm1087_vm12, %v1023_v61, %v1151_v13  ;;  %1499 = vst.msk [vmem:[%s2718_s3 + $0x4] sm:$0xf] %vm1497_vm2, %v1699_v14  ;;  %v1704_v27 = vpack.c.bf16 %v1183_v19, %v1183_v19  ;;  %v1117_v29 = vmul.f32 0.2, %v989_v16  ;;  %v2286_v32 = vpop.f32.mrb[13].mxu1  ;;  %vm1085_vm14 = vcmp.ge.f32.partialorder %v1021_v17, 0.0 }
  0xfc   :  { %v1736_v28 = vpack.c.bf16 %v1215_v20, %v1215_v20  ;;  %1531 = vst.msk [vmem:[%s2718_s3 + $0x84] sm:$0xf] %vm1497_vm2, %v1731_v18  ;;  %v1149_v33 = vmul.f32 0.2, %v1021_v17  ;;  %vm1056_vm15 = vcmp.ge.f32.partialorder %v992_v21, 0.0  ;;  %v1024_v36 = vadd.f32 %v2213_v0, %v953_v22  ;;  %v2303_v40 = vpop.f32.mrb[14].mxu0 }
  0xfd   :  { %v1120_v34 = vmul.f32 0.2, %v992_v21  ;;  %1504 = vst.msk [vmem:[%s2718_s3 + $0x18] sm:$0xf] %vm1497_vm2, %v1704_v27  ;;  %v1181_v35 = vsel %vm1053_vm13, %v989_v16, %v1117_v29  ;;  %v990_v37 = vadd.f32 %v2213_v0, %v919_v23  ;;  %v1022_v38 = vadd.f32 %v2213_v0, %v951_v24  ;;  %v2305_v41 = vpop.f32.mrb[14].mxu1  ;;  %v124_v48 = vld [vmem:[#allocation2 + $0x140] sm:$0xff] }
  0xfe   :  { %1536 = vst.msk [vmem:[%s2718_s3 + $0x98] sm:$0xf] %vm1497_vm2, %v1736_v28  ;;  %v1702_v42 = vpack.c.bf16 %v1181_v35, %v1181_v35  ;;  %v1213_v43 = vsel %vm1085_vm14, %v1021_v17, %v1149_v33  ;;  %v924_v45 = vld [vmem:[#allocation2 + $0x50] sm:$0xff]  ;;  %v2308_v50 = vpop.f32.mrb[15].mxu0  ;;  %v2310_v53 = vpop.f32.mrb[15].mxu1  ;;  %vm1088_vm1 = vcmp.ge.f32.partialorder %v1024_v36, 0.0  ;;  %v790_v4 = vadd.f32 %v2231_v51, %v92_v39 }
  0xff   :  { %v1184_v44 = vsel %vm1056_vm15, %v992_v21, %v1120_v34  ;;  %v1734_v54 = vpack.c.bf16 %v1213_v43, %v1213_v43  ;;  %v1152_v56 = vmul.f32 0.2, %v1024_v36  ;;  %v127_v57 = vld [vmem:[#allocation2 + $0x158] sm:$0xff]  ;;  %v93_v59 = vld [vmem:[#allocation2 + $0x48] sm:$0xff]  ;;  %v98_v61 = vld [vmem:[#allocation2 + $0x70] sm:$0xff]  ;;  %vm1054_vm3 = vcmp.ge.f32.partialorder %v990_v37, 0.0 }
 0x100   :  { %v1705_v55 = vpack.c.bf16 %v1184_v44, %v1184_v44  ;;  %v125_v60 = vld [vmem:[#allocation2 + $0x148] sm:$0xff]  ;;  %1502 = vst.msk [vmem:[%s2718_s3 + $0x10] sm:$0xf] %vm1497_vm2, %v1702_v42  ;;  %v1118_v47 = vmul.f32 0.2, %v990_v37  ;;  %vm1086_vm4 = vcmp.ge.f32.partialorder %v1022_v38, 0.0  ;;  %v995_v3 = vadd.f32 %v2213_v0, %v924_v45 }
 0x101   :  { %v1150_v62 = vmul.f32 0.2, %v1022_v38  ;;  %889 = vst.msk [vmem:[#allocation2 + $0x150] sm:$0xff] %vm19_vm0, %v824_v46  ;;  %v1216_v2 = vsel %vm1088_vm1, %v1024_v36, %v1152_v56  ;;  %v822_v5 = vadd.f32 %v2233_v52, %v124_v48  ;;  %v130_v6 = vld [vmem:[#allocation2 + $0x170] sm:$0xff]  ;;  %v96_v8 = vld [vmem:[#allocation2 + $0x60] sm:$0xff]  ;;  %v793_v13 = vadd.f32 %v2245_v58, %v95_v49  ;;  %v99_v14 = vld [vmem:[#allocation2 + $0x78] sm:$0xff] }
 0x102   :  { %1534 = vst.msk [vmem:[%s2718_s3 + $0x90] sm:$0xf] %vm1497_vm2, %v1734_v54  ;;  %1505 = vst.msk [vmem:[%s2718_s3 + $0x1c] sm:$0xf] %vm1497_vm2, %v1705_v55  ;;  %v128_v9 = vld [vmem:[#allocation2 + $0x160] sm:$0xff]  ;;  %v1737_v10 = vpack.c.bf16 %v1216_v2, %v1216_v2  ;;  %v1182_v11 = vsel %vm1054_vm3, %v990_v37, %v1118_v47  ;;  %v131_v15 = vld [vmem:[#allocation2 + $0x178] sm:$0xff]  ;;  %v825_v58 = vadd.f32 %v2257_v63, %v127_v57 }
 0x103   :  { %v1214_v12 = vsel %vm1086_vm4, %v1022_v38, %v1150_v62  ;;  %v97_v16 = vld [vmem:[#allocation2 + $0x68] sm:$0xff]  ;;  %v1821_v17 = vpop.f32.mrb[16].mxu0  ;;  %v1853_v18 = vpop.f32.mrb[16].mxu1  ;;  %v1703_v19 = vpack.c.bf16 %v1182_v11, %v1182_v11  ;;  %vm1059_vm5 = vcmp.ge.f32.partialorder %v995_v3, 0.0  ;;  %v1123_v21 = vmul.f32 0.2, %v995_v3 }
 0x104   :  { %v1735_v20 = vpack.c.bf16 %v1214_v12, %v1214_v12  ;;  %855 = vst.msk [vmem:[#allocation2 + $0x40] sm:$0xff] %vm19_vm0, %v790_v4  ;;  %887 = vst.msk [vmem:[#allocation2 + $0x140] sm:$0xff] %vm19_vm0, %v822_v5  ;;  %v129_v51 = vld [vmem:[#allocation2 + $0x168] sm:$0xff]  ;;  %v591_v52 = vpop.f32.mrb[17].mxu0  ;;  %v719_v22 = vpop.f32.mrb[17].mxu1  ;;  %v791_v23 = vadd.f32 %v2259_v1, %v93_v59  ;;  %v823_v24 = vadd.f32 %v2262_v7, %v125_v60  ;;  %v102_v28 = vld [vmem:[#allocation2 + $0x90] sm:$0xff] }
 0x105   :  { %1537 = vst.msk [vmem:[%s2718_s3 + $0x9c] sm:$0xf] %vm1497_vm2, %v1737_v10  ;;  %v796_v27 = vadd.f32 %v2276_v25, %v98_v61  ;;  %v134_v29 = vld [vmem:[#allocation2 + $0x190] sm:$0xff]  ;;  %v100_v30 = vld [vmem:[#allocation2 + $0x80] sm:$0xff]  ;;  %v1822_v33 = vpop.f32.mrb[18].mxu0  ;;  %v1854_v34 = vpop.f32.mrb[18].mxu1  ;;  %v1187_v63 = vsel %vm1059_vm5, %v995_v3, %v1123_v21  ;;  %v828_v1 = vadd.f32 %v2278_v26, %v130_v6  ;;  %v794_v7 = vadd.f32 %v2284_v31, %v96_v8 }
 0x106   :  { %858 = vst.msk [vmem:[#allocation2 + $0x58] sm:$0xff] %vm19_vm0, %v793_v13  ;;  %v826_v25 = vadd.f32 %v2286_v32, %v128_v9  ;;  %v132_v35 = vld [vmem:[#allocation2 + $0x180] sm:$0xff]  ;;  %v103_v36 = vld [vmem:[#allocation2 + $0x98] sm:$0xff]  ;;  %v594_v38 = vpop.f32.mrb[19].mxu0  ;;  %v722_v39 = vpop.f32.mrb[19].mxu1  ;;  %v1708_v42 = vpack.c.bf16 %v1187_v63, %v1187_v63  ;;  %890 = vst.msk [vmem:[#allocation2 + $0x158] sm:$0xff] %vm19_vm0, %v825_v58  ;;  %v797_v26 = vadd.f32 %v2303_v40, %v99_v14 }
 0x107   :  { %1503 = vst.msk [vmem:[%s2718_s3 + $0x14] sm:$0xf] %vm1497_vm2, %v1703_v19  ;;  %1535 = vst.msk [vmem:[%s2718_s3 + $0x94] sm:$0xf] %vm1497_vm2, %v1735_v20  ;;  %v135_v37 = vld [vmem:[#allocation2 + $0x198] sm:$0xff]  ;;  %v829_v31 = vadd.f32 %v2305_v41, %v131_v15  ;;  %v795_v32 = vadd.f32 %v2308_v50, %v97_v16  ;;  %v101_v43 = vld [vmem:[#allocation2 + $0x88] sm:$0xff]  ;;  %v827_v46 = vadd.f32 %v2310_v53, %v129_v51 }
 0x108   :  { %856 = vst.msk [vmem:[#allocation2 + $0x48] sm:$0xff] %vm19_vm0, %v791_v23  ;;  %888 = vst.msk [vmem:[#allocation2 + $0x148] sm:$0xff] %vm19_vm0, %v823_v24  ;;  %v133_v44 = vld [vmem:[#allocation2 + $0x188] sm:$0xff]  ;;  %v956_v45 = vld [vmem:[#allocation2 + $0x150] sm:$0xff]  ;;  %v800_v48 = vadd.f32 %v1821_v17, %v102_v28  ;;  %v832_v49 = vadd.f32 %v1853_v18, %v134_v29  ;;  %v798_v54 = vadd.f32 %v591_v52, %v100_v30 }
 0x109   :  { %861 = vst.msk [vmem:[#allocation2 + $0x70] sm:$0xff] %vm19_vm0, %v796_v27  ;;  %893 = vst.msk [vmem:[#allocation2 + $0x170] sm:$0xff] %vm19_vm0, %v828_v1  ;;  %v1027_v40 = vadd.f32 %v2213_v0, %v956_v45  ;;  %v830_v41 = vadd.f32 %v719_v22, %v132_v35  ;;  %v801_v50 = vadd.f32 %v1822_v33, %v103_v36  ;;  %v106_v53 = vld [vmem:[#allocation2 + $0xb0] sm:$0xff]  ;;  %v104_v60 = vld [vmem:[#allocation2 + $0xa0] sm:$0xff]  ;;  %v1825_v2 = vpop.f32.mrb[20].mxu0  ;;  %v1857_v8 = vpop.f32.mrb[20].mxu1 }
 0x10a   :  { %859 = vst.msk [vmem:[#allocation2 + $0x60] sm:$0xff] %vm19_vm0, %v794_v7  ;;  %891 = vst.msk [vmem:[#allocation2 + $0x160] sm:$0xff] %vm19_vm0, %v826_v25  ;;  %v833_v55 = vadd.f32 %v1854_v34, %v135_v37  ;;  %v799_v56 = vadd.f32 %v594_v38, %v101_v43  ;;  %v831_v57 = vadd.f32 %v722_v39, %v133_v44  ;;  %v138_v59 = vld [vmem:[#allocation2 + $0x1b0] sm:$0xff]  ;;  %v607_v9 = vpop.f32.mrb[21].mxu0  ;;  %v136_v14 = vld [vmem:[#allocation2 + $0x1a0] sm:$0xff]  ;;  %v735_v15 = vpop.f32.mrb[21].mxu1 }
 0x10b   :  { %1508 = vst.msk [vmem:[%s2718_s3 + $0x28] sm:$0xf] %vm1497_vm2, %v1708_v42  ;;  %vm1091_vm6 = vcmp.ge.f32.partialorder %v1027_v40, 0.0  ;;  %v1155_v61 = vmul.f32 0.2, %v1027_v40  ;;  %v922_v47 = vld [vmem:[#allocation2 + $0x40] sm:$0xff]  ;;  %v804_v6 = vadd.f32 %v1825_v2, %v106_v53  ;;  %v836_v12 = vadd.f32 %v1857_v8, %v138_v59 }
 0x10c   :  { %862 = vst.msk [vmem:[#allocation2 + $0x78] sm:$0xff] %vm19_vm0, %v797_v26  ;;  %894 = vst.msk [vmem:[#allocation2 + $0x178] sm:$0xff] %vm19_vm0, %v829_v31  ;;  %v954_v62 = vld [vmem:[#allocation2 + $0x140] sm:$0xff]  ;;  %v993_v3 = vadd.f32 %v2213_v0, %v922_v47  ;;  %v802_v13 = vadd.f32 %v607_v9, %v104_v60  ;;  %v2384_v16 = vpop.f32.mrb[22].mxu0  ;;  %v834_v28 = vadd.f32 %v735_v15, %v136_v14  ;;  %v2396_v29 = vpop.f32.mrb[22].mxu1 }
 0x10d   :  { %860 = vst.msk [vmem:[#allocation2 + $0x68] sm:$0xff] %vm19_vm0, %v795_v32  ;;  %892 = vst.msk [vmem:[#allocation2 + $0x168] sm:$0xff] %vm19_vm0, %v827_v46  ;;  %v1025_v4 = vadd.f32 %v2213_v0, %v954_v62  ;;  %v925_v5 = vld [vmem:[#allocation2 + $0x58] sm:$0xff]  ;;  %v1219_v10 = vsel %vm1091_vm6, %v1027_v40, %v1155_v61  ;;  %v2398_v30 = vpop.f32.mrb[23].mxu0  ;;  %v2402_v35 = vpop.f32.mrb[23].mxu1 }
 0x10e   :  { %865 = vst.msk [vmem:[#allocation2 + $0x90] sm:$0xff] %vm19_vm0, %v800_v48  ;;  %897 = vst.msk [vmem:[#allocation2 + $0x190] sm:$0xff] %vm19_vm0, %v832_v49  ;;  %v996_v11 = vadd.f32 %v2213_v0, %v925_v5  ;;  %v1740_v17 = vpack.c.bf16 %v1219_v10, %v1219_v10  ;;  %vm1057_vm7 = vcmp.ge.f32.partialorder %v993_v3, 0.0  ;;  %v1121_v18 = vmul.f32 0.2, %v993_v3  ;;  %v957_v19 = vld [vmem:[#allocation2 + $0x158] sm:$0xff] }
 0x10f   :  { %863 = vst.msk [vmem:[#allocation2 + $0x80] sm:$0xff] %vm19_vm0, %v798_v54  ;;  %895 = vst.msk [vmem:[#allocation2 + $0x180] sm:$0xff] %vm19_vm0, %v830_v41  ;;  %vm1089_vm8 = vcmp.ge.f32.partialorder %v1025_v4, 0.0  ;;  %v923_v20 = vld [vmem:[#allocation2 + $0x48] sm:$0xff]  ;;  %v1153_v21 = vmul.f32 0.2, %v1025_v4  ;;  %v1028_v52 = vadd.f32 %v2213_v0, %v957_v19 }
 0x110   :  { %866 = vst.msk [vmem:[#allocation2 + $0x98] sm:$0xff] %vm19_vm0, %v801_v50  ;;  %898 = vst.msk [vmem:[#allocation2 + $0x198] sm:$0xff] %vm19_vm0, %v833_v55  ;;  %vm1060_vm9 = vcmp.ge.f32.partialorder %v996_v11, 0.0  ;;  %v1124_v51 = vmul.f32 0.2, %v996_v11  ;;  %v955_v22 = vld [vmem:[#allocation2 + $0x148] sm:$0xff]  ;;  %v1185_v58 = vsel %vm1057_vm7, %v993_v3, %v1121_v18  ;;  %v994_v23 = vadd.f32 %v2213_v0, %v923_v20 }
 0x111   :  { %864 = vst.msk [vmem:[#allocation2 + $0x88] sm:$0xff] %vm19_vm0, %v799_v56  ;;  %896 = vst.msk [vmem:[#allocation2 + $0x188] sm:$0xff] %vm19_vm0, %v831_v57  ;;  %v1026_v24 = vadd.f32 %v2213_v0, %v955_v22  ;;  %v928_v27 = vld [vmem:[#allocation2 + $0x70] sm:$0xff]  ;;  %v1706_v33 = vpack.c.bf16 %v1185_v58, %v1185_v58  ;;  %v1217_v34 = vsel %vm1089_vm8, %v1025_v4, %v1153_v21  ;;  %vm1092_vm10 = vcmp.ge.f32.partialorder %v1028_v52, 0.0  ;;  %v926_v7 = vld [vmem:[#allocation2 + $0x60] sm:$0xff]  ;;  %v2422_v45 = vpop.f32.mrb[24].mxu0 }
 0x112   :  { %869 = vst.msk [vmem:[#allocation2 + $0xb0] sm:$0xff] %vm19_vm0, %v804_v6  ;;  %901 = vst.msk [vmem:[#allocation2 + $0x1b0] sm:$0xff] %vm19_vm0, %v836_v12  ;;  %v1188_v63 = vsel %vm1060_vm9, %v996_v11, %v1124_v51  ;;  %v960_v1 = vld [vmem:[#allocation2 + $0x170] sm:$0xff]  ;;  %v958_v25 = vld [vmem:[#allocation2 + $0x160] sm:$0xff]  ;;  %v1738_v36 = vpack.c.bf16 %v1217_v34, %v1217_v34  ;;  %v1156_v38 = vmul.f32 0.2, %v1028_v52  ;;  %v999_v26 = vadd.f32 %v2213_v0, %v928_v27 }
 0x113   :  { %867 = vst.msk [vmem:[#allocation2 + $0xa0] sm:$0xff] %vm19_vm0, %v802_v13  ;;  %v1709_v37 = vpack.c.bf16 %v1188_v63, %v1188_v63  ;;  %vm1058_vm11 = vcmp.ge.f32.partialorder %v994_v23, 0.0  ;;  %899 = vst.msk [vmem:[#allocation2 + $0x1a0] sm:$0xff] %vm19_vm0, %v834_v28  ;;  %v1122_v39 = vmul.f32 0.2, %v994_v23  ;;  %vm1090_vm12 = vcmp.ge.f32.partialorder %v1026_v24, 0.0 }
 0x114   :  { %1540 = vst.msk [vmem:[%s2718_s3 + $0xa8] sm:$0xf] %vm1497_vm2, %v1740_v17  ;;  %1506 = vst.msk [vmem:[%s2718_s3 + $0x20] sm:$0xf] %vm1497_vm2, %v1706_v33  ;;  %v1154_v42 = vmul.f32 0.2, %v1026_v24  ;;  %v1220_v31 = vsel %vm1092_vm10, %v1028_v52, %v1156_v38  ;;  %v1031_v32 = vadd.f32 %v2213_v0, %v960_v1  ;;  %v997_v43 = vadd.f32 %v2213_v0, %v926_v7 }
 0x115   :  { %1538 = vst.msk [vmem:[%s2718_s3 + $0xa0] sm:$0xf] %vm1497_vm2, %v1738_v36  ;;  %1509 = vst.msk [vmem:[%s2718_s3 + $0x2c] sm:$0xf] %vm1497_vm2, %v1709_v37  ;;  %v1029_v44 = vadd.f32 %v2213_v0, %v958_v25  ;;  %v2424_v46 = vpop.f32.mrb[24].mxu1  ;;  %v1741_v48 = vpack.c.bf16 %v1220_v31, %v1220_v31  ;;  %v1186_v49 = vsel %vm1058_vm11, %v994_v23, %v1122_v39  ;;  %vm1063_vm13 = vcmp.ge.f32.partialorder %v999_v26, 0.0 }
 0x116   :  { %v1218_v54 = vsel %vm1090_vm12, %v1026_v24, %v1154_v42  ;;  %v929_v40 = vld [vmem:[#allocation2 + $0x78] sm:$0xff]  ;;  %v2427_v50 = vpop.f32.mrb[25].mxu0  ;;  %v2429_v55 = vpop.f32.mrb[25].mxu1  ;;  %v1707_v53 = vpack.c.bf16 %v1186_v49, %v1186_v49  ;;  %v1127_v57 = vmul.f32 0.2, %v999_v26  ;;  %vm1095_vm14 = vcmp.ge.f32.partialorder %v1031_v32, 0.0 }
 0x117   :  { %v961_v41 = vld [vmem:[#allocation2 + $0x178] sm:$0xff]  ;;  %v1739_v56 = vpack.c.bf16 %v1218_v54, %v1218_v54  ;;  %v927_v59 = vld [vmem:[#allocation2 + $0x68] sm:$0xff]  ;;  %1541 = vst.msk [vmem:[%s2718_s3 + $0xac] sm:$0xf] %vm1497_vm2, %v1741_v48  ;;  %v1159_v60 = vmul.f32 0.2, %v1031_v32  ;;  %v1000_v2 = vadd.f32 %v2213_v0, %v929_v40 }
 0x118   :  { %vm1061_vm15 = vcmp.ge.f32.partialorder %v997_v43, 0.0  ;;  %v1125_v61 = vmul.f32 0.2, %v997_v43  ;;  %vm1093_vm1 = vcmp.ge.f32.partialorder %v1029_v44, 0.0  ;;  %1507 = vst.msk [vmem:[%s2718_s3 + $0x24] sm:$0xf] %vm1497_vm2, %v1707_v53  ;;  %v1191_v47 = vsel %vm1063_vm13, %v999_v26, %v1127_v57 }
 0x119   :  { %1539 = vst.msk [vmem:[%s2718_s3 + $0xa4] sm:$0xf] %vm1497_vm2, %v1739_v56  ;;  %v1157_v62 = vmul.f32 0.2, %v1029_v44  ;;  %v1032_v3 = vadd.f32 %v2213_v0, %v961_v41  ;;  %v2446_v4 = vpop.f32.mrb[26].mxu0  ;;  %v2448_v5 = vpop.f32.mrb[26].mxu1  ;;  %v1712_v6 = vpack.c.bf16 %v1191_v47, %v1191_v47  ;;  %v1223_v8 = vsel %vm1095_vm14, %v1031_v32, %v1159_v60 }
 0x11a   :  { %v1189_v9 = vsel %vm1061_vm15, %v997_v43, %v1125_v61  ;;  %v998_v10 = vadd.f32 %v2213_v0, %v927_v59  ;;  %v959_v11 = vld [vmem:[#allocation2 + $0x168] sm:$0xff]  ;;  %v932_v12 = vld [vmem:[#allocation2 + $0x90] sm:$0xff]  ;;  %v2452_v13 = vpop.f32.mrb[27].mxu0  ;;  %v2454_v14 = vpop.f32.mrb[27].mxu1  ;;  %v1744_v15 = vpack.c.bf16 %v1223_v8, %v1223_v8  ;;  %vm1064_vm3 = vcmp.ge.f32.partialorder %v1000_v2, 0.0  ;;  %v930_v20 = vld [vmem:[#allocation2 + $0x80] sm:$0xff] }
 0x11b   :  { %v1710_v17 = vpack.c.bf16 %v1189_v9, %v1189_v9  ;;  %v1221_v18 = vsel %vm1093_vm1, %v1029_v44, %v1157_v62  ;;  %v964_v19 = vld [vmem:[#allocation2 + $0x190] sm:$0xff]  ;;  %1512 = vst.msk [vmem:[%s2718_s3 + $0x38] sm:$0xf] %vm1497_vm2, %v1712_v6  ;;  %v1128_v51 = vmul.f32 0.2, %v1000_v2  ;;  %vm1096_vm4 = vcmp.ge.f32.partialorder %v1032_v3, 0.0 }
 0x11c   :  { %v1742_v21 = vpack.c.bf16 %v1221_v18, %v1221_v18  ;;  %v1160_v52 = vmul.f32 0.2, %v1032_v3  ;;  %v2461_v22 = vpop.f32.mrb[28].mxu0  ;;  %1544 = vst.msk [vmem:[%s2718_s3 + $0xb8] sm:$0xf] %vm1497_vm2, %v1744_v15  ;;  %vm1062_vm5 = vcmp.ge.f32.partialorder %v998_v10, 0.0  ;;  %v1030_v23 = vadd.f32 %v2213_v0, %v959_v11 }
 0x11d   :  { %1510 = vst.msk [vmem:[%s2718_s3 + $0x30] sm:$0xf] %vm1497_vm2, %v1710_v17  ;;  %v1126_v58 = vmul.f32 0.2, %v998_v10  ;;  %v1003_v24 = vadd.f32 %v2213_v0, %v932_v12  ;;  %v2473_v27 = vpop.f32.mrb[28].mxu1  ;;  %v2475_v28 = vpop.f32.mrb[29].mxu0  ;;  %v1192_v33 = vsel %vm1064_vm3, %v1000_v2, %v1128_v51  ;;  %v1035_v63 = vadd.f32 %v2213_v0, %v964_v19 }
 0x11e   :  { %1542 = vst.msk [vmem:[%s2718_s3 + $0xb0] sm:$0xf] %vm1497_vm2, %v1742_v21  ;;  %v1224_v34 = vsel %vm1096_vm4, %v1032_v3, %v1160_v52  ;;  %v1001_v1 = vadd.f32 %v2213_v0, %v930_v20  ;;  %v2484_v7 = vpop.f32.mrb[29].mxu1  ;;  %v2486_v25 = vpop.f32.mrb[30].mxu0  ;;  %v1713_v36 = vpack.c.bf16 %v1192_v33, %v1192_v33  ;;  %vm1094_vm6 = vcmp.ge.f32.partialorder %v1030_v23, 0.0  ;;  %v962_v39 = vld [vmem:[#allocation2 + $0x180] sm:$0xff] }
 0x11f   :  { %v1745_v37 = vpack.c.bf16 %v1224_v34, %v1224_v34  ;;  %v1190_v38 = vsel %vm1062_vm5, %v998_v10, %v1126_v58  ;;  %v933_v42 = vld [vmem:[#allocation2 + $0x98] sm:$0xff]  ;;  %v2488_v26 = vpop.f32.mrb[30].mxu1  ;;  %v2490_v31 = vpop.f32.mrb[31].mxu0  ;;  %v1158_v43 = vmul.f32 0.2, %v1030_v23  ;;  %vm1067_vm7 = vcmp.ge.f32.partialorder %v1003_v24, 0.0 }
 0x120   :  { %v1711_v32 = vpack.c.bf16 %v1190_v38, %v1190_v38  ;;  %v1131_v44 = vmul.f32 0.2, %v1003_v24  ;;  %v2492_v48 = vpop.f32.mrb[31].mxu1  ;;  %1513 = vst.msk [vmem:[%s2718_s3 + $0x3c] sm:$0xf] %vm1497_vm2, %v1713_v36  ;;  %vm1099_vm8 = vcmp.ge.f32.partialorder %v1035_v63, 0.0  ;;  %v1033_v53 = vadd.f32 %v2213_v0, %v962_v39 }
 0x121   :  { %1545 = vst.msk [vmem:[%s2718_s3 + $0xbc] sm:$0xf] %vm1497_vm2, %v1745_v37  ;;  %v1163_v49 = vmul.f32 0.2, %v1035_v63  ;;  %vm1065_vm9 = vcmp.ge.f32.partialorder %v1001_v1, 0.0  ;;  %v1222_v40 = vsel %vm1094_vm6, %v1030_v23, %v1158_v43  ;;  %v1004_v56 = vadd.f32 %v2213_v0, %v933_v42  ;;  %v965_v57 = vld [vmem:[#allocation2 + $0x198] sm:$0xff] }
 0x122   :  { %v1129_v54 = vmul.f32 0.2, %v1001_v1  ;;  %1511 = vst.msk [vmem:[%s2718_s3 + $0x34] sm:$0xf] %vm1497_vm2, %v1711_v32  ;;  %v1195_v41 = vsel %vm1067_vm7, %v1003_v24, %v1131_v44  ;;  %v931_v59 = vld [vmem:[#allocation2 + $0x88] sm:$0xff]  ;;  %v1743_v60 = vpack.c.bf16 %v1222_v40, %v1222_v40  ;;  %v936_v3 = vld [vmem:[#allocation2 + $0xb0] sm:$0xff]  ;;  %v1036_v12 = vadd.f32 %v2213_v0, %v965_v57 }
 0x123   :  { %v1716_v61 = vpack.c.bf16 %v1195_v41, %v1195_v41  ;;  %v1227_v47 = vsel %vm1099_vm8, %v1035_v63, %v1163_v49  ;;  %v963_v2 = vld [vmem:[#allocation2 + $0x188] sm:$0xff]  ;;  %v968_v6 = vld [vmem:[#allocation2 + $0x1b0] sm:$0xff]  ;;  %vm1097_vm10 = vcmp.ge.f32.partialorder %v1033_v53, 0.0  ;;  %v1161_v10 = vmul.f32 0.2, %v1033_v53  ;;  %v934_v24 = vld [vmem:[#allocation2 + $0xa0] sm:$0xff] }
 0x124   :  { %v1193_v62 = vsel %vm1065_vm9, %v1001_v1, %v1129_v54  ;;  %v1748_v8 = vpack.c.bf16 %v1227_v47, %v1227_v47  ;;  %1543 = vst.msk [vmem:[%s2718_s3 + $0xb4] sm:$0xf] %vm1497_vm2, %v1743_v60  ;;  %vm1068_vm11 = vcmp.ge.f32.partialorder %v1004_v56, 0.0  ;;  %v1132_v11 = vmul.f32 0.2, %v1004_v56  ;;  %v966_v1 = vld [vmem:[#allocation2 + $0x1a0] sm:$0xff] }
 0x125   :  { %v1714_v9 = vpack.c.bf16 %v1193_v62, %v1193_v62  ;;  %1516 = vst.msk [vmem:[%s2718_s3 + $0x48] sm:$0xf] %vm1497_vm2, %v1716_v61  ;;  %v1002_v15 = vadd.f32 %v2213_v0, %v931_v59  ;;  %v1225_v17 = vsel %vm1097_vm10, %v1033_v53, %v1161_v10  ;;  %v1034_v18 = vadd.f32 %v2213_v0, %v963_v2  ;;  %v107_v39 = vld [vmem:[#allocation2 + $0xb8] sm:$0xff]  ;;  %v105_v54 = vld [vmem:[#allocation2 + $0xa8] sm:$0xff]  ;;  %v110_v59 = vld [vmem:[#allocation2 + $0xd0] sm:$0xff] }
 0x126   :  { %1548 = vst.msk [vmem:[%s2718_s3 + $0xc8] sm:$0xf] %vm1497_vm2, %v1748_v8  ;;  %v1007_v19 = vadd.f32 %v2213_v0, %v936_v3  ;;  %v1039_v20 = vadd.f32 %v2213_v0, %v968_v6  ;;  %v1746_v21 = vpack.c.bf16 %v1225_v17, %v1225_v17  ;;  %v1196_v51 = vsel %vm1068_vm11, %v1004_v56, %v1132_v11  ;;  %v139_v49 = vld [vmem:[#allocation2 + $0x1b8] sm:$0xff]  ;;  %v137_v40 = vld [vmem:[#allocation2 + $0x1a8] sm:$0xff]  ;;  %v142_v60 = vld [vmem:[#allocation2 + $0x1d0] sm:$0xff] }
 0x127   :  { %1514 = vst.msk [vmem:[%s2718_s3 + $0x40] sm:$0xf] %vm1497_vm2, %v1714_v9  ;;  %vm1100_vm12 = vcmp.ge.f32.partialorder %v1036_v12, 0.0  ;;  %v1164_v52 = vmul.f32 0.2, %v1036_v12  ;;  %v1717_v58 = vpack.c.bf16 %v1196_v51, %v1196_v51  ;;  %vm1066_vm13 = vcmp.ge.f32.partialorder %v1002_v15, 0.0 }
 0x128   :  { %v1130_v23 = vmul.f32 0.2, %v1002_v15  ;;  %vm1098_vm14 = vcmp.ge.f32.partialorder %v1034_v18, 0.0  ;;  %1546 = vst.msk [vmem:[%s2718_s3 + $0xc0] sm:$0xf] %vm1497_vm2, %v1746_v21  ;;  %vm1071_vm15 = vcmp.ge.f32.partialorder %v1007_v19, 0.0  ;;  %v1005_v44 = vadd.f32 %v2213_v0, %v934_v24 }
 0x129   :  { %v1228_v33 = vsel %vm1100_vm12, %v1036_v12, %v1164_v52  ;;  %v1162_v34 = vmul.f32 0.2, %v1034_v18  ;;  %v1135_v63 = vmul.f32 0.2, %v1007_v19  ;;  %1517 = vst.msk [vmem:[%s2718_s3 + $0x4c] sm:$0xf] %vm1497_vm2, %v1717_v58  ;;  %v1037_v57 = vadd.f32 %v2213_v0, %v966_v1 }
 0x12a   :  { %v1749_v36 = vpack.c.bf16 %v1228_v33, %v1228_v33  ;;  %v1194_v37 = vsel %vm1066_vm13, %v1002_v15, %v1130_v23  ;;  %vm1103_vm1 = vcmp.ge.f32.partialorder %v1039_v20, 0.0  ;;  %v1167_v38 = vmul.f32 0.2, %v1039_v20  ;;  %v108_v61 = vld [vmem:[#allocation2 + $0xc0] sm:$0xff]  ;;  %v111_v6 = vld [vmem:[#allocation2 + $0xd8] sm:$0xff]  ;;  %v141_v11 = vld [vmem:[#allocation2 + $0x1c8] sm:$0xff] }
 0x12b   :  { %v1715_v42 = vpack.c.bf16 %v1194_v37, %v1194_v37  ;;  %v1226_v32 = vsel %vm1098_vm14, %v1034_v18, %v1162_v34  ;;  %v1199_v43 = vsel %vm1071_vm15, %v1007_v19, %v1135_v63  ;;  %vm1069_vm3 = vcmp.ge.f32.partialorder %v1005_v44, 0.0  ;;  %v140_v3 = vld [vmem:[#allocation2 + $0x1c0] sm:$0xff]  ;;  %v143_v8 = vld [vmem:[#allocation2 + $0x1d8] sm:$0xff]  ;;  %v114_v12 = vld [vmem:[#allocation2 + $0xf0] sm:$0xff] }
 0x12c   :  { %1549 = vst.msk [vmem:[%s2718_s3 + $0xcc] sm:$0xf] %vm1497_vm2, %v1749_v36  ;;  %v1747_v41 = vpack.c.bf16 %v1226_v32, %v1226_v32  ;;  %v1720_v53 = vpack.c.bf16 %v1199_v43, %v1199_v43  ;;  %v1231_v56 = vsel %vm1103_vm1, %v1039_v20, %v1167_v38  ;;  %v1133_v62 = vmul.f32 0.2, %v1005_v44  ;;  %v146_v19 = vld [vmem:[#allocation2 + $0x1f0] sm:$0xff]  ;;  %v144_v20 = vld [vmem:[#allocation2 + $0x1e0] sm:$0xff] }
 0x12d   :  { %1515 = vst.msk [vmem:[%s2718_s3 + $0x44] sm:$0xf] %vm1497_vm2, %v1715_v42  ;;  %v1752_v47 = vpack.c.bf16 %v1231_v56, %v1231_v56  ;;  %v805_v2 = vadd.f32 %v2384_v16, %v107_v39  ;;  %vm1101_vm4 = vcmp.ge.f32.partialorder %v1037_v57, 0.0  ;;  %v1165_v0 = vmul.f32 0.2, %v1037_v57  ;;  %v109_v16 = vld [vmem:[#allocation2 + $0xc8] sm:$0xff] }
 0x12e   :  { %1547 = vst.msk [vmem:[%s2718_s3 + $0xc4] sm:$0xf] %vm1497_vm2, %v1747_v41  ;;  %1520 = vst.msk [vmem:[%s2718_s3 + $0x58] sm:$0xf] %vm1497_vm2, %v1720_v53  ;;  %v837_v9 = vadd.f32 %v2396_v29, %v139_v49  ;;  %v803_v10 = vadd.f32 %v2398_v30, %v105_v54  ;;  %v1197_v15 = vsel %vm1069_vm3, %v1005_v44, %v1133_v62  ;;  %v112_v30 = vld [vmem:[#allocation2 + $0xe0] sm:$0xff]  ;;  %v115_v23 = vld [vmem:[#allocation2 + $0xf8] sm:$0xff] }
 0x12f   :  { %1552 = vst.msk [vmem:[%s2718_s3 + $0xd8] sm:$0xf] %vm1497_vm2, %v1752_v47  ;;  %v835_v17 = vadd.f32 %v2402_v35, %v137_v40  ;;  %v808_v18 = vadd.f32 %v2422_v45, %v110_v59  ;;  %v840_v29 = vadd.f32 %v2424_v46, %v142_v60  ;;  %v1718_v21 = vpack.c.bf16 %v1197_v15, %v1197_v15  ;;  %v147_v35 = vld [vmem:[#allocation2 + $0x1f8] sm:$0xff]  ;;  %v113_v24 = vld [vmem:[#allocation2 + $0xe8] sm:$0xff] }
 0x130   :  { %870 = vst.msk [vmem:[#allocation2 + $0xb8] sm:$0xff] %vm19_vm0, %v805_v2  ;;  %v1229_v51 = vsel %vm1101_vm4, %v1037_v57, %v1165_v0  ;;  %902 = vst.msk [vmem:[#allocation2 + $0x1b8] sm:$0xff] %vm19_vm0, %v837_v9  ;;  %v806_v52 = vadd.f32 %v2427_v50, %v108_v61  ;;  %v838_v58 = vadd.f32 %v2429_v55, %v140_v3  ;;  %v145_v63 = vld [vmem:[#allocation2 + $0x1e8] sm:$0xff] }
 0x131   :  { %868 = vst.msk [vmem:[#allocation2 + $0xa8] sm:$0xff] %vm19_vm0, %v803_v10  ;;  %v1750_v45 = vpack.c.bf16 %v1229_v51, %v1229_v51  ;;  %900 = vst.msk [vmem:[#allocation2 + $0x1a8] sm:$0xff] %vm19_vm0, %v835_v17  ;;  %v809_v46 = vadd.f32 %v2446_v4, %v111_v6  ;;  %v841_v33 = vadd.f32 %v2448_v5, %v143_v8 }
 0x132   :  { %873 = vst.msk [vmem:[#allocation2 + $0xd0] sm:$0xff] %vm19_vm0, %v808_v18  ;;  %905 = vst.msk [vmem:[#allocation2 + $0x1d0] sm:$0xff] %vm19_vm0, %v840_v29  ;;  %v807_v34 = vadd.f32 %v2452_v13, %v109_v16  ;;  %v839_v50 = vadd.f32 %v2454_v14, %v141_v11  ;;  %v812_v55 = vadd.f32 %v2461_v22, %v114_v12 }
 0x133   :  { %1518 = vst.msk [vmem:[%s2718_s3 + $0x50] sm:$0xf] %vm1497_vm2, %v1718_v21  ;;  %v844_v4 = vadd.f32 %v2473_v27, %v146_v19  ;;  %v810_v5 = vadd.f32 %v2475_v28, %v112_v30  ;;  %1550 = vst.msk [vmem:[%s2718_s3 + $0xd0] sm:$0xf] %vm1497_vm2, %v1750_v45  ;;  %v842_v13 = vadd.f32 %v2484_v7, %v144_v20 }
 0x134   :  { %871 = vst.msk [vmem:[#allocation2 + $0xc0] sm:$0xff] %vm19_vm0, %v806_v52  ;;  %903 = vst.msk [vmem:[#allocation2 + $0x1c0] sm:$0xff] %vm19_vm0, %v838_v58  ;;  %v813_v14 = vadd.f32 %v2486_v25, %v115_v23  ;;  %v845_v22 = vadd.f32 %v2488_v26, %v147_v35  ;;  %v811_v27 = vadd.f32 %v2490_v31, %v113_v24  ;;  %v2613_v25 = vld [vmem:[%s2717_s2] ss:$0 sm:$0xff] }
 0x135   :  { %874 = vst.msk [vmem:[#allocation2 + $0xd8] sm:$0xff] %vm19_vm0, %v809_v46  ;;  %906 = vst.msk [vmem:[#allocation2 + $0x1d8] sm:$0xff] %vm19_vm0, %v841_v33  ;;  %v843_v28 = vadd.f32 %v2492_v48, %v145_v63 }
 0x136   :  { %872 = vst.msk [vmem:[#allocation2 + $0xc8] sm:$0xff] %vm19_vm0, %v807_v34  ;;  %904 = vst.msk [vmem:[#allocation2 + $0x1c8] sm:$0xff] %vm19_vm0, %v839_v50 }
 0x137   :  { %877 = vst.msk [vmem:[#allocation2 + $0xf0] sm:$0xff] %vm19_vm0, %v812_v55  ;;  %909 = vst.msk [vmem:[#allocation2 + $0x1f0] sm:$0xff] %vm19_vm0, %v844_v4  ;;  %v937_v7 = vld [vmem:[#allocation2 + $0xb8] sm:$0xff] }
 0x138   :  { %875 = vst.msk [vmem:[#allocation2 + $0xe0] sm:$0xff] %vm19_vm0, %v810_v5  ;;  %907 = vst.msk [vmem:[#allocation2 + $0x1e0] sm:$0xff] %vm19_vm0, %v842_v13  ;;  %v1008_v26 = vadd.f32 %v2613_v25, %v937_v7  ;;  %v969_v31 = vld [vmem:[#allocation2 + $0x1b8] sm:$0xff]  ;;  %v935_v48 = vld [vmem:[#allocation2 + $0xa8] sm:$0xff] }
 0x139   :  { %878 = vst.msk [vmem:[#allocation2 + $0xf8] sm:$0xff] %vm19_vm0, %v813_v14  ;;  %910 = vst.msk [vmem:[#allocation2 + $0x1f8] sm:$0xff] %vm19_vm0, %v845_v22  ;;  %v1040_v1 = vadd.f32 %v2613_v25, %v969_v31  ;;  %v1006_v36 = vadd.f32 %v2613_v25, %v935_v48  ;;  %v967_v37 = vld [vmem:[#allocation2 + $0x1a8] sm:$0xff]  ;;  %v940_v38 = vld [vmem:[#allocation2 + $0xd0] sm:$0xff] }
 0x13a   :  { %876 = vst.msk [vmem:[#allocation2 + $0xe8] sm:$0xff] %vm19_vm0, %v811_v27  ;;  %908 = vst.msk [vmem:[#allocation2 + $0x1e8] sm:$0xff] %vm19_vm0, %v843_v28  ;;  %vm1072_vm5 = vcmp.ge.f32.partialorder %v1008_v26, 0.0  ;;  %v1136_v39 = vmul.f32 0.2, %v1008_v26  ;;  %v1038_v42 = vadd.f32 %v2613_v25, %v967_v37  ;;  %v1011_v32 = vadd.f32 %v2613_v25, %v940_v38  ;;  %v972_v43 = vld [vmem:[#allocation2 + $0x1d0] sm:$0xff] }
 0x13b   :  { %vm1104_vm0 = vcmp.ge.f32.partialorder %v1040_v1, 0.0  ;;  %v1168_v44 = vmul.f32 0.2, %v1040_v1  ;;  %vm1070_vm6 = vcmp.ge.f32.partialorder %v1006_v36, 0.0  ;;  %v1134_v49 = vmul.f32 0.2, %v1006_v36 }
 0x13c   :  { %v1200_v54 = vsel %vm1072_vm5, %v1008_v26, %v1136_v39  ;;  %vm1102_vm7 = vcmp.ge.f32.partialorder %v1038_v42, 0.0  ;;  %v1166_v40 = vmul.f32 0.2, %v1038_v42  ;;  %vm1075_vm8 = vcmp.ge.f32.partialorder %v1011_v32, 0.0  ;;  %v938_v41 = vld [vmem:[#allocation2 + $0xc0] sm:$0xff]  ;;  %v941_v61 = vld [vmem:[#allocation2 + $0xd8] sm:$0xff] }
 0x13d   :  { %v970_v53 = vld [vmem:[#allocation2 + $0x1c0] sm:$0xff]  ;;  %v1721_v56 = vpack.c.bf16 %v1200_v54, %v1200_v54  ;;  %v1232_v57 = vsel %vm1104_vm0, %v1040_v1, %v1168_v44  ;;  %v1198_v59 = vsel %vm1070_vm6, %v1006_v36, %v1134_v49  ;;  %v1139_v60 = vmul.f32 0.2, %v1011_v32  ;;  %v973_v10 = vld [vmem:[#allocation2 + $0x1d8] sm:$0xff]  ;;  %v939_v15 = vld [vmem:[#allocation2 + $0xc8] sm:$0xff] }
 0x13e   :  { %v1753_v47 = vpack.c.bf16 %v1232_v57, %v1232_v57  ;;  %v1719_v62 = vpack.c.bf16 %v1198_v59, %v1198_v59  ;;  %v1230_v2 = vsel %vm1102_vm7, %v1038_v42, %v1166_v40  ;;  %v1043_v3 = vadd.f32 %v2613_v25, %v972_v43  ;;  %v971_v20 = vld [vmem:[#allocation2 + $0x1c8] sm:$0xff]  ;;  %v944_v23 = vld [vmem:[#allocation2 + $0xf0] sm:$0xff] }
 0x13f   :  { %1521 = vst.msk [vmem:[%s2718_s3 + $0x5c] sm:$0xf] %vm1497_vm2, %v1721_v56  ;;  %v1751_v6 = vpack.c.bf16 %v1230_v2, %v1230_v2  ;;  %v1203_v8 = vsel %vm1075_vm8, %v1011_v32, %v1139_v60  ;;  %v1009_v0 = vadd.f32 %v2613_v25, %v938_v41  ;;  %v1041_v9 = vadd.f32 %v2613_v25, %v970_v53  ;;  %v976_v35 = vld [vmem:[#allocation2 + $0x1f0] sm:$0xff]  ;;  %v942_v24 = vld [vmem:[#allocation2 + $0xe0] sm:$0xff] }
 0x140   :  { %1553 = vst.msk [vmem:[%s2718_s3 + $0xdc] sm:$0xf] %vm1497_vm2, %v1753_v47  ;;  %1519 = vst.msk [vmem:[%s2718_s3 + $0x54] sm:$0xf] %vm1497_vm2, %v1719_v62  ;;  %v1724_v16 = vpack.c.bf16 %v1203_v8, %v1203_v8  ;;  %vm1107_vm9 = vcmp.ge.f32.partialorder %v1043_v3, 0.0  ;;  %v1012_v12 = vadd.f32 %v2613_v25, %v941_v61  ;;  %v1044_v30 = vadd.f32 %v2613_v25, %v973_v10  ;;  %v974_v34 = vld [vmem:[#allocation2 + $0x1e0] sm:$0xff] }
 0x141   :  { %v1171_v11 = vmul.f32 0.2, %v1043_v3  ;;  %1551 = vst.msk [vmem:[%s2718_s3 + $0xd4] sm:$0xf] %vm1497_vm2, %v1751_v6  ;;  %vm1073_vm10 = vcmp.ge.f32.partialorder %v1009_v0, 0.0  ;;  %vm1105_vm11 = vcmp.ge.f32.partialorder %v1041_v9, 0.0  ;;  %v1010_v58 = vadd.f32 %v2613_v25, %v939_v15 }
 0x142   :  { %v1137_v17 = vmul.f32 0.2, %v1009_v0  ;;  %v1169_v18 = vmul.f32 0.2, %v1041_v9  ;;  %1524 = vst.msk [vmem:[%s2718_s3 + $0x68] sm:$0xf] %vm1497_vm2, %v1724_v16  ;;  %v1042_v5 = vadd.f32 %v2613_v25, %v971_v20  ;;  %v1015_v13 = vadd.f32 %v2613_v25, %v944_v23 }
 0x143   :  { %v1235_v29 = vsel %vm1107_vm9, %v1043_v3, %v1171_v11  ;;  %vm1076_vm12 = vcmp.ge.f32.partialorder %v1012_v12, 0.0  ;;  %v1140_v19 = vmul.f32 0.2, %v1012_v12  ;;  %vm1108_vm13 = vcmp.ge.f32.partialorder %v1044_v30, 0.0  ;;  %v945_v63 = vld [vmem:[#allocation2 + $0xf8] sm:$0xff]  ;;  %v943_v54 = vld [vmem:[#allocation2 + $0xe8] sm:$0xff] }
 0x144   :  { %v1756_v21 = vpack.c.bf16 %v1235_v29, %v1235_v29  ;;  %v1201_v51 = vsel %vm1073_vm10, %v1009_v0, %v1137_v17  ;;  %v1233_v52 = vsel %vm1105_vm11, %v1041_v9, %v1169_v18  ;;  %v1172_v55 = vmul.f32 0.2, %v1044_v30  ;;  %v977_v42 = vld [vmem:[#allocation2 + $0x1f8] sm:$0xff]  ;;  %v975_v40 = vld [vmem:[#allocation2 + $0x1e8] sm:$0xff] }
 0x145   :  { %v1722_v45 = vpack.c.bf16 %v1201_v51, %v1201_v51  ;;  %v1754_v46 = vpack.c.bf16 %v1233_v52, %v1233_v52  ;;  %v1204_v33 = vsel %vm1076_vm12, %v1012_v12, %v1140_v19  ;;  %vm1074_vm14 = vcmp.ge.f32.partialorder %v1010_v58, 0.0 }
 0x146   :  { %1556 = vst.msk [vmem:[%s2718_s3 + $0xe8] sm:$0xf] %vm1497_vm2, %v1756_v21  ;;  %v1725_v50 = vpack.c.bf16 %v1204_v33, %v1204_v33  ;;  %v1138_v4 = vmul.f32 0.2, %v1010_v58  ;;  %v1047_v14 = vadd.f32 %v2613_v25, %v976_v35  ;;  %v1013_v22 = vadd.f32 %v2613_v25, %v942_v24 }
 0x147   :  { %1522 = vst.msk [vmem:[%s2718_s3 + $0x60] sm:$0xf] %vm1497_vm2, %v1722_v45  ;;  %1554 = vst.msk [vmem:[%s2718_s3 + $0xe0] sm:$0xf] %vm1497_vm2, %v1754_v46  ;;  %v1236_v27 = vsel %vm1108_vm13, %v1044_v30, %v1172_v55  ;;  %v1045_v7 = vadd.f32 %v2613_v25, %v974_v34  ;;  %v1016_v26 = vadd.f32 %v2613_v25, %v945_v63  ;;  %vm1106_vm15 = vcmp.ge.f32.partialorder %v1042_v5, 0.0 }
 0x148   :  { %1525 = vst.msk [vmem:[%s2718_s3 + $0x6c] sm:$0xf] %vm1497_vm2, %v1725_v50  ;;  %v1202_v28 = vsel %vm1074_vm14, %v1010_v58, %v1138_v4  ;;  %v1757_v31 = vpack.c.bf16 %v1236_v27, %v1236_v27  ;;  %v1170_v1 = vmul.f32 0.2, %v1042_v5  ;;  %vm1079_vm1 = vcmp.ge.f32.partialorder %v1015_v13, 0.0 }
 0x149   :  { %v1723_v48 = vpack.c.bf16 %v1202_v28, %v1202_v28  ;;  %v1143_v36 = vmul.f32 0.2, %v1015_v13  ;;  %vm1111_vm3 = vcmp.ge.f32.partialorder %v1047_v14, 0.0  ;;  %v1175_v37 = vmul.f32 0.2, %v1047_v14 }
 0x14a   :  { %1557 = vst.msk [vmem:[%s2718_s3 + $0xec] sm:$0xf] %vm1497_vm2, %v1757_v31  ;;  %v1234_v38 = vsel %vm1106_vm15, %v1042_v5, %v1170_v1  ;;  %vm1077_vm4 = vcmp.ge.f32.partialorder %v1013_v22, 0.0  ;;  %v1141_v39 = vmul.f32 0.2, %v1013_v22  ;;  %vm1109_vm5 = vcmp.ge.f32.partialorder %v1045_v7, 0.0 }
 0x14b   :  { %1523 = vst.msk [vmem:[%s2718_s3 + $0x64] sm:$0xf] %vm1497_vm2, %v1723_v48  ;;  %v1755_v32 = vpack.c.bf16 %v1234_v38, %v1234_v38  ;;  %v1207_v43 = vsel %vm1079_vm1, %v1015_v13, %v1143_v36  ;;  %v1239_v44 = vsel %vm1111_vm3, %v1047_v14, %v1175_v37  ;;  %v1173_v49 = vmul.f32 0.2, %v1045_v7 }
 0x14c   :  { %v1728_v41 = vpack.c.bf16 %v1207_v43, %v1207_v43  ;;  %v1760_v53 = vpack.c.bf16 %v1239_v44, %v1239_v44  ;;  %v1205_v56 = vsel %vm1077_vm4, %v1013_v22, %v1141_v39  ;;  %vm1080_vm0 = vcmp.ge.f32.partialorder %v1016_v26, 0.0 }
 0x14d   :  { %1555 = vst.msk [vmem:[%s2718_s3 + $0xe4] sm:$0xf] %vm1497_vm2, %v1755_v32  ;;  %v1726_v57 = vpack.c.bf16 %v1205_v56, %v1205_v56  ;;  %v1237_v59 = vsel %vm1109_vm5, %v1045_v7, %v1173_v49  ;;  %v1144_v60 = vmul.f32 0.2, %v1016_v26  ;;  %v1048_v61 = vadd.f32 %v2613_v25, %v977_v42 }
 0x14e   :  { %1528 = vst.msk [vmem:[%s2718_s3 + $0x78] sm:$0xf] %vm1497_vm2, %v1728_v41  ;;  %1560 = vst.msk [vmem:[%s2718_s3 + $0xf8] sm:$0xf] %vm1497_vm2, %v1760_v53  ;;  %v1758_v47 = vpack.c.bf16 %v1237_v59, %v1237_v59  ;;  %v1014_v62 = vadd.f32 %v2613_v25, %v943_v54  ;;  %v1046_v2 = vadd.f32 %v2613_v25, %v975_v40 }
 0x14f   :  { %1526 = vst.msk [vmem:[%s2718_s3 + $0x70] sm:$0xf] %vm1497_vm2, %v1726_v57  ;;  %v1208_v3 = vsel %vm1080_vm0, %v1016_v26, %v1144_v60  ;;  %vm1112_vm6 = vcmp.ge.f32.partialorder %v1048_v61, 0.0  ;;  %v1176_v6 = vmul.f32 0.2, %v1048_v61 }
 0x150   :  { %1558 = vst.msk [vmem:[%s2718_s3 + $0xf0] sm:$0xf] %vm1497_vm2, %v1758_v47  ;;  %v1729_v8 = vpack.c.bf16 %v1208_v3, %v1208_v3  ;;  %vm1078_vm7 = vcmp.ge.f32.partialorder %v1014_v62, 0.0  ;;  %v1142_v0 = vmul.f32 0.2, %v1014_v62  ;;  %vm1110_vm8 = vcmp.ge.f32.partialorder %v1046_v2, 0.0 }
 0x151   :  { %v1240_v9 = vsel %vm1112_vm6, %v1048_v61, %v1176_v6  ;;  %v1174_v10 = vmul.f32 0.2, %v1046_v2 }
 0x152   :  { %1529 = vst.msk [vmem:[%s2718_s3 + $0x7c] sm:$0xf] %vm1497_vm2, %v1729_v8  ;;  %v1761_v25 = vpack.c.bf16 %v1240_v9, %v1240_v9  ;;  %v1206_v16 = vsel %vm1078_vm7, %v1014_v62, %v1142_v0 }
 0x153   :  { %v1727_v11 = vpack.c.bf16 %v1206_v16, %v1206_v16  ;;  %v1238_v12 = vsel %vm1110_vm8, %v1046_v2, %v1174_v10 }
 0x154   :  { %1561 = vst.msk [vmem:[%s2718_s3 + $0xfc] sm:$0xf] %vm1497_vm2, %v1761_v25  ;;  %v1759_v15 = vpack.c.bf16 %v1238_v12, %v1238_v12 }
 0x155   :  { %1527 = vst.msk [vmem:[%s2718_s3 + $0x74] sm:$0xf] %vm1497_vm2, %v1727_v11 }
 0x156   :  { %1559 = vst.msk [vmem:[%s2718_s3 + $0xf4] sm:$0xf] %vm1497_vm2, %v1759_v15 }

// kernel: a_call__.9
= control target key start
LH: loop header
LB: loop body
LE: loop exit
PB: predicated region body
PF: predicated region fallthrough
CT: control target
= control target key end

     0   :  { %s2544_s1 = inlined_call_operand.vmem [shape: bf16[1024,128], index: 1, kind: input, shape index: {}]   ;;  %s2545_s0 = inlined_call_operand.vmem [shape: bf16[128,1024], index: 0, kind: input, shape index: {}]   ;;  %s2546_s2 = inlined_call_operand.vmem [shape: bf16[128,128], index: 2, kind: output, shape index: {0}]   ;;  %s2547_s3 = inlined_call_operand.vmem [shape: f32[1,8,128], index: 3, kind: output, shape index: {1}]  }
   0x1   :  { %v2001_v0 = vld [vmem:[%s2544_s1 + $0x40] sm:$0xff]   ;;  %v2005_v4 = vld [vmem:[%s2544_s1 + $0x48] sm:$0xff]   ;;  %v2009_v8 = vld [vmem:[%s2544_s1 + $0x50] sm:$0xff]  }
   0x2   :  { %v2002_v1 = vld [vmem:[%s2544_s1 + $0xc0] sm:$0xff]   ;;  %1745 = vmatprep.subr.bf16.mxu0 %v2001_v0  ;;  %v2006_v5 = vld [vmem:[%s2544_s1 + $0xc8] sm:$0xff]   ;;  %v2010_v9 = vld [vmem:[%s2544_s1 + $0xd0] sm:$0xff]  }
   0x3   :  { %v2003_v2 = vld [vmem:[%s2544_s1] sm:$0xff]   ;;  %1809 = vmatprep.subr.bf16.mxu1 %v2002_v1  ;;  %v2007_v6 = vld [vmem:[%s2544_s1 + $0x8] sm:$0xff]   ;;  %v2011_v10 = vld [vmem:[%s2544_s1 + $0x10] sm:$0xff]  }
   0x4   :  { %v2004_v3 = vld [vmem:[%s2544_s1 + $0x80] sm:$0xff]   ;;  %1746 = vmatpush3.bf16.msra.mxu0 %v2003_v2  ;;  %v2008_v7 = vld [vmem:[%s2544_s1 + $0x88] sm:$0xff]   ;;  %v2012_v11 = vld [vmem:[%s2544_s1 + $0x90] sm:$0xff]  }
   0x5   :  { %1810 = vmatpush3.bf16.msra.mxu1 %v2004_v3  ;;  %1747 = vmatprep.subr.bf16.mxu0 %v2005_v4  ;;  %v2013_v12 = vld [vmem:[%s2544_s1 + $0x58] sm:$0xff]   ;;  %v2017_v16 = vld [vmem:[%s2544_s1 + $0x60] sm:$0xff]   ;;  %v2021_v20 = vld [vmem:[%s2544_s1 + $0x68] sm:$0xff]  }
   0x6   :  { %1811 = vmatprep.subr.bf16.mxu1 %v2006_v5  ;;  %v2014_v13 = vld [vmem:[%s2544_s1 + $0xd8] sm:$0xff]   ;;  %v2018_v17 = vld [vmem:[%s2544_s1 + $0xe0] sm:$0xff]   ;;  %v2022_v21 = vld [vmem:[%s2544_s1 + $0xe8] sm:$0xff]  }
   0x7   :  { %v2015_v14 = vld [vmem:[%s2544_s1 + $0x18] sm:$0xff]   ;;  %v2019_v18 = vld [vmem:[%s2544_s1 + $0x20] sm:$0xff]   ;;  %v2023_v22 = vld [vmem:[%s2544_s1 + $0x28] sm:$0xff]  }
   0x8   :  { %1748 = vmatpush3.bf16.msra.mxu0 %v2007_v6  ;;  %v2016_v15 = vld [vmem:[%s2544_s1 + $0x98] sm:$0xff]   ;;  %v2020_v19 = vld [vmem:[%s2544_s1 + $0xa0] sm:$0xff]   ;;  %v2024_v23 = vld [vmem:[%s2544_s1 + $0xa8] sm:$0xff]  }
   0x9   :  { %1812 = vmatpush3.bf16.msra.mxu1 %v2008_v7  ;;  %1749 = vmatprep.subr.bf16.mxu0 %v2009_v8  ;;  %v2025_v24 = vld [vmem:[%s2544_s1 + $0x70] sm:$0xff]   ;;  %v2029_v28 = vld [vmem:[%s2544_s1 + $0x78] sm:$0xff]   ;;  %v50_v32 = vld [vmem:[%s2545_s0] sm:$0xff] }
   0xa   :  { %1813 = vmatprep.subr.bf16.mxu1 %v2010_v9  ;;  %v2026_v25 = vld [vmem:[%s2544_s1 + $0xf0] sm:$0xff]   ;;  %v2030_v29 = vld [vmem:[%s2544_s1 + $0xf8] sm:$0xff]   ;;  %v54_v33 = vld [vmem:[%s2545_s0 + $0x20] sm:$0xff] }
   0xb   :  { %v2027_v26 = vld [vmem:[%s2544_s1 + $0x30] sm:$0xff]   ;;  %v2031_v30 = vld [vmem:[%s2544_s1 + $0x38] sm:$0xff]   ;;  %v51_v34 = vld [vmem:[%s2545_s0 + $0x8] sm:$0xff]  ;;  %v1538_v35 = vcombine.low %v50_v32, %v54_v33  ;;  %v1539_v36 = vcombine.high %v50_v32, %v54_v33 }
   0xc   :  { %1750 = vmatpush3.bf16.msra.mxu0 %v2011_v10  ;;  %v2028_v27 = vld [vmem:[%s2544_s1 + $0xb0] sm:$0xff]   ;;  %v2032_v31 = vld [vmem:[%s2544_s1 + $0xb8] sm:$0xff]   ;;  %v55_v37 = vld [vmem:[%s2545_s0 + $0x28] sm:$0xff] }
   0xd   :  { %1814 = vmatpush3.bf16.msra.mxu1 %v2012_v11  ;;  %1751 = vmatprep.subr.bf16.mxu0 %v2013_v12  ;;  %v1540_v38 = vcombine.low %v51_v34, %v55_v37  ;;  %v1541_v39 = vcombine.high %v51_v34, %v55_v37  ;;  %v2033_v40 = vld [vmem:[%s2544_s1 + $0x140] sm:$0xff]   ;;  %v59_v47 = vld [vmem:[%s2545_s0 + $0x48] sm:$0xff]  ;;  %v2041_v62 = vld [vmem:[%s2544_s1 + $0x150] sm:$0xff]  }
   0xe   :  { %1815 = vmatprep.subr.bf16.mxu1 %v2014_v13  ;;  %978 = vmatprep.mubr.bf16.mxu0 %v1539_v36  ;;  %v2034_v41 = vld [vmem:[%s2544_s1 + $0x100] sm:$0xff]   ;;  %v63_v48 = vld [vmem:[%s2545_s0 + $0x68] sm:$0xff]  ;;  %v2042_v63 = vld [vmem:[%s2544_s1 + $0x110] sm:$0xff]  }
   0xf   :  { %1075 = vmatprep.mubr.bf16.mxu1 %v1541_v39  ;;  %v2035_v42 = vld [vmem:[%s2544_s1 + $0x1c0] sm:$0xff]   ;;  %v1549_v49 = vcombine.high %v59_v47, %v63_v48  ;;  %v2037_v50 = vld [vmem:[%s2544_s1 + $0x148] sm:$0xff]   ;;  %v1548_v53 = vcombine.low %v59_v47, %v63_v48  ;;  %v2043_v0 = vld [vmem:[%s2544_s1 + $0x1d0] sm:$0xff]  }
  0x10   :  { %1752 = vmatpush3.bf16.msra.mxu0 %v2015_v14  ;;  %v2036_v43 = vld [vmem:[%s2544_s1 + $0x180] sm:$0xff]   ;;  %v2038_v52 = vld [vmem:[%s2544_s1 + $0x108] sm:$0xff]   ;;  %v2044_v1 = vld [vmem:[%s2544_s1 + $0x190] sm:$0xff]  }
  0x11   :  { %1816 = vmatpush3.bf16.msra.mxu1 %v2016_v15  ;;  %1753 = vmatprep.subr.bf16.mxu0 %v2017_v16  ;;  %v58_v44 = vld [vmem:[%s2545_s0 + $0x40] sm:$0xff]  ;;  %v2039_v54 = vld [vmem:[%s2544_s1 + $0x1c8] sm:$0xff]   ;;  %v2045_v10 = vld [vmem:[%s2544_s1 + $0x158] sm:$0xff]  }
  0x12   :  { %1817 = vmatprep.subr.bf16.mxu1 %v2018_v17  ;;  %v62_v45 = vld [vmem:[%s2545_s0 + $0x60] sm:$0xff]  ;;  %v2040_v55 = vld [vmem:[%s2544_s1 + $0x188] sm:$0xff]   ;;  %v2046_v11 = vld [vmem:[%s2544_s1 + $0x118] sm:$0xff]  }
  0x13   :  { %v1547_v46 = vcombine.high %v58_v44, %v62_v45  ;;  %v1546_v51 = vcombine.low %v58_v44, %v62_v45  ;;  %v66_v56 = vld [vmem:[%s2545_s0 + $0x80] sm:$0xff]  ;;  %v67_v58 = vld [vmem:[%s2545_s0 + $0x88] sm:$0xff]  ;;  %v2047_v12 = vld [vmem:[%s2544_s1 + $0x1d8] sm:$0xff]  }
  0x14   :  { %1754 = vmatpush3.bf16.msra.mxu0 %v2019_v18  ;;  %v70_v57 = vld [vmem:[%s2545_s0 + $0xa0] sm:$0xff]  ;;  %v71_v59 = vld [vmem:[%s2545_s0 + $0xa8] sm:$0xff]  ;;  %v2048_v13 = vld [vmem:[%s2544_s1 + $0x198] sm:$0xff]  }
  0x15   :  { %1818 = vmatpush3.bf16.msra.mxu1 %v2020_v19  ;;  %1755 = vmatprep.subr.bf16.mxu0 %v2021_v20  ;;  %v1555_v60 = vcombine.high %v66_v56, %v70_v57  ;;  %v1557_v61 = vcombine.high %v67_v58, %v71_v59  ;;  %v1554_v2 = vcombine.low %v66_v56, %v70_v57  ;;  %v74_v3 = vld [vmem:[%s2545_s0 + $0xc0] sm:$0xff]  ;;  %v75_v5 = vld [vmem:[%s2545_s0 + $0xc8] sm:$0xff]  ;;  %v2058_v39 = vld [vmem:[%s2544_s1 + $0x130] sm:$0xff]  }
  0x16   :  { %1819 = vmatprep.subr.bf16.mxu1 %v2022_v21  ;;  %v78_v4 = vld [vmem:[%s2545_s0 + $0xe0] sm:$0xff]  ;;  %v1556_v6 = vcombine.low %v67_v58, %v71_v59  ;;  %v79_v8 = vld [vmem:[%s2545_s0 + $0xe8] sm:$0xff]  ;;  %v2062_v48 = vld [vmem:[%s2544_s1 + $0x138] sm:$0xff]  }
  0x17   :  { %v1563_v7 = vcombine.high %v74_v3, %v78_v4  ;;  %v1565_v9 = vcombine.high %v75_v5, %v79_v8  ;;  %v82_v14 = vld [vmem:[%s2545_s0 + $0x100] sm:$0xff]  ;;  %v83_v16 = vld [vmem:[%s2545_s0 + $0x108] sm:$0xff]  ;;  %v1562_v19 = vcombine.low %v74_v3, %v78_v4  ;;  %v1564_v21 = vcombine.low %v75_v5, %v79_v8  ;;  %v61_v8 = vld [vmem:[%s2545_s0 + $0x58] sm:$0xff] }
  0x18   :  { %1756 = vmatpush3.bf16.msra.mxu0 %v2023_v22  ;;  %v86_v15 = vld [vmem:[%s2545_s0 + $0x120] sm:$0xff]  ;;  %v87_v17 = vld [vmem:[%s2545_s0 + $0x128] sm:$0xff] }
  0x19   :  { %1820 = vmatpush3.bf16.msra.mxu1 %v2024_v23  ;;  %1757 = vmatprep.subr.bf16.mxu0 %v2025_v24  ;;  %v2049_v18 = vld [vmem:[%s2544_s1 + $0x160] sm:$0xff]   ;;  %v1571_v22 = vcombine.high %v82_v14, %v86_v15  ;;  %v1573_v24 = vcombine.high %v83_v16, %v87_v17  ;;  %v2055_v32 = vld [vmem:[%s2544_s1 + $0x1e8] sm:$0xff]   ;;  %v1570_v34 = vcombine.low %v82_v14, %v86_v15  ;;  %v68_v14 = vld [vmem:[%s2545_s0 + $0x90] sm:$0xff] }
  0x1a   :  { %1821 = vmatprep.subr.bf16.mxu1 %v2026_v25  ;;  %v2050_v20 = vld [vmem:[%s2544_s1 + $0x120] sm:$0xff]   ;;  %v2056_v33 = vld [vmem:[%s2544_s1 + $0x1a8] sm:$0xff]   ;;  %v72_v15 = vld [vmem:[%s2545_s0 + $0xb0] sm:$0xff] }
  0x1b   :  { %v2051_v23 = vld [vmem:[%s2544_s1 + $0x1e0] sm:$0xff]   ;;  %v99_v44 = vld [vmem:[%s2545_s0 + $0x188] sm:$0xff] }
  0x1c   :  { %1758 = vmatpush3.bf16.msra.mxu0 %v2027_v26  ;;  %v2052_v25 = vld [vmem:[%s2544_s1 + $0x1a0] sm:$0xff]   ;;  %v103_v45 = vld [vmem:[%s2545_s0 + $0x1a8] sm:$0xff] }
  0x1d   :  { %1822 = vmatpush3.bf16.msra.mxu1 %v2028_v27  ;;  %1759 = vmatprep.subr.bf16.mxu0 %v2029_v28  ;;  %v90_v26 = vld [vmem:[%s2545_s0 + $0x140] sm:$0xff]  ;;  %v2053_v28 = vld [vmem:[%s2544_s1 + $0x168] sm:$0xff]   ;;  %v1588_v59 = vcombine.low %v99_v44, %v103_v45 }
  0x1e   :  { %1823 = vmatprep.subr.bf16.mxu1 %v2030_v29  ;;  %v94_v27 = vld [vmem:[%s2545_s0 + $0x160] sm:$0xff]  ;;  %v91_v29 = vld [vmem:[%s2545_s0 + $0x148] sm:$0xff] }
  0x1f   :  { %v1579_v36 = vcombine.high %v90_v26, %v94_v27  ;;  %v1578_v47 = vcombine.low %v90_v26, %v94_v27  ;;  %v107_v56 = vld [vmem:[%s2545_s0 + $0x1c8] sm:$0xff]  ;;  %v1558_v26 = vcombine.low %v68_v14, %v72_v15 }
  0x20   :  { %1760 = vmatpush3.bf16.msra.mxu0 %v2031_v30  ;;  %v95_v30 = vld [vmem:[%s2545_s0 + $0x168] sm:$0xff] }
  0x21   :  { %1824 = vmatpush3.bf16.msra.mxu1 %v2032_v31  ;;  %1873 = vmatprep.subr.bf16.mxu0 %v2033_v40  ;;  %v2054_v31 = vld [vmem:[%s2544_s1 + $0x128] sm:$0xff]   ;;  %v1581_v37 = vcombine.high %v91_v29, %v95_v30  ;;  %v2059_v40 = vld [vmem:[%s2544_s1 + $0x1f0] sm:$0xff]  }
  0x22   :  { %1937 = vmatprep.subr.bf16.mxu1 %v2035_v42  ;;  %v102_v42 = vld [vmem:[%s2545_s0 + $0x1a0] sm:$0xff]  ;;  %v111_v57 = vld [vmem:[%s2545_s0 + $0x1e8] sm:$0xff] }
  0x23   :  { %979 = vmatmul.mubr.bf16.vlgmr.msra.gmra.mrb[0].mxu0 %v1538_v35  ;;  %v1572_v35 = vcombine.low %v83_v16, %v87_v17  ;;  %v1596_v3 = vcombine.low %v107_v56, %v111_v57  ;;  %v69_v16 = vld [vmem:[%s2545_s0 + $0x98] sm:$0xff] }
  0x24   :  { %1076 = vmatmul.mubr.bf16.vlgmr.msra.gmra.mrb[0].mxu1 %v1540_v38  ;;  %1874 = vmatpush3.bf16.msra.mxu0 %v2034_v41  ;;  %v2057_v38 = vld [vmem:[%s2544_s1 + $0x170] sm:$0xff]   ;;  %v98_v41 = vld [vmem:[%s2545_s0 + $0x180] sm:$0xff]  ;;  %v73_v17 = vld [vmem:[%s2545_s0 + $0xb8] sm:$0xff] }
  0x25   :  { %1938 = vmatpush3.bf16.msra.mxu1 %v2036_v43  ;;  %986 = vmatprep.mubr.bf16.mxu0 %v1547_v46  ;;  %v2060_v43 = vld [vmem:[%s2544_s1 + $0x1b0] sm:$0xff]   ;;  %v2061_v46 = vld [vmem:[%s2544_s1 + $0x178] sm:$0xff]   ;;  %v1586_v58 = vcombine.low %v98_v41, %v102_v42  ;;  %v1560_v27 = vcombine.low %v69_v16, %v73_v17 }
  0x26   :  { %1083 = vmatprep.mubr.bf16.mxu1 %v1549_v49  ;;  %1875 = vmatprep.subr.bf16.mxu0 %v2037_v50  ;;  %v1580_v49 = vcombine.low %v91_v29, %v95_v30  ;;  %v1587_v50 = vcombine.high %v98_v41, %v102_v42  ;;  %v84_v30 = vld [vmem:[%s2545_s0 + $0x110] sm:$0xff]  ;;  %v97_v41 = vld [vmem:[%s2545_s0 + $0x178] sm:$0xff] }
  0x27   :  { %1939 = vmatprep.subr.bf16.mxu1 %v2039_v54  ;;  %v106_v54 = vld [vmem:[%s2545_s0 + $0x1c0] sm:$0xff] }
  0x28   :  { %1876 = vmatpush3.bf16.msra.mxu0 %v2038_v52  ;;  %v1589_v52 = vcombine.high %v99_v44, %v103_v45 }
  0x29   :  { %1940 = vmatpush3.bf16.msra.mxu1 %v2040_v55  ;;  %1877 = vmatprep.subr.bf16.mxu0 %v2041_v62  ;;  %v110_v55 = vld [vmem:[%s2545_s0 + $0x1e0] sm:$0xff]  ;;  %v52_v62 = vld [vmem:[%s2545_s0 + $0x10] sm:$0xff] }
  0x2a   :  { %1941 = vmatprep.subr.bf16.mxu1 %v2043_v0  ;;  %v53_v0 = vld [vmem:[%s2545_s0 + $0x18] sm:$0xff] }
  0x2b   :  { %987 = vmatmul.mubr.bf16.gmra.mrb[4].mxu0 %v1546_v51  ;;  %v2063_v51 = vld [vmem:[%s2544_s1 + $0x1f8] sm:$0xff]  }
  0x2c   :  { %1084 = vmatmul.mubr.bf16.gmra.mrb[4].mxu1 %v1548_v53  ;;  %994 = vmatprep.mubr.bf16.mxu0 %v1555_v60  ;;  %v2064_v53 = vld [vmem:[%s2544_s1 + $0x1b8] sm:$0xff]   ;;  %v1595_v60 = vcombine.high %v106_v54, %v110_v55 }
  0x2d   :  { %1091 = vmatprep.mubr.bf16.mxu1 %v1557_v61  ;;  %1878 = vmatpush3.bf16.msra.mxu0 %v2042_v63  ;;  %v1597_v61 = vcombine.high %v107_v56, %v111_v57  ;;  %v56_v63 = vld [vmem:[%s2545_s0 + $0x30] sm:$0xff]  ;;  %v109_v56 = vld [vmem:[%s2545_s0 + $0x1d8] sm:$0xff] }
  0x2e   :  { %1942 = vmatpush3.bf16.msra.mxu1 %v2044_v1  ;;  %1879 = vmatprep.subr.bf16.mxu0 %v2045_v10  ;;  %v57_v1 = vld [vmem:[%s2545_s0 + $0x38] sm:$0xff]  ;;  %v1543_v4 = vcombine.high %v52_v62, %v56_v63  ;;  %v1542_v10 = vcombine.low %v52_v62, %v56_v63 }
  0x2f   :  { %1943 = vmatprep.subr.bf16.mxu1 %v2047_v12  ;;  %v1545_v5 = vcombine.high %v53_v0, %v57_v1  ;;  %v113_v57 = vld [vmem:[%s2545_s0 + $0x1f8] sm:$0xff] }
  0x30   :  { %v1600_v63 = vcombine.low %v109_v56, %v113_v57 }
  0x31   :  { %1880 = vmatpush3.bf16.msra.mxu0 %v2046_v11  ;;  %v1544_v11 = vcombine.low %v53_v0, %v57_v1 }
  0x32   :  { %1944 = vmatpush3.bf16.msra.mxu1 %v2048_v13  ;;  %1881 = vmatprep.subr.bf16.mxu0 %v2049_v18 }
  0x33   :  { %995 = vmatmul.mubr.bf16.gmra.mrb[8].mxu0 %v1554_v2  ;;  %1945 = vmatprep.subr.bf16.mxu1 %v2051_v23  ;;  %v1594_v2 = vcombine.low %v106_v54, %v110_v55  ;;  %v80_v23 = vld [vmem:[%s2545_s0 + $0xf0] sm:$0xff] }
  0x34   :  { %1092 = vmatmul.mubr.bf16.gmra.mrb[8].mxu1 %v1556_v6  ;;  %1002 = vmatprep.mubr.bf16.mxu0 %v1563_v7  ;;  %v60_v6 = vld [vmem:[%s2545_s0 + $0x50] sm:$0xff] }
  0x35   :  { %1099 = vmatprep.mubr.bf16.mxu1 %v1565_v9  ;;  %1882 = vmatpush3.bf16.msra.mxu0 %v2050_v20  ;;  %v64_v7 = vld [vmem:[%s2545_s0 + $0x70] sm:$0xff]  ;;  %v65_v9 = vld [vmem:[%s2545_s0 + $0x78] sm:$0xff]  ;;  %v1559_v20 = vcombine.high %v68_v14, %v72_v15 }
  0x36   :  { %1946 = vmatpush3.bf16.msra.mxu1 %v2052_v25  ;;  %1883 = vmatprep.subr.bf16.mxu0 %v2053_v28  ;;  %v1551_v12 = vcombine.high %v60_v6, %v64_v7  ;;  %v1553_v13 = vcombine.high %v61_v8, %v65_v9  ;;  %v1550_v18 = vcombine.low %v60_v6, %v64_v7  ;;  %v81_v25 = vld [vmem:[%s2545_s0 + $0xf8] sm:$0xff]  ;;  %v108_v54 = vld [vmem:[%s2545_s0 + $0x1d0] sm:$0xff] }
  0x37   :  { %1947 = vmatprep.subr.bf16.mxu1 %v2055_v32  ;;  %v85_v32 = vld [vmem:[%s2545_s0 + $0x118] sm:$0xff]  ;;  %v112_v55 = vld [vmem:[%s2545_s0 + $0x1f0] sm:$0xff] }
  0x38   :  { %v1598_v62 = vcombine.low %v108_v54, %v112_v55 }
  0x39   :  { %1884 = vmatpush3.bf16.msra.mxu0 %v2054_v31  ;;  %v88_v31 = vld [vmem:[%s2545_s0 + $0x130] sm:$0xff] }
  0x3a   :  { %1948 = vmatpush3.bf16.msra.mxu1 %v2056_v33  ;;  %1885 = vmatprep.subr.bf16.mxu0 %v2057_v38  ;;  %v89_v33 = vld [vmem:[%s2545_s0 + $0x138] sm:$0xff]  ;;  %v92_v38 = vld [vmem:[%s2545_s0 + $0x150] sm:$0xff]  ;;  %v1574_v42 = vcombine.low %v84_v30, %v88_v31 }
  0x3b   :  { %1003 = vmatmul.mubr.bf16.gmra.mrb[12].mxu0 %v1562_v19  ;;  %1949 = vmatprep.subr.bf16.mxu1 %v2059_v40  ;;  %v1552_v19 = vcombine.low %v61_v8, %v65_v9  ;;  %v93_v40 = vld [vmem:[%s2545_s0 + $0x158] sm:$0xff] }
  0x3c   :  { %1100 = vmatmul.mubr.bf16.gmra.mrb[12].mxu1 %v1564_v21  ;;  %1010 = vmatprep.mubr.bf16.mxu0 %v1571_v22  ;;  %v1561_v21 = vcombine.high %v69_v16, %v73_v17  ;;  %v76_v22 = vld [vmem:[%s2545_s0 + $0xd0] sm:$0xff]  ;;  %v1585_v45 = vcombine.high %v93_v40, %v97_v41 }
  0x3d   :  { %1107 = vmatprep.mubr.bf16.mxu1 %v1573_v24  ;;  %1886 = vmatpush3.bf16.msra.mxu0 %v2058_v39  ;;  %v77_v24 = vld [vmem:[%s2545_s0 + $0xd8] sm:$0xff]  ;;  %v1567_v28 = vcombine.high %v76_v22, %v80_v23  ;;  %v96_v39 = vld [vmem:[%s2545_s0 + $0x170] sm:$0xff] }
  0x3e   :  { %1950 = vmatpush3.bf16.msra.mxu1 %v2060_v43  ;;  %1887 = vmatprep.subr.bf16.mxu0 %v2061_v46  ;;  %v1569_v29 = vcombine.high %v77_v24, %v81_v25  ;;  %v1576_v43 = vcombine.low %v85_v32, %v89_v33  ;;  %v1583_v44 = vcombine.high %v92_v38, %v96_v39  ;;  %v100_v46 = vld [vmem:[%s2545_s0 + $0x190] sm:$0xff] }
  0x3f   :  { %1951 = vmatprep.subr.bf16.mxu1 %v2063_v51  ;;  %v1584_v51 = vcombine.low %v93_v40, %v97_v41 }
  0x41   :  { %1888 = vmatpush3.bf16.msra.mxu0 %v2062_v48  ;;  %v101_v48 = vld [vmem:[%s2545_s0 + $0x198] sm:$0xff] }
  0x42   :  { %1952 = vmatpush3.bf16.msra.mxu1 %v2064_v53 }
  0x43   :  { %1011 = vmatmul.mubr.bf16.gmra.mrb[16].mxu0 %v1570_v34  ;;  %v1566_v34 = vcombine.low %v76_v22, %v80_v23 }
  0x44   :  { %1108 = vmatmul.mubr.bf16.gmra.mrb[16].mxu1 %v1572_v35  ;;  %1018 = vmatprep.mubr.bf16.mxu0 %v1579_v36  ;;  %v1568_v35 = vcombine.low %v77_v24, %v81_v25  ;;  %v1575_v36 = vcombine.high %v84_v30, %v88_v31 }
  0x45   :  { %1115 = vmatprep.mubr.bf16.mxu1 %v1581_v37  ;;  %v1577_v37 = vcombine.high %v85_v32, %v89_v33 }
  0x4b   :  { %1019 = vmatmul.mubr.bf16.gmra.mrb[20].mxu0 %v1578_v47  ;;  %v104_v47 = vld [vmem:[%s2545_s0 + $0x1b0] sm:$0xff] }
  0x4c   :  { %1116 = vmatmul.mubr.bf16.gmra.mrb[20].mxu1 %v1580_v49  ;;  %1026 = vmatprep.mubr.bf16.mxu0 %v1587_v50  ;;  %v105_v49 = vld [vmem:[%s2545_s0 + $0x1b8] sm:$0xff]  ;;  %v1582_v50 = vcombine.low %v92_v38, %v96_v39 }
  0x4d   :  { %1123 = vmatprep.mubr.bf16.mxu1 %v1589_v52  ;;  %v1591_v52 = vcombine.high %v100_v46, %v104_v47  ;;  %v1593_v53 = vcombine.high %v101_v48, %v105_v49 }
  0x53   :  { %1027 = vmatmul.mubr.bf16.gmra.mrb[24].mxu0 %v1586_v58  ;;  %v1590_v58 = vcombine.low %v100_v46, %v104_v47 }
  0x54   :  { %1124 = vmatmul.mubr.bf16.gmra.mrb[24].mxu1 %v1588_v59  ;;  %1034 = vmatprep.mubr.bf16.mxu0 %v1595_v60  ;;  %v1592_v59 = vcombine.low %v101_v48, %v105_v49  ;;  %v1599_v60 = vcombine.high %v108_v54, %v112_v55 }
  0x55   :  { %1131 = vmatprep.mubr.bf16.mxu1 %v1597_v61  ;;  %v1601_v61 = vcombine.high %v109_v56, %v113_v57 }
  0x5b   :  { %1035 = vmatmul.mubr.bf16.gmra.mrb[28].mxu0 %v1594_v2 }
  0x5c   :  { %1132 = vmatmul.mubr.bf16.gmra.mrb[28].mxu1 %v1596_v3  ;;  %1172 = vmatprep.mubr.bf16.mxu0 %v1543_v4 }
  0x5d   :  { %1269 = vmatprep.mubr.bf16.mxu1 %v1545_v5 }
  0x63   :  { %1173 = vmatmul.mubr.bf16.vlgmr.msra.gmra.mrb[32].mxu0 %v1542_v10 }
  0x64   :  { %1270 = vmatmul.mubr.bf16.vlgmr.msra.gmra.mrb[32].mxu1 %v1544_v11  ;;  %1180 = vmatprep.mubr.bf16.mxu0 %v1551_v12 }
  0x65   :  { %1277 = vmatprep.mubr.bf16.mxu1 %v1553_v13 }
  0x6b   :  { %1181 = vmatmul.mubr.bf16.gmra.mrb[36].mxu0 %v1550_v18 }
  0x6c   :  { %1278 = vmatmul.mubr.bf16.gmra.mrb[36].mxu1 %v1552_v19  ;;  %1188 = vmatprep.mubr.bf16.mxu0 %v1559_v20 }
  0x6d   :  { %1285 = vmatprep.mubr.bf16.mxu1 %v1561_v21 }
  0x73   :  { %1189 = vmatmul.mubr.bf16.gmra.mrb[40].mxu0 %v1558_v26 }
  0x74   :  { %1286 = vmatmul.mubr.bf16.gmra.mrb[40].mxu1 %v1560_v27  ;;  %1196 = vmatprep.mubr.bf16.mxu0 %v1567_v28 }
  0x75   :  { %1293 = vmatprep.mubr.bf16.mxu1 %v1569_v29 }
  0x7b   :  { %1197 = vmatmul.mubr.bf16.gmra.mrb[44].mxu0 %v1566_v34 }
  0x7c   :  { %1294 = vmatmul.mubr.bf16.gmra.mrb[44].mxu1 %v1568_v35  ;;  %1204 = vmatprep.mubr.bf16.mxu0 %v1575_v36 }
  0x7d   :  { %1301 = vmatprep.mubr.bf16.mxu1 %v1577_v37 }
  0x83   :  { %1205 = vmatmul.mubr.bf16.gmra.mrb[48].mxu0 %v1574_v42 }
  0x84   :  { %1302 = vmatmul.mubr.bf16.gmra.mrb[48].mxu1 %v1576_v43  ;;  %1212 = vmatprep.mubr.bf16.mxu0 %v1583_v44 }
  0x85   :  { %1309 = vmatprep.mubr.bf16.mxu1 %v1585_v45 }
  0x8b   :  { %1213 = vmatmul.mubr.bf16.gmra.mrb[52].mxu0 %v1582_v50 }
  0x8c   :  { %1310 = vmatmul.mubr.bf16.gmra.mrb[52].mxu1 %v1584_v51  ;;  %1220 = vmatprep.mubr.bf16.mxu0 %v1591_v52 }
  0x8d   :  { %1317 = vmatprep.mubr.bf16.mxu1 %v1593_v53 }
  0x93   :  { %1221 = vmatmul.mubr.bf16.gmra.mrb[56].mxu0 %v1590_v58 }
  0x94   :  { %1318 = vmatmul.mubr.bf16.gmra.mrb[56].mxu1 %v1592_v59  ;;  %1228 = vmatprep.mubr.bf16.mxu0 %v1599_v60 }
  0x95   :  { %1325 = vmatprep.mubr.bf16.mxu1 %v1601_v61 }
  0x9b   :  { %1229 = vmatmul.mubr.bf16.gmra.mrb[60].mxu0 %v1598_v62 }
  0x9c   :  { %1326 = vmatmul.mubr.bf16.gmra.mrb[60].mxu1 %v1600_v63 }
  0xf6   :  { %v1761_v0 = vpop.f32.mrb[0].mxu0 }
  0xf7   :  { %v1825_v1 = vpop.f32.mrb[0].mxu1  ;;  %v1762_v2 = vpop.f32.mrb[1].mxu0 }
  0xf8   :  { %v1763_v3 = vadd.f32 %v1762_v2, %v1761_v0  ;;  %v1826_v4 = vpop.f32.mrb[1].mxu1  ;;  %v1764_v5 = vpop.f32.mrb[2].mxu0 }
  0xf9   :  { %v1827_v6 = vadd.f32 %v1826_v4, %v1825_v1  ;;  %v1828_v7 = vpop.f32.mrb[2].mxu1  ;;  %v1765_v8 = vpop.f32.mrb[3].mxu0 }
  0xfa   :  { %v1766_v9 = vadd.f32 %v1765_v8, %v1764_v5  ;;  %v1829_v10 = vpop.f32.mrb[3].mxu1 }
  0xfb   :  { %v2469_v11 = vadd.f32 %v1827_v6, %v1763_v3  ;;  %v1830_v12 = vadd.f32 %v1829_v10, %v1828_v7 }
  0xfd   :  { %v2471_v13 = vadd.f32 %v1830_v12, %v1766_v9 }
  0xfe   :  { %v1767_v14 = vpop.f32.mrb[4].mxu0 }
  0xff   :  { %v1831_v15 = vpop.f32.mrb[4].mxu1  ;;  %v1768_v16 = vpop.f32.mrb[5].mxu0 }
 0x100   :  { %v1769_v17 = vadd.f32 %v1768_v16, %v1767_v14  ;;  %v1832_v18 = vpop.f32.mrb[5].mxu1  ;;  %v1770_v19 = vpop.f32.mrb[6].mxu0 }
 0x101   :  { %v1833_v20 = vadd.f32 %v1832_v18, %v1831_v15  ;;  %v1834_v21 = vpop.f32.mrb[6].mxu1  ;;  %v1771_v22 = vpop.f32.mrb[7].mxu0 }
 0x102   :  { %v1772_v23 = vadd.f32 %v1771_v22, %v1770_v19  ;;  %v1835_v24 = vpop.f32.mrb[7].mxu1 }
 0x103   :  { %v2473_v25 = vadd.f32 %v1833_v20, %v1769_v17  ;;  %v1836_v26 = vadd.f32 %v1835_v24, %v1834_v21 }
 0x105   :  { %v2475_v27 = vadd.f32 %v1836_v26, %v1772_v23 }
 0x106   :  { %v1773_v28 = vpop.f32.mrb[8].mxu0 }
 0x107   :  { %v1837_v29 = vpop.f32.mrb[8].mxu1  ;;  %v1774_v30 = vpop.f32.mrb[9].mxu0 }
 0x108   :  { %v1775_v31 = vadd.f32 %v1774_v30, %v1773_v28  ;;  %v1838_v32 = vpop.f32.mrb[9].mxu1  ;;  %v1776_v33 = vpop.f32.mrb[10].mxu0 }
 0x109   :  { %v1839_v34 = vadd.f32 %v1838_v32, %v1837_v29  ;;  %v1840_v35 = vpop.f32.mrb[10].mxu1  ;;  %v1777_v36 = vpop.f32.mrb[11].mxu0 }
 0x10a   :  { %v1778_v37 = vadd.f32 %v1777_v36, %v1776_v33  ;;  %v1841_v38 = vpop.f32.mrb[11].mxu1 }
 0x10b   :  { %v2477_v39 = vadd.f32 %v1839_v34, %v1775_v31  ;;  %v1842_v40 = vadd.f32 %v1841_v38, %v1840_v35 }
 0x10d   :  { %v2479_v41 = vadd.f32 %v1842_v40, %v1778_v37 }
 0x10e   :  { %v1779_v42 = vpop.f32.mrb[12].mxu0 }
 0x10f   :  { %v1843_v43 = vpop.f32.mrb[12].mxu1  ;;  %v1780_v44 = vpop.f32.mrb[13].mxu0 }
 0x110   :  { %v1781_v45 = vadd.f32 %v1780_v44, %v1779_v42  ;;  %v1844_v46 = vpop.f32.mrb[13].mxu1  ;;  %v1782_v47 = vpop.f32.mrb[14].mxu0 }
 0x111   :  { %v1845_v48 = vadd.f32 %v1844_v46, %v1843_v43  ;;  %v1846_v49 = vpop.f32.mrb[14].mxu1  ;;  %v1783_v50 = vpop.f32.mrb[15].mxu0 }
 0x112   :  { %v1784_v51 = vadd.f32 %v1783_v50, %v1782_v47  ;;  %v1847_v52 = vpop.f32.mrb[15].mxu1 }
 0x113   :  { %v2481_v53 = vadd.f32 %v1845_v48, %v1781_v45  ;;  %v1848_v54 = vadd.f32 %v1847_v52, %v1846_v49 }
 0x115   :  { %v2483_v55 = vadd.f32 %v1848_v54, %v1784_v51 }
 0x116   :  { %v1785_v56 = vpop.f32.mrb[16].mxu0 }
 0x117   :  { %v1849_v57 = vpop.f32.mrb[16].mxu1  ;;  %v1786_v58 = vpop.f32.mrb[17].mxu0 }
 0x118   :  { %v1787_v59 = vadd.f32 %v1786_v58, %v1785_v56  ;;  %v1850_v60 = vpop.f32.mrb[17].mxu1  ;;  %v1788_v61 = vpop.f32.mrb[18].mxu0 }
 0x119   :  { %v1851_v62 = vadd.f32 %v1850_v60, %v1849_v57  ;;  %v1852_v63 = vpop.f32.mrb[18].mxu1  ;;  %v1789_v0 = vpop.f32.mrb[19].mxu0 }
 0x11a   :  { %v1790_v1 = vadd.f32 %v1789_v0, %v1788_v61  ;;  %v1853_v2 = vpop.f32.mrb[19].mxu1 }
 0x11b   :  { %v2485_v3 = vadd.f32 %v1851_v62, %v1787_v59  ;;  %v1854_v4 = vadd.f32 %v1853_v2, %v1852_v63 }
 0x11d   :  { %v2487_v5 = vadd.f32 %v1854_v4, %v1790_v1 }
 0x11e   :  { %v1791_v6 = vpop.f32.mrb[20].mxu0 }
 0x11f   :  { %v1855_v7 = vpop.f32.mrb[20].mxu1  ;;  %v1792_v8 = vpop.f32.mrb[21].mxu0 }
 0x120   :  { %v1793_v9 = vadd.f32 %v1792_v8, %v1791_v6  ;;  %v1856_v10 = vpop.f32.mrb[21].mxu1  ;;  %v1794_v12 = vpop.f32.mrb[22].mxu0 }
 0x121   :  { %v1857_v14 = vadd.f32 %v1856_v10, %v1855_v7  ;;  %v1858_v15 = vpop.f32.mrb[22].mxu1  ;;  %v1795_v16 = vpop.f32.mrb[23].mxu0 }
 0x122   :  { %v1796_v17 = vadd.f32 %v1795_v16, %v1794_v12  ;;  %v1859_v18 = vpop.f32.mrb[23].mxu1 }
 0x123   :  { %v2489_v19 = vadd.f32 %v1857_v14, %v1793_v9  ;;  %v1860_v20 = vadd.f32 %v1859_v18, %v1858_v15 }
 0x125   :  { %v2491_v21 = vadd.f32 %v1860_v20, %v1796_v17 }
 0x126   :  { %v1797_v22 = vpop.f32.mrb[24].mxu0 }
 0x127   :  { %v1861_v23 = vpop.f32.mrb[24].mxu1  ;;  %v1798_v24 = vpop.f32.mrb[25].mxu0 }
 0x128   :  { %v1799_v26 = vadd.f32 %v1798_v24, %v1797_v22  ;;  %v1862_v28 = vpop.f32.mrb[25].mxu1  ;;  %v1800_v29 = vpop.f32.mrb[26].mxu0 }
 0x129   :  { %v1863_v30 = vadd.f32 %v1862_v28, %v1861_v23  ;;  %v1864_v31 = vpop.f32.mrb[26].mxu1  ;;  %v1801_v32 = vpop.f32.mrb[27].mxu0 }
 0x12a   :  { %v1802_v33 = vadd.f32 %v1801_v32, %v1800_v29  ;;  %v1865_v34 = vpop.f32.mrb[27].mxu1 }
 0x12b   :  { %v2493_v35 = vadd.f32 %v1863_v30, %v1799_v26  ;;  %v1866_v36 = vadd.f32 %v1865_v34, %v1864_v31 }
 0x12d   :  { %v2495_v37 = vadd.f32 %v1866_v36, %v1802_v33 }
 0x12e   :  { %v1803_v38 = vpop.f32.mrb[28].mxu0 }
 0x12f   :  { %v1867_v40 = vpop.f32.mrb[28].mxu1  ;;  %v1804_v42 = vpop.f32.mrb[29].mxu0 }
 0x130   :  { %v1805_v43 = vadd.f32 %v1804_v42, %v1803_v38  ;;  %v1868_v44 = vpop.f32.mrb[29].mxu1  ;;  %v1806_v45 = vpop.f32.mrb[30].mxu0 }
 0x131   :  { %v1869_v46 = vadd.f32 %v1868_v44, %v1867_v40  ;;  %v1870_v47 = vpop.f32.mrb[30].mxu1  ;;  %v1807_v48 = vpop.f32.mrb[31].mxu0 }
 0x132   :  { %v1808_v49 = vadd.f32 %v1807_v48, %v1806_v45  ;;  %v1871_v50 = vpop.f32.mrb[31].mxu1 }
 0x133   :  { %v2497_v51 = vadd.f32 %v1869_v46, %v1805_v43  ;;  %v1872_v52 = vadd.f32 %v1871_v50, %v1870_v47 }
 0x135   :  { %v2499_v54 = vadd.f32 %v1872_v52, %v1808_v49 }
 0x136   :  { %v1889_v56 = vpop.f32.mrb[32].mxu0 }
 0x137   :  { %v1953_v57 = vpop.f32.mrb[32].mxu1  ;;  %v1890_v58 = vpop.f32.mrb[33].mxu0 }
 0x138   :  { %v1891_v59 = vadd.f32 %v1890_v58, %v1889_v56  ;;  %v1954_v60 = vpop.f32.mrb[33].mxu1  ;;  %v1892_v61 = vpop.f32.mrb[34].mxu0 }
 0x139   :  { %v1955_v62 = vadd.f32 %v1954_v60, %v1953_v57  ;;  %v1956_v63 = vpop.f32.mrb[34].mxu1  ;;  %v1893_v0 = vpop.f32.mrb[35].mxu0 }
 0x13a   :  { %v1175_v1 = vadd.f32 %v1891_v59, %v2469_v11  ;;  %v1894_v2 = vadd.f32 %v1893_v0, %v1892_v61  ;;  %v1957_v4 = vpop.f32.mrb[35].mxu1 }
 0x13b   :  { %v1958_v6 = vadd.f32 %v1957_v4, %v1956_v63 }
 0x13c   :  { %v1272_v7 = vadd.f32 %v1955_v62, %v1175_v1  ;;  %v1178_v8 = vadd.f32 %v1894_v2, %v2471_v13 }
 0x13e   :  { %v1275_v9 = vadd.f32 %v1958_v6, %v1178_v8  ;;  %v1895_v10 = vpop.f32.mrb[36].mxu0  ;;  %v1486_v12 = vmul.f32 %v1272_v7, %v1272_v7 }
 0x13f   :  { %v1959_v14 = vpop.f32.mrb[36].mxu1  ;;  %v1896_v15 = vpop.f32.mrb[37].mxu0 }
 0x140   :  { %v1701_v16 = vpack.c.bf16 %v1275_v9, %v1272_v7  ;;  %v1465_v17 = vadd.f32 %v1275_v9, %v1272_v7  ;;  %v1487_v18 = vmul.f32 %v1275_v9, %v1275_v9  ;;  %v1897_v20 = vadd.f32 %v1896_v15, %v1895_v10  ;;  %v1960_v22 = vpop.f32.mrb[37].mxu1  ;;  %v1898_v23 = vpop.f32.mrb[38].mxu0 }
 0x141   :  { %v1961_v24 = vadd.f32 %v1960_v22, %v1959_v14  ;;  %v1962_v26 = vpop.f32.mrb[38].mxu1  ;;  %v1899_v11 = vpop.f32.mrb[39].mxu0 }
 0x142   :  { %1702 = vst [vmem:[%s2546_s2] sm:$0xff] %v1701_v16   ;;  %v1502_v28 = vadd.f32 %v1487_v18, %v1486_v12  ;;  %v1183_v13 = vadd.f32 %v1897_v20, %v2473_v25  ;;  %v1900_v29 = vadd.f32 %v1899_v11, %v1898_v23  ;;  %v1963_v30 = vpop.f32.mrb[39].mxu1 }
 0x143   :  { %v1964_v31 = vadd.f32 %v1963_v30, %v1962_v26 }
 0x144   :  { %v1280_v32 = vadd.f32 %v1961_v24, %v1183_v13  ;;  %v1186_v33 = vadd.f32 %v1900_v29, %v2475_v27 }
 0x146   :  { %v1466_v34 = vadd.f32 %v1465_v17, %v1280_v32  ;;  %v1488_v36 = vmul.f32 %v1280_v32, %v1280_v32  ;;  %v1283_v38 = vadd.f32 %v1964_v31, %v1186_v33  ;;  %v1901_v40 = vpop.f32.mrb[40].mxu0 }
 0x147   :  { %v1965_v42 = vpop.f32.mrb[40].mxu1  ;;  %v1902_v43 = vpop.f32.mrb[41].mxu0 }
 0x148   :  { %v1503_v44 = vadd.f32 %v1502_v28, %v1488_v36  ;;  %v1706_v45 = vpack.c.bf16 %v1283_v38, %v1280_v32  ;;  %v1467_v46 = vadd.f32 %v1466_v34, %v1283_v38  ;;  %v1489_v47 = vmul.f32 %v1283_v38, %v1283_v38  ;;  %v1966_v48 = vpop.f32.mrb[41].mxu1  ;;  %v1904_v49 = vpop.f32.mrb[42].mxu0 }
 0x149   :  { %v1903_v50 = vadd.f32 %v1902_v43, %v1901_v40  ;;  %v1967_v25 = vadd.f32 %v1966_v48, %v1965_v42  ;;  %v1968_v52 = vpop.f32.mrb[42].mxu1  ;;  %v1905_v56 = vpop.f32.mrb[43].mxu0 }
 0x14a   :  { %1738 = vst [vmem:[%s2546_s2 + $0x8] sm:$0xff] %v1706_v45   ;;  %v1504_v27 = vadd.f32 %v1503_v44, %v1489_v47  ;;  %v1906_v57 = vadd.f32 %v1905_v56, %v1904_v49  ;;  %v1969_v58 = vpop.f32.mrb[43].mxu1 }
 0x14b   :  { %v1191_v59 = vadd.f32 %v1903_v50, %v2477_v39  ;;  %v1970_v60 = vadd.f32 %v1969_v58, %v1968_v52 }
 0x14c   :  { %v1194_v61 = vadd.f32 %v1906_v57, %v2479_v41 }
 0x14d   :  { %v1288_v62 = vadd.f32 %v1967_v25, %v1191_v59 }
 0x14e   :  { %v1291_v63 = vadd.f32 %v1970_v60, %v1194_v61  ;;  %v1907_v0 = vpop.f32.mrb[44].mxu0 }
 0x14f   :  { %v1468_v1 = vadd.f32 %v1467_v46, %v1288_v62  ;;  %v1490_v2 = vmul.f32 %v1288_v62, %v1288_v62  ;;  %v1971_v4 = vpop.f32.mrb[44].mxu1  ;;  %v1908_v6 = vpop.f32.mrb[45].mxu0 }
 0x150   :  { %v1711_v7 = vpack.c.bf16 %v1291_v63, %v1288_v62  ;;  %v1491_v8 = vmul.f32 %v1291_v63, %v1291_v63  ;;  %v1909_v9 = vadd.f32 %v1908_v6, %v1907_v0  ;;  %v1972_v10 = vpop.f32.mrb[45].mxu1  ;;  %v1910_v12 = vpop.f32.mrb[46].mxu0 }
 0x151   :  { %v1505_v14 = vadd.f32 %v1504_v27, %v1490_v2  ;;  %v1469_v15 = vadd.f32 %v1468_v1, %v1291_v63  ;;  %v1973_v16 = vadd.f32 %v1972_v10, %v1971_v4  ;;  %v1974_v17 = vpop.f32.mrb[46].mxu1  ;;  %v1911_v39 = vpop.f32.mrb[47].mxu0 }
 0x152   :  { %1739 = vst [vmem:[%s2546_s2 + $0x10] sm:$0xff] %v1711_v7   ;;  %v1199_v41 = vadd.f32 %v1909_v9, %v2481_v53  ;;  %v1912_v18 = vadd.f32 %v1911_v39, %v1910_v12  ;;  %v1975_v20 = vpop.f32.mrb[47].mxu1 }
 0x153   :  { %v1506_v22 = vadd.f32 %v1505_v14, %v1491_v8  ;;  %v1976_v23 = vadd.f32 %v1975_v20, %v1974_v17 }
 0x154   :  { %v1296_v24 = vadd.f32 %v1973_v16, %v1199_v41  ;;  %v1202_v26 = vadd.f32 %v1912_v18, %v2483_v55 }
 0x156   :  { %v1470_v11 = vadd.f32 %v1469_v15, %v1296_v24  ;;  %v1492_v28 = vmul.f32 %v1296_v24, %v1296_v24  ;;  %v1299_v13 = vadd.f32 %v1976_v23, %v1202_v26  ;;  %v1913_v29 = vpop.f32.mrb[48].mxu0 }
 0x157   :  { %v1977_v30 = vpop.f32.mrb[48].mxu1  ;;  %v1914_v31 = vpop.f32.mrb[49].mxu0 }
 0x158   :  { %v1507_v32 = vadd.f32 %v1506_v22, %v1492_v28  ;;  %v1716_v33 = vpack.c.bf16 %v1299_v13, %v1296_v24  ;;  %v1471_v34 = vadd.f32 %v1470_v11, %v1299_v13  ;;  %v1493_v36 = vmul.f32 %v1299_v13, %v1299_v13  ;;  %v1978_v38 = vpop.f32.mrb[49].mxu1  ;;  %v1916_v40 = vpop.f32.mrb[50].mxu0 }
 0x159   :  { %v1915_v53 = vadd.f32 %v1914_v31, %v1913_v29  ;;  %v1979_v42 = vadd.f32 %v1978_v38, %v1977_v30  ;;  %v1980_v43 = vpop.f32.mrb[50].mxu1  ;;  %v1917_v44 = vpop.f32.mrb[51].mxu0 }
 0x15a   :  { %1740 = vst [vmem:[%s2546_s2 + $0x18] sm:$0xff] %v1716_v33   ;;  %v1508_v55 = vadd.f32 %v1507_v32, %v1493_v36  ;;  %v1918_v45 = vadd.f32 %v1917_v44, %v1916_v40  ;;  %v1981_v46 = vpop.f32.mrb[51].mxu1 }
 0x15b   :  { %v1207_v47 = vadd.f32 %v1915_v53, %v2485_v3  ;;  %v1982_v48 = vadd.f32 %v1981_v46, %v1980_v43 }
 0x15c   :  { %v1210_v49 = vadd.f32 %v1918_v45, %v2487_v5 }
 0x15d   :  { %v1304_v50 = vadd.f32 %v1979_v42, %v1207_v47 }
 0x15e   :  { %v1307_v25 = vadd.f32 %v1982_v48, %v1210_v49  ;;  %v1919_v52 = vpop.f32.mrb[52].mxu0 }
 0x15f   :  { %v1472_v56 = vadd.f32 %v1471_v34, %v1304_v50  ;;  %v1494_v27 = vmul.f32 %v1304_v50, %v1304_v50  ;;  %v1983_v57 = vpop.f32.mrb[52].mxu1  ;;  %v1920_v58 = vpop.f32.mrb[53].mxu0 }
 0x160   :  { %v1721_v59 = vpack.c.bf16 %v1307_v25, %v1304_v50  ;;  %v1495_v60 = vmul.f32 %v1307_v25, %v1307_v25  ;;  %v1921_v61 = vadd.f32 %v1920_v58, %v1919_v52  ;;  %v1984_v62 = vpop.f32.mrb[53].mxu1  ;;  %v1922_v63 = vpop.f32.mrb[54].mxu0 }
 0x161   :  { %v1509_v0 = vadd.f32 %v1508_v55, %v1494_v27  ;;  %v1473_v1 = vadd.f32 %v1472_v56, %v1307_v25  ;;  %v1985_v2 = vadd.f32 %v1984_v62, %v1983_v57  ;;  %v1986_v4 = vpop.f32.mrb[54].mxu1  ;;  %v1923_v3 = vpop.f32.mrb[55].mxu0 }
 0x162   :  { %1741 = vst [vmem:[%s2546_s2 + $0x20] sm:$0xff] %v1721_v59   ;;  %v1215_v5 = vadd.f32 %v1921_v61, %v2489_v19  ;;  %v1924_v6 = vadd.f32 %v1923_v3, %v1922_v63  ;;  %v1987_v7 = vpop.f32.mrb[55].mxu1 }
 0x163   :  { %v1510_v8 = vadd.f32 %v1509_v0, %v1495_v60  ;;  %v1988_v9 = vadd.f32 %v1987_v7, %v1986_v4 }
 0x164   :  { %v1312_v10 = vadd.f32 %v1985_v2, %v1215_v5  ;;  %v1218_v12 = vadd.f32 %v1924_v6, %v2491_v21  ;;  %v1523_v6 = vlaneseq }
 0x166   :  { %v1474_v14 = vadd.f32 %v1473_v1, %v1312_v10  ;;  %v1496_v15 = vmul.f32 %v1312_v10, %v1312_v10  ;;  %v1315_v16 = vadd.f32 %v1988_v9, %v1218_v12  ;;  %v1925_v17 = vpop.f32.mrb[56].mxu0 }
 0x167   :  { %v1989_v39 = vpop.f32.mrb[56].mxu1  ;;  %v1926_v41 = vpop.f32.mrb[57].mxu0 }
 0x168   :  { %v1511_v18 = vadd.f32 %v1510_v8, %v1496_v15  ;;  %v1726_v20 = vpack.c.bf16 %v1315_v16, %v1312_v10  ;;  %v1475_v22 = vadd.f32 %v1474_v14, %v1315_v16  ;;  %v1497_v23 = vmul.f32 %v1315_v16, %v1315_v16  ;;  %v1990_v24 = vpop.f32.mrb[57].mxu1  ;;  %v1928_v26 = vpop.f32.mrb[58].mxu0 }
 0x169   :  { %v1927_v19 = vadd.f32 %v1926_v41, %v1925_v17  ;;  %v1991_v11 = vadd.f32 %v1990_v24, %v1989_v39  ;;  %v1992_v28 = vpop.f32.mrb[58].mxu1  ;;  %v1929_v13 = vpop.f32.mrb[59].mxu0  ;;  %v1524_v10 = vshrl.u32 %v1523_v6, 7 }
 0x16a   :  { %1742 = vst [vmem:[%s2546_s2 + $0x28] sm:$0xff] %v1726_v20   ;;  %v1512_v21 = vadd.f32 %v1511_v18, %v1497_v23  ;;  %v1930_v29 = vadd.f32 %v1929_v13, %v1928_v26  ;;  %v1993_v30 = vpop.f32.mrb[59].mxu1 }
 0x16b   :  { %v1223_v31 = vadd.f32 %v1927_v19, %v2493_v35  ;;  %v1994_v32 = vadd.f32 %v1993_v30, %v1992_v28  ;;  %vm1526_vm0 = vcmp.eq.s32.totalorder %v1524_v10, 1  ;;  %vm1525_vm1 = vcmp.eq.s32.totalorder %v1524_v10, 0 }
 0x16c   :  { %v1226_v33 = vadd.f32 %v1930_v29, %v2495_v37 }
 0x16d   :  { %v1320_v34 = vadd.f32 %v1991_v11, %v1223_v31 }
 0x16e   :  { %v1323_v36 = vadd.f32 %v1994_v32, %v1226_v33  ;;  %v1931_v38 = vpop.f32.mrb[60].mxu0 }
 0x16f   :  { %v1476_v40 = vadd.f32 %v1475_v22, %v1320_v34  ;;  %v1498_v53 = vmul.f32 %v1320_v34, %v1320_v34  ;;  %v1995_v42 = vpop.f32.mrb[60].mxu1  ;;  %v1932_v43 = vpop.f32.mrb[61].mxu0 }
 0x170   :  { %v1731_v44 = vpack.c.bf16 %v1323_v36, %v1320_v34  ;;  %v1499_v55 = vmul.f32 %v1323_v36, %v1323_v36  ;;  %v1933_v45 = vadd.f32 %v1932_v43, %v1931_v38  ;;  %v1996_v46 = vpop.f32.mrb[61].mxu1  ;;  %v1934_v47 = vpop.f32.mrb[62].mxu0 }
 0x171   :  { %v1513_v48 = vadd.f32 %v1512_v21, %v1498_v53  ;;  %v1477_v49 = vadd.f32 %v1476_v40, %v1323_v36  ;;  %v1997_v50 = vadd.f32 %v1996_v46, %v1995_v42  ;;  %v1998_v25 = vpop.f32.mrb[62].mxu1  ;;  %v1935_v35 = vpop.f32.mrb[63].mxu0 }
 0x172   :  { %1743 = vst [vmem:[%s2546_s2 + $0x30] sm:$0xff] %v1731_v44   ;;  %v1231_v37 = vadd.f32 %v1933_v45, %v2497_v51  ;;  %v1936_v52 = vadd.f32 %v1935_v35, %v1934_v47  ;;  %v1999_v56 = vpop.f32.mrb[63].mxu1 }
 0x173   :  { %v1514_v27 = vadd.f32 %v1513_v48, %v1499_v55  ;;  %v2000_v57 = vadd.f32 %v1999_v56, %v1998_v25 }
 0x174   :  { %v1328_v58 = vadd.f32 %v1997_v50, %v1231_v37  ;;  %v1234_v59 = vadd.f32 %v1936_v52, %v2499_v54 }
 0x176   :  { %v1478_v60 = vadd.f32 %v1477_v49, %v1328_v58  ;;  %v1500_v61 = vmul.f32 %v1328_v58, %v1328_v58  ;;  %v1331_v62 = vadd.f32 %v2000_v57, %v1234_v59 }
 0x178   :  { %v1515_v63 = vadd.f32 %v1514_v27, %v1500_v61  ;;  %v1736_v0 = vpack.c.bf16 %v1331_v62, %v1328_v58  ;;  %v1479_v1 = vadd.f32 %v1478_v60, %v1331_v62  ;;  %v1501_v2 = vmul.f32 %v1331_v62, %v1331_v62 }
 0x17a   :  { %1744 = vst [vmem:[%s2546_s2 + $0x38] sm:$0xff] %v1736_v0   ;;  %v1480_v4 = vrot.slane %v1479_v1, 4  ;;  %v1516_v51 = vadd.f32 %v1515_v63, %v1501_v2 }
 0x17c   :  { %v1481_v3 = vadd.f32 %v1480_v4, %v1479_v1  ;;  %v1517_v5 = vrot.slane %v1516_v51, 4 }
 0x17e   :  { %v1482_v7 = vrot.slane %v1481_v3, 2  ;;  %v1518_v8 = vadd.f32 %v1517_v5, %v1516_v51 }
 0x180   :  { %v1483_v9 = vadd.f32 %v1482_v7, %v1481_v3  ;;  %v1519_v54 = vrot.slane %v1518_v8, 2 }
 0x182   :  { %v1520_v12 = vadd.f32 %v1519_v54, %v1518_v8  ;;  %v1484_v14 = vrot.slane %v1483_v9, 1 }
 0x184   :  { %v1521_v15 = vrot.slane %v1520_v12, 1  ;;  %v1485_v17 = vadd.f32 %v1484_v14, %v1483_v9 }
 0x186   :  { %v1522_v16 = vadd.f32 %v1521_v15, %v1520_v12 }
 0x188   :  { %v1527_v39 = vsel %vm1526_vm0, %v1522_v16, 0.0 }
 0x189   :  { %v1528_v41 = vsel %vm1525_vm1, %v1485_v17, %v1527_v39 }
 0x18a   :  { %1529 = vst [vmem:[%s2547_s3] sm:$0xff] %v1528_v41 }

// kernel: a_call__.10
= control target key start
LH: loop header
LB: loop body
LE: loop exit
PB: predicated region body
PF: predicated region fallthrough
CT: control target
= control target key end

     0   :  { %s455_s0 = inlined_call_operand.vmem [shape: bf16[128,128], index: 0, kind: input, shape index: {}]   ;;  %s456_s1 = inlined_call_operand.vmem [shape: f32[1,128], index: 1, kind: input, shape index: {}]   ;;  %s457_s2 = inlined_call_operand.vmem [shape: f32[1,128], index: 2, kind: input, shape index: {}]   ;;  %s458_s3 = inlined_call_operand.vmem [shape: bf16[128,128], index: 3, kind: output, shape index: {}]  }
   0x1   :  { %v259_v0 = vld [vmem:[%s455_s0] sm:$0xff]   ;;  %v330_v4 = vld [vmem:[%s455_s0 + $0x8] sm:$0xff]   ;;  %v331_v5 = vld [vmem:[%s455_s0 + $0x10] sm:$0xff]  }
   0x2   :  { %v370_v1 = vld [vmem:[%s456_s1] ss:$0 sm:$0xff]  ;;  %v260_v2 = vunpack.c.l.bf16 %v259_v0  ;;  %v261_v3 = vunpack.c.h.bf16 %v259_v0  ;;  %v332_v6 = vld [vmem:[%s455_s0 + $0x18] sm:$0xff]   ;;  %v264_v8 = vunpack.c.l.bf16 %v330_v4  ;;  %v265_v9 = vunpack.c.h.bf16 %v330_v4  ;;  %v334_v35 = vld [vmem:[%s455_s0 + $0x28] sm:$0xff]  }
   0x3   :  { %v384_v7 = vld [vmem:[%s457_s2] ss:$0 sm:$0xff]  ;;  %v268_v10 = vunpack.c.l.bf16 %v331_v5  ;;  %v269_v11 = vunpack.c.h.bf16 %v331_v5  ;;  %v272_v14 = vunpack.c.l.bf16 %v332_v6  ;;  %v273_v15 = vunpack.c.h.bf16 %v332_v6  ;;  %v335_v48 = vld [vmem:[%s455_s0 + $0x30] sm:$0xff]   ;;  %v336_v4 = vld [vmem:[%s455_s0 + $0x38] sm:$0xff]  }
   0x4   :  { %v53_v12 = vmul.f32 %v260_v2, %v370_v1  ;;  %v54_v13 = vmul.f32 %v261_v3, %v370_v1  ;;  %v55_v16 = vmul.f32 %v264_v8, %v370_v1  ;;  %v56_v17 = vmul.f32 %v265_v9, %v370_v1  ;;  %v333_v34 = vld [vmem:[%s455_s0 + $0x20] sm:$0xff]  }
   0x5   :  { %v57_v18 = vmul.f32 %v268_v10, %v370_v1  ;;  %v58_v19 = vmul.f32 %v269_v11, %v370_v1  ;;  %v59_v22 = vmul.f32 %v272_v14, %v370_v1  ;;  %v60_v23 = vmul.f32 %v273_v15, %v370_v1 }
   0x6   :  { %v76_v20 = vadd.f32 %v384_v7, %v53_v12  ;;  %v77_v21 = vadd.f32 %v384_v7, %v54_v13  ;;  %v78_v24 = vadd.f32 %v384_v7, %v55_v16  ;;  %v79_v25 = vadd.f32 %v384_v7, %v56_v17 }
   0x7   :  { %v80_v26 = vadd.f32 %v384_v7, %v57_v18  ;;  %v81_v27 = vadd.f32 %v384_v7, %v58_v19  ;;  %v82_v42 = vadd.f32 %v384_v7, %v59_v22  ;;  %v83_v43 = vadd.f32 %v384_v7, %v60_v23 }
   0x8   :  { %vm92_vm0 = vcmp.ge.f32.partialorder %v76_v20, 0.0  ;;  %vm93_vm1 = vcmp.ge.f32.partialorder %v77_v21, 0.0  ;;  %v108_v28 = vmul.f32 0.2, %v76_v20  ;;  %v109_v29 = vmul.f32 0.2, %v77_v21 }
   0x9   :  { %vm94_vm2 = vcmp.ge.f32.partialorder %v78_v24, 0.0  ;;  %vm95_vm3 = vcmp.ge.f32.partialorder %v79_v25, 0.0  ;;  %v110_v30 = vmul.f32 0.2, %v78_v24  ;;  %v111_v31 = vmul.f32 0.2, %v79_v25 }
   0xa   :  { %v124_v32 = vsel %vm92_vm0, %v76_v20, %v108_v28  ;;  %v125_v33 = vsel %vm93_vm1, %v77_v21, %v109_v29  ;;  %vm96_vm4 = vcmp.ge.f32.partialorder %v80_v26, 0.0  ;;  %vm97_vm5 = vcmp.ge.f32.partialorder %v81_v27, 0.0 }
   0xb   :  { %v293_v36 = vpack.c.bf16 %v125_v33, %v124_v32  ;;  %v126_v37 = vsel %vm94_vm2, %v78_v24, %v110_v30  ;;  %v127_v38 = vsel %vm95_vm3, %v79_v25, %v111_v31  ;;  %v112_v39 = vmul.f32 0.2, %v80_v26 }
   0xc   :  { %v298_v40 = vpack.c.bf16 %v127_v38, %v126_v37  ;;  %v113_v41 = vmul.f32 0.2, %v81_v27  ;;  %v276_v45 = vunpack.c.l.bf16 %v333_v34  ;;  %v277_v46 = vunpack.c.h.bf16 %v333_v34 }
   0xd   :  { %294 = vst [vmem:[%s458_s3] sm:$0xff] %v293_v36   ;;  %v128_v44 = vsel %vm96_vm4, %v80_v26, %v112_v39  ;;  %v280_v47 = vunpack.c.l.bf16 %v334_v35  ;;  %vm98_vm6 = vcmp.ge.f32.partialorder %v82_v42, 0.0  ;;  %vm99_vm7 = vcmp.ge.f32.partialorder %v83_v43, 0.0 }
   0xe   :  { %337 = vst [vmem:[%s458_s3 + $0x8] sm:$0xff] %v298_v40   ;;  %v129_v49 = vsel %vm97_vm5, %v81_v27, %v113_v41  ;;  %v114_v50 = vmul.f32 0.2, %v82_v42  ;;  %v115_v52 = vmul.f32 0.2, %v83_v43  ;;  %v61_v53 = vmul.f32 %v276_v45, %v370_v1 }
   0xf   :  { %v303_v51 = vpack.c.bf16 %v129_v49, %v128_v44  ;;  %v62_v54 = vmul.f32 %v277_v46, %v370_v1  ;;  %v281_v56 = vunpack.c.h.bf16 %v334_v35  ;;  %v63_v57 = vmul.f32 %v280_v47, %v370_v1 }
  0x10   :  { %v130_v55 = vsel %vm98_vm6, %v82_v42, %v114_v50  ;;  %v284_v58 = vunpack.c.l.bf16 %v335_v48  ;;  %v131_v59 = vsel %vm99_vm7, %v83_v43, %v115_v52  ;;  %v84_v60 = vadd.f32 %v384_v7, %v61_v53 }
  0x11   :  { %338 = vst [vmem:[%s458_s3 + $0x10] sm:$0xff] %v303_v51   ;;  %v85_v61 = vadd.f32 %v384_v7, %v62_v54  ;;  %v285_v62 = vunpack.c.h.bf16 %v335_v48  ;;  %v308_v63 = vpack.c.bf16 %v131_v59, %v130_v55  ;;  %v64_v0 = vmul.f32 %v281_v56, %v370_v1 }
  0x12   :  { %v86_v2 = vadd.f32 %v384_v7, %v63_v57  ;;  %v65_v3 = vmul.f32 %v284_v58, %v370_v1  ;;  %vm100_vm8 = vcmp.ge.f32.partialorder %v84_v60, 0.0  ;;  %v116_v5 = vmul.f32 0.2, %v84_v60 }
  0x13   :  { %vm101_vm9 = vcmp.ge.f32.partialorder %v85_v61, 0.0  ;;  %v117_v6 = vmul.f32 0.2, %v85_v61  ;;  %339 = vst [vmem:[%s458_s3 + $0x18] sm:$0xff] %v308_v63   ;;  %v87_v8 = vadd.f32 %v384_v7, %v64_v0  ;;  %v66_v10 = vmul.f32 %v285_v62, %v370_v1 }
  0x14   :  { %vm102_vm10 = vcmp.ge.f32.partialorder %v86_v2, 0.0  ;;  %v118_v9 = vmul.f32 0.2, %v86_v2  ;;  %v132_v11 = vsel %vm100_vm8, %v84_v60, %v116_v5  ;;  %v88_v13 = vadd.f32 %v384_v7, %v65_v3 }
  0x15   :  { %v133_v12 = vsel %vm101_vm9, %v85_v61, %v117_v6  ;;  %v288_v14 = vunpack.c.l.bf16 %v336_v4  ;;  %vm103_vm11 = vcmp.ge.f32.partialorder %v87_v8, 0.0  ;;  %v119_v16 = vmul.f32 0.2, %v87_v8 }
  0x16   :  { %v313_v15 = vpack.c.bf16 %v133_v12, %v132_v11  ;;  %v134_v17 = vsel %vm102_vm10, %v86_v2, %v118_v9  ;;  %v89_v18 = vadd.f32 %v384_v7, %v66_v10  ;;  %vm104_vm12 = vcmp.ge.f32.partialorder %v88_v13, 0.0 }
  0x17   :  { %v120_v19 = vmul.f32 0.2, %v88_v13  ;;  %v289_v20 = vunpack.c.h.bf16 %v336_v4  ;;  %v135_v21 = vsel %vm103_vm11, %v87_v8, %v119_v16  ;;  %v67_v22 = vmul.f32 %v288_v14, %v370_v1 }
  0x18   :  { %340 = vst [vmem:[%s458_s3 + $0x20] sm:$0xff] %v313_v15   ;;  %v318_v23 = vpack.c.bf16 %v135_v21, %v134_v17  ;;  %vm105_vm13 = vcmp.ge.f32.partialorder %v89_v18, 0.0  ;;  %v121_v24 = vmul.f32 0.2, %v89_v18 }
  0x19   :  { %v136_v25 = vsel %vm104_vm12, %v88_v13, %v120_v19  ;;  %v68_v26 = vmul.f32 %v289_v20, %v370_v1  ;;  %v90_v27 = vadd.f32 %v384_v7, %v67_v22 }
  0x1a   :  { %341 = vst [vmem:[%s458_s3 + $0x28] sm:$0xff] %v318_v23   ;;  %v137_v28 = vsel %vm105_vm13, %v89_v18, %v121_v24 }
  0x1b   :  { %v323_v29 = vpack.c.bf16 %v137_v28, %v136_v25  ;;  %v91_v30 = vadd.f32 %v384_v7, %v68_v26  ;;  %vm106_vm14 = vcmp.ge.f32.partialorder %v90_v27, 0.0  ;;  %v122_v31 = vmul.f32 0.2, %v90_v27 }
  0x1d   :  { %342 = vst [vmem:[%s458_s3 + $0x30] sm:$0xff] %v323_v29   ;;  %vm107_vm15 = vcmp.ge.f32.partialorder %v91_v30, 0.0  ;;  %v123_v32 = vmul.f32 0.2, %v91_v30  ;;  %v138_v33 = vsel %vm106_vm14, %v90_v27, %v122_v31 }
  0x1f   :  { %v139_v1 = vsel %vm107_vm15, %v91_v30, %v123_v32 }
  0x20   :  { %v328_v34 = vpack.c.bf16 %v139_v1, %v138_v33 }
  0x22   :  { %343 = vst [vmem:[%s458_s3 + $0x38] sm:$0xff] %v328_v34  }

// kernel: a_call__.11
= control target key start
LH: loop header
LB: loop body
LE: loop exit
PB: predicated region body
PF: predicated region fallthrough
CT: control target
= control target key end

     0   :  { %s2092_s12 = smov 0   ;;  %s2094_s13 = smov 0   ;;  %s2359_s0 = inlined_call_operand.vmem [shape: bf16[32,2048], index: 0, kind: input, shape index: {}]   ;;  %s2360_s1 = inlined_call_operand.vmem [shape: bf16[2048,256], index: 1, kind: input, shape index: {}]   ;;  %s2361_s2 = inlined_call_operand.vmem [shape: bf16[32,256], index: 2, kind: output, shape index: {0}]   ;;  %s2362_s3 = inlined_call_operand.vmem [shape: f32[1,8,256], index: 3, kind: output, shape index: {1}]  }
   0x1   :  { %s2096_s14 = smov 0   ;;  %s2098_s15 = smov 0  }
   0x2   :  { %s2100_s16 = smov 0  }
   0x3 LB: > { %s23_s17 = sadd.s32 1, %s2065_s15  ;;  %p42_p1 = scmp.ne.s32.totalorder %s2057_s13, %s2053_s12  ;;  %s2069_s16 = sphi %s2100_s16, %s14_s16   ;;  %s2065_s15 = sphi %s2098_s15, %s2366_s15   ;;  %s2061_s14 = sphi %s2096_s14, %s2365_s14   ;;  %s2057_s13 = sphi %s2094_s13, %s2364_s13   ;;  %s2053_s12 = sphi %s2092_s12, %s2363_s12  }
   0x4   : > { %p24_p0 = scmp.ge.s32.totalorder %s23_s17, 2  ;;  %p43_p2 = scmp.eq.s32.totalorder %s2069_s16, 0 }
   0x5   : > { %s35_s19 = sadd.s32 1, %s2057_s13  ;;  %p1604_p5 = scmp.ge.s32.totalorder %s2069_s16, 2 }
   0x6   : > { %s2368_s17 = smov (%p24_p0, %s23_s17), 0  ;;  %p44_p3 = por %p43_p2, %p42_p1 }
   0x7   : > { %s31_s18 = ssub.s32 %s2065_s15, %s2368_s17  ;;  %146 = sbr.rel (%p1604_p5) target bundleno = 26 (0x1a), region = 16 }
   0x8   : > { %p33_p4 = scmp.eq.s32.totalorder %s31_s18, 0 }
   0xa   : > { %s2127_s20 = scalar_select %p33_p4, %s2057_s13, %s35_s19  }
   0xe   : > { %149 = sbr.rel (!%p44_p3) target bundleno = 26 (0x1a), region = 20  ;;  %s151_s21 = sand.u32 (%p44_p3), 1, %s2057_s13  }
   0xf   : > { %s1768_s22 = sshll.u32 (%p44_p3), %s2065_s15, 5  ;;  %s1605_s23 = sshll.u32 (%p44_p3), %s151_s21, 7 }
  0x10   : > { %s2135_s26 = scalar_lea.vmem (%p44_p3), %s2359_s0, %s1768_s22  ;;  %s153_s27 = scalar_lea.vmem (%p44_p3), [#allocation3], %s1605_s23 }
  0x11   : > { %v172_v0 = vld [vmem:[%s2135_s26] sm:$0xff] (%p44_p3)  ;;  %v174_v1 = vld [vmem:[%s2135_s26 + $0x8] sm:$0xff] (%p44_p3)  ;;  %v176_v2 = vld [vmem:[%s2135_s26 + $0x10] sm:$0xff] (%p44_p3) }
  0x12   : > { %173 = vst [vmem:[%s153_s27] sm:$0xff] (%p44_p3), %v172_v0  ;;  %175 = vst [vmem:[%s153_s27 + $0x8] sm:$0xff] (%p44_p3), %v174_v1  ;;  %v178_v3 = vld [vmem:[%s2135_s26 + $0x18] sm:$0xff] (%p44_p3)  ;;  %v180_v4 = vld [vmem:[%s2135_s26 + $0x40] sm:$0xff] (%p44_p3) }
  0x13   : > { %177 = vst [vmem:[%s153_s27 + $0x10] sm:$0xff] (%p44_p3), %v176_v2  ;;  %v182_v5 = vld [vmem:[%s2135_s26 + $0x48] sm:$0xff] (%p44_p3)  ;;  %179 = vst [vmem:[%s153_s27 + $0x18] sm:$0xff] (%p44_p3), %v178_v3  ;;  %v184_v6 = vld [vmem:[%s2135_s26 + $0x50] sm:$0xff] (%p44_p3) }
  0x14   : > { %181 = vst [vmem:[%s153_s27 + $0x20] sm:$0xff] (%p44_p3), %v180_v4  ;;  %183 = vst [vmem:[%s153_s27 + $0x28] sm:$0xff] (%p44_p3), %v182_v5  ;;  %v186_v7 = vld [vmem:[%s2135_s26 + $0x58] sm:$0xff] (%p44_p3)  ;;  %v188_v8 = vld [vmem:[%s2135_s26 + $0x80] sm:$0xff] (%p44_p3) }
  0x15   : > { %185 = vst [vmem:[%s153_s27 + $0x30] sm:$0xff] %v184_v6  ;;  %187 = vst [vmem:[%s153_s27 + $0x38] sm:$0xff] %v186_v7  ;;  %v190_v9 = vld [vmem:[%s2135_s26 + $0x88] sm:$0xff]  ;;  %v192_v10 = vld [vmem:[%s2135_s26 + $0x90] sm:$0xff] }
  0x16   : > { %189 = vst [vmem:[%s153_s27 + $0x40] sm:$0xff] %v188_v8  ;;  %v194_v11 = vld [vmem:[%s2135_s26 + $0x98] sm:$0xff]  ;;  %191 = vst [vmem:[%s153_s27 + $0x48] sm:$0xff] %v190_v9  ;;  %v196_v12 = vld [vmem:[%s2135_s26 + $0xc0] sm:$0xff] }
  0x17   : > { %193 = vst [vmem:[%s153_s27 + $0x50] sm:$0xff] %v192_v10  ;;  %195 = vst [vmem:[%s153_s27 + $0x58] sm:$0xff] %v194_v11  ;;  %v198_v13 = vld [vmem:[%s2135_s26 + $0xc8] sm:$0xff]  ;;  %v200_v14 = vld [vmem:[%s2135_s26 + $0xd0] sm:$0xff] }
  0x18   : > { %197 = vst [vmem:[%s153_s27 + $0x60] sm:$0xff] %v196_v12  ;;  %199 = vst [vmem:[%s153_s27 + $0x68] sm:$0xff] %v198_v13  ;;  %v202_v15 = vld [vmem:[%s2135_s26 + $0xd8] sm:$0xff] }
  0x19   : > { %201 = vst [vmem:[%s153_s27 + $0x70] sm:$0xff] %v200_v14  ;;  %203 = vst [vmem:[%s153_s27 + $0x78] sm:$0xff] %v202_v15 }
  0x1a PF: > { %p1608_p6 = scmp.ge.s32.totalorder %s2069_s16, 1  ;;  %p218_p7 = scmp.lt.s32.totalorder %s2069_s16, 3 }
  0x1c   : > { %p219_p8 = pnand %p1608_p6, %p218_p7 }
  0x1d   : > { %s225_s28 = sand.u32 (!%p219_p8), 1, %s2053_s12   ;;  %s1610_s29 = sshll.u32 (!%p219_p8), %s2061_s14, 7 }
  0x1e   : > { %222 = sbr.rel (%p219_p8) target bundleno = 428 (0x1ac), region = 47  ;;  %s1609_s30 = sshll.u32 (!%p219_p8), %s225_s28, 7 }
  0x1f   : > { %p263_p9 = scmp.lt.s32.totalorder (!%p219_p8), %s1610_s29, 255  ;;  %s2162_s8 = scalar_lea.vmem (!%p219_p8), [#allocation3], %s1609_s30 }
  0x20   : > { %p1613_p10 = scmp.ne.s32.totalorder (!%p219_p8), %s2061_s14, 0 }
  0x25   : > { %s2370_s29 = smov (!%p263_p9, %s1610_s29), 255  ;;  %284 = sbr.rel (%p1613_p10) target bundleno = 44 (0x2c), region = 55 }
  0x26   : > { %s1769_s4 = sshll.u32 %s2370_s29, 3  ;;  %v2071_v16 = vmov (!%p1613_p10), 0.0  }
  0x27   : > { %s2160_s7 = scalar_lea.vmem %s2360_s1, %s1769_s4  ;;  %285 = vst [vmem:[#allocation2] sm:$0xff] (!%p1613_p10), %v2071_v16  ;;  %286 = vst [vmem:[#allocation2 + $0x8] sm:$0xff] (!%p1613_p10), %v2071_v16 }
  0x28   : > { %287 = vst [vmem:[#allocation2 + $0x10] sm:$0xff] (!%p1613_p10), %v2071_v16  ;;  %288 = vst [vmem:[#allocation2 + $0x18] sm:$0xff] (!%p1613_p10), %v2071_v16 }
  0x29   : > { %289 = vst [vmem:[#allocation2 + $0x20] sm:$0xff] (!%p1613_p10), %v2071_v16  ;;  %290 = vst [vmem:[#allocation2 + $0x28] sm:$0xff] (!%p1613_p10), %v2071_v16 }
  0x2a   : > { %291 = vst [vmem:[#allocation2 + $0x30] sm:$0xff] (!%p1613_p10), %v2071_v16  ;;  %292 = vst [vmem:[#allocation2 + $0x38] sm:$0xff] (!%p1613_p10), %v2071_v16 }
  0x2c PF: > { %v1839_v17 = vld [vmem:[%s2160_s7 + $0x4] ss:$8 sps:$4 sm:$0xff]   ;;  %v1843_v19 = vld [vmem:[%s2160_s7] ss:$8 sps:$4 sm:$0xff]   ;;  %v1845_v21 = vld [vmem:[%s2160_s7 + $0x14] ss:$8 sps:$4 sm:$0xff]  }
  0x2d   : > { %v1841_v18 = vld [vmem:[%s2160_s7 + $0x204] ss:$8 sps:$4 sm:$0xff]   ;;  %1165 = vmatprep.subr.bf16.mxu1 %v1839_v17  ;;  %v1844_v20 = vld [vmem:[%s2160_s7 + $0x200] ss:$8 sps:$4 sm:$0xff]   ;;  %v1847_v22 = vld [vmem:[%s2160_s7 + $0x214] ss:$8 sps:$4 sm:$0xff]  }
  0x2e   : > { %1271 = vmatprep.subr.bf16.mxu0 %v1841_v18  ;;  %1166 = vmatpush1.bf16.msra.mxu1 %v1843_v19  ;;  %v1849_v23 = vld [vmem:[%s2160_s7 + $0x10] ss:$8 sps:$4 sm:$0xff]   ;;  %v1851_v25 = vld [vmem:[%s2160_s7 + $0x24] ss:$8 sps:$4 sm:$0xff]   ;;  %v1855_v27 = vld [vmem:[%s2160_s7 + $0x20] ss:$8 sps:$4 sm:$0xff]  }
  0x2f   : > { %1272 = vmatpush1.bf16.msra.mxu0 %v1844_v20  ;;  %1167 = vmatprep.subr.bf16.mxu1 %v1845_v21  ;;  %v1850_v24 = vld [vmem:[%s2160_s7 + $0x210] ss:$8 sps:$4 sm:$0xff]   ;;  %v1853_v26 = vld [vmem:[%s2160_s7 + $0x224] ss:$8 sps:$4 sm:$0xff]   ;;  %v1856_v28 = vld [vmem:[%s2160_s7 + $0x220] ss:$8 sps:$4 sm:$0xff]  }
  0x30   : > { %1273 = vmatprep.subr.bf16.mxu0 %v1847_v22  ;;  %v1857_v29 = vld [vmem:[%s2160_s7 + $0x34] ss:$8 sps:$4 sm:$0xff]   ;;  %v1861_v31 = vld [vmem:[%s2160_s7 + $0x30] ss:$8 sps:$4 sm:$0xff]   ;;  %v1863_v33 = vld [vmem:[%s2160_s7 + $0x44] ss:$8 sps:$4 sm:$0xff]  }
  0x31   : > { %v1859_v30 = vld [vmem:[%s2160_s7 + $0x234] ss:$8 sps:$4 sm:$0xff]   ;;  %v1862_v32 = vld [vmem:[%s2160_s7 + $0x230] ss:$8 sps:$4 sm:$0xff]   ;;  %v1865_v34 = vld [vmem:[%s2160_s7 + $0x244] ss:$8 sps:$4 sm:$0xff]  }
  0x32   : > { %1168 = vmatpush1.bf16.msra.mxu1 %v1849_v23  ;;  %v1867_v35 = vld [vmem:[%s2160_s7 + $0x40] ss:$8 sps:$4 sm:$0xff]   ;;  %v1869_v37 = vld [vmem:[%s2160_s7 + $0x54] ss:$8 sps:$4 sm:$0xff]   ;;  %v1873_v39 = vld [vmem:[%s2160_s7 + $0x50] ss:$8 sps:$4 sm:$0xff]  }
  0x33   : > { %1274 = vmatpush1.bf16.msra.mxu0 %v1850_v24  ;;  %1169 = vmatprep.subr.bf16.mxu1 %v1851_v25  ;;  %v1868_v36 = vld [vmem:[%s2160_s7 + $0x240] ss:$8 sps:$4 sm:$0xff]   ;;  %v1871_v38 = vld [vmem:[%s2160_s7 + $0x254] ss:$8 sps:$4 sm:$0xff]   ;;  %v1874_v40 = vld [vmem:[%s2160_s7 + $0x250] ss:$8 sps:$4 sm:$0xff]  }
  0x34   : > { %1275 = vmatprep.subr.bf16.mxu0 %v1853_v26  ;;  %v1875_v41 = vld [vmem:[%s2160_s7 + $0x64] ss:$8 sps:$4 sm:$0xff]   ;;  %v1879_v43 = vld [vmem:[%s2160_s7 + $0x60] ss:$8 sps:$4 sm:$0xff]   ;;  %v1881_v45 = vld [vmem:[%s2160_s7 + $0x74] ss:$8 sps:$4 sm:$0xff]  }
  0x35   : > { %v1877_v42 = vld [vmem:[%s2160_s7 + $0x264] ss:$8 sps:$4 sm:$0xff]   ;;  %v1880_v44 = vld [vmem:[%s2160_s7 + $0x260] ss:$8 sps:$4 sm:$0xff]   ;;  %v1883_v46 = vld [vmem:[%s2160_s7 + $0x274] ss:$8 sps:$4 sm:$0xff]  }
  0x36   : > { %1170 = vmatpush1.bf16.msra.mxu1 %v1855_v27  ;;  %v1885_v47 = vld [vmem:[%s2160_s7 + $0x70] ss:$8 sps:$4 sm:$0xff]   ;;  %v1887_v49 = vld [vmem:[%s2160_s7 + $0x84] ss:$8 sps:$4 sm:$0xff]   ;;  %v1891_v51 = vld [vmem:[%s2160_s7 + $0x80] ss:$8 sps:$4 sm:$0xff]  }
  0x37   : > { %1276 = vmatpush1.bf16.msra.mxu0 %v1856_v28  ;;  %1171 = vmatprep.subr.bf16.mxu1 %v1857_v29  ;;  %v1886_v48 = vld [vmem:[%s2160_s7 + $0x270] ss:$8 sps:$4 sm:$0xff]   ;;  %v1889_v50 = vld [vmem:[%s2160_s7 + $0x284] ss:$8 sps:$4 sm:$0xff]   ;;  %v1892_v52 = vld [vmem:[%s2160_s7 + $0x280] ss:$8 sps:$4 sm:$0xff]  }
  0x38   : > { %1277 = vmatprep.subr.bf16.mxu0 %v1859_v30  ;;  %v1893_v53 = vld [vmem:[%s2160_s7 + $0x94] ss:$8 sps:$4 sm:$0xff]   ;;  %v1897_v55 = vld [vmem:[%s2160_s7 + $0x90] ss:$8 sps:$4 sm:$0xff]   ;;  %v1899_v57 = vld [vmem:[%s2160_s7 + $0xa4] ss:$8 sps:$4 sm:$0xff]  }
  0x39   : > { %v1895_v54 = vld [vmem:[%s2160_s7 + $0x294] ss:$8 sps:$4 sm:$0xff]   ;;  %v1898_v56 = vld [vmem:[%s2160_s7 + $0x290] ss:$8 sps:$4 sm:$0xff]   ;;  %v1901_v58 = vld [vmem:[%s2160_s7 + $0x2a4] ss:$8 sps:$4 sm:$0xff]  }
  0x3a   : > { %1172 = vmatpush1.bf16.msra.mxu1 %v1861_v31  ;;  %v1903_v59 = vld [vmem:[%s2160_s7 + $0xa0] ss:$8 sps:$4 sm:$0xff]   ;;  %v1905_v61 = vld [vmem:[%s2160_s7 + $0xb4] ss:$8 sps:$4 sm:$0xff]   ;;  %v1909_v63 = vld [vmem:[%s2160_s7 + $0xb0] ss:$8 sps:$4 sm:$0xff]  }
  0x3b   : > { %1278 = vmatpush1.bf16.msra.mxu0 %v1862_v32  ;;  %1173 = vmatprep.subr.bf16.mxu1 %v1863_v33  ;;  %v1904_v60 = vld [vmem:[%s2160_s7 + $0x2a0] ss:$8 sps:$4 sm:$0xff]   ;;  %v1907_v62 = vld [vmem:[%s2160_s7 + $0x2b4] ss:$8 sps:$4 sm:$0xff]   ;;  %v1910_v0 = vld [vmem:[%s2160_s7 + $0x2b0] ss:$8 sps:$4 sm:$0xff]  }
  0x3c   : > { %1279 = vmatprep.subr.bf16.mxu0 %v1865_v34  ;;  %v301_v1 = vld [vmem:[%s2162_s8] sm:$0xff]  ;;  %v303_v6 = vld [vmem:[%s2162_s8 + $0x10] sm:$0xff]  ;;  %p1758_p11 = scmp.ne.s32.totalorder %s2061_s14, 1 }
  0x3d   : > { %v305_v2 = vld [vmem:[%s2162_s8 + $0x20] sm:$0xff]  ;;  %v307_v7 = vld [vmem:[%s2162_s8 + $0x30] sm:$0xff] }
  0x3e   : > { %1174 = vmatpush1.bf16.msra.mxu1 %v1867_v35  ;;  %v1911_v3 = vld [vmem:[%s2160_s7 + $0xc4] ss:$8 sps:$4 sm:$0xff]   ;;  %v1615_v5 = vcombine.high %v301_v1, %v305_v2  ;;  %v1619_v8 = vcombine.high %v303_v6, %v307_v7  ;;  %v1915_v9 = vld [vmem:[%s2160_s7 + $0xc0] ss:$8 sps:$4 sm:$0xff]   ;;  %v1917_v11 = vld [vmem:[%s2160_s7 + $0xd4] ss:$8 sps:$4 sm:$0xff]   ;;  %v1614_v25 = vcombine.low %v301_v1, %v305_v2  ;;  %v1618_v27 = vcombine.low %v303_v6, %v307_v7 }
  0x3f   : > { %1280 = vmatpush1.bf16.msra.mxu0 %v1868_v36  ;;  %1175 = vmatprep.subr.bf16.mxu1 %v1869_v37  ;;  %v1913_v4 = vld [vmem:[%s2160_s7 + $0x2c4] ss:$8 sps:$4 sm:$0xff]   ;;  %v1916_v10 = vld [vmem:[%s2160_s7 + $0x2c0] ss:$8 sps:$4 sm:$0xff]   ;;  %v1919_v12 = vld [vmem:[%s2160_s7 + $0x2d4] ss:$8 sps:$4 sm:$0xff]  }
  0x40   : > { %1281 = vmatprep.subr.bf16.mxu0 %v1871_v38  ;;  %1197 = vmatprep.mubr.bf16.mxu1 %v1615_v5  ;;  %v1921_v13 = vld [vmem:[%s2160_s7 + $0xd0] ss:$8 sps:$4 sm:$0xff]   ;;  %v1923_v15 = vld [vmem:[%s2160_s7 + $0xe4] ss:$8 sps:$4 sm:$0xff]   ;;  %v1927_v17 = vld [vmem:[%s2160_s7 + $0xe0] ss:$8 sps:$4 sm:$0xff]  }
  0x41   : > { %1303 = vmatprep.mubr.bf16.mxu0 %v1619_v8  ;;  %v1922_v14 = vld [vmem:[%s2160_s7 + $0x2d0] ss:$8 sps:$4 sm:$0xff]   ;;  %v1925_v16 = vld [vmem:[%s2160_s7 + $0x2e4] ss:$8 sps:$4 sm:$0xff]   ;;  %v1928_v18 = vld [vmem:[%s2160_s7 + $0x2e0] ss:$8 sps:$4 sm:$0xff]  }
  0x42   : > { %1176 = vmatpush1.bf16.msra.mxu1 %v1873_v39  ;;  %v1929_v19 = vld [vmem:[%s2160_s7 + $0xf4] ss:$8 sps:$4 sm:$0xff]   ;;  %v1933_v21 = vld [vmem:[%s2160_s7 + $0xf0] ss:$8 sps:$4 sm:$0xff]   ;;  %v1937_v23 = vld [vmem:[%s2160_s7 + $0x104] ss:$8 sps:$4 sm:$0xff]  }
  0x43   : > { %1282 = vmatpush1.bf16.msra.mxu0 %v1874_v40  ;;  %1177 = vmatprep.subr.bf16.mxu1 %v1875_v41  ;;  %v1931_v20 = vld [vmem:[%s2160_s7 + $0x2f4] ss:$8 sps:$4 sm:$0xff]   ;;  %v1934_v22 = vld [vmem:[%s2160_s7 + $0x2f0] ss:$8 sps:$4 sm:$0xff]   ;;  %v1940_v24 = vld [vmem:[%s2160_s7 + $0x304] ss:$8 sps:$4 sm:$0xff]  }
  0x44   : > { %1283 = vmatprep.subr.bf16.mxu0 %v1877_v42  ;;  %v1935_v26 = vld [vmem:[%s2160_s7 + $0x100] ss:$8 sps:$4 sm:$0xff]   ;;  %v1943_v29 = vld [vmem:[%s2160_s7 + $0x114] ss:$8 sps:$4 sm:$0xff]   ;;  %v1941_v31 = vld [vmem:[%s2160_s7 + $0x110] ss:$8 sps:$4 sm:$0xff]  }
  0x45   : > { %v1938_v28 = vld [vmem:[%s2160_s7 + $0x300] ss:$8 sps:$4 sm:$0xff]   ;;  %v1946_v30 = vld [vmem:[%s2160_s7 + $0x314] ss:$8 sps:$4 sm:$0xff]   ;;  %v1944_v32 = vld [vmem:[%s2160_s7 + $0x310] ss:$8 sps:$4 sm:$0xff]  }
  0x46   : > { %1178 = vmatpush1.bf16.msra.mxu1 %v1879_v43  ;;  %v1949_v33 = vld [vmem:[%s2160_s7 + $0x124] ss:$8 sps:$4 sm:$0xff]   ;;  %v1947_v35 = vld [vmem:[%s2160_s7 + $0x120] ss:$8 sps:$4 sm:$0xff]   ;;  %v1955_v37 = vld [vmem:[%s2160_s7 + $0x134] ss:$8 sps:$4 sm:$0xff]  }
  0x47   : > { %1284 = vmatpush1.bf16.msra.mxu0 %v1880_v44  ;;  %1179 = vmatprep.subr.bf16.mxu1 %v1881_v45  ;;  %v1952_v34 = vld [vmem:[%s2160_s7 + $0x324] ss:$8 sps:$4 sm:$0xff]   ;;  %v1950_v36 = vld [vmem:[%s2160_s7 + $0x320] ss:$8 sps:$4 sm:$0xff]   ;;  %v1958_v38 = vld [vmem:[%s2160_s7 + $0x334] ss:$8 sps:$4 sm:$0xff]  }
  0x48   : > { %1285 = vmatprep.subr.bf16.mxu0 %v1883_v46  ;;  %v1953_v39 = vld [vmem:[%s2160_s7 + $0x130] ss:$8 sps:$4 sm:$0xff]   ;;  %v1961_v41 = vld [vmem:[%s2160_s7 + $0x144] ss:$8 sps:$4 sm:$0xff]   ;;  %v1959_v43 = vld [vmem:[%s2160_s7 + $0x140] ss:$8 sps:$4 sm:$0xff]  }
  0x49   : > { %v1956_v40 = vld [vmem:[%s2160_s7 + $0x330] ss:$8 sps:$4 sm:$0xff]   ;;  %v1964_v42 = vld [vmem:[%s2160_s7 + $0x344] ss:$8 sps:$4 sm:$0xff]   ;;  %v1962_v44 = vld [vmem:[%s2160_s7 + $0x340] ss:$8 sps:$4 sm:$0xff]  }
  0x4a   : > { %1180 = vmatpush1.bf16.msra.mxu1 %v1885_v47  ;;  %v1967_v45 = vld [vmem:[%s2160_s7 + $0x154] ss:$8 sps:$4 sm:$0xff]   ;;  %v309_v47 = vld [vmem:[%s2162_s8 + $0x40] sm:$0xff]  ;;  %v1977_v5 = vld [vmem:[%s2160_s7 + $0x170] ss:$8 sps:$4 sm:$0xff]  }
  0x4b   : > { %1286 = vmatpush1.bf16.msra.mxu0 %v1886_v48  ;;  %1181 = vmatprep.subr.bf16.mxu1 %v1887_v49  ;;  %v1970_v46 = vld [vmem:[%s2160_s7 + $0x354] ss:$8 sps:$4 sm:$0xff]   ;;  %v313_v48 = vld [vmem:[%s2162_s8 + $0x60] sm:$0xff]  ;;  %v1980_v6 = vld [vmem:[%s2160_s7 + $0x370] ss:$8 sps:$4 sm:$0xff]  }
  0x4c   : > { %1287 = vmatprep.subr.bf16.mxu0 %v1889_v50  ;;  %v1623_v49 = vcombine.high %v309_v47, %v313_v48  ;;  %v311_v50 = vld [vmem:[%s2162_s8 + $0x50] sm:$0xff]  ;;  %v1985_v7 = vld [vmem:[%s2160_s7 + $0x184] ss:$8 sps:$4 sm:$0xff]  }
  0x4d   : > { %v1982_v1 = vld [vmem:[%s2160_s7 + $0x374] ss:$8 sps:$4 sm:$0xff]   ;;  %v1988_v8 = vld [vmem:[%s2160_s7 + $0x384] ss:$8 sps:$4 sm:$0xff]  }
  0x4e   : > { %1182 = vmatpush1.bf16.msra.mxu1 %v1891_v51  ;;  %v315_v51 = vld [vmem:[%s2162_s8 + $0x70] sm:$0xff] }
  0x4f   : > { %1288 = vmatpush1.bf16.msra.mxu0 %v1892_v52  ;;  %1183 = vmatprep.subr.bf16.mxu1 %v1893_v53  ;;  %v1965_v52 = vld [vmem:[%s2160_s7 + $0x150] ss:$8 sps:$4 sm:$0xff]  }
  0x50   : > { %1289 = vmatprep.subr.bf16.mxu0 %v1895_v54  ;;  %v1968_v53 = vld [vmem:[%s2160_s7 + $0x350] ss:$8 sps:$4 sm:$0xff]   ;;  %v1627_v54 = vcombine.high %v311_v50, %v315_v51 }
  0x52   : > { %1184 = vmatpush1.bf16.msra.mxu1 %v1897_v55  ;;  %v1622_v55 = vcombine.low %v309_v47, %v313_v48 }
  0x53   : > { %1290 = vmatpush1.bf16.msra.mxu0 %v1898_v56  ;;  %1185 = vmatprep.subr.bf16.mxu1 %v1899_v57  ;;  %v1626_v56 = vcombine.low %v311_v50, %v315_v51  ;;  %v1973_v57 = vld [vmem:[%s2160_s7 + $0x164] ss:$8 sps:$4 sm:$0xff]  }
  0x54   : > { %1291 = vmatprep.subr.bf16.mxu0 %v1901_v58  ;;  %v1976_v58 = vld [vmem:[%s2160_s7 + $0x364] ss:$8 sps:$4 sm:$0xff]  }
  0x55   : > { %v293_v50 = vld [vmem:[#allocation2] sm:$0xff] }
  0x56   : > { %1186 = vmatpush1.bf16.msra.mxu1 %v1903_v59  ;;  %v1971_v59 = vld [vmem:[%s2160_s7 + $0x160] ss:$8 sps:$4 sm:$0xff]  }
  0x57   : > { %1292 = vmatpush1.bf16.msra.mxu0 %v1904_v60  ;;  %1187 = vmatprep.subr.bf16.mxu1 %v1905_v61  ;;  %v1974_v60 = vld [vmem:[%s2160_s7 + $0x360] ss:$8 sps:$4 sm:$0xff]  }
  0x58   : > { %1293 = vmatprep.subr.bf16.mxu0 %v1907_v62  ;;  %v2266_v61 = vld [vmem:[%s2162_s8 + $0x8] sm:$0xff] }
  0x59   : > { %v2269_v62 = vld [vmem:[%s2162_s8 + $0x28] sm:$0xff] }
  0x5a   : > { %1188 = vmatpush1.bf16.msra.mxu1 %v1909_v63  ;;  %v2272_v63 = vld [vmem:[%s2162_s8 + $0x18] sm:$0xff]  ;;  %v1617_v2 = vcombine.high %v2266_v61, %v2269_v62 }
  0x5b   : > { %1294 = vmatpush1.bf16.msra.mxu0 %v1910_v0  ;;  %1189 = vmatprep.subr.bf16.mxu1 %v1911_v3  ;;  %v1979_v0 = vld [vmem:[%s2160_s7 + $0x174] ss:$8 sps:$4 sm:$0xff]  }
  0x5c   : > { %1295 = vmatprep.subr.bf16.mxu0 %v1913_v4  ;;  %v2279_v3 = vld [vmem:[%s2162_s8 + $0x38] sm:$0xff] }
  0x5d   : > { %v1621_v4 = vcombine.high %v2272_v63, %v2279_v3 }
  0x5e   : > { %1190 = vmatpush1.bf16.msra.mxu1 %v1915_v9  ;;  %v1983_v9 = vld [vmem:[%s2160_s7 + $0x180] ss:$8 sps:$4 sm:$0xff]  }
  0x5f   : > { %1296 = vmatpush1.bf16.msra.mxu0 %v1916_v10  ;;  %1191 = vmatprep.subr.bf16.mxu1 %v1917_v11  ;;  %v1986_v10 = vld [vmem:[%s2160_s7 + $0x380] ss:$8 sps:$4 sm:$0xff]   ;;  %v1991_v11 = vld [vmem:[%s2160_s7 + $0x194] ss:$8 sps:$4 sm:$0xff]  }
  0x60   : > { %1297 = vmatprep.subr.bf16.mxu0 %v1919_v12  ;;  %v1994_v12 = vld [vmem:[%s2160_s7 + $0x394] ss:$8 sps:$4 sm:$0xff]  }
  0x62   : > { %1192 = vmatpush1.bf16.msra.mxu1 %v1921_v13  ;;  %v1989_v13 = vld [vmem:[%s2160_s7 + $0x190] ss:$8 sps:$4 sm:$0xff]  }
  0x63   : > { %1298 = vmatpush1.bf16.msra.mxu0 %v1922_v14  ;;  %1193 = vmatprep.subr.bf16.mxu1 %v1923_v15  ;;  %v1992_v14 = vld [vmem:[%s2160_s7 + $0x390] ss:$8 sps:$4 sm:$0xff]   ;;  %v1997_v15 = vld [vmem:[%s2160_s7 + $0x1a4] ss:$8 sps:$4 sm:$0xff]  }
  0x64   : > { %1299 = vmatprep.subr.bf16.mxu0 %v1925_v16  ;;  %v2000_v16 = vld [vmem:[%s2160_s7 + $0x3a4] ss:$8 sps:$4 sm:$0xff]  }
  0x66   : > { %1194 = vmatpush1.bf16.msra.mxu1 %v1927_v17  ;;  %v1995_v17 = vld [vmem:[%s2160_s7 + $0x1a0] ss:$8 sps:$4 sm:$0xff]  }
  0x67   : > { %1300 = vmatpush1.bf16.msra.mxu0 %v1928_v18  ;;  %1195 = vmatprep.subr.bf16.mxu1 %v1929_v19  ;;  %v1998_v18 = vld [vmem:[%s2160_s7 + $0x3a0] ss:$8 sps:$4 sm:$0xff]   ;;  %v2003_v19 = vld [vmem:[%s2160_s7 + $0x1b4] ss:$8 sps:$4 sm:$0xff]  }
  0x68   : > { %1301 = vmatprep.subr.bf16.mxu0 %v1931_v20  ;;  %v2006_v20 = vld [vmem:[%s2160_s7 + $0x3b4] ss:$8 sps:$4 sm:$0xff]  }
  0x6a   : > { %1196 = vmatpush1.bf16.msra.mxu1 %v1933_v21  ;;  %v2001_v21 = vld [vmem:[%s2160_s7 + $0x1b0] ss:$8 sps:$4 sm:$0xff]  }
  0x6b   : > { %1302 = vmatpush1.bf16.msra.mxu0 %v1934_v22  ;;  %1218 = vmatprep.subr.bf16.mxu1 %v1937_v23  ;;  %v2004_v22 = vld [vmem:[%s2160_s7 + $0x3b0] ss:$8 sps:$4 sm:$0xff]   ;;  %v2009_v23 = vld [vmem:[%s2160_s7 + $0x1c4] ss:$8 sps:$4 sm:$0xff]  }
  0x6c   : > { %1324 = vmatprep.subr.bf16.mxu0 %v1940_v24  ;;  %v2012_v24 = vld [vmem:[%s2160_s7 + $0x3c4] ss:$8 sps:$4 sm:$0xff]  }
  0x6d   : > { %1198 = vmatmul.mubr.bf16.vlgmr.msra.gmra.mrb[0].mxu1 %v1614_v25  ;;  %v2007_v25 = vld [vmem:[%s2160_s7 + $0x1c0] ss:$8 sps:$4 sm:$0xff]  }
  0x6e   : > { %1304 = vmatmul.mubr.bf16.vlgmr.msra.gmra.mrb[0].mxu0 %v1618_v27  ;;  %1219 = vmatpush1.bf16.msra.mxu1 %v1935_v26  ;;  %v2010_v26 = vld [vmem:[%s2160_s7 + $0x3c0] ss:$8 sps:$4 sm:$0xff]   ;;  %v2015_v27 = vld [vmem:[%s2160_s7 + $0x1d4] ss:$8 sps:$4 sm:$0xff]  }
  0x6f   : > { %1325 = vmatpush1.bf16.msra.mxu0 %v1938_v28  ;;  %1220 = vmatprep.subr.bf16.mxu1 %v1943_v29  ;;  %v2018_v28 = vld [vmem:[%s2160_s7 + $0x3d4] ss:$8 sps:$4 sm:$0xff]   ;;  %v2013_v29 = vld [vmem:[%s2160_s7 + $0x1d0] ss:$8 sps:$4 sm:$0xff]  }
  0x70   : > { %1326 = vmatprep.subr.bf16.mxu0 %v1946_v30  ;;  %1207 = vmatprep.mubr.bf16.mxu1 %v1623_v49  ;;  %v2016_v30 = vld [vmem:[%s2160_s7 + $0x3d0] ss:$8 sps:$4 sm:$0xff]  }
  0x71   : > { %1313 = vmatprep.mubr.bf16.mxu0 %v1627_v54  ;;  %v294_v54 = vld [vmem:[#allocation2 + $0x8] sm:$0xff] }
  0x72   : > { %1221 = vmatpush1.bf16.msra.mxu1 %v1941_v31  ;;  %v2021_v31 = vld [vmem:[%s2160_s7 + $0x1e4] ss:$8 sps:$4 sm:$0xff]  }
  0x73   : > { %1327 = vmatpush1.bf16.msra.mxu0 %v1944_v32  ;;  %1222 = vmatprep.subr.bf16.mxu1 %v1949_v33  ;;  %v2024_v32 = vld [vmem:[%s2160_s7 + $0x3e4] ss:$8 sps:$4 sm:$0xff]   ;;  %v2019_v33 = vld [vmem:[%s2160_s7 + $0x1e0] ss:$8 sps:$4 sm:$0xff]  }
  0x74   : > { %1328 = vmatprep.subr.bf16.mxu0 %v1952_v34  ;;  %v2022_v34 = vld [vmem:[%s2160_s7 + $0x3e0] ss:$8 sps:$4 sm:$0xff]  }
  0x75   : > { %1208 = vmatmul.mubr.bf16.gmra.mrb[4].mxu1 %v1622_v55 }
  0x76   : > { %1223 = vmatpush1.bf16.msra.mxu1 %v1947_v35  ;;  %1314 = vmatmul.mubr.bf16.gmra.mrb[4].mxu0 %v1626_v56  ;;  %v2027_v35 = vld [vmem:[%s2160_s7 + $0x1f4] ss:$8 sps:$4 sm:$0xff]  }
  0x77   : > { %1329 = vmatpush1.bf16.msra.mxu0 %v1950_v36  ;;  %1224 = vmatprep.subr.bf16.mxu1 %v1955_v37  ;;  %v2030_v36 = vld [vmem:[%s2160_s7 + $0x3f4] ss:$8 sps:$4 sm:$0xff]   ;;  %v2025_v37 = vld [vmem:[%s2160_s7 + $0x1f0] ss:$8 sps:$4 sm:$0xff]  }
  0x78   : > { %1330 = vmatprep.subr.bf16.mxu0 %v1958_v38  ;;  %1250 = vmatprep.mubr.bf16.mxu1 %v1617_v2  ;;  %v2028_v38 = vld [vmem:[%s2160_s7 + $0x3f0] ss:$8 sps:$4 sm:$0xff]  }
  0x79   : > { %1356 = vmatprep.mubr.bf16.mxu0 %v1621_v4 }
  0x7a   : > { %1225 = vmatpush1.bf16.msra.mxu1 %v1953_v39  ;;  %v310_v39 = vld [vmem:[%s2162_s8 + $0x48] sm:$0xff] }
  0x7b   : > { %1331 = vmatpush1.bf16.msra.mxu0 %v1956_v40  ;;  %1226 = vmatprep.subr.bf16.mxu1 %v1961_v41  ;;  %v314_v40 = vld [vmem:[%s2162_s8 + $0x68] sm:$0xff]  ;;  %v312_v41 = vld [vmem:[%s2162_s8 + $0x58] sm:$0xff] }
  0x7c   : > { %1332 = vmatprep.subr.bf16.mxu0 %v1964_v42  ;;  %v316_v42 = vld [vmem:[%s2162_s8 + $0x78] sm:$0xff]  ;;  %v1624_v47 = vcombine.low %v310_v39, %v314_v40 }
  0x7d   : > { %v1628_v48 = vcombine.low %v312_v41, %v316_v42 }
  0x7e   : > { %1227 = vmatpush1.bf16.msra.mxu1 %v1959_v43  ;;  %v1616_v43 = vcombine.low %v2266_v61, %v2269_v62 }
  0x7f   : > { %1333 = vmatpush1.bf16.msra.mxu0 %v1962_v44  ;;  %1228 = vmatprep.subr.bf16.mxu1 %v1967_v45  ;;  %v1620_v44 = vcombine.low %v2272_v63, %v2279_v3  ;;  %v1625_v45 = vcombine.high %v310_v39, %v314_v40  ;;  %v296_v63 = vld [vmem:[#allocation2 + $0x18] sm:$0xff] }
  0x80   : > { %1334 = vmatprep.subr.bf16.mxu0 %v1970_v46  ;;  %v1629_v46 = vcombine.high %v312_v41, %v316_v42 }
  0x82   : > { %1229 = vmatpush1.bf16.msra.mxu1 %v1965_v52 }
  0x83   : > { %1335 = vmatpush1.bf16.msra.mxu0 %v1968_v53  ;;  %1230 = vmatprep.subr.bf16.mxu1 %v1973_v57 }
  0x84   : > { %1336 = vmatprep.subr.bf16.mxu0 %v1976_v58  ;;  %v295_v58 = vld [vmem:[#allocation2 + $0x10] sm:$0xff] }
  0x86   : > { %1231 = vmatpush1.bf16.msra.mxu1 %v1971_v59 }
  0x87   : > { %1337 = vmatpush1.bf16.msra.mxu0 %v1974_v60  ;;  %1232 = vmatprep.subr.bf16.mxu1 %v1979_v0 }
  0x88   : > { %1338 = vmatprep.subr.bf16.mxu0 %v1982_v1 }
  0x8a   : > { %1233 = vmatpush1.bf16.msra.mxu1 %v1977_v5 }
  0x8b   : > { %1339 = vmatpush1.bf16.msra.mxu0 %v1980_v6  ;;  %1234 = vmatprep.subr.bf16.mxu1 %v1985_v7  ;;  %v297_v6 = vld [vmem:[#allocation2 + $0x20] sm:$0xff] }
  0x8c   : > { %1340 = vmatprep.subr.bf16.mxu0 %v1988_v8 }
  0x8e   : > { %1235 = vmatpush1.bf16.msra.mxu1 %v1983_v9 }
  0x8f   : > { %1341 = vmatpush1.bf16.msra.mxu0 %v1986_v10  ;;  %1236 = vmatprep.subr.bf16.mxu1 %v1991_v11  ;;  %v298_v10 = vld [vmem:[#allocation2 + $0x28] sm:$0xff] }
  0x90   : > { %1342 = vmatprep.subr.bf16.mxu0 %v1994_v12 }
  0x92   : > { %1237 = vmatpush1.bf16.msra.mxu1 %v1989_v13 }
  0x93   : > { %1343 = vmatpush1.bf16.msra.mxu0 %v1992_v14  ;;  %1238 = vmatprep.subr.bf16.mxu1 %v1997_v15  ;;  %v299_v14 = vld [vmem:[#allocation2 + $0x30] sm:$0xff] }
  0x94   : > { %1344 = vmatprep.subr.bf16.mxu0 %v2000_v16 }
  0x96   : > { %1239 = vmatpush1.bf16.msra.mxu1 %v1995_v17 }
  0x97   : > { %1345 = vmatpush1.bf16.msra.mxu0 %v1998_v18  ;;  %1240 = vmatprep.subr.bf16.mxu1 %v2003_v19  ;;  %v300_v19 = vld [vmem:[#allocation2 + $0x38] sm:$0xff] }
  0x98   : > { %1346 = vmatprep.subr.bf16.mxu0 %v2006_v20 }
  0x9a   : > { %1241 = vmatpush1.bf16.msra.mxu1 %v2001_v21 }
  0x9b   : > { %1347 = vmatpush1.bf16.msra.mxu0 %v2004_v22  ;;  %1242 = vmatprep.subr.bf16.mxu1 %v2009_v23 }
  0x9c   : > { %1348 = vmatprep.subr.bf16.mxu0 %v2012_v24 }
  0x9e   : > { %1243 = vmatpush1.bf16.msra.mxu1 %v2007_v25 }
  0x9f   : > { %1349 = vmatpush1.bf16.msra.mxu0 %v2010_v26  ;;  %1244 = vmatprep.subr.bf16.mxu1 %v2015_v27 }
  0xa0   : > { %1350 = vmatprep.subr.bf16.mxu0 %v2018_v28 }
  0xa2   : > { %1245 = vmatpush1.bf16.msra.mxu1 %v2013_v29 }
  0xa3   : > { %1351 = vmatpush1.bf16.msra.mxu0 %v2016_v30  ;;  %1246 = vmatprep.subr.bf16.mxu1 %v2021_v31 }
  0xa4   : > { %1352 = vmatprep.subr.bf16.mxu0 %v2024_v32 }
  0xa6   : > { %1247 = vmatpush1.bf16.msra.mxu1 %v2019_v33 }
  0xa7   : > { %1353 = vmatpush1.bf16.msra.mxu0 %v2022_v34  ;;  %1248 = vmatprep.subr.bf16.mxu1 %v2027_v35 }
  0xa8   : > { %1354 = vmatprep.subr.bf16.mxu0 %v2030_v36 }
  0xaa   : > { %1249 = vmatpush1.bf16.msra.mxu1 %v2025_v37 }
  0xab   : > { %1355 = vmatpush1.bf16.msra.mxu0 %v2028_v38 }
  0xad   : > { %1251 = vmatmul.mubr.bf16.vlgmr.msra.gmra.mrb[0].mxu1 %v1616_v43 }
  0xae   : > { %1357 = vmatmul.mubr.bf16.vlgmr.msra.gmra.mrb[0].mxu0 %v1620_v44  ;;  %1260 = vmatprep.mubr.bf16.mxu1 %v1625_v45 }
  0xaf   : > { %1366 = vmatprep.mubr.bf16.mxu0 %v1629_v46 }
  0xb5   : > { %1261 = vmatmul.mubr.bf16.gmra.mrb[4].mxu1 %v1624_v47 }
  0xb6   : > { %1367 = vmatmul.mubr.bf16.gmra.mrb[4].mxu0 %v1628_v48 }
 0x180   : > { %v1252_v49 = vpop.f32.mrb[0].mxu1 }
 0x181   : > { %v1358_v51 = vpop.f32.mrb[0].mxu0  ;;  %v1254_v53 = vpop.f32.mrb[1].mxu1 }
 0x182   : > { %v1774_v52 = vadd.f32 %v1358_v51, %v1252_v49  ;;  %v1360_v55 = vpop.f32.mrb[1].mxu0  ;;  %v1256_v57 = vpop.f32.mrb[2].mxu1 }
 0x183   : > { %v1775_v56 = vadd.f32 %v1360_v55, %v1254_v53  ;;  %v1362_v59 = vpop.f32.mrb[2].mxu0  ;;  %v1258_v62 = vpop.f32.mrb[3].mxu1 }
 0x184   : > { %v1377_v60 = vadd.f32 %v1774_v52, %v293_v50  ;;  %v1776_v61 = vadd.f32 %v1362_v59, %v1256_v57  ;;  %v1364_v0 = vpop.f32.mrb[3].mxu0 }
 0x185   : > { %v1378_v1 = vadd.f32 %v1775_v56, %v294_v54  ;;  %v1777_v2 = vadd.f32 %v1364_v0, %v1258_v62  ;;  %v1477_v0 = vlaneseq (!%p1758_p11) }
 0x186   : > { %1385 = vst [vmem:[#allocation2] sm:$0xff] %v1377_v60  ;;  %v1379_v3 = vadd.f32 %v1776_v61, %v295_v58 }
 0x187   : > { %1386 = vst [vmem:[#allocation2 + $0x8] sm:$0xff] %v1378_v1  ;;  %v1380_v4 = vadd.f32 %v1777_v2, %v296_v63 }
 0x188   : > { %1387 = vst [vmem:[#allocation2 + $0x10] sm:$0xff] %v1379_v3  ;;  %v1262_v5 = vpop.f32.mrb[4].mxu1 }
 0x189   : > { %1388 = vst [vmem:[#allocation2 + $0x18] sm:$0xff] %v1380_v4  ;;  %v1368_v7 = vpop.f32.mrb[4].mxu0  ;;  %v1264_v9 = vpop.f32.mrb[5].mxu1 }
 0x18a   : > { %v1778_v8 = vadd.f32 %v1368_v7, %v1262_v5  ;;  %v1370_v11 = vpop.f32.mrb[5].mxu0  ;;  %v1266_v13 = vpop.f32.mrb[6].mxu1 }
 0x18b   : > { %v1779_v12 = vadd.f32 %v1370_v11, %v1264_v9  ;;  %v1372_v15 = vpop.f32.mrb[6].mxu0  ;;  %v1268_v18 = vpop.f32.mrb[7].mxu1  ;;  %1396 = sbr.rel (%p1758_p11) target bundleno = 428 (0x1ac), region = 59  ;;  %v1478_v9 = vshrl.u32 (!%p1758_p11), %v1477_v0, 7 }
 0x18c   : > { %v1381_v16 = vadd.f32 %v1778_v8, %v297_v6  ;;  %v1780_v17 = vadd.f32 %v1372_v15, %v1266_v13  ;;  %v1374_v20 = vpop.f32.mrb[7].mxu0 }
 0x18d   : > { %v1382_v21 = vadd.f32 %v1779_v12, %v298_v10  ;;  %v1781_v22 = vadd.f32 %v1374_v20, %v1268_v18  ;;  %v1397_v25 = vld [vmem:[#allocation2] sm:$0xff] (!%p1758_p11)  ;;  %vm1480_vm0 = vcmp.eq.s32.totalorder (!%p1758_p11), %v1478_v9, 1  ;;  %vm1479_vm1 = vcmp.eq.s32.totalorder (!%p1758_p11), %v1478_v9, 0 }
 0x18e   : > { %1389 = vst [vmem:[#allocation2 + $0x20] sm:$0xff] %v1381_v16  ;;  %v1383_v23 = vadd.f32 %v1780_v17, %v299_v14  ;;  %v1398_v26 = vld [vmem:[#allocation2 + $0x8] sm:$0xff] (!%p1758_p11)  ;;  %v1451_v29 = vmul.f32 (!%p1758_p11), %v1397_v25, %v1397_v25 }
 0x18f   : > { %1390 = vst [vmem:[#allocation2 + $0x28] sm:$0xff] %v1382_v21  ;;  %v1384_v24 = vadd.f32 %v1781_v22, %v300_v19  ;;  %v1399_v27 = vld [vmem:[#allocation2 + $0x10] sm:$0xff] (!%p1758_p11)  ;;  %v1770_v28 = vpack.c.bf16 (!%p1758_p11), %v1398_v26, %v1397_v25  ;;  %v1452_v30 = vmul.f32 (!%p1758_p11), %v1398_v26, %v1398_v26 }
 0x190   : > { %1391 = vst [vmem:[#allocation2 + $0x30] sm:$0xff] %v1383_v23  ;;  %v1400_v31 = vld [vmem:[#allocation2 + $0x18] sm:$0xff] (!%p1758_p11)  ;;  %v1433_v32 = vadd.f32 (!%p1758_p11), %v1399_v27, %v1397_v25  ;;  %v1453_v37 = vmul.f32 (!%p1758_p11), %v1399_v27, %v1399_v27 }
 0x191   : > { %1392 = vst [vmem:[#allocation2 + $0x38] sm:$0xff] %v1384_v24  ;;  %v1771_v35 = vpack.c.bf16 (!%p1758_p11), %v1400_v31, %v1399_v27  ;;  %v1442_v36 = vadd.f32 (!%p1758_p11), %v1400_v31, %v1398_v26  ;;  %v1454_v38 = vmul.f32 (!%p1758_p11), %v1400_v31, %v1400_v31  ;;  %1429 = vst [vmem:[%s2361_s2] sm:$0xff] (!%p1758_p11), %v1770_v28 }
 0x192   : > { %v1459_v45 = vadd.f32 %v1453_v37, %v1451_v29 }
 0x193   : > { %1430 = vst [vmem:[%s2361_s2 + $0x8] sm:$0xff] %v1771_v35  ;;  %v1468_v46 = vadd.f32 %v1454_v38, %v1452_v30 }
 0x195   : > { %v1401_v33 = vld [vmem:[#allocation2 + $0x20] sm:$0xff] }
 0x196   : > { %v1402_v34 = vld [vmem:[#allocation2 + $0x28] sm:$0xff]  ;;  %v1434_v42 = vadd.f32 %v1433_v32, %v1401_v33  ;;  %v1455_v43 = vmul.f32 %v1401_v33, %v1401_v33 }
 0x197   : > { %v1403_v39 = vld [vmem:[#allocation2 + $0x30] sm:$0xff]  ;;  %v1772_v41 = vpack.c.bf16 %v1402_v34, %v1401_v33  ;;  %v1456_v44 = vmul.f32 %v1402_v34, %v1402_v34  ;;  %v1443_v47 = vadd.f32 %v1442_v36, %v1402_v34 }
 0x198   : > { %v1404_v40 = vld [vmem:[#allocation2 + $0x38] sm:$0xff]  ;;  %v1435_v49 = vadd.f32 %v1434_v42, %v1403_v39  ;;  %v1457_v50 = vmul.f32 %v1403_v39, %v1403_v39  ;;  %v1460_v52 = vadd.f32 %v1459_v45, %v1455_v43 }
 0x199   : > { %v1773_v48 = vpack.c.bf16 %v1404_v40, %v1403_v39  ;;  %1431 = vst [vmem:[%s2361_s2 + $0x10] sm:$0xff] %v1772_v41  ;;  %v1458_v51 = vmul.f32 %v1404_v40, %v1404_v40  ;;  %v1469_v53 = vadd.f32 %v1468_v46, %v1456_v44  ;;  %v1444_v54 = vadd.f32 %v1443_v47, %v1404_v40 }
 0x19a   : > { %v1436_v55 = vrot.slane %v1435_v49, 4  ;;  %v1461_v57 = vadd.f32 %v1460_v52, %v1457_v50 }
 0x19b   : > { %1432 = vst [vmem:[%s2361_s2 + $0x18] sm:$0xff] %v1773_v48  ;;  %v1445_v56 = vrot.slane %v1444_v54, 4  ;;  %v1470_v58 = vadd.f32 %v1469_v53, %v1458_v51 }
 0x19c   : > { %v1437_v59 = vadd.f32 %v1436_v55, %v1435_v49  ;;  %v1462_v61 = vrot.slane %v1461_v57, 4 }
 0x19d   : > { %v1446_v60 = vadd.f32 %v1445_v56, %v1444_v54  ;;  %v1471_v62 = vrot.slane %v1470_v58, 4 }
 0x19e   : > { %v1438_v63 = vrot.slane %v1437_v59, 2  ;;  %v1463_v1 = vadd.f32 %v1462_v61, %v1461_v57 }
 0x19f   : > { %v1447_v2 = vrot.slane %v1446_v60, 2  ;;  %v1472_v3 = vadd.f32 %v1471_v62, %v1470_v58 }
 0x1a0   : > { %v1439_v4 = vadd.f32 %v1438_v63, %v1437_v59  ;;  %v1464_v5 = vrot.slane %v1463_v1, 2 }
 0x1a1   : > { %v1448_v6 = vadd.f32 %v1447_v2, %v1446_v60  ;;  %v1473_v7 = vrot.slane %v1472_v3, 2 }
 0x1a2   : > { %v1440_v8 = vrot.slane %v1439_v4, 1  ;;  %v1465_v10 = vadd.f32 %v1464_v5, %v1463_v1 }
 0x1a3   : > { %v1449_v11 = vrot.slane %v1448_v6, 1  ;;  %v1474_v12 = vadd.f32 %v1473_v7, %v1472_v3 }
 0x1a4   : > { %v1466_v13 = vrot.slane %v1465_v10, 1  ;;  %v1441_v15 = vadd.f32 %v1440_v8, %v1439_v4 }
 0x1a5   : > { %v1475_v14 = vrot.slane %v1474_v12, 1  ;;  %v1450_v16 = vadd.f32 %v1449_v11, %v1448_v6 }
 0x1a6   : > { %v1467_v17 = vadd.f32 %v1466_v13, %v1465_v10 }
 0x1a7   : > { %v1476_v18 = vadd.f32 %v1475_v14, %v1474_v12 }
 0x1a8   : > { %v1481_v19 = vsel %vm1480_vm0, %v1467_v17, 0.0 }
 0x1a9   : > { %v1482_v20 = vsel %vm1480_vm0, %v1476_v18, 0.0  ;;  %v1483_v21 = vsel %vm1479_vm1, %v1441_v15, %v1481_v19 }
 0x1aa   : > { %v1484_v22 = vsel %vm1479_vm1, %v1450_v16, %v1482_v20  ;;  %1485 = vst [vmem:[%s2362_s3] sm:$0xff] %v1483_v21 }
 0x1ab   : > { %1486 = vst [vmem:[%s2362_s3 + $0x8] sm:$0xff] %v1484_v22 }
 0x1ac PF: > { %s14_s16 = sadd.s32 1, %s2069_s16   ;;  %s2363_s12 = smov %s2057_s13 }
 0x1ad   : > { %p11_p12 = scmp.ge.s32.totalorder %s14_s16, 4   ;;  %s2364_s13 = smov %s2127_s20 }
 0x1ae   : > { %s2365_s14 = smov %s2065_s15  ;;  %s2366_s15 = smov %s2368_s17 }
 0x1af   :  { %13 = sbr.rel (!%p11_p12) target bundleno = 3 (0x3), region = 109 }

// kernel: a_call__.12
= control target key start
LH: loop header
LB: loop body
LE: loop exit
PB: predicated region body
PF: predicated region fallthrough
CT: control target
= control target key end

     0   :  { %v28_v0 = vlaneseq  ;;  %s180_s0 = inlined_call_operand.vmem [shape: bf16[32,256], index: 0, kind: input, shape index: {}]   ;;  %s181_s1 = inlined_call_operand.vmem [shape: f32[1,256], index: 1, kind: input, shape index: {}]   ;;  %s182_s2 = inlined_call_operand.vmem [shape: f32[1,256], index: 2, kind: input, shape index: {}]   ;;  %s183_s3 = inlined_call_operand.vmem [shape: bf16[32,256], index: 3, kind: output, shape index: {}]  }
   0x1   :  { %v14_v1 = vld [vmem:[%s180_s0] sm:$0xff]  ;;  %v15_v3 = vld [vmem:[%s180_s0 + $0x8] sm:$0xff]  ;;  %v16_v4 = vld [vmem:[%s180_s0 + $0x10] sm:$0xff] }
   0x2   :  { %v29_v2 = vshrl.u32 %v28_v0, 7  ;;  %v17_v5 = vld [vmem:[%s180_s0 + $0x18] sm:$0xff]  ;;  %v18_v6 = vunpack.c.l.bf16 %v14_v1  ;;  %v19_v7 = vunpack.c.h.bf16 %v14_v1  ;;  %v26_v8 = vld [vmem:[%s181_s1] sm:$0x3]  ;;  %v20_v12 = vunpack.c.l.bf16 %v15_v3 }
   0x3   :  { %v46_v9 = vld [vmem:[%s182_s2] sm:$0x3]  ;;  %v21_v13 = vunpack.c.h.bf16 %v15_v3  ;;  %v22_v14 = vunpack.c.l.bf16 %v16_v4  ;;  %v23_v15 = vunpack.c.h.bf16 %v16_v4  ;;  %v24_v16 = vunpack.c.l.bf16 %v17_v5 }
   0x4   :  { %v30_v10 = vsub.s32 0, %v29_v2  ;;  %v34_v11 = vsub.s32 1, %v29_v2  ;;  %v25_v17 = vunpack.c.h.bf16 %v17_v5 }
   0x6   :  { %v31_v18 = vrot.slane %v26_v8, %v30_v10  ;;  %v35_v19 = vrot.slane %v26_v8, %v34_v11  ;;  %v51_v20 = vrot.slane %v46_v9, %v30_v10  ;;  %v55_v21 = vrot.slane %v46_v9, %v34_v11 }
   0x8   :  { %v38_v22 = vmul.f32 %v31_v18, %v18_v6  ;;  %v39_v23 = vmul.f32 %v35_v19, %v19_v7  ;;  %v40_v24 = vmul.f32 %v31_v18, %v20_v12  ;;  %v41_v25 = vmul.f32 %v35_v19, %v21_v13 }
   0x9   :  { %v42_v26 = vmul.f32 %v31_v18, %v22_v14  ;;  %v43_v27 = vmul.f32 %v35_v19, %v23_v15  ;;  %v44_v28 = vmul.f32 %v31_v18, %v24_v16  ;;  %v45_v29 = vmul.f32 %v35_v19, %v25_v17 }
   0xa   :  { %v58_v30 = vadd.f32 %v51_v20, %v38_v22  ;;  %v59_v31 = vadd.f32 %v55_v21, %v39_v23  ;;  %v60_v32 = vadd.f32 %v51_v20, %v40_v24  ;;  %v61_v33 = vadd.f32 %v55_v21, %v41_v25 }
   0xb   :  { %v62_v34 = vadd.f32 %v51_v20, %v42_v26  ;;  %v63_v35 = vadd.f32 %v55_v21, %v43_v27  ;;  %v64_v36 = vadd.f32 %v51_v20, %v44_v28  ;;  %v65_v37 = vadd.f32 %v55_v21, %v45_v29 }
   0xc   :  { %vm66_vm0 = vcmp.ge.f32.partialorder %v58_v30, 0.0  ;;  %vm67_vm1 = vcmp.ge.f32.partialorder %v59_v31, 0.0  ;;  %v74_v38 = vmul.f32 0.2, %v58_v30  ;;  %v75_v39 = vmul.f32 0.2, %v59_v31 }
   0xd   :  { %vm68_vm2 = vcmp.ge.f32.partialorder %v60_v32, 0.0  ;;  %vm69_vm3 = vcmp.ge.f32.partialorder %v61_v33, 0.0  ;;  %v76_v40 = vmul.f32 0.2, %v60_v32  ;;  %v77_v41 = vmul.f32 0.2, %v61_v33 }
   0xe   :  { %v82_v42 = vsel %vm66_vm0, %v58_v30, %v74_v38  ;;  %v83_v43 = vsel %vm67_vm1, %v59_v31, %v75_v39  ;;  %vm70_vm4 = vcmp.ge.f32.partialorder %v62_v34, 0.0  ;;  %vm71_vm5 = vcmp.ge.f32.partialorder %v63_v35, 0.0 }
   0xf   :  { %v126_v44 = vpack.c.bf16 %v83_v43, %v82_v42  ;;  %v84_v45 = vsel %vm68_vm2, %v60_v32, %v76_v40  ;;  %v85_v46 = vsel %vm69_vm3, %v61_v33, %v77_v41  ;;  %v78_v47 = vmul.f32 0.2, %v62_v34 }
  0x10   :  { %v127_v48 = vpack.c.bf16 %v85_v46, %v84_v45  ;;  %v79_v49 = vmul.f32 0.2, %v63_v35  ;;  %vm72_vm6 = vcmp.ge.f32.partialorder %v64_v36, 0.0  ;;  %vm73_vm7 = vcmp.ge.f32.partialorder %v65_v37, 0.0 }
  0x11   :  { %114 = vst [vmem:[%s183_s3] sm:$0xff] %v126_v44  ;;  %v86_v50 = vsel %vm70_vm4, %v62_v34, %v78_v47  ;;  %v80_v51 = vmul.f32 0.2, %v64_v36  ;;  %v81_v52 = vmul.f32 0.2, %v65_v37 }
  0x12   :  { %115 = vst [vmem:[%s183_s3 + $0x8] sm:$0xff] %v127_v48  ;;  %v87_v53 = vsel %vm71_vm5, %v63_v35, %v79_v49 }
  0x13   :  { %v128_v54 = vpack.c.bf16 %v87_v53, %v86_v50  ;;  %v88_v55 = vsel %vm72_vm6, %v64_v36, %v80_v51  ;;  %v89_v56 = vsel %vm73_vm7, %v65_v37, %v81_v52 }
  0x14   :  { %v129_v57 = vpack.c.bf16 %v89_v56, %v88_v55 }
  0x15   :  { %116 = vst [vmem:[%s183_s3 + $0x10] sm:$0xff] %v128_v54 }
  0x16   :  { %117 = vst [vmem:[%s183_s3 + $0x18] sm:$0xff] %v129_v57 }

// kernel: a_call__.13
= control target key start
LH: loop header
LB: loop body
LE: loop exit
PB: predicated region body
PF: predicated region fallthrough
CT: control target
= control target key end

     0   :  { %s3449_s12 = smov 0   ;;  %s3451_s13 = smov 0   ;;  %s3859_s0 = inlined_call_operand.vmem [shape: bf16[18,4096], index: 0, kind: input, shape index: {}]   ;;  %s3860_s1 = inlined_call_operand.vmem [shape: bf16[4096,512], index: 1, kind: input, shape index: {}]   ;;  %s3861_s2 = inlined_call_operand.vmem [shape: bf16[18,512], index: 2, kind: output, shape index: {0}]   ;;  %s3862_s3 = inlined_call_operand.vmem [shape: f32[1,8,512], index: 3, kind: output, shape index: {1}]  }
   0x1   :  { %s3453_s14 = smov 0   ;;  %s3455_s15 = smov 0  }
   0x2   :  { %s3457_s16 = smov 0  }
   0x3 LB: > { %s23_s17 = sadd.s32 1, %s3422_s15  ;;  %p42_p1 = scmp.ne.s32.totalorder %s3414_s13, %s3410_s12  ;;  %s3426_s16 = sphi %s3457_s16, %s14_s16   ;;  %s3422_s15 = sphi %s3455_s15, %s3866_s15   ;;  %s3418_s14 = sphi %s3453_s14, %s3865_s14   ;;  %s3414_s13 = sphi %s3451_s13, %s3864_s13   ;;  %s3410_s12 = sphi %s3449_s12, %s3863_s12  }
   0x4   : > { %p24_p0 = scmp.ge.s32.totalorder %s23_s17, 4  ;;  %p43_p2 = scmp.eq.s32.totalorder %s3426_s16, 0 }
   0x5   : > { %s35_s19 = sadd.s32 1, %s3414_s13  ;;  %p2629_p5 = scmp.ge.s32.totalorder %s3426_s16, 4 }
   0x6   : > { %s3868_s17 = smov (%p24_p0, %s23_s17), 0  ;;  %p44_p3 = por %p43_p2, %p42_p1 }
   0x7   : > { %s31_s18 = ssub.s32 %s3422_s15, %s3868_s17  ;;  %146 = sbr.rel (%p2629_p5) target bundleno = 25 (0x19), region = 16 }
   0x8   : > { %p33_p4 = scmp.eq.s32.totalorder %s31_s18, 0 }
   0xa   : > { %s3484_s20 = scalar_select %p33_p4, %s3414_s13, %s35_s19  }
   0xe   : > { %149 = sbr.rel (!%p44_p3) target bundleno = 25 (0x19), region = 20  ;;  %s151_s21 = sand.u32 (%p44_p3), 1, %s3414_s13  }
   0xf   : > { %s2921_s22 = sshll.u32 (%p44_p3), %s3422_s15, 5  ;;  %s2953_s23 = smul.u32 (%p44_p3), 96, %s151_s21 }
  0x10   : > { %s159_s26 = scalar_lea.vmem (%p44_p3), %s3859_s0, %s2921_s22 }
  0x11   : > { %v172_v0 = vld [vmem:[%s159_s26] sm:$0xff] (%p44_p3)  ;;  %v174_v1 = vld [vmem:[%s159_s26 + $0x8] sm:$0xff] (%p44_p3)  ;;  %v176_v2 = vld [vmem:[%s159_s26 + $0x10] sm:$0xff] (%p44_p3)  ;;  %s153_s27 = scalar_lea.vmem (%p44_p3), [#allocation3], %s2953_s23 }
  0x12   : > { %v178_v3 = vld [vmem:[%s159_s26 + $0x18] sm:$0xff] (%p44_p3)  ;;  %v180_v4 = vld [vmem:[%s159_s26 + $0x80] sm:$0xff] (%p44_p3)  ;;  %v182_v5 = vld [vmem:[%s159_s26 + $0x88] sm:$0xff] (%p44_p3)  ;;  %173 = vst [vmem:[%s153_s27] sm:$0xff] (%p44_p3), %v172_v0 }
  0x13   : > { %175 = vst [vmem:[%s153_s27 + $0x8] sm:$0xff] (%p44_p3), %v174_v1  ;;  %177 = vst [vmem:[%s153_s27 + $0x10] sm:$0xff] (%p44_p3), %v176_v2  ;;  %v184_v6 = vld [vmem:[%s159_s26 + $0x90] sm:$0xff] (%p44_p3)  ;;  %v186_v7 = vld [vmem:[%s159_s26 + $0x98] sm:$0xff] (%p44_p3) }
  0x14   : > { %179 = vst [vmem:[%s153_s27 + $0x18] sm:$0xff] (%p44_p3), %v178_v3  ;;  %181 = vst [vmem:[%s153_s27 + $0x20] sm:$0xff] (%p44_p3), %v180_v4  ;;  %v188_v8 = vld [vmem:[%s159_s26 + $0x100] sm:$0xff] (%p44_p3)  ;;  %v190_v9 = vld [vmem:[%s159_s26 + $0x108] sm:$0xff] (%p44_p3) }
  0x15   : > { %183 = vst [vmem:[%s153_s27 + $0x28] sm:$0xff] %v182_v5  ;;  %185 = vst [vmem:[%s153_s27 + $0x30] sm:$0xff] %v184_v6  ;;  %v192_v10 = vld [vmem:[%s159_s26 + $0x110] sm:$0xff]  ;;  %v194_v11 = vld [vmem:[%s159_s26 + $0x118] sm:$0xff] }
  0x16   : > { %187 = vst [vmem:[%s153_s27 + $0x38] sm:$0xff] %v186_v7  ;;  %189 = vst [vmem:[%s153_s27 + $0x40] sm:$0xff] %v188_v8 }
  0x17   : > { %191 = vst [vmem:[%s153_s27 + $0x48] sm:$0xff] %v190_v9  ;;  %193 = vst [vmem:[%s153_s27 + $0x50] sm:$0xff] %v192_v10 }
  0x18   : > { %195 = vst [vmem:[%s153_s27 + $0x58] sm:$0xff] %v194_v11 }
  0x19 PF: > { %p2632_p6 = scmp.ge.s32.totalorder %s3426_s16, 1  ;;  %p210_p7 = scmp.lt.s32.totalorder %s3426_s16, 5 }
  0x1b   : > { %p211_p8 = pnand %p2632_p6, %p210_p7 }
  0x1c   : > { %s217_s28 = sand.u32 (!%p211_p8), 1, %s3410_s12   ;;  %s2633_s29 = sshll.u32 (!%p211_p8), %s3418_s14, 7 }
  0x1d   : > { %214 = sbr.rel (%p211_p8) target bundleno = 558 (0x22e), region = 47  ;;  %p255_p9 = scmp.lt.s32.totalorder (!%p211_p8), %s2633_s29, 511 }
  0x1e   : > { %s2954_s30 = smul.u32 (!%p211_p8), 96, %s217_s28  ;;  %p2636_p10 = scmp.ne.s32.totalorder (!%p211_p8), %s3418_s14, 0 }
  0x20   : > { %s3501_s8 = scalar_lea.vmem (!%p211_p8), [#allocation3], %s2954_s30 }
  0x24   : > { %s3870_s29 = smov (!%p255_p9, %s2633_s29), 511  ;;  %276 = sbr.rel (%p2636_p10) target bundleno = 44 (0x2c), region = 55 }
  0x25   : > { %s2922_s4 = sshll.u32 %s3870_s29, 4  ;;  %v3428_v12 = vmov (!%p2636_p10), 0.0  }
  0x26   : > { %s3499_s7 = scalar_lea.vmem %s3860_s1, %s2922_s4  ;;  %277 = vst [vmem:[#allocation2] sm:$0xff] (!%p2636_p10), %v3428_v12  ;;  %278 = vst [vmem:[#allocation2 + $0x8] sm:$0xff] (!%p2636_p10), %v3428_v12 }
  0x27   : > { %279 = vst [vmem:[#allocation2 + $0x10] sm:$0xff] (!%p2636_p10), %v3428_v12  ;;  %280 = vst [vmem:[#allocation2 + $0x18] sm:$0xff] (!%p2636_p10), %v3428_v12 }
  0x28   : > { %281 = vst [vmem:[#allocation2 + $0x20] sm:$0xff] (!%p2636_p10), %v3428_v12  ;;  %282 = vst [vmem:[#allocation2 + $0x28] sm:$0xff] (!%p2636_p10), %v3428_v12 }
  0x29   : > { %283 = vst [vmem:[#allocation2 + $0x30] sm:$0xff] (!%p2636_p10), %v3428_v12  ;;  %284 = vst [vmem:[#allocation2 + $0x38] sm:$0xff] (!%p2636_p10), %v3428_v12 }
  0x2a   : > { %285 = vst [vmem:[#allocation2 + $0x40] sm:$0x3] (!%p2636_p10), %v3428_v12  ;;  %286 = vst [vmem:[#allocation2 + $0x48] sm:$0x3] (!%p2636_p10), %v3428_v12 }
  0x2b   : > { %287 = vst [vmem:[#allocation2 + $0x50] sm:$0x3] %v3428_v12  ;;  %288 = vst [vmem:[#allocation2 + $0x58] sm:$0x3] %v3428_v12 }
  0x2c PF: > { %v2996_v13 = vld [vmem:[%s3499_s7 + $0x4] ss:$16 sps:$4 sm:$0xff]   ;;  %v2998_v14 = vld [vmem:[%s3499_s7 + $0xc] ss:$16 sps:$4 sm:$0xff]   ;;  %v3000_v15 = vld [vmem:[%s3499_s7] ss:$16 sps:$4 sm:$0xff]  }
  0x2d   : > { %1917 = vmatprep.subr.bf16.mxu0 %v2996_v13  ;;  %v3001_v16 = vld [vmem:[%s3499_s7 + $0x8] ss:$16 sps:$4 sm:$0xff]   ;;  %2121 = vmatprep.subr.bf16.mxu1 %v2998_v14  ;;  %v3002_v17 = vld [vmem:[%s3499_s7 + $0x24] ss:$16 sps:$4 sm:$0xff]   ;;  %v3004_v18 = vld [vmem:[%s3499_s7 + $0x2c] ss:$16 sps:$4 sm:$0xff]  }
  0x2e   : > { %1918 = vmatpush1.bf16.msra.mxu0 %v3000_v15  ;;  %2122 = vmatpush1.bf16.msra.mxu1 %v3001_v16  ;;  %v3006_v19 = vld [vmem:[%s3499_s7 + $0x20] ss:$16 sps:$4 sm:$0xff]   ;;  %v3007_v20 = vld [vmem:[%s3499_s7 + $0x28] ss:$16 sps:$4 sm:$0xff]   ;;  %v3008_v21 = vld [vmem:[%s3499_s7 + $0x44] ss:$16 sps:$4 sm:$0xff]  }
  0x2f   : > { %1919 = vmatprep.subr.bf16.mxu0 %v3002_v17  ;;  %2123 = vmatprep.subr.bf16.mxu1 %v3004_v18  ;;  %v3010_v22 = vld [vmem:[%s3499_s7 + $0x4c] ss:$16 sps:$4 sm:$0xff]   ;;  %v3012_v23 = vld [vmem:[%s3499_s7 + $0x40] ss:$16 sps:$4 sm:$0xff]   ;;  %v3013_v24 = vld [vmem:[%s3499_s7 + $0x48] ss:$16 sps:$4 sm:$0xff]  }
  0x30   : > { %v3014_v25 = vld [vmem:[%s3499_s7 + $0x64] ss:$16 sps:$4 sm:$0xff]   ;;  %v3016_v26 = vld [vmem:[%s3499_s7 + $0x6c] ss:$16 sps:$4 sm:$0xff]   ;;  %v3018_v27 = vld [vmem:[%s3499_s7 + $0x60] ss:$16 sps:$4 sm:$0xff]  }
  0x31   : > { %v3019_v28 = vld [vmem:[%s3499_s7 + $0x68] ss:$16 sps:$4 sm:$0xff]   ;;  %v3020_v29 = vld [vmem:[%s3499_s7 + $0x84] ss:$16 sps:$4 sm:$0xff]   ;;  %v3022_v30 = vld [vmem:[%s3499_s7 + $0x8c] ss:$16 sps:$4 sm:$0xff]  }
  0x32   : > { %1920 = vmatpush1.bf16.msra.mxu0 %v3006_v19  ;;  %2124 = vmatpush1.bf16.msra.mxu1 %v3007_v20  ;;  %v3024_v31 = vld [vmem:[%s3499_s7 + $0x80] ss:$16 sps:$4 sm:$0xff]   ;;  %v3025_v32 = vld [vmem:[%s3499_s7 + $0x88] ss:$16 sps:$4 sm:$0xff]   ;;  %v3026_v33 = vld [vmem:[%s3499_s7 + $0xa4] ss:$16 sps:$4 sm:$0xff]  }
  0x33   : > { %1921 = vmatprep.subr.bf16.mxu0 %v3008_v21  ;;  %2125 = vmatprep.subr.bf16.mxu1 %v3010_v22  ;;  %v3028_v34 = vld [vmem:[%s3499_s7 + $0xac] ss:$16 sps:$4 sm:$0xff]   ;;  %v3030_v35 = vld [vmem:[%s3499_s7 + $0xa0] ss:$16 sps:$4 sm:$0xff]   ;;  %v3031_v36 = vld [vmem:[%s3499_s7 + $0xa8] ss:$16 sps:$4 sm:$0xff]  }
  0x34   : > { %v3032_v37 = vld [vmem:[%s3499_s7 + $0xc4] ss:$16 sps:$4 sm:$0xff]   ;;  %v3034_v38 = vld [vmem:[%s3499_s7 + $0xcc] ss:$16 sps:$4 sm:$0xff]   ;;  %v3036_v39 = vld [vmem:[%s3499_s7 + $0xc0] ss:$16 sps:$4 sm:$0xff]  }
  0x35   : > { %v3037_v40 = vld [vmem:[%s3499_s7 + $0xc8] ss:$16 sps:$4 sm:$0xff]   ;;  %v3038_v41 = vld [vmem:[%s3499_s7 + $0xe4] ss:$16 sps:$4 sm:$0xff]   ;;  %v3040_v42 = vld [vmem:[%s3499_s7 + $0xec] ss:$16 sps:$4 sm:$0xff]  }
  0x36   : > { %1922 = vmatpush1.bf16.msra.mxu0 %v3012_v23  ;;  %2126 = vmatpush1.bf16.msra.mxu1 %v3013_v24  ;;  %v3042_v43 = vld [vmem:[%s3499_s7 + $0xe0] ss:$16 sps:$4 sm:$0xff]   ;;  %v3043_v44 = vld [vmem:[%s3499_s7 + $0xe8] ss:$16 sps:$4 sm:$0xff]   ;;  %v3044_v45 = vld [vmem:[%s3499_s7 + $0x104] ss:$16 sps:$4 sm:$0xff]  }
  0x37   : > { %1923 = vmatprep.subr.bf16.mxu0 %v3014_v25  ;;  %2127 = vmatprep.subr.bf16.mxu1 %v3016_v26  ;;  %v3046_v46 = vld [vmem:[%s3499_s7 + $0x10c] ss:$16 sps:$4 sm:$0xff]   ;;  %v3048_v47 = vld [vmem:[%s3499_s7 + $0x100] ss:$16 sps:$4 sm:$0xff]   ;;  %v3049_v48 = vld [vmem:[%s3499_s7 + $0x108] ss:$16 sps:$4 sm:$0xff]  }
  0x38   : > { %v3050_v49 = vld [vmem:[%s3499_s7 + $0x124] ss:$16 sps:$4 sm:$0xff]   ;;  %v3052_v50 = vld [vmem:[%s3499_s7 + $0x12c] ss:$16 sps:$4 sm:$0xff]   ;;  %v3054_v51 = vld [vmem:[%s3499_s7 + $0x120] ss:$16 sps:$4 sm:$0xff]  }
  0x39   : > { %v3055_v52 = vld [vmem:[%s3499_s7 + $0x128] ss:$16 sps:$4 sm:$0xff]   ;;  %v3056_v53 = vld [vmem:[%s3499_s7 + $0x144] ss:$16 sps:$4 sm:$0xff]   ;;  %v3058_v54 = vld [vmem:[%s3499_s7 + $0x14c] ss:$16 sps:$4 sm:$0xff]  }
  0x3a   : > { %1924 = vmatpush1.bf16.msra.mxu0 %v3018_v27  ;;  %2128 = vmatpush1.bf16.msra.mxu1 %v3019_v28  ;;  %v3060_v55 = vld [vmem:[%s3499_s7 + $0x140] ss:$16 sps:$4 sm:$0xff]   ;;  %v3061_v56 = vld [vmem:[%s3499_s7 + $0x148] ss:$16 sps:$4 sm:$0xff]   ;;  %v3062_v57 = vld [vmem:[%s3499_s7 + $0x164] ss:$16 sps:$4 sm:$0xff]  }
  0x3b   : > { %1925 = vmatprep.subr.bf16.mxu0 %v3020_v29  ;;  %2129 = vmatprep.subr.bf16.mxu1 %v3022_v30  ;;  %v3064_v58 = vld [vmem:[%s3499_s7 + $0x16c] ss:$16 sps:$4 sm:$0xff]   ;;  %v301_v59 = vld [vmem:[%s3501_s8] sm:$0xff]  ;;  %v3067_v62 = vld [vmem:[%s3499_s7 + $0x168] ss:$16 sps:$4 sm:$0xff]   ;;  %p2909_p11 = scmp.ne.s32.totalorder %s3418_s14, 3 }
  0x3c   : > { %v305_v60 = vld [vmem:[%s3501_s8 + $0x20] sm:$0xff]  ;;  %v3070_v1 = vld [vmem:[%s3499_s7 + $0x18c] ss:$16 sps:$4 sm:$0xff]   ;;  %v3073_v3 = vld [vmem:[%s3499_s7 + $0x188] ss:$16 sps:$4 sm:$0xff]   ;;  %vm2412_vm0 = vcmask (!%p2909_p11), 1041408  }
  0x3d   : > { %v3066_v61 = vld [vmem:[%s3499_s7 + $0x160] ss:$16 sps:$4 sm:$0xff]   ;;  %v2638_v63 = vcombine.high %v301_v59, %v305_v60  ;;  %v3068_v0 = vld [vmem:[%s3499_s7 + $0x184] ss:$16 sps:$4 sm:$0xff]   ;;  %v3076_v5 = vld [vmem:[%s3499_s7 + $0x1ac] ss:$16 sps:$4 sm:$0xff]   ;;  %v2637_v18 = vcombine.low %v301_v59, %v305_v60 }
  0x3e   : > { %1926 = vmatpush1.bf16.msra.mxu0 %v3024_v31  ;;  %2130 = vmatpush1.bf16.msra.mxu1 %v3025_v32  ;;  %v3072_v2 = vld [vmem:[%s3499_s7 + $0x180] ss:$16 sps:$4 sm:$0xff]   ;;  %v3074_v4 = vld [vmem:[%s3499_s7 + $0x1a4] ss:$16 sps:$4 sm:$0xff]   ;;  %v3079_v7 = vld [vmem:[%s3499_s7 + $0x1a8] ss:$16 sps:$4 sm:$0xff]  }
  0x3f   : > { %1927 = vmatprep.subr.bf16.mxu0 %v3026_v33  ;;  %2131 = vmatprep.subr.bf16.mxu1 %v3028_v34  ;;  %v3078_v6 = vld [vmem:[%s3499_s7 + $0x1a0] ss:$16 sps:$4 sm:$0xff]   ;;  %v3080_v8 = vld [vmem:[%s3499_s7 + $0x1c4] ss:$16 sps:$4 sm:$0xff]   ;;  %v3082_v9 = vld [vmem:[%s3499_s7 + $0x1cc] ss:$16 sps:$4 sm:$0xff]  }
  0x40   : > { %1949 = vmatprep.mubr.bf16.mxu0 %v2638_v63  ;;  %2153 = vmatprep.mubr.bf16.mxu1 %v2638_v63  ;;  %v3084_v10 = vld [vmem:[%s3499_s7 + $0x1c0] ss:$16 sps:$4 sm:$0xff]   ;;  %v3085_v11 = vld [vmem:[%s3499_s7 + $0x1c8] ss:$16 sps:$4 sm:$0xff]   ;;  %v3086_v12 = vld [vmem:[%s3499_s7 + $0x1e4] ss:$16 sps:$4 sm:$0xff]  }
  0x41   : > { %v3088_v13 = vld [vmem:[%s3499_s7 + $0x1ec] ss:$16 sps:$4 sm:$0xff]   ;;  %v3090_v14 = vld [vmem:[%s3499_s7 + $0x1e0] ss:$16 sps:$4 sm:$0xff]   ;;  %v3091_v15 = vld [vmem:[%s3499_s7 + $0x1e8] ss:$16 sps:$4 sm:$0xff]  }
  0x42   : > { %1928 = vmatpush1.bf16.msra.mxu0 %v3030_v35  ;;  %2132 = vmatpush1.bf16.msra.mxu1 %v3031_v36  ;;  %v3094_v16 = vld [vmem:[%s3499_s7 + $0x204] ss:$16 sps:$4 sm:$0xff]   ;;  %v3097_v17 = vld [vmem:[%s3499_s7 + $0x20c] ss:$16 sps:$4 sm:$0xff]   ;;  %v3092_v19 = vld [vmem:[%s3499_s7 + $0x200] ss:$16 sps:$4 sm:$0xff]  }
  0x43   : > { %1929 = vmatprep.subr.bf16.mxu0 %v3032_v37  ;;  %2133 = vmatprep.subr.bf16.mxu1 %v3034_v38  ;;  %v3095_v20 = vld [vmem:[%s3499_s7 + $0x208] ss:$16 sps:$4 sm:$0xff]   ;;  %v3100_v21 = vld [vmem:[%s3499_s7 + $0x224] ss:$16 sps:$4 sm:$0xff]   ;;  %v3103_v22 = vld [vmem:[%s3499_s7 + $0x22c] ss:$16 sps:$4 sm:$0xff]  }
  0x44   : > { %v3098_v23 = vld [vmem:[%s3499_s7 + $0x220] ss:$16 sps:$4 sm:$0xff]   ;;  %v3101_v24 = vld [vmem:[%s3499_s7 + $0x228] ss:$16 sps:$4 sm:$0xff]   ;;  %v3106_v25 = vld [vmem:[%s3499_s7 + $0x244] ss:$16 sps:$4 sm:$0xff]  }
  0x45   : > { %v3109_v26 = vld [vmem:[%s3499_s7 + $0x24c] ss:$16 sps:$4 sm:$0xff]   ;;  %v3104_v27 = vld [vmem:[%s3499_s7 + $0x240] ss:$16 sps:$4 sm:$0xff]   ;;  %v3107_v28 = vld [vmem:[%s3499_s7 + $0x248] ss:$16 sps:$4 sm:$0xff]  }
  0x46   : > { %1930 = vmatpush1.bf16.msra.mxu0 %v3036_v39  ;;  %2134 = vmatpush1.bf16.msra.mxu1 %v3037_v40  ;;  %v3112_v29 = vld [vmem:[%s3499_s7 + $0x264] ss:$16 sps:$4 sm:$0xff]   ;;  %v3115_v30 = vld [vmem:[%s3499_s7 + $0x26c] ss:$16 sps:$4 sm:$0xff]   ;;  %v3110_v31 = vld [vmem:[%s3499_s7 + $0x260] ss:$16 sps:$4 sm:$0xff]  }
  0x47   : > { %1931 = vmatprep.subr.bf16.mxu0 %v3038_v41  ;;  %2135 = vmatprep.subr.bf16.mxu1 %v3040_v42  ;;  %v3113_v32 = vld [vmem:[%s3499_s7 + $0x268] ss:$16 sps:$4 sm:$0xff]   ;;  %v3118_v33 = vld [vmem:[%s3499_s7 + $0x284] ss:$16 sps:$4 sm:$0xff]   ;;  %v3121_v34 = vld [vmem:[%s3499_s7 + $0x28c] ss:$16 sps:$4 sm:$0xff]  }
  0x48   : > { %v3116_v35 = vld [vmem:[%s3499_s7 + $0x280] ss:$16 sps:$4 sm:$0xff]   ;;  %v3119_v36 = vld [vmem:[%s3499_s7 + $0x288] ss:$16 sps:$4 sm:$0xff]   ;;  %v3124_v37 = vld [vmem:[%s3499_s7 + $0x2a4] ss:$16 sps:$4 sm:$0xff]  }
  0x49   : > { %v309_v38 = vld [vmem:[%s3501_s8 + $0x40] sm:$0x11]  ;;  %v3127_v39 = vld [vmem:[%s3499_s7 + $0x2ac] ss:$16 sps:$4 sm:$0xff]  }
  0x4a   : > { %1932 = vmatpush1.bf16.msra.mxu0 %v3042_v43  ;;  %2136 = vmatpush1.bf16.msra.mxu1 %v3043_v44  ;;  %v2646_v40 = vcombine.high %v309_v38, %v309_v38  ;;  %v2645_v41 = vcombine.low %v309_v38, %v309_v38  ;;  %v3122_v42 = vld [vmem:[%s3499_s7 + $0x2a0] ss:$16 sps:$4 sm:$0xff]   ;;  %v3125_v43 = vld [vmem:[%s3499_s7 + $0x2a8] ss:$16 sps:$4 sm:$0xff]   ;;  %v3130_v44 = vld [vmem:[%s3499_s7 + $0x2c4] ss:$16 sps:$4 sm:$0xff]  }
  0x4b   : > { %1933 = vmatprep.subr.bf16.mxu0 %v3044_v45  ;;  %2137 = vmatprep.subr.bf16.mxu1 %v3046_v46  ;;  %v3133_v45 = vld [vmem:[%s3499_s7 + $0x2cc] ss:$16 sps:$4 sm:$0xff]   ;;  %v3148_v59 = vld [vmem:[%s3499_s7 + $0x324] ss:$16 sps:$4 sm:$0xff]  }
  0x4c   : > { %v3598_v46 = vld [vmem:[%s3501_s8 + $0x8] sm:$0xff]  ;;  %v3154_v63 = vld [vmem:[%s3499_s7 + $0x344] ss:$16 sps:$4 sm:$0xff]  }
  0x4d   : > { %v3151_v60 = vld [vmem:[%s3499_s7 + $0x32c] ss:$16 sps:$4 sm:$0xff]   ;;  %v3658_v38 = vld [vmem:[%s3501_s8 + $0x10] sm:$0xff] }
  0x4e   : > { %1934 = vmatpush1.bf16.msra.mxu0 %v3048_v47  ;;  %2138 = vmatpush1.bf16.msra.mxu1 %v3049_v48  ;;  %v3601_v47 = vld [vmem:[%s3501_s8 + $0x28] sm:$0xff]  ;;  %v3128_v48 = vld [vmem:[%s3499_s7 + $0x2c0] ss:$16 sps:$4 sm:$0xff]  }
  0x4f   : > { %1935 = vmatprep.subr.bf16.mxu0 %v3050_v49  ;;  %2139 = vmatprep.subr.bf16.mxu1 %v3052_v50  ;;  %v2640_v49 = vcombine.high %v3598_v46, %v3601_v47  ;;  %v3131_v50 = vld [vmem:[%s3499_s7 + $0x2c8] ss:$16 sps:$4 sm:$0xff]  }
  0x52   : > { %1936 = vmatpush1.bf16.msra.mxu0 %v3054_v51  ;;  %2140 = vmatpush1.bf16.msra.mxu1 %v3055_v52  ;;  %v3136_v51 = vld [vmem:[%s3499_s7 + $0x2e4] ss:$16 sps:$4 sm:$0xff]   ;;  %v3139_v52 = vld [vmem:[%s3499_s7 + $0x2ec] ss:$16 sps:$4 sm:$0xff]  }
  0x53   : > { %1937 = vmatprep.subr.bf16.mxu0 %v3056_v53  ;;  %2141 = vmatprep.subr.bf16.mxu1 %v3058_v54  ;;  %v3134_v53 = vld [vmem:[%s3499_s7 + $0x2e0] ss:$16 sps:$4 sm:$0xff]   ;;  %v3137_v54 = vld [vmem:[%s3499_s7 + $0x2e8] ss:$16 sps:$4 sm:$0xff]  }
  0x56   : > { %1938 = vmatpush1.bf16.msra.mxu0 %v3060_v55  ;;  %2142 = vmatpush1.bf16.msra.mxu1 %v3061_v56  ;;  %v3142_v55 = vld [vmem:[%s3499_s7 + $0x304] ss:$16 sps:$4 sm:$0xff]   ;;  %v3145_v56 = vld [vmem:[%s3499_s7 + $0x30c] ss:$16 sps:$4 sm:$0xff]  }
  0x57   : > { %1939 = vmatprep.subr.bf16.mxu0 %v3062_v57  ;;  %2143 = vmatprep.subr.bf16.mxu1 %v3064_v58  ;;  %v3140_v57 = vld [vmem:[%s3499_s7 + $0x300] ss:$16 sps:$4 sm:$0xff]   ;;  %v3143_v58 = vld [vmem:[%s3499_s7 + $0x308] ss:$16 sps:$4 sm:$0xff]  }
  0x5a   : > { %1940 = vmatpush1.bf16.msra.mxu0 %v3066_v61  ;;  %2144 = vmatpush1.bf16.msra.mxu1 %v3067_v62  ;;  %v3146_v61 = vld [vmem:[%s3499_s7 + $0x320] ss:$16 sps:$4 sm:$0xff]   ;;  %v3149_v62 = vld [vmem:[%s3499_s7 + $0x328] ss:$16 sps:$4 sm:$0xff]  }
  0x5b   : > { %1941 = vmatprep.subr.bf16.mxu0 %v3068_v0  ;;  %2145 = vmatprep.subr.bf16.mxu1 %v3070_v1  ;;  %v3157_v0 = vld [vmem:[%s3499_s7 + $0x34c] ss:$16 sps:$4 sm:$0xff]   ;;  %v3152_v1 = vld [vmem:[%s3499_s7 + $0x340] ss:$16 sps:$4 sm:$0xff]  }
  0x5e   : > { %1942 = vmatpush1.bf16.msra.mxu0 %v3072_v2  ;;  %2146 = vmatpush1.bf16.msra.mxu1 %v3073_v3  ;;  %v3155_v2 = vld [vmem:[%s3499_s7 + $0x348] ss:$16 sps:$4 sm:$0xff]   ;;  %v3160_v3 = vld [vmem:[%s3499_s7 + $0x364] ss:$16 sps:$4 sm:$0xff]  }
  0x5f   : > { %1943 = vmatprep.subr.bf16.mxu0 %v3074_v4  ;;  %2147 = vmatprep.subr.bf16.mxu1 %v3076_v5  ;;  %v3163_v4 = vld [vmem:[%s3499_s7 + $0x36c] ss:$16 sps:$4 sm:$0xff]   ;;  %v3158_v5 = vld [vmem:[%s3499_s7 + $0x360] ss:$16 sps:$4 sm:$0xff]  }
  0x62   : > { %1944 = vmatpush1.bf16.msra.mxu0 %v3078_v6  ;;  %2148 = vmatpush1.bf16.msra.mxu1 %v3079_v7  ;;  %v3161_v6 = vld [vmem:[%s3499_s7 + $0x368] ss:$16 sps:$4 sm:$0xff]   ;;  %v3166_v7 = vld [vmem:[%s3499_s7 + $0x384] ss:$16 sps:$4 sm:$0xff]  }
  0x63   : > { %1945 = vmatprep.subr.bf16.mxu0 %v3080_v8  ;;  %2149 = vmatprep.subr.bf16.mxu1 %v3082_v9  ;;  %v3169_v8 = vld [vmem:[%s3499_s7 + $0x38c] ss:$16 sps:$4 sm:$0xff]   ;;  %v3164_v9 = vld [vmem:[%s3499_s7 + $0x380] ss:$16 sps:$4 sm:$0xff]  }
  0x66   : > { %1946 = vmatpush1.bf16.msra.mxu0 %v3084_v10  ;;  %2150 = vmatpush1.bf16.msra.mxu1 %v3085_v11  ;;  %v3167_v10 = vld [vmem:[%s3499_s7 + $0x388] ss:$16 sps:$4 sm:$0xff]   ;;  %v3172_v11 = vld [vmem:[%s3499_s7 + $0x3a4] ss:$16 sps:$4 sm:$0xff]  }
  0x67   : > { %1947 = vmatprep.subr.bf16.mxu0 %v3086_v12  ;;  %2151 = vmatprep.subr.bf16.mxu1 %v3088_v13  ;;  %v3175_v12 = vld [vmem:[%s3499_s7 + $0x3ac] ss:$16 sps:$4 sm:$0xff]   ;;  %v3170_v13 = vld [vmem:[%s3499_s7 + $0x3a0] ss:$16 sps:$4 sm:$0xff]  }
  0x6a   : > { %1948 = vmatpush1.bf16.msra.mxu0 %v3090_v14  ;;  %2152 = vmatpush1.bf16.msra.mxu1 %v3091_v15  ;;  %v3173_v14 = vld [vmem:[%s3499_s7 + $0x3a8] ss:$16 sps:$4 sm:$0xff]   ;;  %v3180_v15 = vld [vmem:[%s3499_s7 + $0x3c4] ss:$16 sps:$4 sm:$0xff]  }
  0x6b   : > { %1968 = vmatprep.subr.bf16.mxu0 %v3094_v16  ;;  %2172 = vmatprep.subr.bf16.mxu1 %v3097_v17  ;;  %v3183_v16 = vld [vmem:[%s3499_s7 + $0x3cc] ss:$16 sps:$4 sm:$0xff]   ;;  %v3178_v17 = vld [vmem:[%s3499_s7 + $0x3c0] ss:$16 sps:$4 sm:$0xff]  }
  0x6d   : > { %1950 = vmatmul.mubr.bf16.vlgmr.msra.gmra.mrb[0].mxu0 %v2637_v18  ;;  %2154 = vmatmul.mubr.bf16.vlgmr.msra.gmra.mrb[0].mxu1 %v2637_v18  ;;  %v3181_v18 = vld [vmem:[%s3499_s7 + $0x3c8] ss:$16 sps:$4 sm:$0xff]  }
  0x6e   : > { %1969 = vmatpush1.bf16.msra.mxu0 %v3092_v19  ;;  %2173 = vmatpush1.bf16.msra.mxu1 %v3095_v20  ;;  %v3186_v19 = vld [vmem:[%s3499_s7 + $0x3e4] ss:$16 sps:$4 sm:$0xff]   ;;  %v3189_v20 = vld [vmem:[%s3499_s7 + $0x3ec] ss:$16 sps:$4 sm:$0xff]  }
  0x6f   : > { %1970 = vmatprep.subr.bf16.mxu0 %v3100_v21  ;;  %2174 = vmatprep.subr.bf16.mxu1 %v3103_v22  ;;  %v3184_v21 = vld [vmem:[%s3499_s7 + $0x3e0] ss:$16 sps:$4 sm:$0xff]   ;;  %v3187_v22 = vld [vmem:[%s3499_s7 + $0x3e8] ss:$16 sps:$4 sm:$0xff]  }
  0x70   : > { %1959 = vmatprep.mubr.bf16.mxu0 %v2646_v40  ;;  %2163 = vmatprep.mubr.bf16.mxu1 %v2646_v40  ;;  %v3207_v40 = vld [vmem:[%s3499_s7 + $0x448] ss:$16 sps:$4 sm:$0xff]  }
  0x72   : > { %1971 = vmatpush1.bf16.msra.mxu0 %v3098_v23  ;;  %2175 = vmatpush1.bf16.msra.mxu1 %v3101_v24  ;;  %v3192_v23 = vld [vmem:[%s3499_s7 + $0x404] ss:$16 sps:$4 sm:$0xff]   ;;  %v3195_v24 = vld [vmem:[%s3499_s7 + $0x40c] ss:$16 sps:$4 sm:$0xff]  }
  0x73   : > { %1972 = vmatprep.subr.bf16.mxu0 %v3106_v25  ;;  %2176 = vmatprep.subr.bf16.mxu1 %v3109_v26  ;;  %v2639_v25 = vcombine.low %v3598_v46, %v3601_v47  ;;  %v310_v26 = vld [vmem:[%s3501_s8 + $0x48] sm:$0x11]  ;;  %v3218_v46 = vld [vmem:[%s3499_s7 + $0x484] ss:$16 sps:$4 sm:$0xff]  }
  0x74   : > { %v3221_v47 = vld [vmem:[%s3499_s7 + $0x48c] ss:$16 sps:$4 sm:$0xff]  }
  0x75   : > { %1960 = vmatmul.mubr.bf16.gmra.mrb[4].mxu0 %v2645_v41  ;;  %2164 = vmatmul.mubr.bf16.gmra.mrb[4].mxu1 %v2645_v41  ;;  %v3212_v41 = vld [vmem:[%s3499_s7 + $0x464] ss:$16 sps:$4 sm:$0xff]  }
  0x76   : > { %1973 = vmatpush1.bf16.msra.mxu0 %v3104_v27  ;;  %2177 = vmatpush1.bf16.msra.mxu1 %v3107_v28  ;;  %v3190_v27 = vld [vmem:[%s3499_s7 + $0x400] ss:$16 sps:$4 sm:$0xff]   ;;  %v3193_v28 = vld [vmem:[%s3499_s7 + $0x408] ss:$16 sps:$4 sm:$0xff]  }
  0x77   : > { %1974 = vmatprep.subr.bf16.mxu0 %v3112_v29  ;;  %2178 = vmatprep.subr.bf16.mxu1 %v3115_v30  ;;  %v3198_v29 = vld [vmem:[%s3499_s7 + $0x424] ss:$16 sps:$4 sm:$0xff]   ;;  %v3201_v30 = vld [vmem:[%s3499_s7 + $0x42c] ss:$16 sps:$4 sm:$0xff]  }
  0x78   : > { %2000 = vmatprep.mubr.bf16.mxu0 %v2640_v49  ;;  %2204 = vmatprep.mubr.bf16.mxu1 %v2640_v49  ;;  %v3219_v49 = vld [vmem:[%s3499_s7 + $0x488] ss:$16 sps:$4 sm:$0xff]  }
  0x7a   : > { %1975 = vmatpush1.bf16.msra.mxu0 %v3110_v31  ;;  %2179 = vmatpush1.bf16.msra.mxu1 %v3113_v32  ;;  %v2648_v31 = vcombine.high %v310_v26, %v310_v26  ;;  %v3196_v32 = vld [vmem:[%s3499_s7 + $0x420] ss:$16 sps:$4 sm:$0xff]  }
  0x7b   : > { %1976 = vmatprep.subr.bf16.mxu0 %v3118_v33  ;;  %2180 = vmatprep.subr.bf16.mxu1 %v3121_v34  ;;  %v3199_v33 = vld [vmem:[%s3499_s7 + $0x428] ss:$16 sps:$4 sm:$0xff]   ;;  %v3206_v34 = vld [vmem:[%s3499_s7 + $0x444] ss:$16 sps:$4 sm:$0xff]  }
  0x7e   : > { %1977 = vmatpush1.bf16.msra.mxu0 %v3116_v35  ;;  %2181 = vmatpush1.bf16.msra.mxu1 %v3119_v36  ;;  %v3209_v35 = vld [vmem:[%s3499_s7 + $0x44c] ss:$16 sps:$4 sm:$0xff]   ;;  %v3204_v36 = vld [vmem:[%s3499_s7 + $0x440] ss:$16 sps:$4 sm:$0xff]  }
  0x7f   : > { %1978 = vmatprep.subr.bf16.mxu0 %v3124_v37  ;;  %2182 = vmatprep.subr.bf16.mxu1 %v3127_v39  ;;  %v2647_v37 = vcombine.low %v310_v26, %v310_v26  ;;  %v3661_v39 = vld [vmem:[%s3501_s8 + $0x30] sm:$0xff] }
  0x80   : > { %v3284_v26 = vld [vmem:[%s3499_s7 + $0x5e4] ss:$16 sps:$4 sm:$0xff]  }
  0x82   : > { %1979 = vmatpush1.bf16.msra.mxu0 %v3122_v42  ;;  %2183 = vmatpush1.bf16.msra.mxu1 %v3125_v43  ;;  %v3215_v42 = vld [vmem:[%s3499_s7 + $0x46c] ss:$16 sps:$4 sm:$0xff]   ;;  %v2642_v43 = vcombine.high %v3658_v38, %v3661_v39 }
  0x83   : > { %1980 = vmatprep.subr.bf16.mxu0 %v3130_v44  ;;  %2184 = vmatprep.subr.bf16.mxu1 %v3133_v45  ;;  %v3210_v44 = vld [vmem:[%s3499_s7 + $0x460] ss:$16 sps:$4 sm:$0xff]   ;;  %v3213_v45 = vld [vmem:[%s3499_s7 + $0x468] ss:$16 sps:$4 sm:$0xff]  }
  0x86   : > { %1981 = vmatpush1.bf16.msra.mxu0 %v3128_v48  ;;  %2185 = vmatpush1.bf16.msra.mxu1 %v3131_v50  ;;  %v3216_v48 = vld [vmem:[%s3499_s7 + $0x480] ss:$16 sps:$4 sm:$0xff]   ;;  %v3224_v50 = vld [vmem:[%s3499_s7 + $0x4a4] ss:$16 sps:$4 sm:$0xff]  }
  0x87   : > { %1982 = vmatprep.subr.bf16.mxu0 %v3136_v51  ;;  %2186 = vmatprep.subr.bf16.mxu1 %v3139_v52  ;;  %v3227_v51 = vld [vmem:[%s3499_s7 + $0x4ac] ss:$16 sps:$4 sm:$0xff]   ;;  %v3222_v52 = vld [vmem:[%s3499_s7 + $0x4a0] ss:$16 sps:$4 sm:$0xff]  }
  0x8a   : > { %1983 = vmatpush1.bf16.msra.mxu0 %v3134_v53  ;;  %2187 = vmatpush1.bf16.msra.mxu1 %v3137_v54  ;;  %v3225_v53 = vld [vmem:[%s3499_s7 + $0x4a8] ss:$16 sps:$4 sm:$0xff]   ;;  %v3230_v54 = vld [vmem:[%s3499_s7 + $0x4c4] ss:$16 sps:$4 sm:$0xff]  }
  0x8b   : > { %1984 = vmatprep.subr.bf16.mxu0 %v3142_v55  ;;  %2188 = vmatprep.subr.bf16.mxu1 %v3145_v56  ;;  %v3233_v55 = vld [vmem:[%s3499_s7 + $0x4cc] ss:$16 sps:$4 sm:$0xff]   ;;  %v3228_v56 = vld [vmem:[%s3499_s7 + $0x4c0] ss:$16 sps:$4 sm:$0xff]  }
  0x8e   : > { %1985 = vmatpush1.bf16.msra.mxu0 %v3140_v57  ;;  %2189 = vmatpush1.bf16.msra.mxu1 %v3143_v58  ;;  %v3231_v57 = vld [vmem:[%s3499_s7 + $0x4c8] ss:$16 sps:$4 sm:$0xff]   ;;  %v3236_v58 = vld [vmem:[%s3499_s7 + $0x4e4] ss:$16 sps:$4 sm:$0xff]  }
  0x8f   : > { %1986 = vmatprep.subr.bf16.mxu0 %v3148_v59  ;;  %2190 = vmatprep.subr.bf16.mxu1 %v3151_v60  ;;  %v3239_v59 = vld [vmem:[%s3499_s7 + $0x4ec] ss:$16 sps:$4 sm:$0xff]   ;;  %v3234_v60 = vld [vmem:[%s3499_s7 + $0x4e0] ss:$16 sps:$4 sm:$0xff]  }
  0x92   : > { %1987 = vmatpush1.bf16.msra.mxu0 %v3146_v61  ;;  %2191 = vmatpush1.bf16.msra.mxu1 %v3149_v62  ;;  %v3237_v61 = vld [vmem:[%s3499_s7 + $0x4e8] ss:$16 sps:$4 sm:$0xff]   ;;  %v3242_v62 = vld [vmem:[%s3499_s7 + $0x504] ss:$16 sps:$4 sm:$0xff]  }
  0x93   : > { %1988 = vmatprep.subr.bf16.mxu0 %v3154_v63  ;;  %2192 = vmatprep.subr.bf16.mxu1 %v3157_v0  ;;  %v3245_v63 = vld [vmem:[%s3499_s7 + $0x50c] ss:$16 sps:$4 sm:$0xff]   ;;  %v3240_v0 = vld [vmem:[%s3499_s7 + $0x500] ss:$16 sps:$4 sm:$0xff]  }
  0x96   : > { %1989 = vmatpush1.bf16.msra.mxu0 %v3152_v1  ;;  %2193 = vmatpush1.bf16.msra.mxu1 %v3155_v2  ;;  %v3243_v1 = vld [vmem:[%s3499_s7 + $0x508] ss:$16 sps:$4 sm:$0xff]   ;;  %v3248_v2 = vld [vmem:[%s3499_s7 + $0x524] ss:$16 sps:$4 sm:$0xff]  }
  0x97   : > { %1990 = vmatprep.subr.bf16.mxu0 %v3160_v3  ;;  %2194 = vmatprep.subr.bf16.mxu1 %v3163_v4  ;;  %v3251_v3 = vld [vmem:[%s3499_s7 + $0x52c] ss:$16 sps:$4 sm:$0xff]   ;;  %v3246_v4 = vld [vmem:[%s3499_s7 + $0x520] ss:$16 sps:$4 sm:$0xff]  }
  0x9a   : > { %1991 = vmatpush1.bf16.msra.mxu0 %v3158_v5  ;;  %2195 = vmatpush1.bf16.msra.mxu1 %v3161_v6  ;;  %v3249_v5 = vld [vmem:[%s3499_s7 + $0x528] ss:$16 sps:$4 sm:$0xff]   ;;  %v3254_v6 = vld [vmem:[%s3499_s7 + $0x544] ss:$16 sps:$4 sm:$0xff]  }
  0x9b   : > { %1992 = vmatprep.subr.bf16.mxu0 %v3166_v7  ;;  %2196 = vmatprep.subr.bf16.mxu1 %v3169_v8  ;;  %v3257_v7 = vld [vmem:[%s3499_s7 + $0x54c] ss:$16 sps:$4 sm:$0xff]   ;;  %v3252_v8 = vld [vmem:[%s3499_s7 + $0x540] ss:$16 sps:$4 sm:$0xff]  }
  0x9e   : > { %1993 = vmatpush1.bf16.msra.mxu0 %v3164_v9  ;;  %2197 = vmatpush1.bf16.msra.mxu1 %v3167_v10  ;;  %v3255_v9 = vld [vmem:[%s3499_s7 + $0x548] ss:$16 sps:$4 sm:$0xff]   ;;  %v3260_v10 = vld [vmem:[%s3499_s7 + $0x564] ss:$16 sps:$4 sm:$0xff]  }
  0x9f   : > { %1994 = vmatprep.subr.bf16.mxu0 %v3172_v11  ;;  %2198 = vmatprep.subr.bf16.mxu1 %v3175_v12  ;;  %v3263_v11 = vld [vmem:[%s3499_s7 + $0x56c] ss:$16 sps:$4 sm:$0xff]   ;;  %v3258_v12 = vld [vmem:[%s3499_s7 + $0x560] ss:$16 sps:$4 sm:$0xff]  }
  0xa2   : > { %1995 = vmatpush1.bf16.msra.mxu0 %v3170_v13  ;;  %2199 = vmatpush1.bf16.msra.mxu1 %v3173_v14  ;;  %v3261_v13 = vld [vmem:[%s3499_s7 + $0x568] ss:$16 sps:$4 sm:$0xff]   ;;  %v3266_v14 = vld [vmem:[%s3499_s7 + $0x584] ss:$16 sps:$4 sm:$0xff]  }
  0xa3   : > { %1996 = vmatprep.subr.bf16.mxu0 %v3180_v15  ;;  %2200 = vmatprep.subr.bf16.mxu1 %v3183_v16  ;;  %v3269_v15 = vld [vmem:[%s3499_s7 + $0x58c] ss:$16 sps:$4 sm:$0xff]   ;;  %v3264_v16 = vld [vmem:[%s3499_s7 + $0x580] ss:$16 sps:$4 sm:$0xff]  }
  0xa6   : > { %1997 = vmatpush1.bf16.msra.mxu0 %v3178_v17  ;;  %2201 = vmatpush1.bf16.msra.mxu1 %v3181_v18  ;;  %v3267_v17 = vld [vmem:[%s3499_s7 + $0x588] ss:$16 sps:$4 sm:$0xff]   ;;  %v3272_v18 = vld [vmem:[%s3499_s7 + $0x5a4] ss:$16 sps:$4 sm:$0xff]  }
  0xa7   : > { %1998 = vmatprep.subr.bf16.mxu0 %v3186_v19  ;;  %2202 = vmatprep.subr.bf16.mxu1 %v3189_v20  ;;  %v3275_v19 = vld [vmem:[%s3499_s7 + $0x5ac] ss:$16 sps:$4 sm:$0xff]   ;;  %v3270_v20 = vld [vmem:[%s3499_s7 + $0x5a0] ss:$16 sps:$4 sm:$0xff]  }
  0xaa   : > { %1999 = vmatpush1.bf16.msra.mxu0 %v3184_v21  ;;  %2203 = vmatpush1.bf16.msra.mxu1 %v3187_v22  ;;  %v3273_v21 = vld [vmem:[%s3499_s7 + $0x5a8] ss:$16 sps:$4 sm:$0xff]   ;;  %v3278_v22 = vld [vmem:[%s3499_s7 + $0x5c4] ss:$16 sps:$4 sm:$0xff]  }
  0xab   : > { %2019 = vmatprep.subr.bf16.mxu0 %v3192_v23  ;;  %2223 = vmatprep.subr.bf16.mxu1 %v3195_v24  ;;  %v3281_v23 = vld [vmem:[%s3499_s7 + $0x5cc] ss:$16 sps:$4 sm:$0xff]   ;;  %v3276_v24 = vld [vmem:[%s3499_s7 + $0x5c0] ss:$16 sps:$4 sm:$0xff]  }
  0xad   : > { %2001 = vmatmul.mubr.bf16.vlgmr.msra.gmra.mrb[0].mxu0 %v2639_v25  ;;  %2205 = vmatmul.mubr.bf16.vlgmr.msra.gmra.mrb[0].mxu1 %v2639_v25  ;;  %v3279_v25 = vld [vmem:[%s3499_s7 + $0x5c8] ss:$16 sps:$4 sm:$0xff]  }
  0xae   : > { %2020 = vmatpush1.bf16.msra.mxu0 %v3190_v27  ;;  %2224 = vmatpush1.bf16.msra.mxu1 %v3193_v28  ;;  %v3287_v27 = vld [vmem:[%s3499_s7 + $0x5ec] ss:$16 sps:$4 sm:$0xff]   ;;  %v3282_v28 = vld [vmem:[%s3499_s7 + $0x5e0] ss:$16 sps:$4 sm:$0xff]  }
  0xaf   : > { %2021 = vmatprep.subr.bf16.mxu0 %v3198_v29  ;;  %2225 = vmatprep.subr.bf16.mxu1 %v3201_v30  ;;  %v3285_v29 = vld [vmem:[%s3499_s7 + $0x5e8] ss:$16 sps:$4 sm:$0xff]   ;;  %v3290_v30 = vld [vmem:[%s3499_s7 + $0x604] ss:$16 sps:$4 sm:$0xff]  }
  0xb0   : > { %2010 = vmatprep.mubr.bf16.mxu0 %v2648_v31  ;;  %2214 = vmatprep.mubr.bf16.mxu1 %v2648_v31  ;;  %v3293_v31 = vld [vmem:[%s3499_s7 + $0x60c] ss:$16 sps:$4 sm:$0xff]  }
  0xb2   : > { %2022 = vmatpush1.bf16.msra.mxu0 %v3196_v32  ;;  %2226 = vmatpush1.bf16.msra.mxu1 %v3199_v33  ;;  %v2641_v32 = vcombine.low %v3658_v38, %v3661_v39  ;;  %v311_v33 = vld [vmem:[%s3501_s8 + $0x50] sm:$0x11]  ;;  %v3297_v39 = vld [vmem:[%s3499_s7 + $0x628] ss:$16 sps:$4 sm:$0xff]  }
  0xb3   : > { %2023 = vmatprep.subr.bf16.mxu0 %v3206_v34  ;;  %2227 = vmatprep.subr.bf16.mxu1 %v3209_v35  ;;  %v3288_v34 = vld [vmem:[%s3499_s7 + $0x600] ss:$16 sps:$4 sm:$0xff]   ;;  %v3291_v35 = vld [vmem:[%s3499_s7 + $0x608] ss:$16 sps:$4 sm:$0xff]  }
  0xb4   : > { %v3294_v38 = vld [vmem:[%s3499_s7 + $0x620] ss:$16 sps:$4 sm:$0xff]  }
  0xb5   : > { %2011 = vmatmul.mubr.bf16.gmra.mrb[8].mxu0 %v2647_v37  ;;  %2215 = vmatmul.mubr.bf16.gmra.mrb[8].mxu1 %v2647_v37  ;;  %v3299_v37 = vld [vmem:[%s3499_s7 + $0x62c] ss:$16 sps:$4 sm:$0xff]  }
  0xb6   : > { %2024 = vmatpush1.bf16.msra.mxu0 %v3204_v36  ;;  %2228 = vmatpush1.bf16.msra.mxu1 %v3207_v40  ;;  %v3296_v36 = vld [vmem:[%s3499_s7 + $0x624] ss:$16 sps:$4 sm:$0xff]   ;;  %v2650_v40 = vcombine.high %v311_v33, %v311_v33 }
  0xb7   : > { %2025 = vmatprep.subr.bf16.mxu0 %v3212_v41  ;;  %2229 = vmatprep.subr.bf16.mxu1 %v3215_v42  ;;  %v3304_v41 = vld [vmem:[%s3499_s7 + $0x644] ss:$16 sps:$4 sm:$0xff]   ;;  %v3307_v42 = vld [vmem:[%s3499_s7 + $0x64c] ss:$16 sps:$4 sm:$0xff]  }
  0xb8   : > { %2051 = vmatprep.mubr.bf16.mxu0 %v2642_v43  ;;  %2255 = vmatprep.mubr.bf16.mxu1 %v2642_v43  ;;  %v2649_v43 = vcombine.low %v311_v33, %v311_v33  ;;  %v3382_v33 = vld [vmem:[%s3499_s7 + $0x7e4] ss:$16 sps:$4 sm:$0xff]  }
  0xba   : > { %2026 = vmatpush1.bf16.msra.mxu0 %v3210_v44  ;;  %2230 = vmatpush1.bf16.msra.mxu1 %v3213_v45  ;;  %v3732_v44 = vld [vmem:[%s3501_s8 + $0x18] sm:$0xff] }
  0xbb   : > { %2027 = vmatprep.subr.bf16.mxu0 %v3218_v46  ;;  %2231 = vmatprep.subr.bf16.mxu1 %v3221_v47  ;;  %v3735_v45 = vld [vmem:[%s3501_s8 + $0x38] sm:$0xff]  ;;  %v3302_v46 = vld [vmem:[%s3499_s7 + $0x640] ss:$16 sps:$4 sm:$0xff]  }
  0xbc   : > { %v3305_v47 = vld [vmem:[%s3499_s7 + $0x648] ss:$16 sps:$4 sm:$0xff]  }
  0xbe   : > { %2028 = vmatpush1.bf16.msra.mxu0 %v3216_v48  ;;  %2232 = vmatpush1.bf16.msra.mxu1 %v3219_v49  ;;  %v3310_v48 = vld [vmem:[%s3499_s7 + $0x664] ss:$16 sps:$4 sm:$0xff]   ;;  %v3313_v49 = vld [vmem:[%s3499_s7 + $0x66c] ss:$16 sps:$4 sm:$0xff]  }
  0xbf   : > { %2029 = vmatprep.subr.bf16.mxu0 %v3224_v50  ;;  %2233 = vmatprep.subr.bf16.mxu1 %v3227_v51  ;;  %v2644_v50 = vcombine.high %v3732_v44, %v3735_v45  ;;  %v3308_v51 = vld [vmem:[%s3499_s7 + $0x660] ss:$16 sps:$4 sm:$0xff]  }
  0xc2   : > { %2030 = vmatpush1.bf16.msra.mxu0 %v3222_v52  ;;  %2234 = vmatpush1.bf16.msra.mxu1 %v3225_v53  ;;  %v3311_v52 = vld [vmem:[%s3499_s7 + $0x668] ss:$16 sps:$4 sm:$0xff]   ;;  %v3316_v53 = vld [vmem:[%s3499_s7 + $0x684] ss:$16 sps:$4 sm:$0xff]  }
  0xc3   : > { %2031 = vmatprep.subr.bf16.mxu0 %v3230_v54  ;;  %2235 = vmatprep.subr.bf16.mxu1 %v3233_v55  ;;  %v3319_v54 = vld [vmem:[%s3499_s7 + $0x68c] ss:$16 sps:$4 sm:$0xff]   ;;  %v3314_v55 = vld [vmem:[%s3499_s7 + $0x680] ss:$16 sps:$4 sm:$0xff]  }
  0xc6   : > { %2032 = vmatpush1.bf16.msra.mxu0 %v3228_v56  ;;  %2236 = vmatpush1.bf16.msra.mxu1 %v3231_v57  ;;  %v3317_v56 = vld [vmem:[%s3499_s7 + $0x688] ss:$16 sps:$4 sm:$0xff]   ;;  %v3322_v57 = vld [vmem:[%s3499_s7 + $0x6a4] ss:$16 sps:$4 sm:$0xff]  }
  0xc7   : > { %2033 = vmatprep.subr.bf16.mxu0 %v3236_v58  ;;  %2237 = vmatprep.subr.bf16.mxu1 %v3239_v59  ;;  %v3325_v58 = vld [vmem:[%s3499_s7 + $0x6ac] ss:$16 sps:$4 sm:$0xff]   ;;  %v3320_v59 = vld [vmem:[%s3499_s7 + $0x6a0] ss:$16 sps:$4 sm:$0xff]  }
  0xca   : > { %2034 = vmatpush1.bf16.msra.mxu0 %v3234_v60  ;;  %2238 = vmatpush1.bf16.msra.mxu1 %v3237_v61  ;;  %v3323_v60 = vld [vmem:[%s3499_s7 + $0x6a8] ss:$16 sps:$4 sm:$0xff]   ;;  %v3328_v61 = vld [vmem:[%s3499_s7 + $0x6c4] ss:$16 sps:$4 sm:$0xff]  }
  0xcb   : > { %2035 = vmatprep.subr.bf16.mxu0 %v3242_v62  ;;  %2239 = vmatprep.subr.bf16.mxu1 %v3245_v63  ;;  %v3331_v62 = vld [vmem:[%s3499_s7 + $0x6cc] ss:$16 sps:$4 sm:$0xff]   ;;  %v3326_v63 = vld [vmem:[%s3499_s7 + $0x6c0] ss:$16 sps:$4 sm:$0xff]  }
  0xce   : > { %2036 = vmatpush1.bf16.msra.mxu0 %v3240_v0  ;;  %2240 = vmatpush1.bf16.msra.mxu1 %v3243_v1  ;;  %v3329_v0 = vld [vmem:[%s3499_s7 + $0x6c8] ss:$16 sps:$4 sm:$0xff]   ;;  %v3334_v1 = vld [vmem:[%s3499_s7 + $0x6e4] ss:$16 sps:$4 sm:$0xff]  }
  0xcf   : > { %2037 = vmatprep.subr.bf16.mxu0 %v3248_v2  ;;  %2241 = vmatprep.subr.bf16.mxu1 %v3251_v3  ;;  %v3337_v2 = vld [vmem:[%s3499_s7 + $0x6ec] ss:$16 sps:$4 sm:$0xff]   ;;  %v3332_v3 = vld [vmem:[%s3499_s7 + $0x6e0] ss:$16 sps:$4 sm:$0xff]  }
  0xd2   : > { %2038 = vmatpush1.bf16.msra.mxu0 %v3246_v4  ;;  %2242 = vmatpush1.bf16.msra.mxu1 %v3249_v5  ;;  %v3335_v4 = vld [vmem:[%s3499_s7 + $0x6e8] ss:$16 sps:$4 sm:$0xff]   ;;  %v3340_v5 = vld [vmem:[%s3499_s7 + $0x704] ss:$16 sps:$4 sm:$0xff]  }
  0xd3   : > { %2039 = vmatprep.subr.bf16.mxu0 %v3254_v6  ;;  %2243 = vmatprep.subr.bf16.mxu1 %v3257_v7  ;;  %v3343_v6 = vld [vmem:[%s3499_s7 + $0x70c] ss:$16 sps:$4 sm:$0xff]   ;;  %v3338_v7 = vld [vmem:[%s3499_s7 + $0x700] ss:$16 sps:$4 sm:$0xff]  }
  0xd6   : > { %2040 = vmatpush1.bf16.msra.mxu0 %v3252_v8  ;;  %2244 = vmatpush1.bf16.msra.mxu1 %v3255_v9  ;;  %v3341_v8 = vld [vmem:[%s3499_s7 + $0x708] ss:$16 sps:$4 sm:$0xff]   ;;  %v3346_v9 = vld [vmem:[%s3499_s7 + $0x724] ss:$16 sps:$4 sm:$0xff]  }
  0xd7   : > { %2041 = vmatprep.subr.bf16.mxu0 %v3260_v10  ;;  %2245 = vmatprep.subr.bf16.mxu1 %v3263_v11  ;;  %v3349_v10 = vld [vmem:[%s3499_s7 + $0x72c] ss:$16 sps:$4 sm:$0xff]   ;;  %v3344_v11 = vld [vmem:[%s3499_s7 + $0x720] ss:$16 sps:$4 sm:$0xff]  }
  0xda   : > { %2042 = vmatpush1.bf16.msra.mxu0 %v3258_v12  ;;  %2246 = vmatpush1.bf16.msra.mxu1 %v3261_v13  ;;  %v3347_v12 = vld [vmem:[%s3499_s7 + $0x728] ss:$16 sps:$4 sm:$0xff]   ;;  %v3352_v13 = vld [vmem:[%s3499_s7 + $0x744] ss:$16 sps:$4 sm:$0xff]  }
  0xdb   : > { %2043 = vmatprep.subr.bf16.mxu0 %v3266_v14  ;;  %2247 = vmatprep.subr.bf16.mxu1 %v3269_v15  ;;  %v3355_v14 = vld [vmem:[%s3499_s7 + $0x74c] ss:$16 sps:$4 sm:$0xff]   ;;  %v3350_v15 = vld [vmem:[%s3499_s7 + $0x740] ss:$16 sps:$4 sm:$0xff]  }
  0xde   : > { %2044 = vmatpush1.bf16.msra.mxu0 %v3264_v16  ;;  %2248 = vmatpush1.bf16.msra.mxu1 %v3267_v17  ;;  %v3353_v16 = vld [vmem:[%s3499_s7 + $0x748] ss:$16 sps:$4 sm:$0xff]   ;;  %v3358_v17 = vld [vmem:[%s3499_s7 + $0x764] ss:$16 sps:$4 sm:$0xff]  }
  0xdf   : > { %2045 = vmatprep.subr.bf16.mxu0 %v3272_v18  ;;  %2249 = vmatprep.subr.bf16.mxu1 %v3275_v19  ;;  %v3361_v18 = vld [vmem:[%s3499_s7 + $0x76c] ss:$16 sps:$4 sm:$0xff]   ;;  %v3356_v19 = vld [vmem:[%s3499_s7 + $0x760] ss:$16 sps:$4 sm:$0xff]  }
  0xe2   : > { %2046 = vmatpush1.bf16.msra.mxu0 %v3270_v20  ;;  %2250 = vmatpush1.bf16.msra.mxu1 %v3273_v21  ;;  %v3359_v20 = vld [vmem:[%s3499_s7 + $0x768] ss:$16 sps:$4 sm:$0xff]   ;;  %v3364_v21 = vld [vmem:[%s3499_s7 + $0x784] ss:$16 sps:$4 sm:$0xff]  }
  0xe3   : > { %2047 = vmatprep.subr.bf16.mxu0 %v3278_v22  ;;  %2251 = vmatprep.subr.bf16.mxu1 %v3281_v23  ;;  %v3367_v22 = vld [vmem:[%s3499_s7 + $0x78c] ss:$16 sps:$4 sm:$0xff]   ;;  %v3362_v23 = vld [vmem:[%s3499_s7 + $0x780] ss:$16 sps:$4 sm:$0xff]  }
  0xe6   : > { %2048 = vmatpush1.bf16.msra.mxu0 %v3276_v24  ;;  %2252 = vmatpush1.bf16.msra.mxu1 %v3279_v25  ;;  %v3365_v24 = vld [vmem:[%s3499_s7 + $0x788] ss:$16 sps:$4 sm:$0xff]   ;;  %v3370_v25 = vld [vmem:[%s3499_s7 + $0x7a4] ss:$16 sps:$4 sm:$0xff]  }
  0xe7   : > { %2049 = vmatprep.subr.bf16.mxu0 %v3284_v26  ;;  %2253 = vmatprep.subr.bf16.mxu1 %v3287_v27  ;;  %v3373_v26 = vld [vmem:[%s3499_s7 + $0x7ac] ss:$16 sps:$4 sm:$0xff]   ;;  %v3368_v27 = vld [vmem:[%s3499_s7 + $0x7a0] ss:$16 sps:$4 sm:$0xff]  }
  0xea   : > { %2050 = vmatpush1.bf16.msra.mxu0 %v3282_v28  ;;  %2254 = vmatpush1.bf16.msra.mxu1 %v3285_v29  ;;  %v3371_v28 = vld [vmem:[%s3499_s7 + $0x7a8] ss:$16 sps:$4 sm:$0xff]   ;;  %v3376_v29 = vld [vmem:[%s3499_s7 + $0x7c4] ss:$16 sps:$4 sm:$0xff]  }
  0xeb   : > { %2070 = vmatprep.subr.bf16.mxu0 %v3290_v30  ;;  %2274 = vmatprep.subr.bf16.mxu1 %v3293_v31  ;;  %v3379_v30 = vld [vmem:[%s3499_s7 + $0x7cc] ss:$16 sps:$4 sm:$0xff]   ;;  %v3374_v31 = vld [vmem:[%s3499_s7 + $0x7c0] ss:$16 sps:$4 sm:$0xff]  }
  0xed   : > { %2052 = vmatmul.mubr.bf16.vlgmr.msra.gmra.mrb[0].mxu0 %v2641_v32  ;;  %2256 = vmatmul.mubr.bf16.vlgmr.msra.gmra.mrb[0].mxu1 %v2641_v32  ;;  %v3377_v32 = vld [vmem:[%s3499_s7 + $0x7c8] ss:$16 sps:$4 sm:$0xff]  }
  0xee   : > { %2071 = vmatpush1.bf16.msra.mxu0 %v3288_v34  ;;  %2275 = vmatpush1.bf16.msra.mxu1 %v3291_v35  ;;  %v3385_v34 = vld [vmem:[%s3499_s7 + $0x7ec] ss:$16 sps:$4 sm:$0xff]   ;;  %v3380_v35 = vld [vmem:[%s3499_s7 + $0x7e0] ss:$16 sps:$4 sm:$0xff]  }
  0xef   : > { %2072 = vmatprep.subr.bf16.mxu0 %v3296_v36  ;;  %2276 = vmatprep.subr.bf16.mxu1 %v3299_v37  ;;  %v3383_v36 = vld [vmem:[%s3499_s7 + $0x7e8] ss:$16 sps:$4 sm:$0xff]  }
  0xf0   : > { %2061 = vmatprep.mubr.bf16.mxu0 %v2650_v40  ;;  %2265 = vmatprep.mubr.bf16.mxu1 %v2650_v40  ;;  %v312_v37 = vld [vmem:[%s3501_s8 + $0x58] sm:$0x11]  ;;  %v2643_v40 = vcombine.low %v3732_v44, %v3735_v45 }
  0xf2   : > { %2073 = vmatpush1.bf16.msra.mxu0 %v3294_v38  ;;  %2277 = vmatpush1.bf16.msra.mxu1 %v3297_v39  ;;  %v2652_v38 = vcombine.high %v312_v37, %v312_v37  ;;  %v2651_v39 = vcombine.low %v312_v37, %v312_v37 }
  0xf3   : > { %2074 = vmatprep.subr.bf16.mxu0 %v3304_v41  ;;  %2278 = vmatprep.subr.bf16.mxu1 %v3307_v42 }
  0xf5   : > { %2062 = vmatmul.mubr.bf16.gmra.mrb[12].mxu0 %v2649_v43  ;;  %2266 = vmatmul.mubr.bf16.gmra.mrb[12].mxu1 %v2649_v43 }
  0xf6   : > { %2075 = vmatpush1.bf16.msra.mxu0 %v3302_v46  ;;  %2279 = vmatpush1.bf16.msra.mxu1 %v3305_v47 }
  0xf7   : > { %2076 = vmatprep.subr.bf16.mxu0 %v3310_v48  ;;  %2280 = vmatprep.subr.bf16.mxu1 %v3313_v49 }
  0xf8   : > { %2102 = vmatprep.mubr.bf16.mxu0 %v2644_v50  ;;  %2306 = vmatprep.mubr.bf16.mxu1 %v2644_v50 }
  0xfa   : > { %2077 = vmatpush1.bf16.msra.mxu0 %v3308_v51  ;;  %2281 = vmatpush1.bf16.msra.mxu1 %v3311_v52 }
  0xfb   : > { %2078 = vmatprep.subr.bf16.mxu0 %v3316_v53  ;;  %2282 = vmatprep.subr.bf16.mxu1 %v3319_v54 }
  0xfe   : > { %2079 = vmatpush1.bf16.msra.mxu0 %v3314_v55  ;;  %2283 = vmatpush1.bf16.msra.mxu1 %v3317_v56 }
  0xff   : > { %2080 = vmatprep.subr.bf16.mxu0 %v3322_v57  ;;  %2284 = vmatprep.subr.bf16.mxu1 %v3325_v58 }
 0x102   : > { %2081 = vmatpush1.bf16.msra.mxu0 %v3320_v59  ;;  %2285 = vmatpush1.bf16.msra.mxu1 %v3323_v60 }
 0x103   : > { %2082 = vmatprep.subr.bf16.mxu0 %v3328_v61  ;;  %2286 = vmatprep.subr.bf16.mxu1 %v3331_v62 }
 0x106   : > { %2083 = vmatpush1.bf16.msra.mxu0 %v3326_v63  ;;  %2287 = vmatpush1.bf16.msra.mxu1 %v3329_v0 }
 0x107   : > { %2084 = vmatprep.subr.bf16.mxu0 %v3334_v1  ;;  %2288 = vmatprep.subr.bf16.mxu1 %v3337_v2 }
 0x10a   : > { %2085 = vmatpush1.bf16.msra.mxu0 %v3332_v3  ;;  %2289 = vmatpush1.bf16.msra.mxu1 %v3335_v4 }
 0x10b   : > { %2086 = vmatprep.subr.bf16.mxu0 %v3340_v5  ;;  %2290 = vmatprep.subr.bf16.mxu1 %v3343_v6 }
 0x10e   : > { %2087 = vmatpush1.bf16.msra.mxu0 %v3338_v7  ;;  %2291 = vmatpush1.bf16.msra.mxu1 %v3341_v8 }
 0x10f   : > { %2088 = vmatprep.subr.bf16.mxu0 %v3346_v9  ;;  %2292 = vmatprep.subr.bf16.mxu1 %v3349_v10  ;;  %v289_v9 = vld [vmem:[#allocation2] sm:$0xff]  ;;  %v291_v10 = vld [vmem:[#allocation2 + $0x10] sm:$0xff] }
 0x112   : > { %2089 = vmatpush1.bf16.msra.mxu0 %v3344_v11  ;;  %2293 = vmatpush1.bf16.msra.mxu1 %v3347_v12  ;;  %v290_v11 = vld [vmem:[#allocation2 + $0x8] sm:$0xff]  ;;  %v292_v12 = vld [vmem:[#allocation2 + $0x18] sm:$0xff] }
 0x113   : > { %2090 = vmatprep.subr.bf16.mxu0 %v3352_v13  ;;  %2294 = vmatprep.subr.bf16.mxu1 %v3355_v14 }
 0x116   : > { %2091 = vmatpush1.bf16.msra.mxu0 %v3350_v15  ;;  %2295 = vmatpush1.bf16.msra.mxu1 %v3353_v16  ;;  %v293_v15 = vld [vmem:[#allocation2 + $0x20] sm:$0xff]  ;;  %v295_v16 = vld [vmem:[#allocation2 + $0x30] sm:$0xff] }
 0x117   : > { %2092 = vmatprep.subr.bf16.mxu0 %v3358_v17  ;;  %2296 = vmatprep.subr.bf16.mxu1 %v3361_v18 }
 0x11a   : > { %2093 = vmatpush1.bf16.msra.mxu0 %v3356_v19  ;;  %2297 = vmatpush1.bf16.msra.mxu1 %v3359_v20 }
 0x11b   : > { %2094 = vmatprep.subr.bf16.mxu0 %v3364_v21  ;;  %2298 = vmatprep.subr.bf16.mxu1 %v3367_v22  ;;  %v294_v21 = vld [vmem:[#allocation2 + $0x28] sm:$0xff]  ;;  %v296_v22 = vld [vmem:[#allocation2 + $0x38] sm:$0xff] }
 0x11e   : > { %2095 = vmatpush1.bf16.msra.mxu0 %v3362_v23  ;;  %2299 = vmatpush1.bf16.msra.mxu1 %v3365_v24 }
 0x11f   : > { %2096 = vmatprep.subr.bf16.mxu0 %v3370_v25  ;;  %2300 = vmatprep.subr.bf16.mxu1 %v3373_v26 }
 0x122   : > { %2097 = vmatpush1.bf16.msra.mxu0 %v3368_v27  ;;  %2301 = vmatpush1.bf16.msra.mxu1 %v3371_v28 }
 0x123   : > { %2098 = vmatprep.subr.bf16.mxu0 %v3376_v29  ;;  %2302 = vmatprep.subr.bf16.mxu1 %v3379_v30 }
 0x126   : > { %2099 = vmatpush1.bf16.msra.mxu0 %v3374_v31  ;;  %2303 = vmatpush1.bf16.msra.mxu1 %v3377_v32 }
 0x127   : > { %2100 = vmatprep.subr.bf16.mxu0 %v3382_v33  ;;  %2304 = vmatprep.subr.bf16.mxu1 %v3385_v34  ;;  %v297_v33 = vld [vmem:[#allocation2 + $0x40] sm:$0x3] }
 0x12a   : > { %2101 = vmatpush1.bf16.msra.mxu0 %v3380_v35  ;;  %2305 = vmatpush1.bf16.msra.mxu1 %v3383_v36  ;;  %v299_v35 = vld [vmem:[#allocation2 + $0x50] sm:$0x3] }
 0x12d   : > { %2103 = vmatmul.mubr.bf16.vlgmr.msra.gmra.mrb[0].mxu0 %v2643_v40  ;;  %2307 = vmatmul.mubr.bf16.vlgmr.msra.gmra.mrb[0].mxu1 %v2643_v40 }
 0x12e   : > { %2112 = vmatprep.mubr.bf16.mxu0 %v2652_v38  ;;  %2316 = vmatprep.mubr.bf16.mxu1 %v2652_v38  ;;  %v298_v38 = vld [vmem:[#allocation2 + $0x48] sm:$0x3] }
 0x135   : > { %2113 = vmatmul.mubr.bf16.gmra.mrb[16].mxu0 %v2651_v39  ;;  %2317 = vmatmul.mubr.bf16.gmra.mrb[16].mxu1 %v2651_v39 }
 0x148   : > { %v1961_v41 = vpop.f32.mrb[4].mxu0  ;;  %v2165_v42 = vpop.f32.mrb[4].mxu1 }
 0x149   : > { %v1963_v43 = vpop.f32.mrb[5].mxu0  ;;  %v2167_v46 = vpop.f32.mrb[5].mxu1 }
 0x14a   : > { %v1965_v47 = vpop.f32.mrb[6].mxu0  ;;  %v2169_v48 = vpop.f32.mrb[6].mxu1 }
 0x14b   : > { %v1966_v49 = vpop.f32.mrb[7].mxu0  ;;  %v2170_v50 = vpop.f32.mrb[7].mxu1 }
 0x188   : > { %v2012_v51 = vpop.f32.mrb[8].mxu0  ;;  %v2216_v44 = vpop.f32.mrb[8].mxu1 }
 0x189   : > { %v2013_v45 = vadd.f32 %v2012_v51, %v1961_v41  ;;  %v2217_v52 = vadd.f32 %v2216_v44, %v2165_v42  ;;  %v2014_v53 = vpop.f32.mrb[9].mxu0  ;;  %v2218_v54 = vpop.f32.mrb[9].mxu1  ;;  %v300_v41 = vld [vmem:[#allocation2 + $0x58] sm:$0x3] }
 0x18a   : > { %v2015_v55 = vadd.f32 %v2014_v53, %v1963_v43  ;;  %v2219_v56 = vadd.f32 %v2218_v54, %v2167_v46  ;;  %v2016_v57 = vpop.f32.mrb[10].mxu0  ;;  %v2220_v58 = vpop.f32.mrb[10].mxu1 }
 0x18b   : > { %v2017_v59 = vpop.f32.mrb[11].mxu0  ;;  %v2221_v60 = vpop.f32.mrb[11].mxu1 }
 0x1c8   : > { %v2063_v61 = vpop.f32.mrb[12].mxu0  ;;  %v2267_v62 = vpop.f32.mrb[12].mxu1 }
 0x1c9   : > { %v2064_v63 = vadd.f32 %v2063_v61, %v2013_v45  ;;  %v2268_v0 = vadd.f32 %v2267_v62, %v2217_v52  ;;  %v2065_v1 = vpop.f32.mrb[13].mxu0  ;;  %v2269_v2 = vpop.f32.mrb[13].mxu1 }
 0x1ca   : > { %v2066_v3 = vadd.f32 %v2065_v1, %v2015_v55  ;;  %v2270_v4 = vadd.f32 %v2269_v2, %v2219_v56  ;;  %v2067_v5 = vpop.f32.mrb[14].mxu0  ;;  %v2271_v6 = vpop.f32.mrb[14].mxu1  ;;  %v2496_v56 = vlaneseq (!%p2909_p11) }
 0x1cb   : > { %v2068_v7 = vpop.f32.mrb[15].mxu0  ;;  %v2272_v8 = vpop.f32.mrb[15].mxu1 }
 0x200   : > { %v2104_v13 = vpop.f32.mrb[0].mxu0  ;;  %v2308_v14 = vpop.f32.mrb[0].mxu1 }
 0x201   : > { %v2325_v17 = vadd.f32 %v2104_v13, %v289_v9  ;;  %v2327_v18 = vadd.f32 %v2308_v14, %v291_v10  ;;  %v2106_v19 = vpop.f32.mrb[1].mxu0  ;;  %v2310_v20 = vpop.f32.mrb[1].mxu1 }
 0x202   : > { %v2326_v23 = vadd.f32 %v2106_v19, %v290_v11  ;;  %v2328_v24 = vadd.f32 %v2310_v20, %v292_v12  ;;  %v2108_v25 = vpop.f32.mrb[2].mxu0  ;;  %v2312_v26 = vpop.f32.mrb[2].mxu1 }
 0x203   : > { %2337 = vst [vmem:[#allocation2] sm:$0xff] %v2325_v17  ;;  %2339 = vst [vmem:[#allocation2 + $0x10] sm:$0xff] %v2327_v18  ;;  %v2329_v27 = vadd.f32 %v2108_v25, %v293_v15  ;;  %v2331_v28 = vadd.f32 %v2312_v26, %v295_v16  ;;  %v2110_v29 = vpop.f32.mrb[3].mxu0  ;;  %v2314_v30 = vpop.f32.mrb[3].mxu1 }
 0x204   : > { %2338 = vst [vmem:[#allocation2 + $0x8] sm:$0xff] %v2326_v23  ;;  %2340 = vst [vmem:[#allocation2 + $0x18] sm:$0xff] %v2328_v24  ;;  %v2330_v31 = vadd.f32 %v2110_v29, %v294_v21  ;;  %v2332_v32 = vadd.f32 %v2314_v30, %v296_v22 }
 0x205   : > { %2341 = vst [vmem:[#allocation2 + $0x20] sm:$0xff] %v2329_v27  ;;  %2343 = vst [vmem:[#allocation2 + $0x30] sm:$0xff] %v2331_v28 }
 0x206   : > { %2342 = vst [vmem:[#allocation2 + $0x28] sm:$0xff] %v2330_v31  ;;  %2344 = vst [vmem:[#allocation2 + $0x38] sm:$0xff] %v2332_v32 }
 0x208   : > { %v2114_v34 = vpop.f32.mrb[16].mxu0  ;;  %v2318_v36 = vpop.f32.mrb[16].mxu1  ;;  %2352 = sbr.rel (%p2909_p11) target bundleno = 558 (0x22e), region = 59 }
 0x209   : > { %v2115_v37 = vadd.f32 %v2114_v34, %v2064_v63  ;;  %v2319_v40 = vadd.f32 %v2318_v36, %v2268_v0  ;;  %v2116_v39 = vpop.f32.mrb[17].mxu0  ;;  %v2320_v42 = vpop.f32.mrb[17].mxu1 }
 0x20a   : > { %v2117_v43 = vadd.f32 %v2116_v39, %v2066_v3  ;;  %v2321_v46 = vadd.f32 %v2320_v42, %v2270_v4  ;;  %v2118_v47 = vpop.f32.mrb[18].mxu0  ;;  %v2322_v48 = vpop.f32.mrb[18].mxu1  ;;  %v2353_v53 = vld [vmem:[#allocation2] sm:$0xff] (!%p2909_p11)  ;;  %v2355_v55 = vld [vmem:[#allocation2 + $0x10] sm:$0xff] (!%p2909_p11) }
 0x20b   : > { %v2333_v49 = vadd.f32 %v2115_v37, %v297_v33  ;;  %v2335_v50 = vadd.f32 %v2319_v40, %v299_v35  ;;  %v2119_v51 = vpop.f32.mrb[19].mxu0  ;;  %v2323_v44 = vpop.f32.mrb[19].mxu1  ;;  %v2354_v54 = vld [vmem:[#allocation2 + $0x8] sm:$0xff] (!%p2909_p11)  ;;  %v2448_v58 = vmul.f32 (!%p2909_p11), %v2353_v53, %v2353_v53  ;;  %v2356_v60 = vld [vmem:[#allocation2 + $0x18] sm:$0xff] (!%p2909_p11)  ;;  %v2450_v61 = vmul.f32 (!%p2909_p11), %v2355_v55, %v2355_v55 }
 0x20c   : > { %v2334_v45 = vadd.f32 %v2117_v43, %v298_v38  ;;  %v2336_v52 = vadd.f32 %v2321_v46, %v300_v41  ;;  %v2923_v57 = vpack.c.bf16 (!%p2909_p11), %v2354_v54, %v2353_v53  ;;  %v2449_v59 = vmul.f32 (!%p2909_p11), %v2354_v54, %v2354_v54  ;;  %v2357_v62 = vld [vmem:[#allocation2 + $0x20] sm:$0xff] (!%p2909_p11)  ;;  %v2359_v4 = vld [vmem:[#allocation2 + $0x30] sm:$0xff] (!%p2909_p11) }
 0x20d   : > { %2345 = vst [vmem:[#allocation2 + $0x40] sm:$0x3] %v2333_v49  ;;  %2347 = vst [vmem:[#allocation2 + $0x50] sm:$0x3] %v2335_v50  ;;  %v2358_v63 = vld [vmem:[#allocation2 + $0x28] sm:$0xff] (!%p2909_p11)  ;;  %v2924_v0 = vpack.c.bf16 (!%p2909_p11), %v2356_v60, %v2355_v55  ;;  %v2451_v1 = vmul.f32 (!%p2909_p11), %v2356_v60, %v2356_v60  ;;  %v2411_v3 = vadd.f32 (!%p2909_p11), %v2357_v62, %v2353_v53  ;;  %v2360_v5 = vld [vmem:[#allocation2 + $0x38] sm:$0xff] (!%p2909_p11) }
 0x20e   : > { %2346 = vst [vmem:[#allocation2 + $0x48] sm:$0x3] %v2334_v45  ;;  %2348 = vst [vmem:[#allocation2 + $0x58] sm:$0x3] %v2336_v52  ;;  %v2925_v2 = vpack.c.bf16 (!%p2909_p11), %v2358_v63, %v2357_v62  ;;  %v2421_v6 = vadd.f32 (!%p2909_p11), %v2358_v63, %v2354_v54  ;;  %v2452_v7 = vmul.f32 (!%p2909_p11), %v2357_v62, %v2357_v62 }
 0x20f   : > { %2405 = vst [vmem:[%s3861_s2] sm:$0xff] %v2923_v57  ;;  %v2453_v8 = vmul.f32 %v2358_v63, %v2358_v63  ;;  %v2926_v9 = vpack.c.bf16 %v2360_v5, %v2359_v4  ;;  %2406 = vst [vmem:[%s3861_s2 + $0x8] sm:$0xff] %v2924_v0  ;;  %v2430_v10 = vadd.f32 %v2359_v4, %v2355_v55 }
 0x210   : > { %2407 = vst [vmem:[%s3861_s2 + $0x10] sm:$0xff] %v2925_v2  ;;  %v2439_v11 = vadd.f32 %v2360_v5, %v2356_v60  ;;  %v2454_v12 = vmul.f32 %v2359_v4, %v2359_v4  ;;  %v2455_v13 = vmul.f32 %v2360_v5, %v2360_v5  ;;  %v2460_v16 = vadd.f32 %v2452_v7, %v2448_v58 }
 0x211   : > { %v2469_v17 = vadd.f32 %v2453_v8, %v2449_v59  ;;  %2408 = vst [vmem:[%s3861_s2 + $0x18] sm:$0xff] %v2926_v9  ;;  %v2497_v59 = vshrl.u32 %v2496_v56, 7 }
 0x212   : > { %v2478_v21 = vadd.f32 %v2454_v12, %v2450_v61  ;;  %v2487_v22 = vadd.f32 %v2455_v13, %v2451_v1 }
 0x213   : > { %vm2499_vm1 = vcmp.eq.s32.totalorder %v2497_v59, 1  ;;  %vm2498_vm2 = vcmp.eq.s32.totalorder %v2497_v59, 0 }
 0x214   : > { %v2361_v14 = vld [vmem:[#allocation2 + $0x40] sm:$0x3]  ;;  %v2363_v20 = vld [vmem:[#allocation2 + $0x50] sm:$0x3] }
 0x215   : > { %v2362_v15 = vld [vmem:[#allocation2 + $0x48] sm:$0x3]  ;;  %v2413_v19 = vsel %vm2412_vm0, %v2361_v14, 0.0  ;;  %v2364_v25 = vld [vmem:[#allocation2 + $0x58] sm:$0x3]  ;;  %v2456_v27 = vmul.f32 %v2361_v14, %v2361_v14  ;;  %v2431_v31 = vsel %vm2412_vm0, %v2363_v20, 0.0  ;;  %v2458_v33 = vmul.f32 %v2363_v20, %v2363_v20 }
 0x216   : > { %v2927_v18 = vpack.c.bf16 %v2362_v15, %v2361_v14  ;;  %v2414_v23 = vadd.f32 %v2413_v19, %v2411_v3  ;;  %v2422_v24 = vsel %vm2412_vm0, %v2362_v15, 0.0  ;;  %v2457_v28 = vmul.f32 %v2362_v15, %v2362_v15 }
 0x217   : > { %v2423_v26 = vadd.f32 %v2422_v24, %v2421_v6  ;;  %v2928_v29 = vpack.c.bf16 %v2364_v25, %v2363_v20  ;;  %v2440_v32 = vsel %vm2412_vm0, %v2364_v25, 0.0  ;;  %v2461_v35 = vsel %vm2412_vm0, %v2456_v27, 0.0 }
 0x218   : > { %2409 = vst [vmem:[%s3861_s2 + $0x20] sm:$0x11] %v2927_v18  ;;  %v2415_v30 = vrot.slane %v2414_v23, 4  ;;  %v2470_v36 = vsel %vm2412_vm0, %v2457_v28, 0.0  ;;  %v2432_v37 = vadd.f32 %v2431_v31, %v2430_v10  ;;  %v2462_v38 = vadd.f32 %v2461_v35, %v2460_v16 }
 0x219   : > { %v2424_v34 = vrot.slane %v2423_v26, 4  ;;  %2410 = vst [vmem:[%s3861_s2 + $0x28] sm:$0x11] %v2928_v29  ;;  %v2471_v39 = vadd.f32 %v2470_v36, %v2469_v17  ;;  %v2441_v41 = vadd.f32 %v2440_v32, %v2439_v11  ;;  %v2459_v46 = vmul.f32 %v2364_v25, %v2364_v25 }
 0x21a   : > { %v2416_v40 = vadd.f32 %v2415_v30, %v2414_v23  ;;  %v2433_v43 = vrot.slane %v2432_v37, 4  ;;  %v2479_v47 = vsel %vm2412_vm0, %v2458_v33, 0.0  ;;  %v2463_v48 = vrot.slane %v2462_v38, 4 }
 0x21b   : > { %v2425_v42 = vadd.f32 %v2424_v34, %v2423_v26  ;;  %v2472_v49 = vrot.slane %v2471_v39, 4  ;;  %v2442_v50 = vrot.slane %v2441_v41, 4  ;;  %v2480_v51 = vadd.f32 %v2479_v47, %v2478_v21 }
 0x21c   : > { %v2434_v44 = vadd.f32 %v2433_v43, %v2432_v37  ;;  %v2488_v45 = vsel %vm2412_vm0, %v2459_v46, 0.0  ;;  %v2417_v52 = vrot.slane %v2416_v40, 2  ;;  %v2464_v57 = vadd.f32 %v2463_v48, %v2462_v38 }
 0x21d   : > { %v2443_v53 = vadd.f32 %v2442_v50, %v2441_v41  ;;  %v2481_v54 = vrot.slane %v2480_v51, 4  ;;  %v2489_v55 = vadd.f32 %v2488_v45, %v2487_v22  ;;  %v2426_v60 = vrot.slane %v2425_v42, 2 }
 0x21e   : > { %v2418_v58 = vadd.f32 %v2417_v52, %v2416_v40  ;;  %v2465_v62 = vrot.slane %v2464_v57, 2  ;;  %v2473_v63 = vadd.f32 %v2472_v49, %v2471_v39  ;;  %v2435_v0 = vrot.slane %v2434_v44, 2 }
 0x21f   : > { %v2490_v61 = vrot.slane %v2489_v55, 4  ;;  %v2427_v2 = vadd.f32 %v2426_v60, %v2425_v42  ;;  %v2482_v3 = vadd.f32 %v2481_v54, %v2480_v51  ;;  %v2444_v4 = vrot.slane %v2443_v53, 2 }
 0x220   : > { %v2419_v1 = vrot.slane %v2418_v58, 1  ;;  %v2466_v5 = vadd.f32 %v2465_v62, %v2464_v57  ;;  %v2474_v6 = vrot.slane %v2473_v63, 2  ;;  %v2436_v7 = vadd.f32 %v2435_v0, %v2434_v44 }
 0x221   : > { %v2491_v8 = vadd.f32 %v2490_v61, %v2489_v55  ;;  %v2428_v9 = vrot.slane %v2427_v2, 1  ;;  %v2483_v10 = vrot.slane %v2482_v3, 2  ;;  %v2445_v11 = vadd.f32 %v2444_v4, %v2443_v53 }
 0x222   : > { %v2467_v12 = vrot.slane %v2466_v5, 1  ;;  %v2475_v13 = vadd.f32 %v2474_v6, %v2473_v63  ;;  %v2437_v14 = vrot.slane %v2436_v7, 1  ;;  %v2420_v15 = vadd.f32 %v2419_v1, %v2418_v58 }
 0x223   : > { %v2492_v56 = vrot.slane %v2491_v8, 2  ;;  %v2484_v16 = vadd.f32 %v2483_v10, %v2482_v3  ;;  %v2446_v17 = vrot.slane %v2445_v11, 1  ;;  %v2429_v21 = vadd.f32 %v2428_v9, %v2427_v2 }
 0x224   : > { %v2468_v18 = vadd.f32 %v2467_v12, %v2466_v5  ;;  %v2476_v19 = vrot.slane %v2475_v13, 1  ;;  %v2438_v25 = vadd.f32 %v2437_v14, %v2436_v7 }
 0x225   : > { %v2493_v20 = vadd.f32 %v2492_v56, %v2491_v8  ;;  %v2485_v22 = vrot.slane %v2484_v16, 1  ;;  %v2447_v29 = vadd.f32 %v2446_v17, %v2445_v11 }
 0x226   : > { %v2500_v23 = vsel %vm2499_vm1, %v2468_v18, 0.0  ;;  %v2477_v24 = vadd.f32 %v2476_v19, %v2475_v13 }
 0x227   : > { %v2494_v26 = vrot.slane %v2493_v20, 1  ;;  %v2504_v27 = vsel %vm2498_vm2, %v2420_v15, %v2500_v23  ;;  %v2486_v28 = vadd.f32 %v2485_v22, %v2484_v16 }
 0x228   : > { %2508 = vst [vmem:[%s3862_s3] sm:$0xff] %v2504_v27  ;;  %v2501_v30 = vsel %vm2499_vm1, %v2477_v24, 0.0 }
 0x229   : > { %v2495_v31 = vadd.f32 %v2494_v26, %v2493_v20  ;;  %v2505_v32 = vsel %vm2498_vm2, %v2429_v21, %v2501_v30  ;;  %v2502_v33 = vsel %vm2499_vm1, %v2486_v28, 0.0 }
 0x22a   : > { %2509 = vst [vmem:[%s3862_s3 + $0x8] sm:$0xff] %v2505_v32  ;;  %v2506_v34 = vsel %vm2498_vm2, %v2438_v25, %v2502_v33 }
 0x22b   : > { %v2503_v35 = vsel %vm2499_vm1, %v2495_v31, 0.0  ;;  %2510 = vst [vmem:[%s3862_s3 + $0x10] sm:$0xff] %v2506_v34 }
 0x22c   : > { %v2507_v36 = vsel %vm2498_vm2, %v2447_v29, %v2503_v35 }
 0x22d   : > { %2511 = vst [vmem:[%s3862_s3 + $0x18] sm:$0xff] %v2507_v36 }
 0x22e PF: > { %s14_s16 = sadd.s32 1, %s3426_s16   ;;  %s3863_s12 = smov %s3414_s13 }
 0x22f   : > { %p11_p12 = scmp.ge.s32.totalorder %s14_s16, 6   ;;  %s3864_s13 = smov %s3484_s20 }
 0x230   : > { %s3865_s14 = smov %s3422_s15  ;;  %s3866_s15 = smov %s3868_s17 }
 0x231   :  { %13 = sbr.rel (!%p11_p12) target bundleno = 3 (0x3), region = 109 }

// kernel: a_call__.14
= control target key start
LH: loop header
LB: loop body
LE: loop exit
PB: predicated region body
PF: predicated region fallthrough
CT: control target
= control target key end

     0   :  { %v34_v0 = vlaneseq  ;;  %s275_s0 = inlined_call_operand.vmem [shape: bf16[18,512], index: 0, kind: input, shape index: {}]   ;;  %s276_s1 = inlined_call_operand.vmem [shape: f32[1,512], index: 1, kind: input, shape index: {}]   ;;  %s277_s2 = inlined_call_operand.vmem [shape: f32[1,512], index: 2, kind: input, shape index: {}]   ;;  %s278_s3 = inlined_call_operand.vmem [shape: bf16[18,512], index: 3, kind: output, shape index: {}]  }
   0x1   :  { %v14_v1 = vld [vmem:[%s275_s0] sm:$0xff]  ;;  %v15_v5 = vld [vmem:[%s275_s0 + $0x8] sm:$0xff]  ;;  %v16_v6 = vld [vmem:[%s275_s0 + $0x10] sm:$0xff] }
   0x2   :  { %v20_v2 = vunpack.c.l.bf16 %v14_v1  ;;  %v21_v3 = vunpack.c.h.bf16 %v14_v1  ;;  %v35_v4 = vshrl.u32 %v34_v0, 7  ;;  %v17_v7 = vld [vmem:[%s275_s0 + $0x18] sm:$0xff]  ;;  %v32_v8 = vld [vmem:[%s276_s1] sm:$0xf]  ;;  %v22_v10 = vunpack.c.l.bf16 %v15_v5  ;;  %v19_v57 = vld [vmem:[%s275_s0 + $0x28] sm:$0x11] }
   0x3   :  { %v66_v9 = vld [vmem:[%s277_s2] sm:$0xf]  ;;  %v23_v11 = vunpack.c.h.bf16 %v15_v5  ;;  %v24_v12 = vunpack.c.l.bf16 %v16_v6  ;;  %v25_v13 = vunpack.c.h.bf16 %v16_v6  ;;  %v26_v19 = vunpack.c.l.bf16 %v17_v7 }
   0x4   :  { %v239_v14 = vld [vmem:[%s275_s0 + $0x20] sm:$0x11]  ;;  %v36_v15 = vsub.s32 0, %v35_v4  ;;  %v40_v16 = vsub.s32 1, %v35_v4  ;;  %v44_v17 = vsub.s32 2, %v35_v4  ;;  %v48_v18 = vsub.s32 3, %v35_v4 }
   0x5   :  { %v27_v20 = vunpack.c.h.bf16 %v17_v7  ;;  %v28_v21 = vunpack.c.l.bf16 %v239_v14  ;;  %v29_v22 = vunpack.c.h.bf16 %v239_v14 }
   0x6   :  { %v37_v23 = vrot.slane %v32_v8, %v36_v15  ;;  %v41_v24 = vrot.slane %v32_v8, %v40_v16  ;;  %v71_v25 = vrot.slane %v66_v9, %v36_v15  ;;  %v75_v26 = vrot.slane %v66_v9, %v40_v16 }
   0x7   :  { %v45_v27 = vrot.slane %v32_v8, %v44_v17  ;;  %v49_v28 = vrot.slane %v32_v8, %v48_v18  ;;  %v243_v29 = vrot.slane %v66_v9, %v44_v17  ;;  %v245_v30 = vrot.slane %v66_v9, %v48_v18 }
   0x8   :  { %v54_v31 = vmul.f32 %v37_v23, %v20_v2  ;;  %v55_v32 = vmul.f32 %v41_v24, %v21_v3  ;;  %v58_v33 = vmul.f32 %v37_v23, %v24_v12  ;;  %v59_v34 = vmul.f32 %v41_v24, %v25_v13 }
   0x9   :  { %v56_v35 = vmul.f32 %v45_v27, %v22_v10  ;;  %v57_v36 = vmul.f32 %v49_v28, %v23_v11  ;;  %v60_v37 = vmul.f32 %v45_v27, %v26_v19  ;;  %v61_v38 = vmul.f32 %v49_v28, %v27_v20 }
   0xa   :  { %v88_v39 = vadd.f32 %v71_v25, %v54_v31  ;;  %v89_v40 = vadd.f32 %v75_v26, %v55_v32  ;;  %v92_v41 = vadd.f32 %v71_v25, %v58_v33  ;;  %v93_v42 = vadd.f32 %v75_v26, %v59_v34 }
   0xb   :  { %v90_v43 = vadd.f32 %v243_v29, %v56_v35  ;;  %v91_v44 = vadd.f32 %v245_v30, %v57_v36  ;;  %v94_v45 = vadd.f32 %v243_v29, %v60_v37  ;;  %v95_v46 = vadd.f32 %v245_v30, %v61_v38 }
   0xc   :  { %vm100_vm0 = vcmp.ge.f32.partialorder %v88_v39, 0.0  ;;  %vm101_vm1 = vcmp.ge.f32.partialorder %v89_v40, 0.0  ;;  %v112_v47 = vmul.f32 0.2, %v88_v39  ;;  %v113_v48 = vmul.f32 0.2, %v89_v40 }
   0xd   :  { %vm102_vm2 = vcmp.ge.f32.partialorder %v90_v43, 0.0  ;;  %vm103_vm3 = vcmp.ge.f32.partialorder %v91_v44, 0.0  ;;  %v114_v49 = vmul.f32 0.2, %v90_v43  ;;  %v115_v50 = vmul.f32 0.2, %v91_v44 }
   0xe   :  { %v124_v51 = vsel %vm100_vm0, %v88_v39, %v112_v47  ;;  %v125_v52 = vsel %vm101_vm1, %v89_v40, %v113_v48  ;;  %vm104_vm4 = vcmp.ge.f32.partialorder %v92_v41, 0.0  ;;  %vm105_vm5 = vcmp.ge.f32.partialorder %v93_v42, 0.0 }
   0xf   :  { %v192_v53 = vpack.c.bf16 %v125_v52, %v124_v51  ;;  %v126_v54 = vsel %vm102_vm2, %v90_v43, %v114_v49  ;;  %v127_v55 = vsel %vm103_vm3, %v91_v44, %v115_v50  ;;  %v116_v56 = vmul.f32 0.2, %v92_v41 }
  0x10   :  { %v193_v58 = vpack.c.bf16 %v127_v55, %v126_v54  ;;  %v117_v59 = vmul.f32 0.2, %v93_v42  ;;  %vm106_vm6 = vcmp.ge.f32.partialorder %v94_v45, 0.0  ;;  %vm107_vm7 = vcmp.ge.f32.partialorder %v95_v46, 0.0 }
  0x11   :  { %176 = vst [vmem:[%s278_s3] sm:$0xff] %v192_v53  ;;  %v128_v60 = vsel %vm104_vm4, %v92_v41, %v116_v56  ;;  %v118_v61 = vmul.f32 0.2, %v94_v45  ;;  %v119_v62 = vmul.f32 0.2, %v95_v46  ;;  %v62_v63 = vmul.f32 %v37_v23, %v28_v21 }
  0x12   :  { %177 = vst [vmem:[%s278_s3 + $0x8] sm:$0xff] %v193_v58  ;;  %v129_v0 = vsel %vm105_vm5, %v93_v42, %v117_v59  ;;  %v63_v1 = vmul.f32 %v41_v24, %v29_v22  ;;  %v30_v2 = vunpack.c.l.bf16 %v19_v57  ;;  %v31_v3 = vunpack.c.h.bf16 %v19_v57 }
  0x13   :  { %v194_v4 = vpack.c.bf16 %v129_v0, %v128_v60  ;;  %v130_v5 = vsel %vm106_vm6, %v94_v45, %v118_v61  ;;  %v131_v6 = vsel %vm107_vm7, %v95_v46, %v119_v62  ;;  %v96_v7 = vadd.f32 %v71_v25, %v62_v63 }
  0x14   :  { %v195_v8 = vpack.c.bf16 %v131_v6, %v130_v5  ;;  %v97_v9 = vadd.f32 %v75_v26, %v63_v1  ;;  %v64_v10 = vmul.f32 %v45_v27, %v30_v2  ;;  %v65_v11 = vmul.f32 %v49_v28, %v31_v3 }
  0x15   :  { %178 = vst [vmem:[%s278_s3 + $0x10] sm:$0xff] %v194_v4  ;;  %vm108_vm8 = vcmp.ge.f32.partialorder %v96_v7, 0.0  ;;  %v120_v12 = vmul.f32 0.2, %v96_v7 }
  0x16   :  { %179 = vst [vmem:[%s278_s3 + $0x18] sm:$0xff] %v195_v8  ;;  %vm109_vm9 = vcmp.ge.f32.partialorder %v97_v9, 0.0  ;;  %v121_v13 = vmul.f32 0.2, %v97_v9  ;;  %v98_v14 = vadd.f32 %v243_v29, %v64_v10  ;;  %v99_v15 = vadd.f32 %v245_v30, %v65_v11 }
  0x17   :  { %v132_v16 = vsel %vm108_vm8, %v96_v7, %v120_v12 }
  0x18   :  { %v133_v17 = vsel %vm109_vm9, %v97_v9, %v121_v13  ;;  %vm110_vm10 = vcmp.ge.f32.partialorder %v98_v14, 0.0  ;;  %vm111_vm11 = vcmp.ge.f32.partialorder %v99_v15, 0.0  ;;  %v122_v18 = vmul.f32 0.2, %v98_v14 }
  0x19   :  { %v196_v19 = vpack.c.bf16 %v133_v17, %v132_v16  ;;  %v123_v20 = vmul.f32 0.2, %v99_v15 }
  0x1a   :  { %v134_v21 = vsel %vm110_vm10, %v98_v14, %v122_v18 }
  0x1b   :  { %180 = vst [vmem:[%s278_s3 + $0x20] sm:$0x11] %v196_v19  ;;  %v135_v22 = vsel %vm111_vm11, %v99_v15, %v123_v20 }
  0x1c   :  { %v197_v23 = vpack.c.bf16 %v135_v22, %v134_v21 }
  0x1e   :  { %181 = vst [vmem:[%s278_s3 + $0x28] sm:$0x11] %v197_v23 }

// kernel: a_call__.15
= control target key start
LH: loop header
LB: loop body
LE: loop exit
PB: predicated region body
PF: predicated region fallthrough
CT: control target
= control target key end

     0   :  { %s1348_s12 = smov 0   ;;  %s1350_s13 = smov 0   ;;  %s1465_s0 = inlined_call_operand.vmem [shape: bf16[8,8192], index: 0, kind: input, shape index: {}]   ;;  %s1466_s1 = inlined_call_operand.vmem [shape: bf16[8192,128], index: 1, kind: input, shape index: {}]   ;;  %s1467_s2 = inlined_call_operand.vmem [shape: f32[1,128], index: 2, kind: input, shape index: {}]   ;;  %s1468_s3 = inlined_call_operand.vmem [shape: f32[8,128], index: 3, kind: output, shape index: {}]  }
   0x1   :  { %s1352_s14 = smov 0  }
   0x2 LB: > { %s22_s15 = sadd.s32 1, %s1321_s13  ;;  %p1031_p0 = scmp.ge.s32.totalorder %s1325_s14, 1  ;;  %s1325_s14 = sphi %s1352_s14, %s13_s14   ;;  %s1321_s13 = sphi %s1350_s13, %s1470_s13   ;;  %s1317_s12 = sphi %s1348_s12, %s1469_s12  }
   0x3   : > { %p23_p1 = scmp.ge.s32.totalorder %s22_s15, 8  ;;  %p167_p2 = scmp.lt.s32.totalorder %s1325_s14, 9 }
   0x5   : > { %s1472_s15 = smov (%p23_p1, %s22_s15), 0  ;;  %p168_p3 = pnand %p1031_p0, %p167_p2 }
   0x6   : > { %s1032_s16 = sshll.u32 (!%p168_p3), %s1317_s12, 3  ;;  %s1034_s17 = sshll.u32 (!%p168_p3), %s1317_s12, 7 }
   0x7   : > { %171 = sbr.rel (%p168_p3) target bundleno = 350 (0x15e), region = 32  ;;  %p202_p4 = scmp.lt.s32.totalorder (!%p168_p3), %s1032_s16, 63 }
   0x8   : > { %p210_p5 = scmp.lt.s32.totalorder (!%p168_p3), %s1034_s17, 1023  ;;  %p1036_p6 = scmp.ne.s32.totalorder (!%p168_p3), %s1317_s12, 0 }
   0xe   : > { %s1474_s16 = smov (!%p202_p4, %s1032_s16), 63  ;;  %s1476_s17 = smov (!%p210_p5, %s1034_s17), 1023 }
   0xf   : > { %s1033_s18 = sshll.u32 %s1474_s16, 2  ;;  %s1035_s22 = sshll.u32 %s1476_s17, 2  ;;  %v1327_v0 = vmov (!%p1036_p6), 0.0  }
  0x10   : > { %s1373_s21 = scalar_lea.vmem %s1465_s0, %s1033_s18  ;;  %s1378_s25 = scalar_lea.vmem %s1466_s1, %s1035_s22  ;;  %224 = vst [vmem:[#allocation2] sm:$0xff] (!%p1036_p6), %v1327_v0 }
  0x11   : > { %223 = sbr.rel (%p1036_p6) target bundleno = 24 (0x18), region = 36 }
  0x18 PF: > { %v1227_v1 = vld [vmem:[%s1378_s25 + $0x40] sm:$0xff]   ;;  %v1231_v5 = vld [vmem:[%s1378_s25 + $0x48] sm:$0xff]   ;;  %v1235_v9 = vld [vmem:[%s1378_s25 + $0x50] sm:$0xff]   ;;  %p1109_p7 = scmp.ne.s32.totalorder %s1317_s12, 7 }
  0x19   : > { %v1228_v2 = vld [vmem:[%s1378_s25 + $0xc0] sm:$0xff]   ;;  %1114 = vmatprep.subr.bf16.mxu0 %v1227_v1  ;;  %v1232_v6 = vld [vmem:[%s1378_s25 + $0xc8] sm:$0xff]   ;;  %v1236_v10 = vld [vmem:[%s1378_s25 + $0xd0] sm:$0xff]  }
  0x1a   : > { %v1229_v3 = vld [vmem:[%s1378_s25] sm:$0xff]   ;;  %1136 = vmatprep.subr.bf16.mxu1 %v1228_v2  ;;  %v1233_v7 = vld [vmem:[%s1378_s25 + $0x8] sm:$0xff]   ;;  %v1237_v11 = vld [vmem:[%s1378_s25 + $0x10] sm:$0xff]  }
  0x1b   : > { %v1230_v4 = vld [vmem:[%s1378_s25 + $0x80] sm:$0xff]   ;;  %1115 = vmatpush3.bf16.msra.mxu0 %v1229_v3  ;;  %v1234_v8 = vld [vmem:[%s1378_s25 + $0x88] sm:$0xff]   ;;  %v1238_v12 = vld [vmem:[%s1378_s25 + $0x90] sm:$0xff]  }
  0x1c   : > { %1137 = vmatpush3.bf16.msra.mxu1 %v1230_v4  ;;  %1116 = vmatprep.subr.bf16.mxu0 %v1231_v5  ;;  %v1239_v13 = vld [vmem:[%s1378_s25 + $0x58] sm:$0xff]   ;;  %v1243_v17 = vld [vmem:[%s1378_s25 + $0x60] sm:$0xff]   ;;  %v1247_v21 = vld [vmem:[%s1378_s25 + $0x68] sm:$0xff]  }
  0x1d   : > { %1138 = vmatprep.subr.bf16.mxu1 %v1232_v6  ;;  %v1240_v14 = vld [vmem:[%s1378_s25 + $0xd8] sm:$0xff]   ;;  %v1244_v18 = vld [vmem:[%s1378_s25 + $0xe0] sm:$0xff]   ;;  %v1248_v22 = vld [vmem:[%s1378_s25 + $0xe8] sm:$0xff]  }
  0x1e   : > { %v1241_v15 = vld [vmem:[%s1378_s25 + $0x18] sm:$0xff]   ;;  %v1245_v19 = vld [vmem:[%s1378_s25 + $0x20] sm:$0xff]   ;;  %v1249_v23 = vld [vmem:[%s1378_s25 + $0x28] sm:$0xff]  }
  0x1f   : > { %1117 = vmatpush3.bf16.msra.mxu0 %v1233_v7  ;;  %v1242_v16 = vld [vmem:[%s1378_s25 + $0x98] sm:$0xff]   ;;  %v1246_v20 = vld [vmem:[%s1378_s25 + $0xa0] sm:$0xff]   ;;  %v1250_v24 = vld [vmem:[%s1378_s25 + $0xa8] sm:$0xff]  }
  0x20   : > { %1139 = vmatpush3.bf16.msra.mxu1 %v1234_v8  ;;  %1118 = vmatprep.subr.bf16.mxu0 %v1235_v9  ;;  %v1251_v25 = vld [vmem:[%s1378_s25 + $0x70] sm:$0xff]   ;;  %v1255_v29 = vld [vmem:[%s1378_s25 + $0x78] sm:$0xff]   ;;  %v226_v33 = vld [vmem:[%s1373_s21] sm:$0xff] }
  0x21   : > { %1140 = vmatprep.subr.bf16.mxu1 %v1236_v10  ;;  %v1252_v26 = vld [vmem:[%s1378_s25 + $0xf0] sm:$0xff]   ;;  %v1256_v30 = vld [vmem:[%s1378_s25 + $0xf8] sm:$0xff]   ;;  %v227_v34 = vld [vmem:[%s1373_s21 + $0x8] sm:$0xff]  ;;  %v1037_v35 = vcombine.low %v226_v33, %v226_v33  ;;  %v1038_v36 = vcombine.high %v226_v33, %v226_v33 }
  0x22   : > { %v1253_v27 = vld [vmem:[%s1378_s25 + $0x30] sm:$0xff]   ;;  %v1257_v31 = vld [vmem:[%s1378_s25 + $0x38] sm:$0xff]   ;;  %v1039_v37 = vcombine.low %v227_v34, %v227_v34  ;;  %v1040_v38 = vcombine.high %v227_v34, %v227_v34  ;;  %v1263_v39 = vld [vmem:[%s1378_s25 + $0x140] sm:$0xff]  }
  0x23   : > { %1119 = vmatpush3.bf16.msra.mxu0 %v1237_v11  ;;  %v1254_v28 = vld [vmem:[%s1378_s25 + $0xb0] sm:$0xff]   ;;  %v1258_v32 = vld [vmem:[%s1378_s25 + $0xb8] sm:$0xff]   ;;  %v1264_v40 = vld [vmem:[%s1378_s25 + $0x1c0] sm:$0xff]   ;;  %802 = vmatprep.mubr.bf16.mxu0 %v1038_v36 }
  0x24   : > { %1141 = vmatpush3.bf16.msra.mxu1 %v1238_v12  ;;  %1120 = vmatprep.subr.bf16.mxu0 %v1239_v13  ;;  %v1265_v41 = vld [vmem:[%s1378_s25 + $0x100] sm:$0xff]   ;;  %v1267_v43 = vld [vmem:[%s1378_s25 + $0x148] sm:$0xff]   ;;  %v1271_v47 = vld [vmem:[%s1378_s25 + $0x150] sm:$0xff]  }
  0x25   : > { %1142 = vmatprep.subr.bf16.mxu1 %v1240_v14  ;;  %842 = vmatprep.mubr.bf16.mxu1 %v1040_v38  ;;  %v1266_v42 = vld [vmem:[%s1378_s25 + $0x180] sm:$0xff]   ;;  %v1268_v44 = vld [vmem:[%s1378_s25 + $0x1c8] sm:$0xff]   ;;  %v1272_v48 = vld [vmem:[%s1378_s25 + $0x1d0] sm:$0xff]  }
  0x26   : > { %v1269_v45 = vld [vmem:[%s1378_s25 + $0x108] sm:$0xff]   ;;  %v1273_v49 = vld [vmem:[%s1378_s25 + $0x110] sm:$0xff]   ;;  %v1275_v51 = vld [vmem:[%s1378_s25 + $0x158] sm:$0xff]  }
  0x27   : > { %1121 = vmatpush3.bf16.msra.mxu0 %v1241_v15  ;;  %v1270_v46 = vld [vmem:[%s1378_s25 + $0x188] sm:$0xff]   ;;  %v1274_v50 = vld [vmem:[%s1378_s25 + $0x190] sm:$0xff]   ;;  %v1276_v52 = vld [vmem:[%s1378_s25 + $0x1d8] sm:$0xff]  }
  0x28   : > { %1143 = vmatpush3.bf16.msra.mxu1 %v1242_v16  ;;  %1122 = vmatprep.subr.bf16.mxu0 %v1243_v17  ;;  %v1277_v53 = vld [vmem:[%s1378_s25 + $0x118] sm:$0xff]   ;;  %v1279_v55 = vld [vmem:[%s1378_s25 + $0x160] sm:$0xff]   ;;  %v1283_v59 = vld [vmem:[%s1378_s25 + $0x168] sm:$0xff]  }
  0x29   : > { %1144 = vmatprep.subr.bf16.mxu1 %v1244_v18  ;;  %v1278_v54 = vld [vmem:[%s1378_s25 + $0x198] sm:$0xff]   ;;  %v1280_v56 = vld [vmem:[%s1378_s25 + $0x1e0] sm:$0xff]   ;;  %v1284_v60 = vld [vmem:[%s1378_s25 + $0x1e8] sm:$0xff]  }
  0x2a   : > { %v1281_v57 = vld [vmem:[%s1378_s25 + $0x120] sm:$0xff]   ;;  %v1285_v61 = vld [vmem:[%s1378_s25 + $0x128] sm:$0xff]   ;;  %v1287_v63 = vld [vmem:[%s1378_s25 + $0x170] sm:$0xff]  }
  0x2b   : > { %1123 = vmatpush3.bf16.msra.mxu0 %v1245_v19  ;;  %v1282_v58 = vld [vmem:[%s1378_s25 + $0x1a0] sm:$0xff]   ;;  %v1286_v62 = vld [vmem:[%s1378_s25 + $0x1a8] sm:$0xff]   ;;  %v1288_v0 = vld [vmem:[%s1378_s25 + $0x1f0] sm:$0xff]  }
  0x2c   : > { %1145 = vmatpush3.bf16.msra.mxu1 %v1246_v20  ;;  %1124 = vmatprep.subr.bf16.mxu0 %v1247_v21  ;;  %v1289_v1 = vld [vmem:[%s1378_s25 + $0x130] sm:$0xff]   ;;  %v1291_v3 = vld [vmem:[%s1378_s25 + $0x178] sm:$0xff]  }
  0x2d   : > { %1146 = vmatprep.subr.bf16.mxu1 %v1248_v22  ;;  %v1290_v2 = vld [vmem:[%s1378_s25 + $0x1b0] sm:$0xff]   ;;  %v1292_v4 = vld [vmem:[%s1378_s25 + $0x1f8] sm:$0xff]  }
  0x2e   : > { %v1293_v5 = vld [vmem:[%s1378_s25 + $0x138] sm:$0xff]   ;;  %v228_v7 = vld [vmem:[%s1373_s21 + $0x10] sm:$0xff] }
  0x2f   : > { %1125 = vmatpush3.bf16.msra.mxu0 %v1249_v23  ;;  %v1294_v6 = vld [vmem:[%s1378_s25 + $0x1b8] sm:$0xff]   ;;  %v1041_v8 = vcombine.low %v228_v7, %v228_v7  ;;  %v1042_v9 = vcombine.high %v228_v7, %v228_v7 }
  0x30   : > { %1147 = vmatpush3.bf16.msra.mxu1 %v1250_v24  ;;  %1126 = vmatprep.subr.bf16.mxu0 %v1251_v25  ;;  %v229_v10 = vld [vmem:[%s1373_s21 + $0x18] sm:$0xff] }
  0x31   : > { %1148 = vmatprep.subr.bf16.mxu1 %v1252_v26  ;;  %v1043_v11 = vcombine.low %v229_v10, %v229_v10  ;;  %v1044_v12 = vcombine.high %v229_v10, %v229_v10 }
  0x33   : > { %1127 = vmatpush3.bf16.msra.mxu0 %v1253_v27 }
  0x34   : > { %1149 = vmatpush3.bf16.msra.mxu1 %v1254_v28  ;;  %1128 = vmatprep.subr.bf16.mxu0 %v1255_v29 }
  0x35   : > { %1150 = vmatprep.subr.bf16.mxu1 %v1256_v30 }
  0x37   : > { %1129 = vmatpush3.bf16.msra.mxu0 %v1257_v31 }
  0x38   : > { %1151 = vmatpush3.bf16.msra.mxu1 %v1258_v32  ;;  %1158 = vmatprep.subr.bf16.mxu0 %v1263_v39  ;;  %v1110_v39 = vld [vmem:[%s1467_s2] ss:$0 sm:$0xff] (!%p1109_p7) }
  0x39   : > { %1180 = vmatprep.subr.bf16.mxu1 %v1264_v40 }
  0x3a   : > { %803 = vmatmul.mubr.bf16.vlgmr.msra.gmra.mrb[0].mxu0 %v1037_v35  ;;  %v225_v35 = vld [vmem:[#allocation2] sm:$0xff] }
  0x3b   : > { %843 = vmatmul.mubr.bf16.vlgmr.msra.gmra.mrb[0].mxu1 %v1039_v37  ;;  %1159 = vmatpush3.bf16.msra.mxu0 %v1265_v41 }
  0x3c   : > { %1181 = vmatpush3.bf16.msra.mxu1 %v1266_v42  ;;  %1160 = vmatprep.subr.bf16.mxu0 %v1267_v43 }
  0x3d   : > { %1182 = vmatprep.subr.bf16.mxu1 %v1268_v44  ;;  %882 = vmatprep.mubr.bf16.mxu0 %v1042_v9 }
  0x3e   : > { %922 = vmatprep.mubr.bf16.mxu1 %v1044_v12 }
  0x3f   : > { %1161 = vmatpush3.bf16.msra.mxu0 %v1269_v45 }
  0x40   : > { %1183 = vmatpush3.bf16.msra.mxu1 %v1270_v46  ;;  %1162 = vmatprep.subr.bf16.mxu0 %v1271_v47 }
  0x41   : > { %1184 = vmatprep.subr.bf16.mxu1 %v1272_v48 }
  0x43   : > { %1163 = vmatpush3.bf16.msra.mxu0 %v1273_v49 }
  0x44   : > { %1185 = vmatpush3.bf16.msra.mxu1 %v1274_v50  ;;  %1164 = vmatprep.subr.bf16.mxu0 %v1275_v51 }
  0x45   : > { %1186 = vmatprep.subr.bf16.mxu1 %v1276_v52 }
  0x47   : > { %1165 = vmatpush3.bf16.msra.mxu0 %v1277_v53 }
  0x48   : > { %1187 = vmatpush3.bf16.msra.mxu1 %v1278_v54  ;;  %1166 = vmatprep.subr.bf16.mxu0 %v1279_v55 }
  0x49   : > { %1188 = vmatprep.subr.bf16.mxu1 %v1280_v56 }
  0x4b   : > { %1167 = vmatpush3.bf16.msra.mxu0 %v1281_v57 }
  0x4c   : > { %1189 = vmatpush3.bf16.msra.mxu1 %v1282_v58  ;;  %1168 = vmatprep.subr.bf16.mxu0 %v1283_v59 }
  0x4d   : > { %1190 = vmatprep.subr.bf16.mxu1 %v1284_v60 }
  0x4f   : > { %1169 = vmatpush3.bf16.msra.mxu0 %v1285_v61 }
  0x50   : > { %1191 = vmatpush3.bf16.msra.mxu1 %v1286_v62  ;;  %1170 = vmatprep.subr.bf16.mxu0 %v1287_v63 }
  0x51   : > { %1192 = vmatprep.subr.bf16.mxu1 %v1288_v0 }
  0x53   : > { %1171 = vmatpush3.bf16.msra.mxu0 %v1289_v1 }
  0x54   : > { %1193 = vmatpush3.bf16.msra.mxu1 %v1290_v2  ;;  %1172 = vmatprep.subr.bf16.mxu0 %v1291_v3 }
  0x55   : > { %1194 = vmatprep.subr.bf16.mxu1 %v1292_v4 }
  0x57   : > { %1173 = vmatpush3.bf16.msra.mxu0 %v1293_v5 }
  0x58   : > { %1195 = vmatpush3.bf16.msra.mxu1 %v1294_v6 }
  0x5a   : > { %883 = vmatmul.mubr.bf16.vlgmr.msra.gmra.mrb[4].mxu0 %v1041_v8 }
  0x5b   : > { %923 = vmatmul.mubr.bf16.vlgmr.msra.gmra.mrb[4].mxu1 %v1043_v11 }
 0x10d   : > { %v1130_v13 = vpop.f32.mrb[0].mxu0 }
 0x10e   : > { %v1152_v14 = vpop.f32.mrb[0].mxu1  ;;  %v1131_v15 = vpop.f32.mrb[1].mxu0 }
 0x10f   : > { %v1153_v16 = vpop.f32.mrb[1].mxu1  ;;  %v1132_v17 = vadd.f32 %v1131_v15, %v1130_v13  ;;  %v1133_v19 = vpop.f32.mrb[2].mxu0 }
 0x110   : > { %v1154_v18 = vadd.f32 %v1153_v16, %v1152_v14  ;;  %v1155_v20 = vpop.f32.mrb[2].mxu1  ;;  %v1134_v21 = vpop.f32.mrb[3].mxu0 }
 0x111   : > { %v1156_v22 = vpop.f32.mrb[3].mxu1 }
 0x112   : > { %v845_v23 = vadd.f32 %v1154_v18, %v1132_v17 }
 0x12d   : > { %v1174_v24 = vpop.f32.mrb[4].mxu0 }
 0x12e   : > { %v1196_v25 = vpop.f32.mrb[4].mxu1  ;;  %v1175_v26 = vpop.f32.mrb[5].mxu0 }
 0x12f   : > { %v1197_v27 = vpop.f32.mrb[5].mxu1  ;;  %v1176_v28 = vadd.f32 %v1175_v26, %v1174_v24  ;;  %v1177_v30 = vpop.f32.mrb[6].mxu0 }
 0x130   : > { %v1198_v29 = vadd.f32 %v1197_v27, %v1196_v25  ;;  %v1199_v31 = vpop.f32.mrb[6].mxu1  ;;  %v1178_v32 = vpop.f32.mrb[7].mxu0 }
 0x131   : > { %v1200_v33 = vpop.f32.mrb[7].mxu1  ;;  %v885_v34 = vadd.f32 %v1176_v28, %v845_v23  ;;  %935 = sbr.rel (%p1109_p7) target bundleno = 350 (0x15e), region = 40 }
 0x133   : > { %v925_v36 = vadd.f32 %v1198_v29, %v885_v34 }
 0x135   : > { %v930_v37 = vadd.f32 %v925_v36, %v225_v35 }
 0x137   : > { %931 = vst [vmem:[#allocation2] sm:$0xff] %v930_v37 }
 0x13e   : > { %v936_v38 = vld [vmem:[#allocation2] sm:$0xff] }
 0x13f   : > { %v944_v40 = vadd.f32 %v1110_v39, %v936_v38 }
 0x141   : > { %v945_v41 = vsub.f32 0.0, %v944_v40 }
 0x143   : > { %v946_v42 = vmul.f32 1.442695, %v945_v41 }
 0x145   : > { %1299 = vpow2.f32 %v946_v42 }
 0x14f   : > { %v1300_v43 = vpop.eup %1299 }
 0x150   : > { %v948_v44 = vadd.f32 1.0, %v1300_v43 }
 0x152   : > { %1301 = vrcp.f32 %v948_v44 }
 0x15c   : > { %v1302_v45 = vpop.eup %1301 }
 0x15d   : > { %950 = vst [vmem:[%s1468_s3] sm:$0xff] %v1302_v45 }
 0x15e PF: > { %s13_s14 = sadd.s32 1, %s1325_s14   ;;  %s1469_s12 = smov %s1321_s13 }
 0x15f   : > { %p10_p8 = scmp.ge.s32.totalorder %s13_s14, 10   ;;  %s1470_s13 = smov %s1472_s15 }
 0x161   :  { %12 = sbr.rel (!%p10_p8) target bundleno = 2 (0x2), region = 73 }

</bundles_post_ra>
